<compile_context>
chip_gen: v7x
topology: tpu7x:2x2x1
jax: 0.10.0
libtpu: 0.0.40
codegen_flags: <defaults>
</compile_context>

<pallas_src>
import functools

import jax
import jax.numpy as jnp
from jax import lax
from jax.experimental import pallas as pl
from jax.experimental.pallas import tpu as pltpu


MXU_DTYPE = jnp.bfloat16          # MXU operand dtype (accumulation stays f32)
LN_EPS = 1e-5                     # matches torch.nn.LayerNorm default
VMEM_LIMIT = 32 * 1024 * 1024     # fits every chip (v7x physical VMEM = 64 MiB)


def _compiler_params():
    return pltpu.CompilerParams(
        dimension_semantics=("parallel",),
        vmem_limit_bytes=VMEM_LIMIT,
    )


def _const_spec(shape):
    """BlockSpec for a grid-invariant (weight / bias) operand."""
    nd = len(shape)
    return pl.BlockSpec(shape, lambda i: (0,) * nd)


def _pick_row_tile(m, target=512):
    if m <= target:
        return m
    for t in (target, 256, 128):
        if m % t == 0:
            return t
    return 256  # Pallas masks the partial edge block.


# ----------------------------------------------------------------------------
# In-kernel math helpers (all f32)
# ----------------------------------------------------------------------------

def _ln_rows(x, g, b, eps):
    mu = jnp.mean(x, axis=-1, keepdims=True)
    xc = x - mu
    var = jnp.mean(xc * xc, axis=-1, keepdims=True)
    return xc * lax.rsqrt(var + eps) * g + b


def _gelu_exact(x):
    # Exact (erf) GELU; erf via Abramowitz-Stegun 7.1.26 (max abs err ~1.5e-7)
    # so it matches torch.nn.GELU() within f32 noise using only exp on the EUP.
    z = x * 0.7071067811865476
    az = jnp.abs(z)
    t = 1.0 / (1.0 + 0.3275911 * az)
    poly = t * (0.254829592 + t * (-0.284496736 + t * (1.421413741
                + t * (-1.453152027 + t * 1.061405429))))
    erf_abs = 1.0 - poly * jnp.exp(-az * az)
    erf_z = jnp.where(z >= 0, erf_abs, -erf_abs)
    return 0.5 * x * (1.0 + erf_z)


def _self_attention(hm, wq_ref, wk_ref, wv_ref, wo_ref, *, heads, scale):
    """All-head self attention on one token block.  hm: [N, D] bf16.

    Weights carry a leading head axis so no lane-dim slicing is needed; the
    static loop unrolls over heads (small) with full-width K=D projections.
    """
    n = hm.shape[0]
    d_model = wo_ref.shape[2]
    acc = jnp.zeros((n, d_model), jnp.float32)
    for hh in range(heads):
        qh = jnp.dot(hm, wq_ref[hh], preferred_element_type=jnp.float32) * scale
        kh = jnp.dot(hm, wk_ref[hh], preferred_element_type=jnp.float32)
        vh = jnp.dot(hm, wv_ref[hh], preferred_element_type=jnp.float32)
        s = lax.dot_general(qh.astype(MXU_DTYPE), kh.astype(MXU_DTYPE),
                            (((1,), (1,)), ((), ())),
                            preferred_element_type=jnp.float32)       # [N, N]
        s = s - jnp.max(s, axis=-1, keepdims=True)
        p = jnp.exp(s)
        p = p * pl.reciprocal(jnp.sum(p, axis=-1, keepdims=True), approx=True)
        oh = jnp.dot(p.astype(MXU_DTYPE), vh.astype(MXU_DTYPE),
                     preferred_element_type=jnp.float32)               # [N, d]
        acc = acc + jnp.dot(oh.astype(MXU_DTYPE), wo_ref[hh],
                            preferred_element_type=jnp.float32)        # [N, D]
    return acc


def _cross_direction(x_cls, ctx_patch,
                     piw, pib, lng, lnb, wq, wk, wv, wo, bo, pow_, pob,
                     *, heads, scale, eps):
    """ProjectInOut(PreNorm(Attention(kv_include_self=True)))(x_cls) + x_cls."""
    y = jnp.dot(x_cls.astype(MXU_DTYPE), piw[...],
                preferred_element_type=jnp.float32) + pib[...].astype(jnp.float32)
    yn = _ln_rows(y, lng[...].astype(jnp.float32), lnb[...].astype(jnp.float32), eps)
    ynm = yn.astype(MXU_DTYPE)
    ctxm = ctx_patch.astype(MXU_DTYPE)
    dim_out = piw.shape[1]
    acc = jnp.zeros((x_cls.shape[0], dim_out), jnp.float32)
    for hh in range(heads):
        qh = jnp.dot(ynm, wq[hh], preferred_element_type=jnp.float32) * scale
        ks = jnp.dot(ynm, wk[hh], preferred_element_type=jnp.float32)
        vs = jnp.dot(ynm, wv[hh], preferred_element_type=jnp.float32)
        kc = jnp.dot(ctxm, wk[hh], preferred_element_type=jnp.float32)
        vc = jnp.dot(ctxm, wv[hh], preferred_element_type=jnp.float32)
        # kv_include_self == softmax over [self key, context keys]; computed
        # block-wise (shared max / shared denominator) so no in-kernel concat.
        s_s = lax.dot_general(qh.astype(MXU_DTYPE), ks.astype(MXU_DTYPE),
                              (((1,), (1,)), ((), ())),
                              preferred_element_type=jnp.float32)
        s_c = lax.dot_general(qh.astype(MXU_DTYPE), kc.astype(MXU_DTYPE),
                              (((1,), (1,)), ((), ())),
                              preferred_element_type=jnp.float32)
        m = jnp.maximum(jnp.max(s_s, axis=-1, keepdims=True),
                        jnp.max(s_c, axis=-1, keepdims=True))
        p_s = jnp.exp(s_s - m)
        p_c = jnp.exp(s_c - m)
        inv = pl.reciprocal(jnp.sum(p_s, axis=-1, keepdims=True)
                            + jnp.sum(p_c, axis=-1, keepdims=True), approx=True)
        oh = (jnp.dot(p_s.astype(MXU_DTYPE), vs.astype(MXU_DTYPE),
                      preferred_element_type=jnp.float32)
              + jnp.dot(p_c.astype(MXU_DTYPE), vc.astype(MXU_DTYPE),
                        preferred_element_type=jnp.float32)) * inv
        acc = acc + jnp.dot(oh.astype(MXU_DTYPE), wo[hh],
                            preferred_element_type=jnp.float32)
    attn_out = acc + bo[...].astype(jnp.float32)
    out = jnp.dot(attn_out.astype(MXU_DTYPE), pow_[...],
                  preferred_element_type=jnp.float32) + pob[...].astype(jnp.float32)
    return out + x_cls                                                 # residual (dim_in)


# ----------------------------------------------------------------------------
# Pallas kernels
# ----------------------------------------------------------------------------

def _enc_layer_kernel(x_ref,
                      a_lng, a_lnb, wq, wk, wv, wo, bo,
                      f_lng, f_lnb, w1, b1, w2, b2,
                      n_g, n_b,
                      o_ref, *, heads, scale, eps, final_norm):
    """One full Transformer layer (attn block + FF block [+ final LN]) per batch."""
    x = x_ref[...].astype(jnp.float32)                                 # [N, D]
    # ---- PreNorm + multi-head self-attention + residual --------------------
    h = _ln_rows(x, a_lng[...].astype(jnp.float32),
                 a_lnb[...].astype(jnp.float32), eps)
    attn = _self_attention(h.astype(MXU_DTYPE), wq, wk, wv, wo,
                           heads=heads, scale=scale)
    x = x + attn + bo[...].astype(jnp.float32)
    # ---- PreNorm + FeedForward (GELU) + residual ----------------------------
    h = _ln_rows(x, f_lng[...].astype(jnp.float32),
                 f_lnb[...].astype(jnp.float32), eps)
    hmid = jnp.dot(h.astype(MXU_DTYPE), w1[...],
                   preferred_element_type=jnp.float32) + b1[...].astype(jnp.float32)
    hmid = _gelu_exact(hmid)
    y = jnp.dot(hmid.astype(MXU_DTYPE), w2[...],
                preferred_element_type=jnp.float32) + b2[...].astype(jnp.float32)
    x = x + y
    # ---- trailing Transformer LayerNorm folded into the last layer ---------
    if final_norm:
        x = _ln_rows(x, n_g[...].astype(jnp.float32),
                     n_b[...].astype(jnp.float32), eps)
    o_ref[...] = x.astype(o_ref.dtype)


def _cross_layer_kernel(sm_ref, lg_ref,
                        a_piw, a_pib, a_lng, a_lnb, a_wq, a_wk, a_wv, a_wo,
                        a_bo, a_pow, a_pob,
                        b_piw, b_pib, b_lng, b_lnb, b_wq, b_wk, b_wv, b_wo,
                        b_bo, b_pow, b_pob,
                        sm_out_ref, lg_out_ref, *, heads, scale, eps):
    """One CrossTransformer layer (both directions) per batch element."""
    sm = sm_ref[...].astype(jnp.float32)                               # [N_sm, D_sm]
    lg = lg_ref[...].astype(jnp.float32)                               # [N_lg, D_lg]
    new_sm_cls = _cross_direction(
        sm[0:1, :], lg[1:, :],
        a_piw, a_pib, a_lng, a_lnb, a_wq, a_wk, a_wv, a_wo, a_bo, a_pow, a_pob,
        heads=heads, scale=scale, eps=eps)
    new_lg_cls = _cross_direction(
        lg[0:1, :], sm[1:, :],
        b_piw, b_pib, b_lng, b_lnb, b_wq, b_wk, b_wv, b_wo, b_bo, b_pow, b_pob,
        heads=heads, scale=scale, eps=eps)
    # Patch tokens pass through unchanged; only the cls row is rewritten, so
    # no separate XLA concat / HBM copy is needed afterwards.
    sm_out_ref[...] = sm.astype(sm_out_ref.dtype)
    lg_out_ref[...] = lg.astype(lg_out_ref.dtype)
    sm_out_ref[0:1, :] = new_sm_cls.astype(sm_out_ref.dtype)
    lg_out_ref[0:1, :] = new_lg_cls.astype(lg_out_ref.dtype)


def _embed_kernel(x_ref, w_ref, b_ref, pos_ref, o_ref):
    y = jnp.dot(x_ref[...].astype(MXU_DTYPE), w_ref[...],
                preferred_element_type=jnp.float32)
    y = y + b_ref[...].astype(jnp.float32) + pos_ref[...].astype(jnp.float32)
    o_ref[...] = y.astype(o_ref.dtype)


def _sum_conv_kernel(x1_ref, x2_ref, w_ref, b_ref, o_ref):
    x = x1_ref[...].astype(jnp.float32) + x2_ref[...].astype(jnp.float32)
    y = jnp.dot(x.astype(MXU_DTYPE), w_ref[...], preferred_element_type=jnp.float32)
    o_ref[...] = (y + b_ref[...].astype(jnp.float32)).astype(o_ref.dtype)


# ----------------------------------------------------------------------------
# Kernel wrappers
# ----------------------------------------------------------------------------

def encoder_layer(x, attn_p, ff_p, norm_g, norm_b, *, heads, dim_head, final_norm):
    B, N, D = x.shape
    Hff = int(ff_p["w1"].shape[1])
    inner = heads * dim_head
    scale = float(dim_head) ** -0.5
    cost = pl.CostEstimate(
        flops=int(B * (6 * N * D * inner + 4 * heads * N * N * dim_head
                       + 2 * N * inner * D + 4 * N * D * Hff)),
        transcendentals=int(B * (heads * N * N + N * Hff)),
        bytes_accessed=int(8 * B * N * D + 2 * (4 * D * inner + 2 * D * Hff)
                           + 4 * (7 * D + Hff)))
    token_spec = pl.BlockSpec((None, N, D), lambda b: (b, 0, 0))
    in_specs = [
        token_spec,
        _const_spec((1, D)), _const_spec((1, D)),
        _const_spec((heads, D, dim_head)), _const_spec((heads, D, dim_head)),
        _const_spec((heads, D, dim_head)), _const_spec((heads, dim_head, D)),
        _const_spec((1, D)),
        _const_spec((1, D)), _const_spec((1, D)),
        _const_spec((D, Hff)), _const_spec((1, Hff)),
        _const_spec((Hff, D)), _const_spec((1, D)),
        _const_spec((1, D)), _const_spec((1, D)),
    ]
    return pl.pallas_call(
        functools.partial(_enc_layer_kernel, heads=heads, scale=scale,
                          eps=LN_EPS, final_norm=final_norm),
        out_shape=jax.ShapeDtypeStruct((B, N, D), x.dtype),
        grid=(B,),
        in_specs=in_specs,
        out_specs=token_spec,
        compiler_params=_compiler_params(),
        cost_estimate=cost,
    )(x,
      attn_p["ln_g"], attn_p["ln_b"],
      attn_p["wq"], attn_p["wk"], attn_p["wv"], attn_p["wo"], attn_p["bo"],
      ff_p["ln_g"], ff_p["ln_b"], ff_p["w1"], ff_p["b1"], ff_p["w2"], ff_p["b2"],
      norm_g, norm_b)


def cross_layer(sm_tokens, lg_tokens, p, *, heads, dim_head):
    B, N_sm, D_sm = sm_tokens.shape
    _, N_lg, D_lg = lg_tokens.shape
    inner = heads * dim_head
    scale = float(dim_head) ** -0.5
    a = p["sm_attend_lg"]
    b = p["lg_attend_sm"]

    def dir_specs(din, dout):
        return [
            _const_spec((din, dout)), _const_spec((1, dout)),
            _const_spec((1, dout)), _const_spec((1, dout)),
            _const_spec((heads, dout, dim_head)), _const_spec((heads, dout, dim_head)),
            _const_spec((heads, dout, dim_head)), _const_spec((heads, dim_head, dout)),
            _const_spec((1, dout)),
            _const_spec((dout, din)), _const_spec((1, din)),
        ]

    def dir_args(q):
        return (q["proj_in_w"], q["proj_in_b"], q["ln_g"], q["ln_b"],
                q["wq"], q["wk"], q["wv"], q["wo"], q["bo"],
                q["proj_out_w"], q["proj_out_b"])

    sm_spec = pl.BlockSpec((None, N_sm, D_sm), lambda i: (i, 0, 0))
    lg_spec = pl.BlockSpec((None, N_lg, D_lg), lambda i: (i, 0, 0))
    cost = pl.CostEstimate(
        flops=int(B * 2 * (5 * (N_sm + N_lg) * max(D_sm, D_lg) * inner
                           + 4 * D_sm * D_lg)),
        transcendentals=int(B * 2 * heads * (N_sm + N_lg)),
        bytes_accessed=int(8 * B * (N_sm * D_sm + N_lg * D_lg)
                           + 2 * 2 * (2 * D_sm * D_lg + 4 * max(D_sm, D_lg) * inner)))
    return pl.pallas_call(
        functools.partial(_cross_layer_kernel, heads=heads, scale=scale, eps=LN_EPS),
        out_shape=(jax.ShapeDtypeStruct((B, N_sm, D_sm), sm_tokens.dtype),
                   jax.ShapeDtypeStruct((B, N_lg, D_lg), lg_tokens.dtype)),
        grid=(B,),
        in_specs=[sm_spec, lg_spec] + dir_specs(D_sm, D_lg) + dir_specs(D_lg, D_sm),
        out_specs=(sm_spec, lg_spec),
        compiler_params=_compiler_params(),
        cost_estimate=cost,
    )(sm_tokens, lg_tokens, *dir_args(a), *dir_args(b))


def image_embed(img, p, patch_size):
    # einops: 'b c (h p1) (w p2) -> b (h w) (p1 p2 c)'  (layout glue in plain JAX)
    B, C, H, W = img.shape
    hh, ww = H // patch_size, W // patch_size
    x = img.reshape(B, C, hh, patch_size, ww, patch_size)
    x = x.transpose(0, 2, 4, 3, 5, 1).reshape(B, hh * ww, patch_size * patch_size * C)
    n_p, pd = hh * ww, patch_size * patch_size * C
    dim = int(p["w"].shape[1])
    cost = pl.CostEstimate(
        flops=int(2 * B * n_p * pd * dim + 2 * B * n_p * dim),
        transcendentals=0,
        bytes_accessed=int(4 * B * n_p * (pd + dim) + 2 * pd * dim + 4 * (n_p + 1) * dim))
    return pl.pallas_call(
        _embed_kernel,
        out_shape=jax.ShapeDtypeStruct((B, n_p, dim), img.dtype),
        grid=(B,),
        in_specs=[
            pl.BlockSpec((None, n_p, pd), lambda b: (b, 0, 0)),
            _const_spec((pd, dim)),
            _const_spec((1, dim)),
            _const_spec((n_p, dim)),
        ],
        out_specs=pl.BlockSpec((None, n_p, dim), lambda b: (b, 0, 0)),
        compiler_params=_compiler_params(),
        cost_estimate=cost,
    )(x, p["w"], p["b"], p["pos"])


def tokens_to_rows(tokens, image_size, patch_size):
    # einops: 'b (h w) (p1 p2 c) -> b (h p1) ((w p2) c)'  (NHWC rows, channels
    # folded into the lane dimension).
    B, N, D = tokens.shape
    ps = patch_size
    h = image_size // ps
    c = D // (ps * ps)
    x = tokens.reshape(B, h, h, ps, ps, c)
    x = x.transpose(0, 1, 3, 2, 4, 5)
    return x.reshape(B, h * ps, h * ps * c)


def fused_sum_conv(sm_tokens, lg_tokens, conv_w, conv_b, cfg):
    """(rearranged sm + rearranged lg) followed by a 1x1 Conv2d, fused."""
    S = cfg["image_size"]
    B = sm_tokens.shape[0]
    rows_sm = tokens_to_rows(sm_tokens, S, cfg["sm_patch_size"])       # [B, S, S*C]
    rows_lg = tokens_to_rows(lg_tokens, S, cfg["lg_patch_size"])       # [B, S, S*C]
    C = rows_sm.shape[-1] // S
    Cout = int(conv_w.shape[1])

    if S * Cout <= 8192 and S % 8 == 0:
        # Fold a whole pixel row into lanes: block-diagonal [(x,c),(x',co)]
        # weight gives one dense matmul with lane-dense (S*Cout-wide) stores.
        eye = jnp.eye(S, dtype=conv_w.dtype)
        w = jnp.einsum("xy,ck->xcyk", eye, conv_w).reshape(S * C, S * Cout)
        bias = jnp.tile(conv_b, (S,)).reshape(1, S * Cout)
        x1 = rows_sm.reshape(B * S, S * C)
        x2 = rows_lg.reshape(B * S, S * C)
        Kin, Nout, TM = S * C, S * Cout, S
    else:
        # TODO(synk): wide-output configs fall back to the plain per-pixel 1x1
        # conv (Cout >= 128 already keeps stores lane-dense there).
        w = conv_w
        bias = conv_b.reshape(1, Cout)
        x1 = rows_sm.reshape(B * S * S, C)
        x2 = rows_lg.reshape(B * S * S, C)
        Kin, Nout, TM = C, Cout, _pick_row_tile(B * S * S)

    M = x1.shape[0]
    cost = pl.CostEstimate(
        flops=int(2 * M * Kin * Nout + M * Kin),
        transcendentals=0,
        bytes_accessed=int(4 * M * (2 * Kin + Nout) + 2 * Kin * Nout + 4 * Nout))
    y = pl.pallas_call(
        _sum_conv_kernel,
        out_shape=jax.ShapeDtypeStruct((M, Nout), sm_tokens.dtype),
        grid=(pl.cdiv(M, TM),),
        in_specs=[
            pl.BlockSpec((TM, Kin), lambda i: (i, 0)),
            pl.BlockSpec((TM, Kin), lambda i: (i, 0)),
            _const_spec((Kin, Nout)),
            _const_spec((1, Nout)),
        ],
        out_specs=pl.BlockSpec((TM, Nout), lambda i: (i, 0)),
        compiler_params=_compiler_params(),
        cost_estimate=cost,
    )(x1, x2, w, bias)
    return y.reshape(B, S, S, Cout).transpose(0, 3, 1, 2)              # NCHW output


# ----------------------------------------------------------------------------
# Model composition (plain JAX glue around the fused kernels)
# ----------------------------------------------------------------------------

def run_transformer(tp, x, *, heads, dim_head):
    layers = tp["layers"]
    for idx, layer in enumerate(layers):
        x = encoder_layer(x, layer["attn"], layer["ff"], tp["norm_g"], tp["norm_b"],
                          heads=heads, dim_head=dim_head,
                          final_norm=(idx == len(layers) - 1))
    return x


def cross_plus_vit_segnet_forward(params, img, cfg):
    sm_tokens = image_embed(img, params["sm_embed"], cfg["sm_patch_size"])
    lg_tokens = image_embed(img, params["lg_embed"], cfg["lg_patch_size"])
    for enc in params["encoder"]:
        sm_tokens = run_transformer(enc["sm_enc"], sm_tokens,
                                    heads=cfg["sm_enc_heads"],
                                    dim_head=cfg["sm_enc_dim_head"])
        lg_tokens = run_transformer(enc["lg_enc"], lg_tokens,
                                    heads=cfg["lg_enc_heads"],
                                    dim_head=cfg["lg_enc_dim_head"])
        for cl in enc["cross"]["layers"]:
            sm_tokens, lg_tokens = cross_layer(sm_tokens, lg_tokens, cl,
                                               heads=cfg["cross_attn_heads"],
                                               dim_head=cfg["cross_attn_dim_head"])
    return fused_sum_conv(sm_tokens, lg_tokens, params["conv_w"], params["conv_b"], cfg)


# ----------------------------------------------------------------------------
# Parameter initialization (deterministic, synthetic).  Matmul weights stored
# bf16 (MXU operands); biases / LN params / pos embeddings stay f32.  Attention
# projections carry a leading head axis.  Static hyper-parameters (heads, dims)
# live in `cfg`, never in this pytree.
# ----------------------------------------------------------------------------

class KeyGen:
    def __init__(self, key):
        self.key = key

    def __call__(self):
        self.key, sub = jax.random.split(self.key)
        return sub


def _w(key, shape, scale=0.02):
    return (jax.random.normal(key, shape, jnp.float32) * scale).astype(MXU_DTYPE)


def init_attention(kg, dim, heads, dim_head):
    return dict(
        ln_g=jnp.ones((1, dim), jnp.float32), ln_b=jnp.zeros((1, dim), jnp.float32),
        wq=_w(kg(), (heads, dim, dim_head)),
        wk=_w(kg(), (heads, dim, dim_head)),
        wv=_w(kg(), (heads, dim, dim_head)),
        wo=_w(kg(), (heads, dim_head, dim)),
        bo=jnp.zeros((1, dim), jnp.float32))


def init_ff(kg, dim, hidden):
    return dict(
        ln_g=jnp.ones((1, dim), jnp.float32), ln_b=jnp.zeros((1, dim), jnp.float32),
        w1=_w(kg(), (dim, hidden)), b1=jnp.zeros((1, hidden), jnp.float32),
        w2=_w(kg(), (hidden, dim)), b2=jnp.zeros((1, dim), jnp.float32))


def init_transformer(kg, dim, depth, heads, dim_head, mlp_dim):
    return dict(
        layers=[dict(attn=init_attention(kg, dim, heads, dim_head),
                     ff=init_ff(kg, dim, mlp_dim)) for _ in range(depth)],
        norm_g=jnp.ones((1, dim), jnp.float32),
        norm_b=jnp.zeros((1, dim), jnp.float32))


def init_cross_block(kg, dim_in, dim_out, heads, dim_head):
    return dict(
        proj_in_w=_w(kg(), (dim_in, dim_out)),
        proj_in_b=jnp.zeros((1, dim_out), jnp.float32),
        ln_g=jnp.ones((1, dim_out), jnp.float32),
        ln_b=jnp.zeros((1, dim_out), jnp.float32),
        wq=_w(kg(), (heads, dim_out, dim_head)),
        wk=_w(kg(), (heads, dim_out, dim_head)),
        wv=_w(kg(), (heads, dim_out, dim_head)),
        wo=_w(kg(), (heads, dim_head, dim_out)),
        bo=jnp.zeros((1, dim_out), jnp.float32),
        proj_out_w=_w(kg(), (dim_out, dim_in)),
        proj_out_b=jnp.zeros((1, dim_in), jnp.float32))


def init_cross_transformer(kg, sm_dim, lg_dim, depth, heads, dim_head):
    return dict(layers=[dict(
        sm_attend_lg=init_cross_block(kg, sm_dim, lg_dim, heads, dim_head),
        lg_attend_sm=init_cross_block(kg, lg_dim, sm_dim, heads, dim_head))
        for _ in range(depth)])


def init_model(key, cfg):
    kg = KeyGen(key)
    sm_np = (cfg["image_size"] // cfg["sm_patch_size"]) ** 2
    lg_np = (cfg["image_size"] // cfg["lg_patch_size"]) ** 2
    sm_patch_dim = cfg["channels"] * cfg["sm_patch_size"] ** 2
    lg_patch_dim = cfg["channels"] * cfg["lg_patch_size"] ** 2
    out_in_channels = cfg["lg_dim"] // cfg["lg_patch_size"] ** 2
    assert out_in_channels == cfg["sm_dim"] // cfg["sm_patch_size"] ** 2

    encoder = []
    for _ in range(cfg["depth"]):
        encoder.append(dict(
            sm_enc=init_transformer(kg, cfg["sm_dim"], cfg["sm_enc_depth"],
                                    cfg["sm_enc_heads"], cfg["sm_enc_dim_head"],
                                    cfg["sm_enc_mlp_dim"]),
            lg_enc=init_transformer(kg, cfg["lg_dim"], cfg["lg_enc_depth"],
                                    cfg["lg_enc_heads"], cfg["lg_enc_dim_head"],
                                    cfg["lg_enc_mlp_dim"]),
            cross=init_cross_transformer(kg, cfg["sm_dim"], cfg["lg_dim"],
                                         cfg["cross_attn_depth"],
                                         cfg["cross_attn_heads"],
                                         cfg["cross_attn_dim_head"]),
        ))

    return dict(
        sm_embed=dict(w=_w(kg(), (sm_patch_dim, cfg["sm_dim"])),
                      b=jnp.zeros((1, cfg["sm_dim"]), jnp.float32),
                      pos=jax.random.normal(kg(), (sm_np, cfg["sm_dim"]), jnp.float32)),
        lg_embed=dict(w=_w(kg(), (lg_patch_dim, cfg["lg_dim"])),
                      b=jnp.zeros((1, cfg["lg_dim"]), jnp.float32),
                      pos=jax.random.normal(kg(), (lg_np, cfg["lg_dim"]), jnp.float32)),
        encoder=encoder,
        conv_w=_w(kg(), (out_in_channels, cfg["output_channels"])),
        conv_b=jnp.zeros((cfg["output_channels"],), jnp.float32),
    )


# ----------------------------------------------------------------------------
# Entry point
# ----------------------------------------------------------------------------

if __name__ == "__main__":
    # Small configuration with the same structural constraints as the PyTorch
    # defaults (image % patch == 0 and sm_dim / sm_patch^2 == lg_dim / lg_patch^2).
    cfg = dict(
        image_size=24,
        channels=4,
        output_channels=32,
        sm_dim=64,          # 64 / 4^2  = 4 output channels after rearrange
        lg_dim=144,         # 144 / 6^2 = 4 output channels after rearrange
        sm_patch_size=4,
        sm_enc_depth=1, sm_enc_heads=2, sm_enc_mlp_dim=128, sm_enc_dim_head=16,
        lg_patch_size=6,
        lg_enc_depth=1, lg_enc_heads=2, lg_enc_mlp_dim=128, lg_enc_dim_head=16,
        cross_attn_depth=1, cross_attn_heads=2, cross_attn_dim_head=16,
        depth=1,
    )

    key = jax.random.PRNGKey(0)
    k_param, k_img = jax.random.split(key)
    params = init_model(k_param, cfg)

    batch = 2
    img = jax.random.normal(
        k_img, (batch, cfg["channels"], cfg["image_size"], cfg["image_size"]),
        jnp.float32)

    fwd = jax.jit(functools.partial(cross_plus_vit_segnet_forward, cfg=cfg))
    out = fwd(params, img)
    out = jax.block_until_ready(out)

    expected = (batch, cfg["output_channels"], cfg["image_size"], cfg["image_size"])
    assert out.shape == expected, (out.shape, expected)
    assert bool(jnp.all(jnp.isfinite(out)))
    print("KERNEL_OK")
</pallas_src>

<mosaic_0001>
module attributes {stable_mosaic.version = 11 : i64} {
  func.func @_embed_kernel(%arg0: i32, %arg1: memref<1x36x64xf32, #tpu.memory_space<vmem>>, %arg2: memref<64x64xbf16, #tpu.memory_space<vmem>>, %arg3: memref<1x64xf32, #tpu.memory_space<vmem>>, %arg4: memref<36x64xf32, #tpu.memory_space<vmem>>, %arg5: memref<1x36x64xf32, #tpu.memory_space<vmem>>) attributes {dimension_semantics = [#tpu.dimension_semantics<parallel>], iteration_bounds = array<i64: 2>, scalar_prefetch = 0 : i64, scratch_operands = 0 : i64, tpu.core_type = #tpu.core_type<tc>, window_params = [{transform_indices = @transform_0, window_bounds = array<i64: 1, 36, 64>}, {pipeline_mode = #tpu.pipeline_mode<synchronous>, transform_indices = @transform_1, window_bounds = array<i64: 64, 64>}, {pipeline_mode = #tpu.pipeline_mode<synchronous>, transform_indices = @transform_2, window_bounds = array<i64: 1, 64>}, {pipeline_mode = #tpu.pipeline_mode<synchronous>, transform_indices = @transform_3, window_bounds = array<i64: 36, 64>}, {transform_indices = @transform_4, window_bounds = array<i64: 1, 36, 64>}]} {
    %c0 = arith.constant 0 : index
    %c0_0 = arith.constant 0 : index
    %c0_1 = arith.constant 0 : index
    %0 = vector.load %arg1[%c0, %c0_0, %c0_1] : memref<1x36x64xf32, #tpu.memory_space<vmem>>, vector<1x36x64xf32>
    %1 = vector.shape_cast %0 : vector<1x36x64xf32> to vector<36x64xf32>
    %2 = arith.truncf %1 : vector<36x64xf32> to vector<36x64xbf16>
    %c0_2 = arith.constant 0 : index
    %c0_3 = arith.constant 0 : index
    %3 = vector.load %arg2[%c0_2, %c0_3] : memref<64x64xbf16, #tpu.memory_space<vmem>>, vector<64x64xbf16>
    %cst = arith.constant dense<0.000000e+00> : vector<36x64xf32>
    %4 = tpu.matmul %2, %3, %cst {dimension_numbers = #tpu.dot_dimension_numbers<[1], [0], [0], [1], [0, 0, 1, 1], [], []>} : vector<36x64xbf16>, vector<64x64xbf16>, vector<36x64xf32> -> vector<36x64xf32>
    %c0_4 = arith.constant 0 : index
    %c0_5 = arith.constant 0 : index
    %5 = vector.load %arg3[%c0_4, %c0_5] : memref<1x64xf32, #tpu.memory_space<vmem>>, vector<1x64xf32>
    %6 = vector.broadcast %5 : vector<1x64xf32> to vector<36x64xf32>
    %7 = arith.addf %4, %6 : vector<36x64xf32>
    %c0_6 = arith.constant 0 : index
    %c0_7 = arith.constant 0 : index
    %8 = vector.load %arg4[%c0_6, %c0_7] : memref<36x64xf32, #tpu.memory_space<vmem>>, vector<36x64xf32>
    %9 = arith.addf %7, %8 : vector<36x64xf32>
    %c0_8 = arith.constant 0 : index
    %c0_9 = arith.constant 0 : index
    %c0_10 = arith.constant 0 : index
    %10 = vector.load %arg5[%c0_8, %c0_9, %c0_10] : memref<1x36x64xf32, #tpu.memory_space<vmem>>, vector<1x36x64xf32>
    %11 = vector.shape_cast %10 : vector<1x36x64xf32> to vector<36x64xf32>
    %12 = vector.shape_cast %9 : vector<36x64xf32> to vector<1x36x64xf32>
    tpu.vector_store %arg5[%c0_8, %c0_9, %c0_10], %12 {strides = array<i32>} : memref<1x36x64xf32, #tpu.memory_space<vmem>>, vector<1x36x64xf32>,
    return
  }
  func.func @transform_0(%arg0: i32) -> (i32, i32, i32) {
    %c0_i32 = arith.constant 0 : i32
    %c0_i32_0 = arith.constant 0 : i32
    %c0_i32_1 = arith.constant 0 : i32
    return %arg0, %c0_i32, %c0_i32_0 : i32, i32, i32
  }
  func.func @transform_1(%arg0: i32) -> (i32, i32) {
    %c0_i32 = arith.constant 0 : i32
    %c0_i32_0 = arith.constant 0 : i32
    %c0_i32_1 = arith.constant 0 : i32
    return %c0_i32, %c0_i32_0 : i32, i32
  }
  func.func @transform_2(%arg0: i32) -> (i32, i32) {
    %c0_i32 = arith.constant 0 : i32
    %c0_i32_0 = arith.constant 0 : i32
    %c0_i32_1 = arith.constant 0 : i32
    return %c0_i32, %c0_i32_0 : i32, i32
  }
  func.func @transform_3(%arg0: i32) -> (i32, i32) {
    %c0_i32 = arith.constant 0 : i32
    %c0_i32_0 = arith.constant 0 : i32
    %c0_i32_1 = arith.constant 0 : i32
    return %c0_i32, %c0_i32_0 : i32, i32
  }
  func.func @transform_4(%arg0: i32) -> (i32, i32, i32) {
    %c0_i32 = arith.constant 0 : i32
    %c0_i32_0 = arith.constant 0 : i32
    %c0_i32_1 = arith.constant 0 : i32
    return %arg0, %c0_i32, %c0_i32_0 : i32, i32, i32
  }
}

module attributes {stable_mosaic.version = 11 : i64} {
  func.func @_enc_layer_kernel(%arg0: i32, %arg1: memref<1x36x64xf32, #tpu.memory_space<vmem>>, %arg2: memref<1x64xf32, #tpu.memory_space<vmem>>, %arg3: memref<1x64xf32, #tpu.memory_space<vmem>>, %arg4: memref<2x64x16xbf16, #tpu.memory_space<vmem>>, %arg5: memref<2x64x16xbf16, #tpu.memory_space<vmem>>, %arg6: memref<2x64x16xbf16, #tpu.memory_space<vmem>>, %arg7: memref<2x16x64xbf16, #tpu.memory_space<vmem>>, %arg8: memref<1x64xf32, #tpu.memory_space<vmem>>, %arg9: memref<1x64xf32, #tpu.memory_space<vmem>>, %arg10: memref<1x64xf32, #tpu.memory_space<vmem>>, %arg11: memref<64x128xbf16, #tpu.memory_space<vmem>>, %arg12: memref<1x128xf32, #tpu.memory_space<vmem>>, %arg13: memref<128x64xbf16, #tpu.memory_space<vmem>>, %arg14: memref<1x64xf32, #tpu.memory_space<vmem>>, %arg15: memref<1x64xf32, #tpu.memory_space<vmem>>, %arg16: memref<1x64xf32, #tpu.memory_space<vmem>>, %arg17: memref<1x36x64xf32, #tpu.memory_space<vmem>>) attributes {dimension_semantics = [#tpu.dimension_semantics<parallel>], iteration_bounds = array<i64: 2>, scalar_prefetch = 0 : i64, scratch_operands = 0 : i64, tpu.core_type = #tpu.core_type<tc>, window_params = [{transform_indices = @transform_0, window_bounds = array<i64: 1, 36, 64>}, {pipeline_mode = #tpu.pipeline_mode<synchronous>, transform_indices = @transform_1, window_bounds = array<i64: 1, 64>}, {pipeline_mode = #tpu.pipeline_mode<synchronous>, transform_indices = @transform_2, window_bounds = array<i64: 1, 64>}, {pipeline_mode = #tpu.pipeline_mode<synchronous>, transform_indices = @transform_3, window_bounds = array<i64: 2, 64, 16>}, {pipeline_mode = #tpu.pipeline_mode<synchronous>, transform_indices = @transform_4, window_bounds = array<i64: 2, 64, 16>}, {pipeline_mode = #tpu.pipeline_mode<synchronous>, transform_indices = @transform_5, window_bounds = array<i64: 2, 64, 16>}, {pipeline_mode = #tpu.pipeline_mode<synchronous>, transform_indices = @transform_6, window_bounds = array<i64: 2, 16, 64>}, {pipeline_mode = #tpu.pipeline_mode<synchronous>, transform_indices = @transform_7, window_bounds = array<i64: 1, 64>}, {pipeline_mode = #tpu.pipeline_mode<synchronous>, transform_indices = @transform_8, window_bounds = array<i64: 1, 64>}, {pipeline_mode = #tpu.pipeline_mode<synchronous>, transform_indices = @transform_9, window_bounds = array<i64: 1, 64>}, {pipeline_mode = #tpu.pipeline_mode<synchronous>, transform_indices = @transform_10, window_bounds = array<i64: 64, 128>}, {pipeline_mode = #tpu.pipeline_mode<synchronous>, transform_indices = @transform_11, window_bounds = array<i64: 1, 128>}, {pipeline_mode = #tpu.pipeline_mode<synchronous>, transform_indices = @transform_12, window_bounds = array<i64: 128, 64>}, {pipeline_mode = #tpu.pipeline_mode<synchronous>, transform_indices = @transform_13, window_bounds = array<i64: 1, 64>}, {pipeline_mode = #tpu.pipeline_mode<synchronous>, transform_indices = @transform_14, window_bounds = array<i64: 1, 64>}, {pipeline_mode = #tpu.pipeline_mode<synchronous>, transform_indices = @transform_15, window_bounds = array<i64: 1, 64>}, {transform_indices = @transform_16, window_bounds = array<i64: 1, 36, 64>}]} {
    %c0 = arith.constant 0 : index
    %c0_0 = arith.constant 0 : index
    %c0_1 = arith.constant 0 : index
    %0 = vector.load %arg1[%c0, %c0_0, %c0_1] : memref<1x36x64xf32, #tpu.memory_space<vmem>>, vector<1x36x64xf32>
    %1 = vector.shape_cast %0 : vector<1x36x64xf32> to vector<36x64xf32>
    %c0_2 = arith.constant 0 : index
    %c0_3 = arith.constant 0 : index
    %2 = vector.load %arg2[%c0_2, %c0_3] : memref<1x64xf32, #tpu.memory_space<vmem>>, vector<1x64xf32>
    %c0_4 = arith.constant 0 : index
    %c0_5 = arith.constant 0 : index
    %3 = vector.load %arg3[%c0_4, %c0_5] : memref<1x64xf32, #tpu.memory_space<vmem>>, vector<1x64xf32>
    %cst = arith.constant dense<0.000000e+00> : vector<36xf32>
    %4 = vector.multi_reduction <add>, %1, %cst [1] : vector<36x64xf32> to vector<36xf32>
    %5 = vector.shape_cast %4 : vector<36xf32> to vector<36x1xf32>
    %cst_6 = arith.constant 6.400000e+01 : f32
    %6 = vector.broadcast %cst_6 : f32 to vector<36x1xf32>
    %7 = arith.divf %5, %6 : vector<36x1xf32>
    %8 = vector.broadcast %7 : vector<36x1xf32> to vector<36x64xf32>
    %9 = arith.subf %1, %8 : vector<36x64xf32>
    %10 = arith.mulf %9, %9 : vector<36x64xf32>
    %cst_7 = arith.constant dense<0.000000e+00> : vector<36xf32>
    %11 = vector.multi_reduction <add>, %10, %cst_7 [1] : vector<36x64xf32> to vector<36xf32>
    %12 = vector.shape_cast %11 : vector<36xf32> to vector<36x1xf32>
    %cst_8 = arith.constant 6.400000e+01 : f32
    %13 = vector.broadcast %cst_8 : f32 to vector<36x1xf32>
    %14 = arith.divf %12, %13 : vector<36x1xf32>
    %cst_9 = arith.constant 9.99999974E-6 : f32
    %15 = vector.broadcast %cst_9 : f32 to vector<36x1xf32>
    %16 = arith.addf %14, %15 : vector<36x1xf32>
    %17 = math.rsqrt %16 : vector<36x1xf32>
    %18 = vector.broadcast %17 : vector<36x1xf32> to vector<36x64xf32>
    %19 = arith.mulf %9, %18 : vector<36x64xf32>
    %20 = vector.broadcast %2 : vector<1x64xf32> to vector<36x64xf32>
    %21 = arith.mulf %19, %20 : vector<36x64xf32>
    %22 = vector.broadcast %3 : vector<1x64xf32> to vector<36x64xf32>
    %23 = arith.addf %21, %22 : vector<36x64xf32>
    %24 = arith.truncf %23 : vector<36x64xf32> to vector<36x64xbf16>
    %cst_10 = arith.constant 0.000000e+00 : f32
    %25 = vector.broadcast %cst_10 : f32 to vector<36x64xf32>
    %c0_11 = arith.constant 0 : index
    %c0_12 = arith.constant 0 : index
    %c0_13 = arith.constant 0 : index
    %26 = vector.load %arg4[%c0_11, %c0_12, %c0_13] : memref<2x64x16xbf16, #tpu.memory_space<vmem>>, vector<1x64x16xbf16>
    %27 = vector.shape_cast %26 : vector<1x64x16xbf16> to vector<64x16xbf16>
    %cst_14 = arith.constant dense<0.000000e+00> : vector<36x16xf32>
    %28 = tpu.matmul %24, %27, %cst_14 {dimension_numbers = #tpu.dot_dimension_numbers<[1], [0], [0], [1], [0, 0, 1, 1], [], []>} : vector<36x64xbf16>, vector<64x16xbf16>, vector<36x16xf32> -> vector<36x16xf32>
    %cst_15 = arith.constant 2.500000e-01 : f32
    %29 = vector.broadcast %cst_15 : f32 to vector<36x16xf32>
    %30 = arith.mulf %28, %29 : vector<36x16xf32>
    %c0_16 = arith.constant 0 : index
    %c0_17 = arith.constant 0 : index
    %c0_18 = arith.constant 0 : index
    %31 = vector.load %arg5[%c0_16, %c0_17, %c0_18] : memref<2x64x16xbf16, #tpu.memory_space<vmem>>, vector<1x64x16xbf16>
    %32 = vector.shape_cast %31 : vector<1x64x16xbf16> to vector<64x16xbf16>
    %cst_19 = arith.constant dense<0.000000e+00> : vector<36x16xf32>
    %33 = tpu.matmul %24, %32, %cst_19 {dimension_numbers = #tpu.dot_dimension_numbers<[1], [0], [0], [1], [0, 0, 1, 1], [], []>} : vector<36x64xbf16>, vector<64x16xbf16>, vector<36x16xf32> -> vector<36x16xf32>
    %c0_20 = arith.constant 0 : index
    %c0_21 = arith.constant 0 : index
    %c0_22 = arith.constant 0 : index
    %34 = vector.load %arg6[%c0_20, %c0_21, %c0_22] : memref<2x64x16xbf16, #tpu.memory_space<vmem>>, vector<1x64x16xbf16>
    %35 = vector.shape_cast %34 : vector<1x64x16xbf16> to vector<64x16xbf16>
    %cst_23 = arith.constant dense<0.000000e+00> : vector<36x16xf32>
    %36 = tpu.matmul %24, %35, %cst_23 {dimension_numbers = #tpu.dot_dimension_numbers<[1], [0], [0], [1], [0, 0, 1, 1], [], []>} : vector<36x64xbf16>, vector<64x16xbf16>, vector<36x16xf32> -> vector<36x16xf32>
    %37 = arith.truncf %30 : vector<36x16xf32> to vector<36x16xbf16>
    %38 = arith.truncf %33 : vector<36x16xf32> to vector<36x16xbf16>
    %cst_24 = arith.constant dense<0.000000e+00> : vector<36x36xf32>
    %39 = tpu.matmul %37, %38, %cst_24 {dimension_numbers = #tpu.dot_dimension_numbers<[1], [1], [0], [0], [0, 0, 1, 0], [], []>} : vector<36x16xbf16>, vector<36x16xbf16>, vector<36x36xf32> -> vector<36x36xf32>
    %cst_25 = arith.constant dense<0xFF800000> : vector<36xf32>
    %40 = vector.multi_reduction <maximumf>, %39, %cst_25 [1] : vector<36x36xf32> to vector<36xf32>
    %41 = vector.shape_cast %40 : vector<36xf32> to vector<36x1xf32>
    %42 = vector.broadcast %41 : vector<36x1xf32> to vector<36x36xf32>
    %43 = arith.subf %39, %42 : vector<36x36xf32>
    %44 = math.exp %43 : vector<36x36xf32>
    %cst_26 = arith.constant dense<0.000000e+00> : vector<36xf32>
    %45 = vector.multi_reduction <add>, %44, %cst_26 [1] : vector<36x36xf32> to vector<36xf32>
    %46 = vector.shape_cast %45 : vector<36xf32> to vector<36x1xf32>
    %47 = tpu.reciprocal %46 {approx = true} : vector<36x1xf32> -> vector<36x1xf32>
    %48 = vector.broadcast %47 : vector<36x1xf32> to vector<36x36xf32>
    %49 = arith.mulf %44, %48 : vector<36x36xf32>
    %50 = arith.truncf %49 : vector<36x36xf32> to vector<36x36xbf16>
    %51 = arith.truncf %36 : vector<36x16xf32> to vector<36x16xbf16>
    %cst_27 = arith.constant dense<0.000000e+00> : vector<36x16xf32>
    %52 = tpu.matmul %50, %51, %cst_27 {dimension_numbers = #tpu.dot_dimension_numbers<[1], [0], [0], [1], [0, 0, 1, 1], [], []>} : vector<36x36xbf16>, vector<36x16xbf16>, vector<36x16xf32> -> vector<36x16xf32>
    %53 = arith.truncf %52 : vector<36x16xf32> to vector<36x16xbf16>
    %c0_28 = arith.constant 0 : index
    %c0_29 = arith.constant 0 : index
    %c0_30 = arith.constant 0 : index
    %54 = vector.load %arg7[%c0_28, %c0_29, %c0_30] : memref<2x16x64xbf16, #tpu.memory_space<vmem>>, vector<1x16x64xbf16>
    %55 = vector.shape_cast %54 : vector<1x16x64xbf16> to vector<16x64xbf16>
    %cst_31 = arith.constant dense<0.000000e+00> : vector<36x64xf32>
    %56 = tpu.matmul %53, %55, %cst_31 {dimension_numbers = #tpu.dot_dimension_numbers<[1], [0], [0], [1], [0, 0, 1, 1], [], []>} : vector<36x16xbf16>, vector<16x64xbf16>, vector<36x64xf32> -> vector<36x64xf32>
    %57 = arith.addf %25, %56 : vector<36x64xf32>
    %c1 = arith.constant 1 : index
    %c0_32 = arith.constant 0 : index
    %c0_33 = arith.constant 0 : index
    %58 = vector.load %arg4[%c1, %c0_32, %c0_33] : memref<2x64x16xbf16, #tpu.memory_space<vmem>>, vector<1x64x16xbf16>
    %59 = vector.shape_cast %58 : vector<1x64x16xbf16> to vector<64x16xbf16>
    %cst_34 = arith.constant dense<0.000000e+00> : vector<36x16xf32>
    %60 = tpu.matmul %24, %59, %cst_34 {dimension_numbers = #tpu.dot_dimension_numbers<[1], [0], [0], [1], [0, 0, 1, 1], [], []>} : vector<36x64xbf16>, vector<64x16xbf16>, vector<36x16xf32> -> vector<36x16xf32>
    %cst_35 = arith.constant 2.500000e-01 : f32
    %61 = vector.broadcast %cst_35 : f32 to vector<36x16xf32>
    %62 = arith.mulf %60, %61 : vector<36x16xf32>
    %c1_36 = arith.constant 1 : index
    %c0_37 = arith.constant 0 : index
    %c0_38 = arith.constant 0 : index
    %63 = vector.load %arg5[%c1_36, %c0_37, %c0_38] : memref<2x64x16xbf16, #tpu.memory_space<vmem>>, vector<1x64x16xbf16>
    %64 = vector.shape_cast %63 : vector<1x64x16xbf16> to vector<64x16xbf16>
    %cst_39 = arith.constant dense<0.000000e+00> : vector<36x16xf32>
    %65 = tpu.matmul %24, %64, %cst_39 {dimension_numbers = #tpu.dot_dimension_numbers<[1], [0], [0], [1], [0, 0, 1, 1], [], []>} : vector<36x64xbf16>, vector<64x16xbf16>, vector<36x16xf32> -> vector<36x16xf32>
    %c1_40 = arith.constant 1 : index
    %c0_41 = arith.constant 0 : index
    %c0_42 = arith.constant 0 : index
    %66 = vector.load %arg6[%c1_40, %c0_41, %c0_42] : memref<2x64x16xbf16, #tpu.memory_space<vmem>>, vector<1x64x16xbf16>
    %67 = vector.shape_cast %66 : vector<1x64x16xbf16> to vector<64x16xbf16>
    %cst_43 = arith.constant dense<0.000000e+00> : vector<36x16xf32>
    %68 = tpu.matmul %24, %67, %cst_43 {dimension_numbers = #tpu.dot_dimension_numbers<[1], [0], [0], [1], [0, 0, 1, 1], [], []>} : vector<36x64xbf16>, vector<64x16xbf16>, vector<36x16xf32> -> vector<36x16xf32>
    %69 = arith.truncf %62 : vector<36x16xf32> to vector<36x16xbf16>
    %70 = arith.truncf %65 : vector<36x16xf32> to vector<36x16xbf16>
    %cst_44 = arith.constant dense<0.000000e+00> : vector<36x36xf32>
    %71 = tpu.matmul %69, %70, %cst_44 {dimension_numbers = #tpu.dot_dimension_numbers<[1], [1], [0], [0], [0, 0, 1, 0], [], []>} : vector<36x16xbf16>, vector<36x16xbf16>, vector<36x36xf32> -> vector<36x36xf32>
    %cst_45 = arith.constant dense<0xFF800000> : vector<36xf32>
    %72 = vector.multi_reduction <maximumf>, %71, %cst_45 [1] : vector<36x36xf32> to vector<36xf32>
    %73 = vector.shape_cast %72 : vector<36xf32> to vector<36x1xf32>
    %74 = vector.broadcast %73 : vector<36x1xf32> to vector<36x36xf32>
    %75 = arith.subf %71, %74 : vector<36x36xf32>
    %76 = math.exp %75 : vector<36x36xf32>
    %cst_46 = arith.constant dense<0.000000e+00> : vector<36xf32>
    %77 = vector.multi_reduction <add>, %76, %cst_46 [1] : vector<36x36xf32> to vector<36xf32>
    %78 = vector.shape_cast %77 : vector<36xf32> to vector<36x1xf32>
    %79 = tpu.reciprocal %78 {approx = true} : vector<36x1xf32> -> vector<36x1xf32>
    %80 = vector.broadcast %79 : vector<36x1xf32> to vector<36x36xf32>
    %81 = arith.mulf %76, %80 : vector<36x36xf32>
    %82 = arith.truncf %81 : vector<36x36xf32> to vector<36x36xbf16>
    %83 = arith.truncf %68 : vector<36x16xf32> to vector<36x16xbf16>
    %cst_47 = arith.constant dense<0.000000e+00> : vector<36x16xf32>
    %84 = tpu.matmul %82, %83, %cst_47 {dimension_numbers = #tpu.dot_dimension_numbers<[1], [0], [0], [1], [0, 0, 1, 1], [], []>} : vector<36x36xbf16>, vector<36x16xbf16>, vector<36x16xf32> -> vector<36x16xf32>
    %85 = arith.truncf %84 : vector<36x16xf32> to vector<36x16xbf16>
    %c1_48 = arith.constant 1 : index
    %c0_49 = arith.constant 0 : index
    %c0_50 = arith.constant 0 : index
    %86 = vector.load %arg7[%c1_48, %c0_49, %c0_50] : memref<2x16x64xbf16, #tpu.memory_space<vmem>>, vector<1x16x64xbf16>
    %87 = vector.shape_cast %86 : vector<1x16x64xbf16> to vector<16x64xbf16>
    %cst_51 = arith.constant dense<0.000000e+00> : vector<36x64xf32>
    %88 = tpu.matmul %85, %87, %cst_51 {dimension_numbers = #tpu.dot_dimension_numbers<[1], [0], [0], [1], [0, 0, 1, 1], [], []>} : vector<36x16xbf16>, vector<16x64xbf16>, vector<36x64xf32> -> vector<36x64xf32>
    %89 = arith.addf %57, %88 : vector<36x64xf32>
    %90 = arith.addf %1, %89 : vector<36x64xf32>
    %c0_52 = arith.constant 0 : index
    %c0_53 = arith.constant 0 : index
    %91 = vector.load %arg8[%c0_52, %c0_53] : memref<1x64xf32, #tpu.memory_space<vmem>>, vector<1x64xf32>
    %92 = vector.broadcast %91 : vector<1x64xf32> to vector<36x64xf32>
    %93 = arith.addf %90, %92 : vector<36x64xf32>
    %c0_54 = arith.constant 0 : index
    %c0_55 = arith.constant 0 : index
    %94 = vector.load %arg9[%c0_54, %c0_55] : memref<1x64xf32, #tpu.memory_space<vmem>>, vector<1x64xf32>
    %c0_56 = arith.constant 0 : index
    %c0_57 = arith.constant 0 : index
    %95 = vector.load %arg10[%c0_56, %c0_57] : memref<1x64xf32, #tpu.memory_space<vmem>>, vector<1x64xf32>
    %cst_58 = arith.constant dense<0.000000e+00> : vector<36xf32>
    %96 = vector.multi_reduction <add>, %93, %cst_58 [1] : vector<36x64xf32> to vector<36xf32>
    %97 = vector.shape_cast %96 : vector<36xf32> to vector<36x1xf32>
    %cst_59 = arith.constant 6.400000e+01 : f32
    %98 = vector.broadcast %cst_59 : f32 to vector<36x1xf32>
    %99 = arith.divf %97, %98 : vector<36x1xf32>
    %100 = vector.broadcast %99 : vector<36x1xf32> to vector<36x64xf32>
    %101 = arith.subf %93, %100 : vector<36x64xf32>
    %102 = arith.mulf %101, %101 : vector<36x64xf32>
    %cst_60 = arith.constant dense<0.000000e+00> : vector<36xf32>
    %103 = vector.multi_reduction <add>, %102, %cst_60 [1] : vector<36x64xf32> to vector<36xf32>
    %104 = vector.shape_cast %103 : vector<36xf32> to vector<36x1xf32>
    %cst_61 = arith.constant 6.400000e+01 : f32
    %105 = vector.broadcast %cst_61 : f32 to vector<36x1xf32>
    %106 = arith.divf %104, %105 : vector<36x1xf32>
    %cst_62 = arith.constant 9.99999974E-6 : f32
    %107 = vector.broadcast %cst_62 : f32 to vector<36x1xf32>
    %108 = arith.addf %106, %107 : vector<36x1xf32>
    %109 = math.rsqrt %108 : vector<36x1xf32>
    %110 = vector.broadcast %109 : vector<36x1xf32> to vector<36x64xf32>
    %111 = arith.mulf %101, %110 : vector<36x64xf32>
    %112 = vector.broadcast %94 : vector<1x64xf32> to vector<36x64xf32>
    %113 = arith.mulf %111, %112 : vector<36x64xf32>
    %114 = vector.broadcast %95 : vector<1x64xf32> to vector<36x64xf32>
    %115 = arith.addf %113, %114 : vector<36x64xf32>
    %116 = arith.truncf %115 : vector<36x64xf32> to vector<36x64xbf16>
    %c0_63 = arith.constant 0 : index
    %c0_64 = arith.constant 0 : index
    %117 = vector.load %arg11[%c0_63, %c0_64] : memref<64x128xbf16, #tpu.memory_space<vmem>>, vector<64x128xbf16>
    %cst_65 = arith.constant dense<0.000000e+00> : vector<36x128xf32>
    %118 = tpu.matmul %116, %117, %cst_65 {dimension_numbers = #tpu.dot_dimension_numbers<[1], [0], [0], [1], [0, 0, 1, 1], [], []>} : vector<36x64xbf16>, vector<64x128xbf16>, vector<36x128xf32> -> vector<36x128xf32>
    %c0_66 = arith.constant 0 : index
    %c0_67 = arith.constant 0 : index
    %119 = vector.load %arg12[%c0_66, %c0_67] : memref<1x128xf32, #tpu.memory_space<vmem>>, vector<1x128xf32>
    %120 = vector.broadcast %119 : vector<1x128xf32> to vector<36x128xf32>
    %121 = arith.addf %118, %120 : vector<36x128xf32>
    %cst_68 = arith.constant 0.707106769 : f32
    %122 = vector.broadcast %cst_68 : f32 to vector<36x128xf32>
    %123 = arith.mulf %121, %122 : vector<36x128xf32>
    %124 = math.absf %123 : vector<36x128xf32>
    %cst_69 = arith.constant 0.327591091 : f32
    %125 = vector.broadcast %cst_69 : f32 to vector<36x128xf32>
    %126 = arith.mulf %125, %124 : vector<36x128xf32>
    %cst_70 = arith.constant 1.000000e+00 : f32
    %127 = vector.broadcast %cst_70 : f32 to vector<36x128xf32>
    %128 = arith.addf %127, %126 : vector<36x128xf32>
    %cst_71 = arith.constant 1.000000e+00 : f32
    %129 = vector.broadcast %cst_71 : f32 to vector<36x128xf32>
    %130 = arith.divf %129, %128 : vector<36x128xf32>
    %cst_72 = arith.constant 1.06140542 : f32
    %131 = vector.broadcast %cst_72 : f32 to vector<36x128xf32>
    %132 = arith.mulf %130, %131 : vector<36x128xf32>
    %cst_73 = arith.constant -1.45315206 : f32
    %133 = vector.broadcast %cst_73 : f32 to vector<36x128xf32>
    %134 = arith.addf %133, %132 : vector<36x128xf32>
    %135 = arith.mulf %130, %134 : vector<36x128xf32>
    %cst_74 = arith.constant 1.42141378 : f32
    %136 = vector.broadcast %cst_74 : f32 to vector<36x128xf32>
    %137 = arith.addf %136, %135 : vector<36x128xf32>
    %138 = arith.mulf %130, %137 : vector<36x128xf32>
    %cst_75 = arith.constant -0.284496725 : f32
    %139 = vector.broadcast %cst_75 : f32 to vector<36x128xf32>
    %140 = arith.addf %139, %138 : vector<36x128xf32>
    %141 = arith.mulf %130, %140 : vector<36x128xf32>
    %cst_76 = arith.constant 0.254829586 : f32
    %142 = vector.broadcast %cst_76 : f32 to vector<36x128xf32>
    %143 = arith.addf %142, %141 : vector<36x128xf32>
    %144 = arith.mulf %130, %143 : vector<36x128xf32>
    %cst_77 = arith.constant 0.000000e+00 : f32
    %145 = vector.broadcast %cst_77 : f32 to vector<36x128xf32>
    %146 = arith.subf %145, %124 : vector<36x128xf32>
    %147 = arith.mulf %146, %124 : vector<36x128xf32>
    %148 = math.exp %147 : vector<36x128xf32>
    %149 = arith.mulf %144, %148 : vector<36x128xf32>
    %cst_78 = arith.constant 1.000000e+00 : f32
    %150 = vector.broadcast %cst_78 : f32 to vector<36x128xf32>
    %151 = arith.subf %150, %149 : vector<36x128xf32>
    %cst_79 = arith.constant 0.000000e+00 : f32
    %152 = vector.broadcast %cst_79 : f32 to vector<36x128xf32>
    %153 = arith.cmpf oge, %123, %152 : vector<36x128xf32>
    %cst_80 = arith.constant 0.000000e+00 : f32
    %154 = vector.broadcast %cst_80 : f32 to vector<36x128xf32>
    %155 = arith.subf %154, %151 : vector<36x128xf32>
    %156 = arith.select %153, %151, %155 : vector<36x128xi1>, vector<36x128xf32>
    %cst_81 = arith.constant 5.000000e-01 : f32
    %157 = vector.broadcast %cst_81 : f32 to vector<36x128xf32>
    %158 = arith.mulf %157, %121 : vector<36x128xf32>
    %cst_82 = arith.constant 1.000000e+00 : f32
    %159 = vector.broadcast %cst_82 : f32 to vector<36x128xf32>
    %160 = arith.addf %159, %156 : vector<36x128xf32>
    %161 = arith.mulf %158, %160 : vector<36x128xf32>
    %162 = arith.truncf %161 : vector<36x128xf32> to vector<36x128xbf16>
    %c0_83 = arith.constant 0 : index
    %c0_84 = arith.constant 0 : index
    %163 = vector.load %arg13[%c0_83, %c0_84] : memref<128x64xbf16, #tpu.memory_space<vmem>>, vector<128x64xbf16>
    %cst_85 = arith.constant dense<0.000000e+00> : vector<36x64xf32>
    %164 = tpu.matmul %162, %163, %cst_85 {dimension_numbers = #tpu.dot_dimension_numbers<[1], [0], [0], [1], [0, 0, 1, 1], [], []>} : vector<36x128xbf16>, vector<128x64xbf16>, vector<36x64xf32> -> vector<36x64xf32>
    %c0_86 = arith.constant 0 : index
    %c0_87 = arith.constant 0 : index
    %165 = vector.load %arg14[%c0_86, %c0_87] : memref<1x64xf32, #tpu.memory_space<vmem>>, vector<1x64xf32>
    %166 = vector.broadcast %165 : vector<1x64xf32> to vector<36x64xf32>
    %167 = arith.addf %164, %166 : vector<36x64xf32>
    %168 = arith.addf %93, %167 : vector<36x64xf32>
    %c0_88 = arith.constant 0 : index
    %c0_89 = arith.constant 0 : index
    %169 = vector.load %arg15[%c0_88, %c0_89] : memref<1x64xf32, #tpu.memory_space<vmem>>, vector<1x64xf32>
    %c0_90 = arith.constant 0 : index
    %c0_91 = arith.constant 0 : index
    %170 = vector.load %arg16[%c0_90, %c0_91] : memref<1x64xf32, #tpu.memory_space<vmem>>, vector<1x64xf32>
    %cst_92 = arith.constant dense<0.000000e+00> : vector<36xf32>
    %171 = vector.multi_reduction <add>, %168, %cst_92 [1] : vector<36x64xf32> to vector<36xf32>
    %172 = vector.shape_cast %171 : vector<36xf32> to vector<36x1xf32>
    %cst_93 = arith.constant 6.400000e+01 : f32
    %173 = vector.broadcast %cst_93 : f32 to vector<36x1xf32>
    %174 = arith.divf %172, %173 : vector<36x1xf32>
    %175 = vector.broadcast %174 : vector<36x1xf32> to vector<36x64xf32>
    %176 = arith.subf %168, %175 : vector<36x64xf32>
    %177 = arith.mulf %176, %176 : vector<36x64xf32>
    %cst_94 = arith.constant dense<0.000000e+00> : vector<36xf32>
    %178 = vector.multi_reduction <add>, %177, %cst_94 [1] : vector<36x64xf32> to vector<36xf32>
    %179 = vector.shape_cast %178 : vector<36xf32> to vector<36x1xf32>
    %cst_95 = arith.constant 6.400000e+01 : f32
    %180 = vector.broadcast %cst_95 : f32 to vector<36x1xf32>
    %181 = arith.divf %179, %180 : vector<36x1xf32>
    %cst_96 = arith.constant 9.99999974E-6 : f32
    %182 = vector.broadcast %cst_96 : f32 to vector<36x1xf32>
    %183 = arith.addf %181, %182 : vector<36x1xf32>
    %184 = math.rsqrt %183 : vector<36x1xf32>
    %185 = vector.broadcast %184 : vector<36x1xf32> to vector<36x64xf32>
    %186 = arith.mulf %176, %185 : vector<36x64xf32>
    %187 = vector.broadcast %169 : vector<1x64xf32> to vector<36x64xf32>
    %188 = arith.mulf %186, %187 : vector<36x64xf32>
    %189 = vector.broadcast %170 : vector<1x64xf32> to vector<36x64xf32>
    %190 = arith.addf %188, %189 : vector<36x64xf32>
    %c0_97 = arith.constant 0 : index
    %c0_98 = arith.constant 0 : index
    %c0_99 = arith.constant 0 : index
    %191 = vector.load %arg17[%c0_97, %c0_98, %c0_99] : memref<1x36x64xf32, #tpu.memory_space<vmem>>, vector<1x36x64xf32>
    %192 = vector.shape_cast %191 : vector<1x36x64xf32> to vector<36x64xf32>
    %193 = vector.shape_cast %190 : vector<36x64xf32> to vector<1x36x64xf32>
    tpu.vector_store %arg17[%c0_97, %c0_98, %c0_99], %193 {strides = array<i32>} : memref<1x36x64xf32, #tpu.memory_space<vmem>>, vector<1x36x64xf32>,
    return
  }
  func.func @transform_0(%arg0: i32) -> (i32, i32, i32) {
    %c0_i32 = arith.constant 0 : i32
    %c0_i32_0 = arith.constant 0 : i32
    %c0_i32_1 = arith.constant 0 : i32
    return %arg0, %c0_i32, %c0_i32_0 : i32, i32, i32
  }
  func.func @transform_1(%arg0: i32) -> (i32, i32) {
    %c0_i32 = arith.constant 0 : i32
    %c0_i32_0 = arith.constant 0 : i32
    %c0_i32_1 = arith.constant 0 : i32
    return %c0_i32, %c0_i32_0 : i32, i32
  }
  func.func @transform_2(%arg0: i32) -> (i32, i32) {
    %c0_i32 = arith.constant 0 : i32
    %c0_i32_0 = arith.constant 0 : i32
    %c0_i32_1 = arith.constant 0 : i32
    return %c0_i32, %c0_i32_0 : i32, i32
  }
  func.func @transform_3(%arg0: i32) -> (i32, i32, i32) {
    %c0_i32 = arith.constant 0 : i32
    %c0_i32_0 = arith.constant 0 : i32
    %c0_i32_1 = arith.constant 0 : i32
    %c0_i32_2 = arith.constant 0 : i32
    return %c0_i32, %c0_i32_0, %c0_i32_1 : i32, i32, i32
  }
  func.func @transform_4(%arg0: i32) -> (i32, i32, i32) {
    %c0_i32 = arith.constant 0 : i32
    %c0_i32_0 = arith.constant 0 : i32
    %c0_i32_1 = arith.constant 0 : i32
    %c0_i32_2 = arith.constant 0 : i32
    return %c0_i32, %c0_i32_0, %c0_i32_1 : i32, i32, i32
  }
  func.func @transform_5(%arg0: i32) -> (i32, i32, i32) {
    %c0_i32 = arith.constant 0 : i32
    %c0_i32_0 = arith.constant 0 : i32
    %c0_i32_1 = arith.constant 0 : i32
    %c0_i32_2 = arith.constant 0 : i32
    return %c0_i32, %c0_i32_0, %c0_i32_1 : i32, i32, i32
  }
  func.func @transform_6(%arg0: i32) -> (i32, i32, i32) {
    %c0_i32 = arith.constant 0 : i32
    %c0_i32_0 = arith.constant 0 : i32
    %c0_i32_1 = arith.constant 0 : i32
    %c0_i32_2 = arith.constant 0 : i32
    return %c0_i32, %c0_i32_0, %c0_i32_1 : i32, i32, i32
  }
  func.func @transform_7(%arg0: i32) -> (i32, i32) {
    %c0_i32 = arith.constant 0 : i32
    %c0_i32_0 = arith.constant 0 : i32
    %c0_i32_1 = arith.constant 0 : i32
    return %c0_i32, %c0_i32_0 : i32, i32
  }
  func.func @transform_8(%arg0: i32) -> (i32, i32) {
    %c0_i32 = arith.constant 0 : i32
    %c0_i32_0 = arith.constant 0 : i32
    %c0_i32_1 = arith.constant 0 : i32
    return %c0_i32, %c0_i32_0 : i32, i32
  }
  func.func @transform_9(%arg0: i32) -> (i32, i32) {
    %c0_i32 = arith.constant 0 : i32
    %c0_i32_0 = arith.constant 0 : i32
    %c0_i32_1 = arith.constant 0 : i32
    return %c0_i32, %c0_i32_0 : i32, i32
  }
  func.func @transform_10(%arg0: i32) -> (i32, i32) {
    %c0_i32 = arith.constant 0 : i32
    %c0_i32_0 = arith.constant 0 : i32
    %c0_i32_1 = arith.constant 0 : i32
    return %c0_i32, %c0_i32_0 : i32, i32
  }
  func.func @transform_11(%arg0: i32) -> (i32, i32) {
    %c0_i32 = arith.constant 0 : i32
    %c0_i32_0 = arith.constant 0 : i32
    %c0_i32_1 = arith.constant 0 : i32
    return %c0_i32, %c0_i32_0 : i32, i32
  }
  func.func @transform_12(%arg0: i32) -> (i32, i32) {
    %c0_i32 = arith.constant 0 : i32
    %c0_i32_0 = arith.constant 0 : i32
    %c0_i32_1 = arith.constant 0 : i32
    return %c0_i32, %c0_i32_0 : i32, i32
  }
  func.func @transform_13(%arg0: i32) -> (i32, i32) {
    %c0_i32 = arith.constant 0 : i32
    %c0_i32_0 = arith.constant 0 : i32
    %c0_i32_1 = arith.constant 0 : i32
    return %c0_i32, %c0_i32_0 : i32, i32
  }
  func.func @transform_14(%arg0: i32) -> (i32, i32) {
    %c0_i32 = arith.constant 0 : i32
    %c0_i32_0 = arith.constant 0 : i32
    %c0_i32_1 = arith.constant 0 : i32
    return %c0_i32, %c0_i32_0 : i32, i32
  }
  func.func @transform_15(%arg0: i32) -> (i32, i32) {
    %c0_i32 = arith.constant 0 : i32
    %c0_i32_0 = arith.constant 0 : i32
    %c0_i32_1 = arith.constant 0 : i32
    return %c0_i32, %c0_i32_0 : i32, i32
  }
  func.func @transform_16(%arg0: i32) -> (i32, i32, i32) {
    %c0_i32 = arith.constant 0 : i32
    %c0_i32_0 = arith.constant 0 : i32
    %c0_i32_1 = arith.constant 0 : i32
    return %arg0, %c0_i32, %c0_i32_0 : i32, i32, i32
  }
}

module attributes {stable_mosaic.version = 11 : i64} {
  func.func @_embed_kernel(%arg0: i32, %arg1: memref<1x16x144xf32, #tpu.memory_space<vmem>>, %arg2: memref<144x144xbf16, #tpu.memory_space<vmem>>, %arg3: memref<1x144xf32, #tpu.memory_space<vmem>>, %arg4: memref<16x144xf32, #tpu.memory_space<vmem>>, %arg5: memref<1x16x144xf32, #tpu.memory_space<vmem>>) attributes {dimension_semantics = [#tpu.dimension_semantics<parallel>], iteration_bounds = array<i64: 2>, scalar_prefetch = 0 : i64, scratch_operands = 0 : i64, tpu.core_type = #tpu.core_type<tc>, window_params = [{transform_indices = @transform_0, window_bounds = array<i64: 1, 16, 144>}, {pipeline_mode = #tpu.pipeline_mode<synchronous>, transform_indices = @transform_1, window_bounds = array<i64: 144, 144>}, {pipeline_mode = #tpu.pipeline_mode<synchronous>, transform_indices = @transform_2, window_bounds = array<i64: 1, 144>}, {pipeline_mode = #tpu.pipeline_mode<synchronous>, transform_indices = @transform_3, window_bounds = array<i64: 16, 144>}, {transform_indices = @transform_4, window_bounds = array<i64: 1, 16, 144>}]} {
    %c0 = arith.constant 0 : index
    %c0_0 = arith.constant 0 : index
    %c0_1 = arith.constant 0 : index
    %0 = vector.load %arg1[%c0, %c0_0, %c0_1] : memref<1x16x144xf32, #tpu.memory_space<vmem>>, vector<1x16x144xf32>
    %1 = vector.shape_cast %0 : vector<1x16x144xf32> to vector<16x144xf32>
    %2 = arith.truncf %1 : vector<16x144xf32> to vector<16x144xbf16>
    %c0_2 = arith.constant 0 : index
    %c0_3 = arith.constant 0 : index
    %3 = vector.load %arg2[%c0_2, %c0_3] : memref<144x144xbf16, #tpu.memory_space<vmem>>, vector<144x144xbf16>
    %cst = arith.constant dense<0.000000e+00> : vector<16x144xf32>
    %4 = tpu.matmul %2, %3, %cst {dimension_numbers = #tpu.dot_dimension_numbers<[1], [0], [0], [1], [0, 0, 1, 1], [], []>} : vector<16x144xbf16>, vector<144x144xbf16>, vector<16x144xf32> -> vector<16x144xf32>
    %c0_4 = arith.constant 0 : index
    %c0_5 = arith.constant 0 : index
    %5 = vector.load %arg3[%c0_4, %c0_5] : memref<1x144xf32, #tpu.memory_space<vmem>>, vector<1x144xf32>
    %6 = vector.broadcast %5 : vector<1x144xf32> to vector<16x144xf32>
    %7 = arith.addf %4, %6 : vector<16x144xf32>
    %c0_6 = arith.constant 0 : index
    %c0_7 = arith.constant 0 : index
    %8 = vector.load %arg4[%c0_6, %c0_7] : memref<16x144xf32, #tpu.memory_space<vmem>>, vector<16x144xf32>
    %9 = arith.addf %7, %8 : vector<16x144xf32>
    %c0_8 = arith.constant 0 : index
    %c0_9 = arith.constant 0 : index
    %c0_10 = arith.constant 0 : index
    %10 = vector.load %arg5[%c0_8, %c0_9, %c0_10] : memref<1x16x144xf32, #tpu.memory_space<vmem>>, vector<1x16x144xf32>
    %11 = vector.shape_cast %10 : vector<1x16x144xf32> to vector<16x144xf32>
    %12 = vector.shape_cast %9 : vector<16x144xf32> to vector<1x16x144xf32>
    tpu.vector_store %arg5[%c0_8, %c0_9, %c0_10], %12 {strides = array<i32>} : memref<1x16x144xf32, #tpu.memory_space<vmem>>, vector<1x16x144xf32>,
    return
  }
  func.func @transform_0(%arg0: i32) -> (i32, i32, i32) {
    %c0_i32 = arith.constant 0 : i32
    %c0_i32_0 = arith.constant 0 : i32
    %c0_i32_1 = arith.constant 0 : i32
    return %arg0, %c0_i32, %c0_i32_0 : i32, i32, i32
  }
  func.func @transform_1(%arg0: i32) -> (i32, i32) {
    %c0_i32 = arith.constant 0 : i32
    %c0_i32_0 = arith.constant 0 : i32
    %c0_i32_1 = arith.constant 0 : i32
    return %c0_i32, %c0_i32_0 : i32, i32
  }
  func.func @transform_2(%arg0: i32) -> (i32, i32) {
    %c0_i32 = arith.constant 0 : i32
    %c0_i32_0 = arith.constant 0 : i32
    %c0_i32_1 = arith.constant 0 : i32
    return %c0_i32, %c0_i32_0 : i32, i32
  }
  func.func @transform_3(%arg0: i32) -> (i32, i32) {
    %c0_i32 = arith.constant 0 : i32
    %c0_i32_0 = arith.constant 0 : i32
    %c0_i32_1 = arith.constant 0 : i32
    return %c0_i32, %c0_i32_0 : i32, i32
  }
  func.func @transform_4(%arg0: i32) -> (i32, i32, i32) {
    %c0_i32 = arith.constant 0 : i32
    %c0_i32_0 = arith.constant 0 : i32
    %c0_i32_1 = arith.constant 0 : i32
    return %arg0, %c0_i32, %c0_i32_0 : i32, i32, i32
  }
}

module attributes {stable_mosaic.version = 11 : i64} {
  func.func @_enc_layer_kernel(%arg0: i32, %arg1: memref<1x16x144xf32, #tpu.memory_space<vmem>>, %arg2: memref<1x144xf32, #tpu.memory_space<vmem>>, %arg3: memref<1x144xf32, #tpu.memory_space<vmem>>, %arg4: memref<2x144x16xbf16, #tpu.memory_space<vmem>>, %arg5: memref<2x144x16xbf16, #tpu.memory_space<vmem>>, %arg6: memref<2x144x16xbf16, #tpu.memory_space<vmem>>, %arg7: memref<2x16x144xbf16, #tpu.memory_space<vmem>>, %arg8: memref<1x144xf32, #tpu.memory_space<vmem>>, %arg9: memref<1x144xf32, #tpu.memory_space<vmem>>, %arg10: memref<1x144xf32, #tpu.memory_space<vmem>>, %arg11: memref<144x128xbf16, #tpu.memory_space<vmem>>, %arg12: memref<1x128xf32, #tpu.memory_space<vmem>>, %arg13: memref<128x144xbf16, #tpu.memory_space<vmem>>, %arg14: memref<1x144xf32, #tpu.memory_space<vmem>>, %arg15: memref<1x144xf32, #tpu.memory_space<vmem>>, %arg16: memref<1x144xf32, #tpu.memory_space<vmem>>, %arg17: memref<1x16x144xf32, #tpu.memory_space<vmem>>) attributes {dimension_semantics = [#tpu.dimension_semantics<parallel>], iteration_bounds = array<i64: 2>, scalar_prefetch = 0 : i64, scratch_operands = 0 : i64, tpu.core_type = #tpu.core_type<tc>, window_params = [{transform_indices = @transform_0, window_bounds = array<i64: 1, 16, 144>}, {pipeline_mode = #tpu.pipeline_mode<synchronous>, transform_indices = @transform_1, window_bounds = array<i64: 1, 144>}, {pipeline_mode = #tpu.pipeline_mode<synchronous>, transform_indices = @transform_2, window_bounds = array<i64: 1, 144>}, {pipeline_mode = #tpu.pipeline_mode<synchronous>, transform_indices = @transform_3, window_bounds = array<i64: 2, 144, 16>}, {pipeline_mode = #tpu.pipeline_mode<synchronous>, transform_indices = @transform_4, window_bounds = array<i64: 2, 144, 16>}, {pipeline_mode = #tpu.pipeline_mode<synchronous>, transform_indices = @transform_5, window_bounds = array<i64: 2, 144, 16>}, {pipeline_mode = #tpu.pipeline_mode<synchronous>, transform_indices = @transform_6, window_bounds = array<i64: 2, 16, 144>}, {pipeline_mode = #tpu.pipeline_mode<synchronous>, transform_indices = @transform_7, window_bounds = array<i64: 1, 144>}, {pipeline_mode = #tpu.pipeline_mode<synchronous>, transform_indices = @transform_8, window_bounds = array<i64: 1, 144>}, {pipeline_mode = #tpu.pipeline_mode<synchronous>, transform_indices = @transform_9, window_bounds = array<i64: 1, 144>}, {pipeline_mode = #tpu.pipeline_mode<synchronous>, transform_indices = @transform_10, window_bounds = array<i64: 144, 128>}, {pipeline_mode = #tpu.pipeline_mode<synchronous>, transform_indices = @transform_11, window_bounds = array<i64: 1, 128>}, {pipeline_mode = #tpu.pipeline_mode<synchronous>, transform_indices = @transform_12, window_bounds = array<i64: 128, 144>}, {pipeline_mode = #tpu.pipeline_mode<synchronous>, transform_indices = @transform_13, window_bounds = array<i64: 1, 144>}, {pipeline_mode = #tpu.pipeline_mode<synchronous>, transform_indices = @transform_14, window_bounds = array<i64: 1, 144>}, {pipeline_mode = #tpu.pipeline_mode<synchronous>, transform_indices = @transform_15, window_bounds = array<i64: 1, 144>}, {transform_indices = @transform_16, window_bounds = array<i64: 1, 16, 144>}]} {
    %c0 = arith.constant 0 : index
    %c0_0 = arith.constant 0 : index
    %c0_1 = arith.constant 0 : index
    %0 = vector.load %arg1[%c0, %c0_0, %c0_1] : memref<1x16x144xf32, #tpu.memory_space<vmem>>, vector<1x16x144xf32>
    %1 = vector.shape_cast %0 : vector<1x16x144xf32> to vector<16x144xf32>
    %c0_2 = arith.constant 0 : index
    %c0_3 = arith.constant 0 : index
    %2 = vector.load %arg2[%c0_2, %c0_3] : memref<1x144xf32, #tpu.memory_space<vmem>>, vector<1x144xf32>
    %c0_4 = arith.constant 0 : index
    %c0_5 = arith.constant 0 : index
    %3 = vector.load %arg3[%c0_4, %c0_5] : memref<1x144xf32, #tpu.memory_space<vmem>>, vector<1x144xf32>
    %cst = arith.constant dense<0.000000e+00> : vector<16xf32>
    %4 = vector.multi_reduction <add>, %1, %cst [1] : vector<16x144xf32> to vector<16xf32>
    %5 = vector.shape_cast %4 : vector<16xf32> to vector<16x1xf32>
    %cst_6 = arith.constant 1.440000e+02 : f32
    %6 = vector.broadcast %cst_6 : f32 to vector<16x1xf32>
    %7 = arith.divf %5, %6 : vector<16x1xf32>
    %8 = vector.broadcast %7 : vector<16x1xf32> to vector<16x144xf32>
    %9 = arith.subf %1, %8 : vector<16x144xf32>
    %10 = arith.mulf %9, %9 : vector<16x144xf32>
    %cst_7 = arith.constant dense<0.000000e+00> : vector<16xf32>
    %11 = vector.multi_reduction <add>, %10, %cst_7 [1] : vector<16x144xf32> to vector<16xf32>
    %12 = vector.shape_cast %11 : vector<16xf32> to vector<16x1xf32>
    %cst_8 = arith.constant 1.440000e+02 : f32
    %13 = vector.broadcast %cst_8 : f32 to vector<16x1xf32>
    %14 = arith.divf %12, %13 : vector<16x1xf32>
    %cst_9 = arith.constant 9.99999974E-6 : f32
    %15 = vector.broadcast %cst_9 : f32 to vector<16x1xf32>
    %16 = arith.addf %14, %15 : vector<16x1xf32>
    %17 = math.rsqrt %16 : vector<16x1xf32>
    %18 = vector.broadcast %17 : vector<16x1xf32> to vector<16x144xf32>
    %19 = arith.mulf %9, %18 : vector<16x144xf32>
    %20 = vector.broadcast %2 : vector<1x144xf32> to vector<16x144xf32>
    %21 = arith.mulf %19, %20 : vector<16x144xf32>
    %22 = vector.broadcast %3 : vector<1x144xf32> to vector<16x144xf32>
    %23 = arith.addf %21, %22 : vector<16x144xf32>
    %24 = arith.truncf %23 : vector<16x144xf32> to vector<16x144xbf16>
    %cst_10 = arith.constant 0.000000e+00 : f32
    %25 = vector.broadcast %cst_10 : f32 to vector<16x144xf32>
    %c0_11 = arith.constant 0 : index
    %c0_12 = arith.constant 0 : index
    %c0_13 = arith.constant 0 : index
    %26 = vector.load %arg4[%c0_11, %c0_12, %c0_13] : memref<2x144x16xbf16, #tpu.memory_space<vmem>>, vector<1x144x16xbf16>
    %27 = vector.shape_cast %26 : vector<1x144x16xbf16> to vector<144x16xbf16>
    %cst_14 = arith.constant dense<0.000000e+00> : vector<16x16xf32>
    %28 = tpu.matmul %24, %27, %cst_14 {dimension_numbers = #tpu.dot_dimension_numbers<[1], [0], [0], [1], [0, 0, 1, 1], [], []>} : vector<16x144xbf16>, vector<144x16xbf16>, vector<16x16xf32> -> vector<16x16xf32>
    %cst_15 = arith.constant 2.500000e-01 : f32
    %29 = vector.broadcast %cst_15 : f32 to vector<16x16xf32>
    %30 = arith.mulf %28, %29 : vector<16x16xf32>
    %c0_16 = arith.constant 0 : index
    %c0_17 = arith.constant 0 : index
    %c0_18 = arith.constant 0 : index
    %31 = vector.load %arg5[%c0_16, %c0_17, %c0_18] : memref<2x144x16xbf16, #tpu.memory_space<vmem>>, vector<1x144x16xbf16>
    %32 = vector.shape_cast %31 : vector<1x144x16xbf16> to vector<144x16xbf16>
    %cst_19 = arith.constant dense<0.000000e+00> : vector<16x16xf32>
    %33 = tpu.matmul %24, %32, %cst_19 {dimension_numbers = #tpu.dot_dimension_numbers<[1], [0], [0], [1], [0, 0, 1, 1], [], []>} : vector<16x144xbf16>, vector<144x16xbf16>, vector<16x16xf32> -> vector<16x16xf32>
    %c0_20 = arith.constant 0 : index
    %c0_21 = arith.constant 0 : index
    %c0_22 = arith.constant 0 : index
    %34 = vector.load %arg6[%c0_20, %c0_21, %c0_22] : memref<2x144x16xbf16, #tpu.memory_space<vmem>>, vector<1x144x16xbf16>
    %35 = vector.shape_cast %34 : vector<1x144x16xbf16> to vector<144x16xbf16>
    %cst_23 = arith.constant dense<0.000000e+00> : vector<16x16xf32>
    %36 = tpu.matmul %24, %35, %cst_23 {dimension_numbers = #tpu.dot_dimension_numbers<[1], [0], [0], [1], [0, 0, 1, 1], [], []>} : vector<16x144xbf16>, vector<144x16xbf16>, vector<16x16xf32> -> vector<16x16xf32>
    %37 = arith.truncf %30 : vector<16x16xf32> to vector<16x16xbf16>
    %38 = arith.truncf %33 : vector<16x16xf32> to vector<16x16xbf16>
    %cst_24 = arith.constant dense<0.000000e+00> : vector<16x16xf32>
    %39 = tpu.matmul %37, %38, %cst_24 {dimension_numbers = #tpu.dot_dimension_numbers<[1], [1], [0], [0], [0, 0, 1, 0], [], []>} : vector<16x16xbf16>, vector<16x16xbf16>, vector<16x16xf32> -> vector<16x16xf32>
    %cst_25 = arith.constant dense<0xFF800000> : vector<16xf32>
    %40 = vector.multi_reduction <maximumf>, %39, %cst_25 [1] : vector<16x16xf32> to vector<16xf32>
    %41 = vector.shape_cast %40 : vector<16xf32> to vector<16x1xf32>
    %42 = vector.broadcast %41 : vector<16x1xf32> to vector<16x16xf32>
    %43 = arith.subf %39, %42 : vector<16x16xf32>
    %44 = math.exp %43 : vector<16x16xf32>
    %cst_26 = arith.constant dense<0.000000e+00> : vector<16xf32>
    %45 = vector.multi_reduction <add>, %44, %cst_26 [1] : vector<16x16xf32> to vector<16xf32>
    %46 = vector.shape_cast %45 : vector<16xf32> to vector<16x1xf32>
    %47 = tpu.reciprocal %46 {approx = true} : vector<16x1xf32> -> vector<16x1xf32>
    %48 = vector.broadcast %47 : vector<16x1xf32> to vector<16x16xf32>
    %49 = arith.mulf %44, %48 : vector<16x16xf32>
    %50 = arith.truncf %49 : vector<16x16xf32> to vector<16x16xbf16>
    %51 = arith.truncf %36 : vector<16x16xf32> to vector<16x16xbf16>
    %cst_27 = arith.constant dense<0.000000e+00> : vector<16x16xf32>
    %52 = tpu.matmul %50, %51, %cst_27 {dimension_numbers = #tpu.dot_dimension_numbers<[1], [0], [0], [1], [0, 0, 1, 1], [], []>} : vector<16x16xbf16>, vector<16x16xbf16>, vector<16x16xf32> -> vector<16x16xf32>
    %53 = arith.truncf %52 : vector<16x16xf32> to vector<16x16xbf16>
    %c0_28 = arith.constant 0 : index
    %c0_29 = arith.constant 0 : index
    %c0_30 = arith.constant 0 : index
    %54 = vector.load %arg7[%c0_28, %c0_29, %c0_30] : memref<2x16x144xbf16, #tpu.memory_space<vmem>>, vector<1x16x144xbf16>
    %55 = vector.shape_cast %54 : vector<1x16x144xbf16> to vector<16x144xbf16>
    %cst_31 = arith.constant dense<0.000000e+00> : vector<16x144xf32>
    %56 = tpu.matmul %53, %55, %cst_31 {dimension_numbers = #tpu.dot_dimension_numbers<[1], [0], [0], [1], [0, 0, 1, 1], [], []>} : vector<16x16xbf16>, vector<16x144xbf16>, vector<16x144xf32> -> vector<16x144xf32>
    %57 = arith.addf %25, %56 : vector<16x144xf32>
    %c1 = arith.constant 1 : index
    %c0_32 = arith.constant 0 : index
    %c0_33 = arith.constant 0 : index
    %58 = vector.load %arg4[%c1, %c0_32, %c0_33] : memref<2x144x16xbf16, #tpu.memory_space<vmem>>, vector<1x144x16xbf16>
    %59 = vector.shape_cast %58 : vector<1x144x16xbf16> to vector<144x16xbf16>
    %cst_34 = arith.constant dense<0.000000e+00> : vector<16x16xf32>
    %60 = tpu.matmul %24, %59, %cst_34 {dimension_numbers = #tpu.dot_dimension_numbers<[1], [0], [0], [1], [0, 0, 1, 1], [], []>} : vector<16x144xbf16>, vector<144x16xbf16>, vector<16x16xf32> -> vector<16x16xf32>
    %cst_35 = arith.constant 2.500000e-01 : f32
    %61 = vector.broadcast %cst_35 : f32 to vector<16x16xf32>
    %62 = arith.mulf %60, %61 : vector<16x16xf32>
    %c1_36 = arith.constant 1 : index
    %c0_37 = arith.constant 0 : index
    %c0_38 = arith.constant 0 : index
    %63 = vector.load %arg5[%c1_36, %c0_37, %c0_38] : memref<2x144x16xbf16, #tpu.memory_space<vmem>>, vector<1x144x16xbf16>
    %64 = vector.shape_cast %63 : vector<1x144x16xbf16> to vector<144x16xbf16>
    %cst_39 = arith.constant dense<0.000000e+00> : vector<16x16xf32>
    %65 = tpu.matmul %24, %64, %cst_39 {dimension_numbers = #tpu.dot_dimension_numbers<[1], [0], [0], [1], [0, 0, 1, 1], [], []>} : vector<16x144xbf16>, vector<144x16xbf16>, vector<16x16xf32> -> vector<16x16xf32>
    %c1_40 = arith.constant 1 : index
    %c0_41 = arith.constant 0 : index
    %c0_42 = arith.constant 0 : index
    %66 = vector.load %arg6[%c1_40, %c0_41, %c0_42] : memref<2x144x16xbf16, #tpu.memory_space<vmem>>, vector<1x144x16xbf16>
    %67 = vector.shape_cast %66 : vector<1x144x16xbf16> to vector<144x16xbf16>
    %cst_43 = arith.constant dense<0.000000e+00> : vector<16x16xf32>
    %68 = tpu.matmul %24, %67, %cst_43 {dimension_numbers = #tpu.dot_dimension_numbers<[1], [0], [0], [1], [0, 0, 1, 1], [], []>} : vector<16x144xbf16>, vector<144x16xbf16>, vector<16x16xf32> -> vector<16x16xf32>
    %69 = arith.truncf %62 : vector<16x16xf32> to vector<16x16xbf16>
    %70 = arith.truncf %65 : vector<16x16xf32> to vector<16x16xbf16>
    %cst_44 = arith.constant dense<0.000000e+00> : vector<16x16xf32>
    %71 = tpu.matmul %69, %70, %cst_44 {dimension_numbers = #tpu.dot_dimension_numbers<[1], [1], [0], [0], [0, 0, 1, 0], [], []>} : vector<16x16xbf16>, vector<16x16xbf16>, vector<16x16xf32> -> vector<16x16xf32>
    %cst_45 = arith.constant dense<0xFF800000> : vector<16xf32>
    %72 = vector.multi_reduction <maximumf>, %71, %cst_45 [1] : vector<16x16xf32> to vector<16xf32>
    %73 = vector.shape_cast %72 : vector<16xf32> to vector<16x1xf32>
    %74 = vector.broadcast %73 : vector<16x1xf32> to vector<16x16xf32>
    %75 = arith.subf %71, %74 : vector<16x16xf32>
    %76 = math.exp %75 : vector<16x16xf32>
    %cst_46 = arith.constant dense<0.000000e+00> : vector<16xf32>
    %77 = vector.multi_reduction <add>, %76, %cst_46 [1] : vector<16x16xf32> to vector<16xf32>
    %78 = vector.shape_cast %77 : vector<16xf32> to vector<16x1xf32>
    %79 = tpu.reciprocal %78 {approx = true} : vector<16x1xf32> -> vector<16x1xf32>
    %80 = vector.broadcast %79 : vector<16x1xf32> to vector<16x16xf32>
    %81 = arith.mulf %76, %80 : vector<16x16xf32>
    %82 = arith.truncf %81 : vector<16x16xf32> to vector<16x16xbf16>
    %83 = arith.truncf %68 : vector<16x16xf32> to vector<16x16xbf16>
    %cst_47 = arith.constant dense<0.000000e+00> : vector<16x16xf32>
    %84 = tpu.matmul %82, %83, %cst_47 {dimension_numbers = #tpu.dot_dimension_numbers<[1], [0], [0], [1], [0, 0, 1, 1], [], []>} : vector<16x16xbf16>, vector<16x16xbf16>, vector<16x16xf32> -> vector<16x16xf32>
    %85 = arith.truncf %84 : vector<16x16xf32> to vector<16x16xbf16>
    %c1_48 = arith.constant 1 : index
    %c0_49 = arith.constant 0 : index
    %c0_50 = arith.constant 0 : index
    %86 = vector.load %arg7[%c1_48, %c0_49, %c0_50] : memref<2x16x144xbf16, #tpu.memory_space<vmem>>, vector<1x16x144xbf16>
    %87 = vector.shape_cast %86 : vector<1x16x144xbf16> to vector<16x144xbf16>
    %cst_51 = arith.constant dense<0.000000e+00> : vector<16x144xf32>
    %88 = tpu.matmul %85, %87, %cst_51 {dimension_numbers = #tpu.dot_dimension_numbers<[1], [0], [0], [1], [0, 0, 1, 1], [], []>} : vector<16x16xbf16>, vector<16x144xbf16>, vector<16x144xf32> -> vector<16x144xf32>
    %89 = arith.addf %57, %88 : vector<16x144xf32>
    %90 = arith.addf %1, %89 : vector<16x144xf32>
    %c0_52 = arith.constant 0 : index
    %c0_53 = arith.constant 0 : index
    %91 = vector.load %arg8[%c0_52, %c0_53] : memref<1x144xf32, #tpu.memory_space<vmem>>, vector<1x144xf32>
    %92 = vector.broadcast %91 : vector<1x144xf32> to vector<16x144xf32>
    %93 = arith.addf %90, %92 : vector<16x144xf32>
    %c0_54 = arith.constant 0 : index
    %c0_55 = arith.constant 0 : index
    %94 = vector.load %arg9[%c0_54, %c0_55] : memref<1x144xf32, #tpu.memory_space<vmem>>, vector<1x144xf32>
    %c0_56 = arith.constant 0 : index
    %c0_57 = arith.constant 0 : index
    %95 = vector.load %arg10[%c0_56, %c0_57] : memref<1x144xf32, #tpu.memory_space<vmem>>, vector<1x144xf32>
    %cst_58 = arith.constant dense<0.000000e+00> : vector<16xf32>
    %96 = vector.multi_reduction <add>, %93, %cst_58 [1] : vector<16x144xf32> to vector<16xf32>
    %97 = vector.shape_cast %96 : vector<16xf32> to vector<16x1xf32>
    %cst_59 = arith.constant 1.440000e+02 : f32
    %98 = vector.broadcast %cst_59 : f32 to vector<16x1xf32>
    %99 = arith.divf %97, %98 : vector<16x1xf32>
    %100 = vector.broadcast %99 : vector<16x1xf32> to vector<16x144xf32>
    %101 = arith.subf %93, %100 : vector<16x144xf32>
    %102 = arith.mulf %101, %101 : vector<16x144xf32>
    %cst_60 = arith.constant dense<0.000000e+00> : vector<16xf32>
    %103 = vector.multi_reduction <add>, %102, %cst_60 [1] : vector<16x144xf32> to vector<16xf32>
    %104 = vector.shape_cast %103 : vector<16xf32> to vector<16x1xf32>
    %cst_61 = arith.constant 1.440000e+02 : f32
    %105 = vector.broadcast %cst_61 : f32 to vector<16x1xf32>
    %106 = arith.divf %104, %105 : vector<16x1xf32>
    %cst_62 = arith.constant 9.99999974E-6 : f32
    %107 = vector.broadcast %cst_62 : f32 to vector<16x1xf32>
    %108 = arith.addf %106, %107 : vector<16x1xf32>
    %109 = math.rsqrt %108 : vector<16x1xf32>
    %110 = vector.broadcast %109 : vector<16x1xf32> to vector<16x144xf32>
    %111 = arith.mulf %101, %110 : vector<16x144xf32>
    %112 = vector.broadcast %94 : vector<1x144xf32> to vector<16x144xf32>
    %113 = arith.mulf %111, %112 : vector<16x144xf32>
    %114 = vector.broadcast %95 : vector<1x144xf32> to vector<16x144xf32>
    %115 = arith.addf %113, %114 : vector<16x144xf32>
    %116 = arith.truncf %115 : vector<16x144xf32> to vector<16x144xbf16>
    %c0_63 = arith.constant 0 : index
    %c0_64 = arith.constant 0 : index
    %117 = vector.load %arg11[%c0_63, %c0_64] : memref<144x128xbf16, #tpu.memory_space<vmem>>, vector<144x128xbf16>
    %cst_65 = arith.constant dense<0.000000e+00> : vector<16x128xf32>
    %118 = tpu.matmul %116, %117, %cst_65 {dimension_numbers = #tpu.dot_dimension_numbers<[1], [0], [0], [1], [0, 0, 1, 1], [], []>} : vector<16x144xbf16>, vector<144x128xbf16>, vector<16x128xf32> -> vector<16x128xf32>
    %c0_66 = arith.constant 0 : index
    %c0_67 = arith.constant 0 : index
    %119 = vector.load %arg12[%c0_66, %c0_67] : memref<1x128xf32, #tpu.memory_space<vmem>>, vector<1x128xf32>
    %120 = vector.broadcast %119 : vector<1x128xf32> to vector<16x128xf32>
    %121 = arith.addf %118, %120 : vector<16x128xf32>
    %cst_68 = arith.constant 0.707106769 : f32
    %122 = vector.broadcast %cst_68 : f32 to vector<16x128xf32>
    %123 = arith.mulf %121, %122 : vector<16x128xf32>
    %124 = math.absf %123 : vector<16x128xf32>
    %cst_69 = arith.constant 0.327591091 : f32
    %125 = vector.broadcast %cst_69 : f32 to vector<16x128xf32>
    %126 = arith.mulf %125, %124 : vector<16x128xf32>
    %cst_70 = arith.constant 1.000000e+00 : f32
    %127 = vector.broadcast %cst_70 : f32 to vector<16x128xf32>
    %128 = arith.addf %127, %126 : vector<16x128xf32>
    %cst_71 = arith.constant 1.000000e+00 : f32
    %129 = vector.broadcast %cst_71 : f32 to vector<16x128xf32>
    %130 = arith.divf %129, %128 : vector<16x128xf32>
    %cst_72 = arith.constant 1.06140542 : f32
    %131 = vector.broadcast %cst_72 : f32 to vector<16x128xf32>
    %132 = arith.mulf %130, %131 : vector<16x128xf32>
    %cst_73 = arith.constant -1.45315206 : f32
    %133 = vector.broadcast %cst_73 : f32 to vector<16x128xf32>
    %134 = arith.addf %133, %132 : vector<16x128xf32>
    %135 = arith.mulf %130, %134 : vector<16x128xf32>
    %cst_74 = arith.constant 1.42141378 : f32
    %136 = vector.broadcast %cst_74 : f32 to vector<16x128xf32>
    %137 = arith.addf %136, %135 : vector<16x128xf32>
    %138 = arith.mulf %130, %137 : vector<16x128xf32>
    %cst_75 = arith.constant -0.284496725 : f32
    %139 = vector.broadcast %cst_75 : f32 to vector<16x128xf32>
    %140 = arith.addf %139, %138 : vector<16x128xf32>
    %141 = arith.mulf %130, %140 : vector<16x128xf32>
    %cst_76 = arith.constant 0.254829586 : f32
    %142 = vector.broadcast %cst_76 : f32 to vector<16x128xf32>
    %143 = arith.addf %142, %141 : vector<16x128xf32>
    %144 = arith.mulf %130, %143 : vector<16x128xf32>
    %cst_77 = arith.constant 0.000000e+00 : f32
    %145 = vector.broadcast %cst_77 : f32 to vector<16x128xf32>
    %146 = arith.subf %145, %124 : vector<16x128xf32>
    %147 = arith.mulf %146, %124 : vector<16x128xf32>
    %148 = math.exp %147 : vector<16x128xf32>
    %149 = arith.mulf %144, %148 : vector<16x128xf32>
    %cst_78 = arith.constant 1.000000e+00 : f32
    %150 = vector.broadcast %cst_78 : f32 to vector<16x128xf32>
    %151 = arith.subf %150, %149 : vector<16x128xf32>
    %cst_79 = arith.constant 0.000000e+00 : f32
    %152 = vector.broadcast %cst_79 : f32 to vector<16x128xf32>
    %153 = arith.cmpf oge, %123, %152 : vector<16x128xf32>
    %cst_80 = arith.constant 0.000000e+00 : f32
    %154 = vector.broadcast %cst_80 : f32 to vector<16x128xf32>
    %155 = arith.subf %154, %151 : vector<16x128xf32>
    %156 = arith.select %153, %151, %155 : vector<16x128xi1>, vector<16x128xf32>
    %cst_81 = arith.constant 5.000000e-01 : f32
    %157 = vector.broadcast %cst_81 : f32 to vector<16x128xf32>
    %158 = arith.mulf %157, %121 : vector<16x128xf32>
    %cst_82 = arith.constant 1.000000e+00 : f32
    %159 = vector.broadcast %cst_82 : f32 to vector<16x128xf32>
    %160 = arith.addf %159, %156 : vector<16x128xf32>
    %161 = arith.mulf %158, %160 : vector<16x128xf32>
    %162 = arith.truncf %161 : vector<16x128xf32> to vector<16x128xbf16>
    %c0_83 = arith.constant 0 : index
    %c0_84 = arith.constant 0 : index
    %163 = vector.load %arg13[%c0_83, %c0_84] : memref<128x144xbf16, #tpu.memory_space<vmem>>, vector<128x144xbf16>
    %cst_85 = arith.constant dense<0.000000e+00> : vector<16x144xf32>
    %164 = tpu.matmul %162, %163, %cst_85 {dimension_numbers = #tpu.dot_dimension_numbers<[1], [0], [0], [1], [0, 0, 1, 1], [], []>} : vector<16x128xbf16>, vector<128x144xbf16>, vector<16x144xf32> -> vector<16x144xf32>
    %c0_86 = arith.constant 0 : index
    %c0_87 = arith.constant 0 : index
    %165 = vector.load %arg14[%c0_86, %c0_87] : memref<1x144xf32, #tpu.memory_space<vmem>>, vector<1x144xf32>
    %166 = vector.broadcast %165 : vector<1x144xf32> to vector<16x144xf32>
    %167 = arith.addf %164, %166 : vector<16x144xf32>
    %168 = arith.addf %93, %167 : vector<16x144xf32>
    %c0_88 = arith.constant 0 : index
    %c0_89 = arith.constant 0 : index
    %169 = vector.load %arg15[%c0_88, %c0_89] : memref<1x144xf32, #tpu.memory_space<vmem>>, vector<1x144xf32>
    %c0_90 = arith.constant 0 : index
    %c0_91 = arith.constant 0 : index
    %170 = vector.load %arg16[%c0_90, %c0_91] : memref<1x144xf32, #tpu.memory_space<vmem>>, vector<1x144xf32>
    %cst_92 = arith.constant dense<0.000000e+00> : vector<16xf32>
    %171 = vector.multi_reduction <add>, %168, %cst_92 [1] : vector<16x144xf32> to vector<16xf32>
    %172 = vector.shape_cast %171 : vector<16xf32> to vector<16x1xf32>
    %cst_93 = arith.constant 1.440000e+02 : f32
    %173 = vector.broadcast %cst_93 : f32 to vector<16x1xf32>
    %174 = arith.divf %172, %173 : vector<16x1xf32>
    %175 = vector.broadcast %174 : vector<16x1xf32> to vector<16x144xf32>
    %176 = arith.subf %168, %175 : vector<16x144xf32>
    %177 = arith.mulf %176, %176 : vector<16x144xf32>
    %cst_94 = arith.constant dense<0.000000e+00> : vector<16xf32>
    %178 = vector.multi_reduction <add>, %177, %cst_94 [1] : vector<16x144xf32> to vector<16xf32>
    %179 = vector.shape_cast %178 : vector<16xf32> to vector<16x1xf32>
    %cst_95 = arith.constant 1.440000e+02 : f32
    %180 = vector.broadcast %cst_95 : f32 to vector<16x1xf32>
    %181 = arith.divf %179, %180 : vector<16x1xf32>
    %cst_96 = arith.constant 9.99999974E-6 : f32
    %182 = vector.broadcast %cst_96 : f32 to vector<16x1xf32>
    %183 = arith.addf %181, %182 : vector<16x1xf32>
    %184 = math.rsqrt %183 : vector<16x1xf32>
    %185 = vector.broadcast %184 : vector<16x1xf32> to vector<16x144xf32>
    %186 = arith.mulf %176, %185 : vector<16x144xf32>
    %187 = vector.broadcast %169 : vector<1x144xf32> to vector<16x144xf32>
    %188 = arith.mulf %186, %187 : vector<16x144xf32>
    %189 = vector.broadcast %170 : vector<1x144xf32> to vector<16x144xf32>
    %190 = arith.addf %188, %189 : vector<16x144xf32>
    %c0_97 = arith.constant 0 : index
    %c0_98 = arith.constant 0 : index
    %c0_99 = arith.constant 0 : index
    %191 = vector.load %arg17[%c0_97, %c0_98, %c0_99] : memref<1x16x144xf32, #tpu.memory_space<vmem>>, vector<1x16x144xf32>
    %192 = vector.shape_cast %191 : vector<1x16x144xf32> to vector<16x144xf32>
    %193 = vector.shape_cast %190 : vector<16x144xf32> to vector<1x16x144xf32>
    tpu.vector_store %arg17[%c0_97, %c0_98, %c0_99], %193 {strides = array<i32>} : memref<1x16x144xf32, #tpu.memory_space<vmem>>, vector<1x16x144xf32>,
    return
  }
  func.func @transform_0(%arg0: i32) -> (i32, i32, i32) {
    %c0_i32 = arith.constant 0 : i32
    %c0_i32_0 = arith.constant 0 : i32
    %c0_i32_1 = arith.constant 0 : i32
    return %arg0, %c0_i32, %c0_i32_0 : i32, i32, i32
  }
  func.func @transform_1(%arg0: i32) -> (i32, i32) {
    %c0_i32 = arith.constant 0 : i32
    %c0_i32_0 = arith.constant 0 : i32
    %c0_i32_1 = arith.constant 0 : i32
    return %c0_i32, %c0_i32_0 : i32, i32
  }
  func.func @transform_2(%arg0: i32) -> (i32, i32) {
    %c0_i32 = arith.constant 0 : i32
    %c0_i32_0 = arith.constant 0 : i32
    %c0_i32_1 = arith.constant 0 : i32
    return %c0_i32, %c0_i32_0 : i32, i32
  }
  func.func @transform_3(%arg0: i32) -> (i32, i32, i32) {
    %c0_i32 = arith.constant 0 : i32
    %c0_i32_0 = arith.constant 0 : i32
    %c0_i32_1 = arith.constant 0 : i32
    %c0_i32_2 = arith.constant 0 : i32
    return %c0_i32, %c0_i32_0, %c0_i32_1 : i32, i32, i32
  }
  func.func @transform_4(%arg0: i32) -> (i32, i32, i32) {
    %c0_i32 = arith.constant 0 : i32
    %c0_i32_0 = arith.constant 0 : i32
    %c0_i32_1 = arith.constant 0 : i32
    %c0_i32_2 = arith.constant 0 : i32
    return %c0_i32, %c0_i32_0, %c0_i32_1 : i32, i32, i32
  }
  func.func @transform_5(%arg0: i32) -> (i32, i32, i32) {
    %c0_i32 = arith.constant 0 : i32
    %c0_i32_0 = arith.constant 0 : i32
    %c0_i32_1 = arith.constant 0 : i32
    %c0_i32_2 = arith.constant 0 : i32
    return %c0_i32, %c0_i32_0, %c0_i32_1 : i32, i32, i32
  }
  func.func @transform_6(%arg0: i32) -> (i32, i32, i32) {
    %c0_i32 = arith.constant 0 : i32
    %c0_i32_0 = arith.constant 0 : i32
    %c0_i32_1 = arith.constant 0 : i32
    %c0_i32_2 = arith.constant 0 : i32
    return %c0_i32, %c0_i32_0, %c0_i32_1 : i32, i32, i32
  }
  func.func @transform_7(%arg0: i32) -> (i32, i32) {
    %c0_i32 = arith.constant 0 : i32
    %c0_i32_0 = arith.constant 0 : i32
    %c0_i32_1 = arith.constant 0 : i32
    return %c0_i32, %c0_i32_0 : i32, i32
  }
  func.func @transform_8(%arg0: i32) -> (i32, i32) {
    %c0_i32 = arith.constant 0 : i32
    %c0_i32_0 = arith.constant 0 : i32
    %c0_i32_1 = arith.constant 0 : i32
    return %c0_i32, %c0_i32_0 : i32, i32
  }
  func.func @transform_9(%arg0: i32) -> (i32, i32) {
    %c0_i32 = arith.constant 0 : i32
    %c0_i32_0 = arith.constant 0 : i32
    %c0_i32_1 = arith.constant 0 : i32
    return %c0_i32, %c0_i32_0 : i32, i32
  }
  func.func @transform_10(%arg0: i32) -> (i32, i32) {
    %c0_i32 = arith.constant 0 : i32
    %c0_i32_0 = arith.constant 0 : i32
    %c0_i32_1 = arith.constant 0 : i32
    return %c0_i32, %c0_i32_0 : i32, i32
  }
  func.func @transform_11(%arg0: i32) -> (i32, i32) {
    %c0_i32 = arith.constant 0 : i32
    %c0_i32_0 = arith.constant 0 : i32
    %c0_i32_1 = arith.constant 0 : i32
    return %c0_i32, %c0_i32_0 : i32, i32
  }
  func.func @transform_12(%arg0: i32) -> (i32, i32) {
    %c0_i32 = arith.constant 0 : i32
    %c0_i32_0 = arith.constant 0 : i32
    %c0_i32_1 = arith.constant 0 : i32
    return %c0_i32, %c0_i32_0 : i32, i32
  }
  func.func @transform_13(%arg0: i32) -> (i32, i32) {
    %c0_i32 = arith.constant 0 : i32
    %c0_i32_0 = arith.constant 0 : i32
    %c0_i32_1 = arith.constant 0 : i32
    return %c0_i32, %c0_i32_0 : i32, i32
  }
  func.func @transform_14(%arg0: i32) -> (i32, i32) {
    %c0_i32 = arith.constant 0 : i32
    %c0_i32_0 = arith.constant 0 : i32
    %c0_i32_1 = arith.constant 0 : i32
    return %c0_i32, %c0_i32_0 : i32, i32
  }
  func.func @transform_15(%arg0: i32) -> (i32, i32) {
    %c0_i32 = arith.constant 0 : i32
    %c0_i32_0 = arith.constant 0 : i32
    %c0_i32_1 = arith.constant 0 : i32
    return %c0_i32, %c0_i32_0 : i32, i32
  }
  func.func @transform_16(%arg0: i32) -> (i32, i32, i32) {
    %c0_i32 = arith.constant 0 : i32
    %c0_i32_0 = arith.constant 0 : i32
    %c0_i32_1 = arith.constant 0 : i32
    return %arg0, %c0_i32, %c0_i32_0 : i32, i32, i32
  }
}

module attributes {stable_mosaic.version = 11 : i64} {
  func.func @_cross_layer_kernel(%arg0: i32, %arg1: memref<1x36x64xf32, #tpu.memory_space<vmem>>, %arg2: memref<1x16x144xf32, #tpu.memory_space<vmem>>, %arg3: memref<64x144xbf16, #tpu.memory_space<vmem>>, %arg4: memref<1x144xf32, #tpu.memory_space<vmem>>, %arg5: memref<1x144xf32, #tpu.memory_space<vmem>>, %arg6: memref<1x144xf32, #tpu.memory_space<vmem>>, %arg7: memref<2x144x16xbf16, #tpu.memory_space<vmem>>, %arg8: memref<2x144x16xbf16, #tpu.memory_space<vmem>>, %arg9: memref<2x144x16xbf16, #tpu.memory_space<vmem>>, %arg10: memref<2x16x144xbf16, #tpu.memory_space<vmem>>, %arg11: memref<1x144xf32, #tpu.memory_space<vmem>>, %arg12: memref<144x64xbf16, #tpu.memory_space<vmem>>, %arg13: memref<1x64xf32, #tpu.memory_space<vmem>>, %arg14: memref<144x64xbf16, #tpu.memory_space<vmem>>, %arg15: memref<1x64xf32, #tpu.memory_space<vmem>>, %arg16: memref<1x64xf32, #tpu.memory_space<vmem>>, %arg17: memref<1x64xf32, #tpu.memory_space<vmem>>, %arg18: memref<2x64x16xbf16, #tpu.memory_space<vmem>>, %arg19: memref<2x64x16xbf16, #tpu.memory_space<vmem>>, %arg20: memref<2x64x16xbf16, #tpu.memory_space<vmem>>, %arg21: memref<2x16x64xbf16, #tpu.memory_space<vmem>>, %arg22: memref<1x64xf32, #tpu.memory_space<vmem>>, %arg23: memref<64x144xbf16, #tpu.memory_space<vmem>>, %arg24: memref<1x144xf32, #tpu.memory_space<vmem>>, %arg25: memref<1x36x64xf32, #tpu.memory_space<vmem>>, %arg26: memref<1x16x144xf32, #tpu.memory_space<vmem>>) attributes {dimension_semantics = [#tpu.dimension_semantics<parallel>], iteration_bounds = array<i64: 2>, scalar_prefetch = 0 : i64, scratch_operands = 0 : i64, tpu.core_type = #tpu.core_type<tc>, window_params = [{transform_indices = @transform_0, window_bounds = array<i64: 1, 36, 64>}, {transform_indices = @transform_1, window_bounds = array<i64: 1, 16, 144>}, {pipeline_mode = #tpu.pipeline_mode<synchronous>, transform_indices = @transform_2, window_bounds = array<i64: 64, 144>}, {pipeline_mode = #tpu.pipeline_mode<synchronous>, transform_indices = @transform_3, window_bounds = array<i64: 1, 144>}, {pipeline_mode = #tpu.pipeline_mode<synchronous>, transform_indices = @transform_4, window_bounds = array<i64: 1, 144>}, {pipeline_mode = #tpu.pipeline_mode<synchronous>, transform_indices = @transform_5, window_bounds = array<i64: 1, 144>}, {pipeline_mode = #tpu.pipeline_mode<synchronous>, transform_indices = @transform_6, window_bounds = array<i64: 2, 144, 16>}, {pipeline_mode = #tpu.pipeline_mode<synchronous>, transform_indices = @transform_7, window_bounds = array<i64: 2, 144, 16>}, {pipeline_mode = #tpu.pipeline_mode<synchronous>, transform_indices = @transform_8, window_bounds = array<i64: 2, 144, 16>}, {pipeline_mode = #tpu.pipeline_mode<synchronous>, transform_indices = @transform_9, window_bounds = array<i64: 2, 16, 144>}, {pipeline_mode = #tpu.pipeline_mode<synchronous>, transform_indices = @transform_10, window_bounds = array<i64: 1, 144>}, {pipeline_mode = #tpu.pipeline_mode<synchronous>, transform_indices = @transform_11, window_bounds = array<i64: 144, 64>}, {pipeline_mode = #tpu.pipeline_mode<synchronous>, transform_indices = @transform_12, window_bounds = array<i64: 1, 64>}, {pipeline_mode = #tpu.pipeline_mode<synchronous>, transform_indices = @transform_13, window_bounds = array<i64: 144, 64>}, {pipeline_mode = #tpu.pipeline_mode<synchronous>, transform_indices = @transform_14, window_bounds = array<i64: 1, 64>}, {pipeline_mode = #tpu.pipeline_mode<synchronous>, transform_indices = @transform_15, window_bounds = array<i64: 1, 64>}, {pipeline_mode = #tpu.pipeline_mode<synchronous>, transform_indices = @transform_16, window_bounds = array<i64: 1, 64>}, {pipeline_mode = #tpu.pipeline_mode<synchronous>, transform_indices = @transform_17, window_bounds = array<i64: 2, 64, 16>}, {pipeline_mode = #tpu.pipeline_mode<synchronous>, transform_indices = @transform_18, window_bounds = array<i64: 2, 64, 16>}, {pipeline_mode = #tpu.pipeline_mode<synchronous>, transform_indices = @transform_19, window_bounds = array<i64: 2, 64, 16>}, {pipeline_mode = #tpu.pipeline_mode<synchronous>, transform_indices = @transform_20, window_bounds = array<i64: 2, 16, 64>}, {pipeline_mode = #tpu.pipeline_mode<synchronous>, transform_indices = @transform_21, window_bounds = array<i64: 1, 64>}, {pipeline_mode = #tpu.pipeline_mode<synchronous>, transform_indices = @transform_22, window_bounds = array<i64: 64, 144>}, {pipeline_mode = #tpu.pipeline_mode<synchronous>, transform_indices = @transform_23, window_bounds = array<i64: 1, 144>}, {transform_indices = @transform_24, window_bounds = array<i64: 1, 36, 64>}, {transform_indices = @transform_25, window_bounds = array<i64: 1, 16, 144>}]} {
    %c0 = arith.constant 0 : index
    %c0_0 = arith.constant 0 : index
    %c0_1 = arith.constant 0 : index
    %0 = vector.load %arg1[%c0, %c0_0, %c0_1] : memref<1x36x64xf32, #tpu.memory_space<vmem>>, vector<1x36x64xf32>
    %1 = vector.shape_cast %0 : vector<1x36x64xf32> to vector<36x64xf32>
    %c0_2 = arith.constant 0 : index
    %c0_3 = arith.constant 0 : index
    %c0_4 = arith.constant 0 : index
    %2 = vector.load %arg2[%c0_2, %c0_3, %c0_4] : memref<1x16x144xf32, #tpu.memory_space<vmem>>, vector<1x16x144xf32>
    %3 = vector.shape_cast %2 : vector<1x16x144xf32> to vector<16x144xf32>
    %4 = vector.extract_strided_slice %1 {offsets = [0, 0], sizes = [1, 64], strides = [1, 1]} : vector<36x64xf32> to vector<1x64xf32>
    %5 = vector.extract_strided_slice %3 {offsets = [1, 0], sizes = [15, 144], strides = [1, 1]} : vector<16x144xf32> to vector<15x144xf32>
    %6 = arith.truncf %4 : vector<1x64xf32> to vector<1x64xbf16>
    %c0_5 = arith.constant 0 : index
    %c0_6 = arith.constant 0 : index
    %7 = vector.load %arg3[%c0_5, %c0_6] : memref<64x144xbf16, #tpu.memory_space<vmem>>, vector<64x144xbf16>
    %cst = arith.constant dense<0.000000e+00> : vector<1x144xf32>
    %8 = tpu.matmul %6, %7, %cst {dimension_numbers = #tpu.dot_dimension_numbers<[1], [0], [0], [1], [0, 0, 1, 1], [], []>} : vector<1x64xbf16>, vector<64x144xbf16>, vector<1x144xf32> -> vector<1x144xf32>
    %c0_7 = arith.constant 0 : index
    %c0_8 = arith.constant 0 : index
    %9 = vector.load %arg4[%c0_7, %c0_8] : memref<1x144xf32, #tpu.memory_space<vmem>>, vector<1x144xf32>
    %10 = arith.addf %8, %9 : vector<1x144xf32>
    %c0_9 = arith.constant 0 : index
    %c0_10 = arith.constant 0 : index
    %11 = vector.load %arg5[%c0_9, %c0_10] : memref<1x144xf32, #tpu.memory_space<vmem>>, vector<1x144xf32>
    %c0_11 = arith.constant 0 : index
    %c0_12 = arith.constant 0 : index
    %12 = vector.load %arg6[%c0_11, %c0_12] : memref<1x144xf32, #tpu.memory_space<vmem>>, vector<1x144xf32>
    %cst_13 = arith.constant dense<0.000000e+00> : vector<1xf32>
    %13 = vector.multi_reduction <add>, %10, %cst_13 [1] : vector<1x144xf32> to vector<1xf32>
    %14 = vector.shape_cast %13 : vector<1xf32> to vector<1x1xf32>
    %cst_14 = arith.constant 1.440000e+02 : f32
    %15 = vector.broadcast %cst_14 : f32 to vector<1x1xf32>
    %16 = arith.divf %14, %15 : vector<1x1xf32>
    %17 = vector.broadcast %16 : vector<1x1xf32> to vector<1x144xf32>
    %18 = arith.subf %10, %17 : vector<1x144xf32>
    %19 = arith.mulf %18, %18 : vector<1x144xf32>
    %cst_15 = arith.constant dense<0.000000e+00> : vector<1xf32>
    %20 = vector.multi_reduction <add>, %19, %cst_15 [1] : vector<1x144xf32> to vector<1xf32>
    %21 = vector.shape_cast %20 : vector<1xf32> to vector<1x1xf32>
    %cst_16 = arith.constant 1.440000e+02 : f32
    %22 = vector.broadcast %cst_16 : f32 to vector<1x1xf32>
    %23 = arith.divf %21, %22 : vector<1x1xf32>
    %cst_17 = arith.constant 9.99999974E-6 : f32
    %24 = vector.broadcast %cst_17 : f32 to vector<1x1xf32>
    %25 = arith.addf %23, %24 : vector<1x1xf32>
    %26 = math.rsqrt %25 : vector<1x1xf32>
    %27 = vector.broadcast %26 : vector<1x1xf32> to vector<1x144xf32>
    %28 = arith.mulf %18, %27 : vector<1x144xf32>
    %29 = arith.mulf %28, %11 : vector<1x144xf32>
    %30 = arith.addf %29, %12 : vector<1x144xf32>
    %31 = arith.truncf %30 : vector<1x144xf32> to vector<1x144xbf16>
    %32 = arith.truncf %5 : vector<15x144xf32> to vector<15x144xbf16>
    %cst_18 = arith.constant 0.000000e+00 : f32
    %33 = vector.broadcast %cst_18 : f32 to vector<1x144xf32>
    %c0_19 = arith.constant 0 : index
    %c0_20 = arith.constant 0 : index
    %c0_21 = arith.constant 0 : index
    %34 = vector.load %arg7[%c0_19, %c0_20, %c0_21] : memref<2x144x16xbf16, #tpu.memory_space<vmem>>, vector<1x144x16xbf16>
    %35 = vector.shape_cast %34 : vector<1x144x16xbf16> to vector<144x16xbf16>
    %cst_22 = arith.constant dense<0.000000e+00> : vector<1x16xf32>
    %36 = tpu.matmul %31, %35, %cst_22 {dimension_numbers = #tpu.dot_dimension_numbers<[1], [0], [0], [1], [0, 0, 1, 1], [], []>} : vector<1x144xbf16>, vector<144x16xbf16>, vector<1x16xf32> -> vector<1x16xf32>
    %cst_23 = arith.constant 2.500000e-01 : f32
    %37 = vector.broadcast %cst_23 : f32 to vector<1x16xf32>
    %38 = arith.mulf %36, %37 : vector<1x16xf32>
    %c0_24 = arith.constant 0 : index
    %c0_25 = arith.constant 0 : index
    %c0_26 = arith.constant 0 : index
    %39 = vector.load %arg8[%c0_24, %c0_25, %c0_26] : memref<2x144x16xbf16, #tpu.memory_space<vmem>>, vector<1x144x16xbf16>
    %40 = vector.shape_cast %39 : vector<1x144x16xbf16> to vector<144x16xbf16>
    %cst_27 = arith.constant dense<0.000000e+00> : vector<1x16xf32>
    %41 = tpu.matmul %31, %40, %cst_27 {dimension_numbers = #tpu.dot_dimension_numbers<[1], [0], [0], [1], [0, 0, 1, 1], [], []>} : vector<1x144xbf16>, vector<144x16xbf16>, vector<1x16xf32> -> vector<1x16xf32>
    %c0_28 = arith.constant 0 : index
    %c0_29 = arith.constant 0 : index
    %c0_30 = arith.constant 0 : index
    %42 = vector.load %arg9[%c0_28, %c0_29, %c0_30] : memref<2x144x16xbf16, #tpu.memory_space<vmem>>, vector<1x144x16xbf16>
    %43 = vector.shape_cast %42 : vector<1x144x16xbf16> to vector<144x16xbf16>
    %cst_31 = arith.constant dense<0.000000e+00> : vector<1x16xf32>
    %44 = tpu.matmul %31, %43, %cst_31 {dimension_numbers = #tpu.dot_dimension_numbers<[1], [0], [0], [1], [0, 0, 1, 1], [], []>} : vector<1x144xbf16>, vector<144x16xbf16>, vector<1x16xf32> -> vector<1x16xf32>
    %c0_32 = arith.constant 0 : index
    %c0_33 = arith.constant 0 : index
    %c0_34 = arith.constant 0 : index
    %45 = vector.load %arg8[%c0_32, %c0_33, %c0_34] : memref<2x144x16xbf16, #tpu.memory_space<vmem>>, vector<1x144x16xbf16>
    %46 = vector.shape_cast %45 : vector<1x144x16xbf16> to vector<144x16xbf16>
    %cst_35 = arith.constant dense<0.000000e+00> : vector<15x16xf32>
    %47 = tpu.matmul %32, %46, %cst_35 {dimension_numbers = #tpu.dot_dimension_numbers<[1], [0], [0], [1], [0, 0, 1, 1], [], []>} : vector<15x144xbf16>, vector<144x16xbf16>, vector<15x16xf32> -> vector<15x16xf32>
    %c0_36 = arith.constant 0 : index
    %c0_37 = arith.constant 0 : index
    %c0_38 = arith.constant 0 : index
    %48 = vector.load %arg9[%c0_36, %c0_37, %c0_38] : memref<2x144x16xbf16, #tpu.memory_space<vmem>>, vector<1x144x16xbf16>
    %49 = vector.shape_cast %48 : vector<1x144x16xbf16> to vector<144x16xbf16>
    %cst_39 = arith.constant dense<0.000000e+00> : vector<15x16xf32>
    %50 = tpu.matmul %32, %49, %cst_39 {dimension_numbers = #tpu.dot_dimension_numbers<[1], [0], [0], [1], [0, 0, 1, 1], [], []>} : vector<15x144xbf16>, vector<144x16xbf16>, vector<15x16xf32> -> vector<15x16xf32>
    %51 = arith.truncf %38 : vector<1x16xf32> to vector<1x16xbf16>
    %52 = arith.truncf %41 : vector<1x16xf32> to vector<1x16xbf16>
    %53 = arith.extf %51 : vector<1x16xbf16> to vector<1x16xf32>
    %54 = arith.extf %52 : vector<1x16xbf16> to vector<1x16xf32>
    %cst_40 = arith.constant dense<0.000000e+00> : vector<1xf32>
    %55 = arith.mulf %53, %54 : vector<1x16xf32>
    %56 = vector.multi_reduction <add>, %55, %cst_40 [1] : vector<1x16xf32> to vector<1xf32>
    %57 = vector.shape_cast %56 : vector<1xf32> to vector<1x1xf32>
    %58 = arith.truncf %38 : vector<1x16xf32> to vector<1x16xbf16>
    %59 = arith.truncf %47 : vector<15x16xf32> to vector<15x16xbf16>
    %cst_41 = arith.constant dense<0.000000e+00> : vector<1x15xf32>
    %60 = tpu.matmul %58, %59, %cst_41 {dimension_numbers = #tpu.dot_dimension_numbers<[1], [1], [0], [0], [0, 0, 1, 0], [], []>} : vector<1x16xbf16>, vector<15x16xbf16>, vector<1x15xf32> -> vector<1x15xf32>
    %cst_42 = arith.constant dense<0xFF800000> : vector<1xf32>
    %61 = vector.multi_reduction <maximumf>, %57, %cst_42 [1] : vector<1x1xf32> to vector<1xf32>
    %62 = vector.shape_cast %61 : vector<1xf32> to vector<1x1xf32>
    %cst_43 = arith.constant dense<0xFF800000> : vector<1xf32>
    %63 = vector.multi_reduction <maximumf>, %60, %cst_43 [1] : vector<1x15xf32> to vector<1xf32>
    %64 = vector.shape_cast %63 : vector<1xf32> to vector<1x1xf32>
    %65 = arith.maximumf %62, %64 : vector<1x1xf32>
    %66 = arith.subf %57, %65 : vector<1x1xf32>
    %67 = math.exp %66 : vector<1x1xf32>
    %68 = vector.broadcast %65 : vector<1x1xf32> to vector<1x15xf32>
    %69 = arith.subf %60, %68 : vector<1x15xf32>
    %70 = math.exp %69 : vector<1x15xf32>
    %cst_44 = arith.constant dense<0.000000e+00> : vector<1xf32>
    %71 = vector.multi_reduction <add>, %67, %cst_44 [1] : vector<1x1xf32> to vector<1xf32>
    %72 = vector.shape_cast %71 : vector<1xf32> to vector<1x1xf32>
    %cst_45 = arith.constant dense<0.000000e+00> : vector<1xf32>
    %73 = vector.multi_reduction <add>, %70, %cst_45 [1] : vector<1x15xf32> to vector<1xf32>
    %74 = vector.shape_cast %73 : vector<1xf32> to vector<1x1xf32>
    %75 = arith.addf %72, %74 : vector<1x1xf32>
    %76 = tpu.reciprocal %75 {approx = true} : vector<1x1xf32> -> vector<1x1xf32>
    %77 = arith.truncf %67 : vector<1x1xf32> to vector<1x1xbf16>
    %78 = arith.truncf %44 : vector<1x16xf32> to vector<1x16xbf16>
    %cst_46 = arith.constant dense<0.000000e+00> : vector<1x16xf32>
    %79 = tpu.matmul %77, %78, %cst_46 {dimension_numbers = #tpu.dot_dimension_numbers<[1], [0], [0], [1], [0, 0, 1, 1], [], []>} : vector<1x1xbf16>, vector<1x16xbf16>, vector<1x16xf32> -> vector<1x16xf32>
    %80 = arith.truncf %70 : vector<1x15xf32> to vector<1x15xbf16>
    %81 = arith.truncf %50 : vector<15x16xf32> to vector<15x16xbf16>
    %cst_47 = arith.constant dense<0.000000e+00> : vector<1x16xf32>
    %82 = tpu.matmul %80, %81, %cst_47 {dimension_numbers = #tpu.dot_dimension_numbers<[1], [0], [0], [1], [0, 0, 1, 1], [], []>} : vector<1x15xbf16>, vector<15x16xbf16>, vector<1x16xf32> -> vector<1x16xf32>
    %83 = arith.addf %79, %82 : vector<1x16xf32>
    %84 = vector.broadcast %76 : vector<1x1xf32> to vector<1x16xf32>
    %85 = arith.mulf %83, %84 : vector<1x16xf32>
    %86 = arith.truncf %85 : vector<1x16xf32> to vector<1x16xbf16>
    %c0_48 = arith.constant 0 : index
    %c0_49 = arith.constant 0 : index
    %c0_50 = arith.constant 0 : index
    %87 = vector.load %arg10[%c0_48, %c0_49, %c0_50] : memref<2x16x144xbf16, #tpu.memory_space<vmem>>, vector<1x16x144xbf16>
    %88 = vector.shape_cast %87 : vector<1x16x144xbf16> to vector<16x144xbf16>
    %cst_51 = arith.constant dense<0.000000e+00> : vector<1x144xf32>
    %89 = tpu.matmul %86, %88, %cst_51 {dimension_numbers = #tpu.dot_dimension_numbers<[1], [0], [0], [1], [0, 0, 1, 1], [], []>} : vector<1x16xbf16>, vector<16x144xbf16>, vector<1x144xf32> -> vector<1x144xf32>
    %90 = arith.addf %33, %89 : vector<1x144xf32>
    %c1 = arith.constant 1 : index
    %c0_52 = arith.constant 0 : index
    %c0_53 = arith.constant 0 : index
    %91 = vector.load %arg7[%c1, %c0_52, %c0_53] : memref<2x144x16xbf16, #tpu.memory_space<vmem>>, vector<1x144x16xbf16>
    %92 = vector.shape_cast %91 : vector<1x144x16xbf16> to vector<144x16xbf16>
    %cst_54 = arith.constant dense<0.000000e+00> : vector<1x16xf32>
    %93 = tpu.matmul %31, %92, %cst_54 {dimension_numbers = #tpu.dot_dimension_numbers<[1], [0], [0], [1], [0, 0, 1, 1], [], []>} : vector<1x144xbf16>, vector<144x16xbf16>, vector<1x16xf32> -> vector<1x16xf32>
    %cst_55 = arith.constant 2.500000e-01 : f32
    %94 = vector.broadcast %cst_55 : f32 to vector<1x16xf32>
    %95 = arith.mulf %93, %94 : vector<1x16xf32>
    %c1_56 = arith.constant 1 : index
    %c0_57 = arith.constant 0 : index
    %c0_58 = arith.constant 0 : index
    %96 = vector.load %arg8[%c1_56, %c0_57, %c0_58] : memref<2x144x16xbf16, #tpu.memory_space<vmem>>, vector<1x144x16xbf16>
    %97 = vector.shape_cast %96 : vector<1x144x16xbf16> to vector<144x16xbf16>
    %cst_59 = arith.constant dense<0.000000e+00> : vector<1x16xf32>
    %98 = tpu.matmul %31, %97, %cst_59 {dimension_numbers = #tpu.dot_dimension_numbers<[1], [0], [0], [1], [0, 0, 1, 1], [], []>} : vector<1x144xbf16>, vector<144x16xbf16>, vector<1x16xf32> -> vector<1x16xf32>
    %c1_60 = arith.constant 1 : index
    %c0_61 = arith.constant 0 : index
    %c0_62 = arith.constant 0 : index
    %99 = vector.load %arg9[%c1_60, %c0_61, %c0_62] : memref<2x144x16xbf16, #tpu.memory_space<vmem>>, vector<1x144x16xbf16>
    %100 = vector.shape_cast %99 : vector<1x144x16xbf16> to vector<144x16xbf16>
    %cst_63 = arith.constant dense<0.000000e+00> : vector<1x16xf32>
    %101 = tpu.matmul %31, %100, %cst_63 {dimension_numbers = #tpu.dot_dimension_numbers<[1], [0], [0], [1], [0, 0, 1, 1], [], []>} : vector<1x144xbf16>, vector<144x16xbf16>, vector<1x16xf32> -> vector<1x16xf32>
    %c1_64 = arith.constant 1 : index
    %c0_65 = arith.constant 0 : index
    %c0_66 = arith.constant 0 : index
    %102 = vector.load %arg8[%c1_64, %c0_65, %c0_66] : memref<2x144x16xbf16, #tpu.memory_space<vmem>>, vector<1x144x16xbf16>
    %103 = vector.shape_cast %102 : vector<1x144x16xbf16> to vector<144x16xbf16>
    %cst_67 = arith.constant dense<0.000000e+00> : vector<15x16xf32>
    %104 = tpu.matmul %32, %103, %cst_67 {dimension_numbers = #tpu.dot_dimension_numbers<[1], [0], [0], [1], [0, 0, 1, 1], [], []>} : vector<15x144xbf16>, vector<144x16xbf16>, vector<15x16xf32> -> vector<15x16xf32>
    %c1_68 = arith.constant 1 : index
    %c0_69 = arith.constant 0 : index
    %c0_70 = arith.constant 0 : index
    %105 = vector.load %arg9[%c1_68, %c0_69, %c0_70] : memref<2x144x16xbf16, #tpu.memory_space<vmem>>, vector<1x144x16xbf16>
    %106 = vector.shape_cast %105 : vector<1x144x16xbf16> to vector<144x16xbf16>
    %cst_71 = arith.constant dense<0.000000e+00> : vector<15x16xf32>
    %107 = tpu.matmul %32, %106, %cst_71 {dimension_numbers = #tpu.dot_dimension_numbers<[1], [0], [0], [1], [0, 0, 1, 1], [], []>} : vector<15x144xbf16>, vector<144x16xbf16>, vector<15x16xf32> -> vector<15x16xf32>
    %108 = arith.truncf %95 : vector<1x16xf32> to vector<1x16xbf16>
    %109 = arith.truncf %98 : vector<1x16xf32> to vector<1x16xbf16>
    %110 = arith.extf %108 : vector<1x16xbf16> to vector<1x16xf32>
    %111 = arith.extf %109 : vector<1x16xbf16> to vector<1x16xf32>
    %cst_72 = arith.constant dense<0.000000e+00> : vector<1xf32>
    %112 = arith.mulf %110, %111 : vector<1x16xf32>
    %113 = vector.multi_reduction <add>, %112, %cst_72 [1] : vector<1x16xf32> to vector<1xf32>
    %114 = vector.shape_cast %113 : vector<1xf32> to vector<1x1xf32>
    %115 = arith.truncf %95 : vector<1x16xf32> to vector<1x16xbf16>
    %116 = arith.truncf %104 : vector<15x16xf32> to vector<15x16xbf16>
    %cst_73 = arith.constant dense<0.000000e+00> : vector<1x15xf32>
    %117 = tpu.matmul %115, %116, %cst_73 {dimension_numbers = #tpu.dot_dimension_numbers<[1], [1], [0], [0], [0, 0, 1, 0], [], []>} : vector<1x16xbf16>, vector<15x16xbf16>, vector<1x15xf32> -> vector<1x15xf32>
    %cst_74 = arith.constant dense<0xFF800000> : vector<1xf32>
    %118 = vector.multi_reduction <maximumf>, %114, %cst_74 [1] : vector<1x1xf32> to vector<1xf32>
    %119 = vector.shape_cast %118 : vector<1xf32> to vector<1x1xf32>
    %cst_75 = arith.constant dense<0xFF800000> : vector<1xf32>
    %120 = vector.multi_reduction <maximumf>, %117, %cst_75 [1] : vector<1x15xf32> to vector<1xf32>
    %121 = vector.shape_cast %120 : vector<1xf32> to vector<1x1xf32>
    %122 = arith.maximumf %119, %121 : vector<1x1xf32>
    %123 = arith.subf %114, %122 : vector<1x1xf32>
    %124 = math.exp %123 : vector<1x1xf32>
    %125 = vector.broadcast %122 : vector<1x1xf32> to vector<1x15xf32>
    %126 = arith.subf %117, %125 : vector<1x15xf32>
    %127 = math.exp %126 : vector<1x15xf32>
    %cst_76 = arith.constant dense<0.000000e+00> : vector<1xf32>
    %128 = vector.multi_reduction <add>, %124, %cst_76 [1] : vector<1x1xf32> to vector<1xf32>
    %129 = vector.shape_cast %128 : vector<1xf32> to vector<1x1xf32>
    %cst_77 = arith.constant dense<0.000000e+00> : vector<1xf32>
    %130 = vector.multi_reduction <add>, %127, %cst_77 [1] : vector<1x15xf32> to vector<1xf32>
    %131 = vector.shape_cast %130 : vector<1xf32> to vector<1x1xf32>
    %132 = arith.addf %129, %131 : vector<1x1xf32>
    %133 = tpu.reciprocal %132 {approx = true} : vector<1x1xf32> -> vector<1x1xf32>
    %134 = arith.truncf %124 : vector<1x1xf32> to vector<1x1xbf16>
    %135 = arith.truncf %101 : vector<1x16xf32> to vector<1x16xbf16>
    %cst_78 = arith.constant dense<0.000000e+00> : vector<1x16xf32>
    %136 = tpu.matmul %134, %135, %cst_78 {dimension_numbers = #tpu.dot_dimension_numbers<[1], [0], [0], [1], [0, 0, 1, 1], [], []>} : vector<1x1xbf16>, vector<1x16xbf16>, vector<1x16xf32> -> vector<1x16xf32>
    %137 = arith.truncf %127 : vector<1x15xf32> to vector<1x15xbf16>
    %138 = arith.truncf %107 : vector<15x16xf32> to vector<15x16xbf16>
    %cst_79 = arith.constant dense<0.000000e+00> : vector<1x16xf32>
    %139 = tpu.matmul %137, %138, %cst_79 {dimension_numbers = #tpu.dot_dimension_numbers<[1], [0], [0], [1], [0, 0, 1, 1], [], []>} : vector<1x15xbf16>, vector<15x16xbf16>, vector<1x16xf32> -> vector<1x16xf32>
    %140 = arith.addf %136, %139 : vector<1x16xf32>
    %141 = vector.broadcast %133 : vector<1x1xf32> to vector<1x16xf32>
    %142 = arith.mulf %140, %141 : vector<1x16xf32>
    %143 = arith.truncf %142 : vector<1x16xf32> to vector<1x16xbf16>
    %c1_80 = arith.constant 1 : index
    %c0_81 = arith.constant 0 : index
    %c0_82 = arith.constant 0 : index
    %144 = vector.load %arg10[%c1_80, %c0_81, %c0_82] : memref<2x16x144xbf16, #tpu.memory_space<vmem>>, vector<1x16x144xbf16>
    %145 = vector.shape_cast %144 : vector<1x16x144xbf16> to vector<16x144xbf16>
    %cst_83 = arith.constant dense<0.000000e+00> : vector<1x144xf32>
    %146 = tpu.matmul %143, %145, %cst_83 {dimension_numbers = #tpu.dot_dimension_numbers<[1], [0], [0], [1], [0, 0, 1, 1], [], []>} : vector<1x16xbf16>, vector<16x144xbf16>, vector<1x144xf32> -> vector<1x144xf32>
    %147 = arith.addf %90, %146 : vector<1x144xf32>
    %c0_84 = arith.constant 0 : index
    %c0_85 = arith.constant 0 : index
    %148 = vector.load %arg11[%c0_84, %c0_85] : memref<1x144xf32, #tpu.memory_space<vmem>>, vector<1x144xf32>
    %149 = arith.addf %147, %148 : vector<1x144xf32>
    %150 = arith.truncf %149 : vector<1x144xf32> to vector<1x144xbf16>
    %c0_86 = arith.constant 0 : index
    %c0_87 = arith.constant 0 : index
    %151 = vector.load %arg12[%c0_86, %c0_87] : memref<144x64xbf16, #tpu.memory_space<vmem>>, vector<144x64xbf16>
    %cst_88 = arith.constant dense<0.000000e+00> : vector<1x64xf32>
    %152 = tpu.matmul %150, %151, %cst_88 {dimension_numbers = #tpu.dot_dimension_numbers<[1], [0], [0], [1], [0, 0, 1, 1], [], []>} : vector<1x144xbf16>, vector<144x64xbf16>, vector<1x64xf32> -> vector<1x64xf32>
    %c0_89 = arith.constant 0 : index
    %c0_90 = arith.constant 0 : index
    %153 = vector.load %arg13[%c0_89, %c0_90] : memref<1x64xf32, #tpu.memory_space<vmem>>, vector<1x64xf32>
    %154 = arith.addf %152, %153 : vector<1x64xf32>
    %155 = arith.addf %154, %4 : vector<1x64xf32>
    %156 = vector.extract_strided_slice %3 {offsets = [0, 0], sizes = [1, 144], strides = [1, 1]} : vector<16x144xf32> to vector<1x144xf32>
    %157 = vector.extract_strided_slice %1 {offsets = [1, 0], sizes = [35, 64], strides = [1, 1]} : vector<36x64xf32> to vector<35x64xf32>
    %158 = arith.truncf %156 : vector<1x144xf32> to vector<1x144xbf16>
    %c0_91 = arith.constant 0 : index
    %c0_92 = arith.constant 0 : index
    %159 = vector.load %arg14[%c0_91, %c0_92] : memref<144x64xbf16, #tpu.memory_space<vmem>>, vector<144x64xbf16>
    %cst_93 = arith.constant dense<0.000000e+00> : vector<1x64xf32>
    %160 = tpu.matmul %158, %159, %cst_93 {dimension_numbers = #tpu.dot_dimension_numbers<[1], [0], [0], [1], [0, 0, 1, 1], [], []>} : vector<1x144xbf16>, vector<144x64xbf16>, vector<1x64xf32> -> vector<1x64xf32>
    %c0_94 = arith.constant 0 : index
    %c0_95 = arith.constant 0 : index
    %161 = vector.load %arg15[%c0_94, %c0_95] : memref<1x64xf32, #tpu.memory_space<vmem>>, vector<1x64xf32>
    %162 = arith.addf %160, %161 : vector<1x64xf32>
    %c0_96 = arith.constant 0 : index
    %c0_97 = arith.constant 0 : index
    %163 = vector.load %arg16[%c0_96, %c0_97] : memref<1x64xf32, #tpu.memory_space<vmem>>, vector<1x64xf32>
    %c0_98 = arith.constant 0 : index
    %c0_99 = arith.constant 0 : index
    %164 = vector.load %arg17[%c0_98, %c0_99] : memref<1x64xf32, #tpu.memory_space<vmem>>, vector<1x64xf32>
    %cst_100 = arith.constant dense<0.000000e+00> : vector<1xf32>
    %165 = vector.multi_reduction <add>, %162, %cst_100 [1] : vector<1x64xf32> to vector<1xf32>
    %166 = vector.shape_cast %165 : vector<1xf32> to vector<1x1xf32>
    %cst_101 = arith.constant 6.400000e+01 : f32
    %167 = vector.broadcast %cst_101 : f32 to vector<1x1xf32>
    %168 = arith.divf %166, %167 : vector<1x1xf32>
    %169 = vector.broadcast %168 : vector<1x1xf32> to vector<1x64xf32>
    %170 = arith.subf %162, %169 : vector<1x64xf32>
    %171 = arith.mulf %170, %170 : vector<1x64xf32>
    %cst_102 = arith.constant dense<0.000000e+00> : vector<1xf32>
    %172 = vector.multi_reduction <add>, %171, %cst_102 [1] : vector<1x64xf32> to vector<1xf32>
    %173 = vector.shape_cast %172 : vector<1xf32> to vector<1x1xf32>
    %cst_103 = arith.constant 6.400000e+01 : f32
    %174 = vector.broadcast %cst_103 : f32 to vector<1x1xf32>
    %175 = arith.divf %173, %174 : vector<1x1xf32>
    %cst_104 = arith.constant 9.99999974E-6 : f32
    %176 = vector.broadcast %cst_104 : f32 to vector<1x1xf32>
    %177 = arith.addf %175, %176 : vector<1x1xf32>
    %178 = math.rsqrt %177 : vector<1x1xf32>
    %179 = vector.broadcast %178 : vector<1x1xf32> to vector<1x64xf32>
    %180 = arith.mulf %170, %179 : vector<1x64xf32>
    %181 = arith.mulf %180, %163 : vector<1x64xf32>
    %182 = arith.addf %181, %164 : vector<1x64xf32>
    %183 = arith.truncf %182 : vector<1x64xf32> to vector<1x64xbf16>
    %184 = arith.truncf %157 : vector<35x64xf32> to vector<35x64xbf16>
    %cst_105 = arith.constant 0.000000e+00 : f32
    %185 = vector.broadcast %cst_105 : f32 to vector<1x64xf32>
    %c0_106 = arith.constant 0 : index
    %c0_107 = arith.constant 0 : index
    %c0_108 = arith.constant 0 : index
    %186 = vector.load %arg18[%c0_106, %c0_107, %c0_108] : memref<2x64x16xbf16, #tpu.memory_space<vmem>>, vector<1x64x16xbf16>
    %187 = vector.shape_cast %186 : vector<1x64x16xbf16> to vector<64x16xbf16>
    %cst_109 = arith.constant dense<0.000000e+00> : vector<1x16xf32>
    %188 = tpu.matmul %183, %187, %cst_109 {dimension_numbers = #tpu.dot_dimension_numbers<[1], [0], [0], [1], [0, 0, 1, 1], [], []>} : vector<1x64xbf16>, vector<64x16xbf16>, vector<1x16xf32> -> vector<1x16xf32>
    %cst_110 = arith.constant 2.500000e-01 : f32
    %189 = vector.broadcast %cst_110 : f32 to vector<1x16xf32>
    %190 = arith.mulf %188, %189 : vector<1x16xf32>
    %c0_111 = arith.constant 0 : index
    %c0_112 = arith.constant 0 : index
    %c0_113 = arith.constant 0 : index
    %191 = vector.load %arg19[%c0_111, %c0_112, %c0_113] : memref<2x64x16xbf16, #tpu.memory_space<vmem>>, vector<1x64x16xbf16>
    %192 = vector.shape_cast %191 : vector<1x64x16xbf16> to vector<64x16xbf16>
    %cst_114 = arith.constant dense<0.000000e+00> : vector<1x16xf32>
    %193 = tpu.matmul %183, %192, %cst_114 {dimension_numbers = #tpu.dot_dimension_numbers<[1], [0], [0], [1], [0, 0, 1, 1], [], []>} : vector<1x64xbf16>, vector<64x16xbf16>, vector<1x16xf32> -> vector<1x16xf32>
    %c0_115 = arith.constant 0 : index
    %c0_116 = arith.constant 0 : index
    %c0_117 = arith.constant 0 : index
    %194 = vector.load %arg20[%c0_115, %c0_116, %c0_117] : memref<2x64x16xbf16, #tpu.memory_space<vmem>>, vector<1x64x16xbf16>
    %195 = vector.shape_cast %194 : vector<1x64x16xbf16> to vector<64x16xbf16>
    %cst_118 = arith.constant dense<0.000000e+00> : vector<1x16xf32>
    %196 = tpu.matmul %183, %195, %cst_118 {dimension_numbers = #tpu.dot_dimension_numbers<[1], [0], [0], [1], [0, 0, 1, 1], [], []>} : vector<1x64xbf16>, vector<64x16xbf16>, vector<1x16xf32> -> vector<1x16xf32>
    %c0_119 = arith.constant 0 : index
    %c0_120 = arith.constant 0 : index
    %c0_121 = arith.constant 0 : index
    %197 = vector.load %arg19[%c0_119, %c0_120, %c0_121] : memref<2x64x16xbf16, #tpu.memory_space<vmem>>, vector<1x64x16xbf16>
    %198 = vector.shape_cast %197 : vector<1x64x16xbf16> to vector<64x16xbf16>
    %cst_122 = arith.constant dense<0.000000e+00> : vector<35x16xf32>
    %199 = tpu.matmul %184, %198, %cst_122 {dimension_numbers = #tpu.dot_dimension_numbers<[1], [0], [0], [1], [0, 0, 1, 1], [], []>} : vector<35x64xbf16>, vector<64x16xbf16>, vector<35x16xf32> -> vector<35x16xf32>
    %c0_123 = arith.constant 0 : index
    %c0_124 = arith.constant 0 : index
    %c0_125 = arith.constant 0 : index
    %200 = vector.load %arg20[%c0_123, %c0_124, %c0_125] : memref<2x64x16xbf16, #tpu.memory_space<vmem>>, vector<1x64x16xbf16>
    %201 = vector.shape_cast %200 : vector<1x64x16xbf16> to vector<64x16xbf16>
    %cst_126 = arith.constant dense<0.000000e+00> : vector<35x16xf32>
    %202 = tpu.matmul %184, %201, %cst_126 {dimension_numbers = #tpu.dot_dimension_numbers<[1], [0], [0], [1], [0, 0, 1, 1], [], []>} : vector<35x64xbf16>, vector<64x16xbf16>, vector<35x16xf32> -> vector<35x16xf32>
    %203 = arith.truncf %190 : vector<1x16xf32> to vector<1x16xbf16>
    %204 = arith.truncf %193 : vector<1x16xf32> to vector<1x16xbf16>
    %205 = arith.extf %203 : vector<1x16xbf16> to vector<1x16xf32>
    %206 = arith.extf %204 : vector<1x16xbf16> to vector<1x16xf32>
    %cst_127 = arith.constant dense<0.000000e+00> : vector<1xf32>
    %207 = arith.mulf %205, %206 : vector<1x16xf32>
    %208 = vector.multi_reduction <add>, %207, %cst_127 [1] : vector<1x16xf32> to vector<1xf32>
    %209 = vector.shape_cast %208 : vector<1xf32> to vector<1x1xf32>
    %210 = arith.truncf %190 : vector<1x16xf32> to vector<1x16xbf16>
    %211 = arith.truncf %199 : vector<35x16xf32> to vector<35x16xbf16>
    %cst_128 = arith.constant dense<0.000000e+00> : vector<1x35xf32>
    %212 = tpu.matmul %210, %211, %cst_128 {dimension_numbers = #tpu.dot_dimension_numbers<[1], [1], [0], [0], [0, 0, 1, 0], [], []>} : vector<1x16xbf16>, vector<35x16xbf16>, vector<1x35xf32> -> vector<1x35xf32>
    %cst_129 = arith.constant dense<0xFF800000> : vector<1xf32>
    %213 = vector.multi_reduction <maximumf>, %209, %cst_129 [1] : vector<1x1xf32> to vector<1xf32>
    %214 = vector.shape_cast %213 : vector<1xf32> to vector<1x1xf32>
    %cst_130 = arith.constant dense<0xFF800000> : vector<1xf32>
    %215 = vector.multi_reduction <maximumf>, %212, %cst_130 [1] : vector<1x35xf32> to vector<1xf32>
    %216 = vector.shape_cast %215 : vector<1xf32> to vector<1x1xf32>
    %217 = arith.maximumf %214, %216 : vector<1x1xf32>
    %218 = arith.subf %209, %217 : vector<1x1xf32>
    %219 = math.exp %218 : vector<1x1xf32>
    %220 = vector.broadcast %217 : vector<1x1xf32> to vector<1x35xf32>
    %221 = arith.subf %212, %220 : vector<1x35xf32>
    %222 = math.exp %221 : vector<1x35xf32>
    %cst_131 = arith.constant dense<0.000000e+00> : vector<1xf32>
    %223 = vector.multi_reduction <add>, %219, %cst_131 [1] : vector<1x1xf32> to vector<1xf32>
    %224 = vector.shape_cast %223 : vector<1xf32> to vector<1x1xf32>
    %cst_132 = arith.constant dense<0.000000e+00> : vector<1xf32>
    %225 = vector.multi_reduction <add>, %222, %cst_132 [1] : vector<1x35xf32> to vector<1xf32>
    %226 = vector.shape_cast %225 : vector<1xf32> to vector<1x1xf32>
    %227 = arith.addf %224, %226 : vector<1x1xf32>
    %228 = tpu.reciprocal %227 {approx = true} : vector<1x1xf32> -> vector<1x1xf32>
    %229 = arith.truncf %219 : vector<1x1xf32> to vector<1x1xbf16>
    %230 = arith.truncf %196 : vector<1x16xf32> to vector<1x16xbf16>
    %cst_133 = arith.constant dense<0.000000e+00> : vector<1x16xf32>
    %231 = tpu.matmul %229, %230, %cst_133 {dimension_numbers = #tpu.dot_dimension_numbers<[1], [0], [0], [1], [0, 0, 1, 1], [], []>} : vector<1x1xbf16>, vector<1x16xbf16>, vector<1x16xf32> -> vector<1x16xf32>
    %232 = arith.truncf %222 : vector<1x35xf32> to vector<1x35xbf16>
    %233 = arith.truncf %202 : vector<35x16xf32> to vector<35x16xbf16>
    %cst_134 = arith.constant dense<0.000000e+00> : vector<1x16xf32>
    %234 = tpu.matmul %232, %233, %cst_134 {dimension_numbers = #tpu.dot_dimension_numbers<[1], [0], [0], [1], [0, 0, 1, 1], [], []>} : vector<1x35xbf16>, vector<35x16xbf16>, vector<1x16xf32> -> vector<1x16xf32>
    %235 = arith.addf %231, %234 : vector<1x16xf32>
    %236 = vector.broadcast %228 : vector<1x1xf32> to vector<1x16xf32>
    %237 = arith.mulf %235, %236 : vector<1x16xf32>
    %238 = arith.truncf %237 : vector<1x16xf32> to vector<1x16xbf16>
    %c0_135 = arith.constant 0 : index
    %c0_136 = arith.constant 0 : index
    %c0_137 = arith.constant 0 : index
    %239 = vector.load %arg21[%c0_135, %c0_136, %c0_137] : memref<2x16x64xbf16, #tpu.memory_space<vmem>>, vector<1x16x64xbf16>
    %240 = vector.shape_cast %239 : vector<1x16x64xbf16> to vector<16x64xbf16>
    %cst_138 = arith.constant dense<0.000000e+00> : vector<1x64xf32>
    %241 = tpu.matmul %238, %240, %cst_138 {dimension_numbers = #tpu.dot_dimension_numbers<[1], [0], [0], [1], [0, 0, 1, 1], [], []>} : vector<1x16xbf16>, vector<16x64xbf16>, vector<1x64xf32> -> vector<1x64xf32>
    %242 = arith.addf %185, %241 : vector<1x64xf32>
    %c1_139 = arith.constant 1 : index
    %c0_140 = arith.constant 0 : index
    %c0_141 = arith.constant 0 : index
    %243 = vector.load %arg18[%c1_139, %c0_140, %c0_141] : memref<2x64x16xbf16, #tpu.memory_space<vmem>>, vector<1x64x16xbf16>
    %244 = vector.shape_cast %243 : vector<1x64x16xbf16> to vector<64x16xbf16>
    %cst_142 = arith.constant dense<0.000000e+00> : vector<1x16xf32>
    %245 = tpu.matmul %183, %244, %cst_142 {dimension_numbers = #tpu.dot_dimension_numbers<[1], [0], [0], [1], [0, 0, 1, 1], [], []>} : vector<1x64xbf16>, vector<64x16xbf16>, vector<1x16xf32> -> vector<1x16xf32>
    %cst_143 = arith.constant 2.500000e-01 : f32
    %246 = vector.broadcast %cst_143 : f32 to vector<1x16xf32>
    %247 = arith.mulf %245, %246 : vector<1x16xf32>
    %c1_144 = arith.constant 1 : index
    %c0_145 = arith.constant 0 : index
    %c0_146 = arith.constant 0 : index
    %248 = vector.load %arg19[%c1_144, %c0_145, %c0_146] : memref<2x64x16xbf16, #tpu.memory_space<vmem>>, vector<1x64x16xbf16>
    %249 = vector.shape_cast %248 : vector<1x64x16xbf16> to vector<64x16xbf16>
    %cst_147 = arith.constant dense<0.000000e+00> : vector<1x16xf32>
    %250 = tpu.matmul %183, %249, %cst_147 {dimension_numbers = #tpu.dot_dimension_numbers<[1], [0], [0], [1], [0, 0, 1, 1], [], []>} : vector<1x64xbf16>, vector<64x16xbf16>, vector<1x16xf32> -> vector<1x16xf32>
    %c1_148 = arith.constant 1 : index
    %c0_149 = arith.constant 0 : index
    %c0_150 = arith.constant 0 : index
    %251 = vector.load %arg20[%c1_148, %c0_149, %c0_150] : memref<2x64x16xbf16, #tpu.memory_space<vmem>>, vector<1x64x16xbf16>
    %252 = vector.shape_cast %251 : vector<1x64x16xbf16> to vector<64x16xbf16>
    %cst_151 = arith.constant dense<0.000000e+00> : vector<1x16xf32>
    %253 = tpu.matmul %183, %252, %cst_151 {dimension_numbers = #tpu.dot_dimension_numbers<[1], [0], [0], [1], [0, 0, 1, 1], [], []>} : vector<1x64xbf16>, vector<64x16xbf16>, vector<1x16xf32> -> vector<1x16xf32>
    %c1_152 = arith.constant 1 : index
    %c0_153 = arith.constant 0 : index
    %c0_154 = arith.constant 0 : index
    %254 = vector.load %arg19[%c1_152, %c0_153, %c0_154] : memref<2x64x16xbf16, #tpu.memory_space<vmem>>, vector<1x64x16xbf16>
    %255 = vector.shape_cast %254 : vector<1x64x16xbf16> to vector<64x16xbf16>
    %cst_155 = arith.constant dense<0.000000e+00> : vector<35x16xf32>
    %256 = tpu.matmul %184, %255, %cst_155 {dimension_numbers = #tpu.dot_dimension_numbers<[1], [0], [0], [1], [0, 0, 1, 1], [], []>} : vector<35x64xbf16>, vector<64x16xbf16>, vector<35x16xf32> -> vector<35x16xf32>
    %c1_156 = arith.constant 1 : index
    %c0_157 = arith.constant 0 : index
    %c0_158 = arith.constant 0 : index
    %257 = vector.load %arg20[%c1_156, %c0_157, %c0_158] : memref<2x64x16xbf16, #tpu.memory_space<vmem>>, vector<1x64x16xbf16>
    %258 = vector.shape_cast %257 : vector<1x64x16xbf16> to vector<64x16xbf16>
    %cst_159 = arith.constant dense<0.000000e+00> : vector<35x16xf32>
    %259 = tpu.matmul %184, %258, %cst_159 {dimension_numbers = #tpu.dot_dimension_numbers<[1], [0], [0], [1], [0, 0, 1, 1], [], []>} : vector<35x64xbf16>, vector<64x16xbf16>, vector<35x16xf32> -> vector<35x16xf32>
    %260 = arith.truncf %247 : vector<1x16xf32> to vector<1x16xbf16>
    %261 = arith.truncf %250 : vector<1x16xf32> to vector<1x16xbf16>
    %262 = arith.extf %260 : vector<1x16xbf16> to vector<1x16xf32>
    %263 = arith.extf %261 : vector<1x16xbf16> to vector<1x16xf32>
    %cst_160 = arith.constant dense<0.000000e+00> : vector<1xf32>
    %264 = arith.mulf %262, %263 : vector<1x16xf32>
    %265 = vector.multi_reduction <add>, %264, %cst_160 [1] : vector<1x16xf32> to vector<1xf32>
    %266 = vector.shape_cast %265 : vector<1xf32> to vector<1x1xf32>
    %267 = arith.truncf %247 : vector<1x16xf32> to vector<1x16xbf16>
    %268 = arith.truncf %256 : vector<35x16xf32> to vector<35x16xbf16>
    %cst_161 = arith.constant dense<0.000000e+00> : vector<1x35xf32>
    %269 = tpu.matmul %267, %268, %cst_161 {dimension_numbers = #tpu.dot_dimension_numbers<[1], [1], [0], [0], [0, 0, 1, 0], [], []>} : vector<1x16xbf16>, vector<35x16xbf16>, vector<1x35xf32> -> vector<1x35xf32>
    %cst_162 = arith.constant dense<0xFF800000> : vector<1xf32>
    %270 = vector.multi_reduction <maximumf>, %266, %cst_162 [1] : vector<1x1xf32> to vector<1xf32>
    %271 = vector.shape_cast %270 : vector<1xf32> to vector<1x1xf32>
    %cst_163 = arith.constant dense<0xFF800000> : vector<1xf32>
    %272 = vector.multi_reduction <maximumf>, %269, %cst_163 [1] : vector<1x35xf32> to vector<1xf32>
    %273 = vector.shape_cast %272 : vector<1xf32> to vector<1x1xf32>
    %274 = arith.maximumf %271, %273 : vector<1x1xf32>
    %275 = arith.subf %266, %274 : vector<1x1xf32>
    %276 = math.exp %275 : vector<1x1xf32>
    %277 = vector.broadcast %274 : vector<1x1xf32> to vector<1x35xf32>
    %278 = arith.subf %269, %277 : vector<1x35xf32>
    %279 = math.exp %278 : vector<1x35xf32>
    %cst_164 = arith.constant dense<0.000000e+00> : vector<1xf32>
    %280 = vector.multi_reduction <add>, %276, %cst_164 [1] : vector<1x1xf32> to vector<1xf32>
    %281 = vector.shape_cast %280 : vector<1xf32> to vector<1x1xf32>
    %cst_165 = arith.constant dense<0.000000e+00> : vector<1xf32>
    %282 = vector.multi_reduction <add>, %279, %cst_165 [1] : vector<1x35xf32> to vector<1xf32>
    %283 = vector.shape_cast %282 : vector<1xf32> to vector<1x1xf32>
    %284 = arith.addf %281, %283 : vector<1x1xf32>
    %285 = tpu.reciprocal %284 {approx = true} : vector<1x1xf32> -> vector<1x1xf32>
    %286 = arith.truncf %276 : vector<1x1xf32> to vector<1x1xbf16>
    %287 = arith.truncf %253 : vector<1x16xf32> to vector<1x16xbf16>
    %cst_166 = arith.constant dense<0.000000e+00> : vector<1x16xf32>
    %288 = tpu.matmul %286, %287, %cst_166 {dimension_numbers = #tpu.dot_dimension_numbers<[1], [0], [0], [1], [0, 0, 1, 1], [], []>} : vector<1x1xbf16>, vector<1x16xbf16>, vector<1x16xf32> -> vector<1x16xf32>
    %289 = arith.truncf %279 : vector<1x35xf32> to vector<1x35xbf16>
    %290 = arith.truncf %259 : vector<35x16xf32> to vector<35x16xbf16>
    %cst_167 = arith.constant dense<0.000000e+00> : vector<1x16xf32>
    %291 = tpu.matmul %289, %290, %cst_167 {dimension_numbers = #tpu.dot_dimension_numbers<[1], [0], [0], [1], [0, 0, 1, 1], [], []>} : vector<1x35xbf16>, vector<35x16xbf16>, vector<1x16xf32> -> vector<1x16xf32>
    %292 = arith.addf %288, %291 : vector<1x16xf32>
    %293 = vector.broadcast %285 : vector<1x1xf32> to vector<1x16xf32>
    %294 = arith.mulf %292, %293 : vector<1x16xf32>
    %295 = arith.truncf %294 : vector<1x16xf32> to vector<1x16xbf16>
    %c1_168 = arith.constant 1 : index
    %c0_169 = arith.constant 0 : index
    %c0_170 = arith.constant 0 : index
    %296 = vector.load %arg21[%c1_168, %c0_169, %c0_170] : memref<2x16x64xbf16, #tpu.memory_space<vmem>>, vector<1x16x64xbf16>
    %297 = vector.shape_cast %296 : vector<1x16x64xbf16> to vector<16x64xbf16>
    %cst_171 = arith.constant dense<0.000000e+00> : vector<1x64xf32>
    %298 = tpu.matmul %295, %297, %cst_171 {dimension_numbers = #tpu.dot_dimension_numbers<[1], [0], [0], [1], [0, 0, 1, 1], [], []>} : vector<1x16xbf16>, vector<16x64xbf16>, vector<1x64xf32> -> vector<1x64xf32>
    %299 = arith.addf %242, %298 : vector<1x64xf32>
    %c0_172 = arith.constant 0 : index
    %c0_173 = arith.constant 0 : index
    %300 = vector.load %arg22[%c0_172, %c0_173] : memref<1x64xf32, #tpu.memory_space<vmem>>, vector<1x64xf32>
    %301 = arith.addf %299, %300 : vector<1x64xf32>
    %302 = arith.truncf %301 : vector<1x64xf32> to vector<1x64xbf16>
    %c0_174 = arith.constant 0 : index
    %c0_175 = arith.constant 0 : index
    %303 = vector.load %arg23[%c0_174, %c0_175] : memref<64x144xbf16, #tpu.memory_space<vmem>>, vector<64x144xbf16>
    %cst_176 = arith.constant dense<0.000000e+00> : vector<1x144xf32>
    %304 = tpu.matmul %302, %303, %cst_176 {dimension_numbers = #tpu.dot_dimension_numbers<[1], [0], [0], [1], [0, 0, 1, 1], [], []>} : vector<1x64xbf16>, vector<64x144xbf16>, vector<1x144xf32> -> vector<1x144xf32>
    %c0_177 = arith.constant 0 : index
    %c0_178 = arith.constant 0 : index
    %305 = vector.load %arg24[%c0_177, %c0_178] : memref<1x144xf32, #tpu.memory_space<vmem>>, vector<1x144xf32>
    %306 = arith.addf %304, %305 : vector<1x144xf32>
    %307 = arith.addf %306, %156 : vector<1x144xf32>
    %c0_179 = arith.constant 0 : index
    %c0_180 = arith.constant 0 : index
    %c0_181 = arith.constant 0 : index
    %308 = vector.load %arg25[%c0_179, %c0_180, %c0_181] : memref<1x36x64xf32, #tpu.memory_space<vmem>>, vector<1x36x64xf32>
    %309 = vector.shape_cast %308 : vector<1x36x64xf32> to vector<36x64xf32>
    %310 = vector.shape_cast %1 : vector<36x64xf32> to vector<1x36x64xf32>
    tpu.vector_store %arg25[%c0_179, %c0_180, %c0_181], %310 {strides = array<i32>} : memref<1x36x64xf32, #tpu.memory_space<vmem>>, vector<1x36x64xf32>,
    %c0_182 = arith.constant 0 : index
    %c0_183 = arith.constant 0 : index
    %c0_184 = arith.constant 0 : index
    %311 = vector.load %arg26[%c0_182, %c0_183, %c0_184] : memref<1x16x144xf32, #tpu.memory_space<vmem>>, vector<1x16x144xf32>
    %312 = vector.shape_cast %311 : vector<1x16x144xf32> to vector<16x144xf32>
    %313 = vector.shape_cast %3 : vector<16x144xf32> to vector<1x16x144xf32>
    tpu.vector_store %arg26[%c0_182, %c0_183, %c0_184], %313 {strides = array<i32>} : memref<1x16x144xf32, #tpu.memory_space<vmem>>, vector<1x16x144xf32>,
    %c0_185 = arith.constant 0 : index
    %c0_186 = arith.constant 0 : index
    %c0_187 = arith.constant 0 : index
    %314 = vector.load %arg25[%c0_185, %c0_186, %c0_187] : memref<1x36x64xf32, #tpu.memory_space<vmem>>, vector<1x1x64xf32>
    %315 = vector.shape_cast %314 : vector<1x1x64xf32> to vector<1x64xf32>
    %316 = vector.shape_cast %155 : vector<1x64xf32> to vector<1x1x64xf32>
    tpu.vector_store %arg25[%c0_185, %c0_186, %c0_187], %316 {strides = array<i32>} : memref<1x36x64xf32, #tpu.memory_space<vmem>>, vector<1x1x64xf32>,
    %c0_188 = arith.constant 0 : index
    %c0_189 = arith.constant 0 : index
    %c0_190 = arith.constant 0 : index
    %317 = vector.load %arg26[%c0_188, %c0_189, %c0_190] : memref<1x16x144xf32, #tpu.memory_space<vmem>>, vector<1x1x144xf32>
    %318 = vector.shape_cast %317 : vector<1x1x144xf32> to vector<1x144xf32>
    %319 = vector.shape_cast %307 : vector<1x144xf32> to vector<1x1x144xf32>
    tpu.vector_store %arg26[%c0_188, %c0_189, %c0_190], %319 {strides = array<i32>} : memref<1x16x144xf32, #tpu.memory_space<vmem>>, vector<1x1x144xf32>,
    return
  }
  func.func @transform_0(%arg0: i32) -> (i32, i32, i32) {
    %c0_i32 = arith.constant 0 : i32
    %c0_i32_0 = arith.constant 0 : i32
    %c0_i32_1 = arith.constant 0 : i32
    return %arg0, %c0_i32, %c0_i32_0 : i32, i32, i32
  }
  func.func @transform_1(%arg0: i32) -> (i32, i32, i32) {
    %c0_i32 = arith.constant 0 : i32
    %c0_i32_0 = arith.constant 0 : i32
    %c0_i32_1 = arith.constant 0 : i32
    return %arg0, %c0_i32, %c0_i32_0 : i32, i32, i32
  }
  func.func @transform_2(%arg0: i32) -> (i32, i32) {
    %c0_i32 = arith.constant 0 : i32
    %c0_i32_0 = arith.constant 0 : i32
    %c0_i32_1 = arith.constant 0 : i32
    return %c0_i32, %c0_i32_0 : i32, i32
  }
  func.func @transform_3(%arg0: i32) -> (i32, i32) {
    %c0_i32 = arith.constant 0 : i32
    %c0_i32_0 = arith.constant 0 : i32
    %c0_i32_1 = arith.constant 0 : i32
    return %c0_i32, %c0_i32_0 : i32, i32
  }
  func.func @transform_4(%arg0: i32) -> (i32, i32) {
    %c0_i32 = arith.constant 0 : i32
    %c0_i32_0 = arith.constant 0 : i32
    %c0_i32_1 = arith.constant 0 : i32
    return %c0_i32, %c0_i32_0 : i32, i32
  }
  func.func @transform_5(%arg0: i32) -> (i32, i32) {
    %c0_i32 = arith.constant 0 : i32
    %c0_i32_0 = arith.constant 0 : i32
    %c0_i32_1 = arith.constant 0 : i32
    return %c0_i32, %c0_i32_0 : i32, i32
  }
  func.func @transform_6(%arg0: i32) -> (i32, i32, i32) {
    %c0_i32 = arith.constant 0 : i32
    %c0_i32_0 = arith.constant 0 : i32
    %c0_i32_1 = arith.constant 0 : i32
    %c0_i32_2 = arith.constant 0 : i32
    return %c0_i32, %c0_i32_0, %c0_i32_1 : i32, i32, i32
  }
  func.func @transform_7(%arg0: i32) -> (i32, i32, i32) {
    %c0_i32 = arith.constant 0 : i32
    %c0_i32_0 = arith.constant 0 : i32
    %c0_i32_1 = arith.constant 0 : i32
    %c0_i32_2 = arith.constant 0 : i32
    return %c0_i32, %c0_i32_0, %c0_i32_1 : i32, i32, i32
  }
  func.func @transform_8(%arg0: i32) -> (i32, i32, i32) {
    %c0_i32 = arith.constant 0 : i32
    %c0_i32_0 = arith.constant 0 : i32
    %c0_i32_1 = arith.constant 0 : i32
    %c0_i32_2 = arith.constant 0 : i32
    return %c0_i32, %c0_i32_0, %c0_i32_1 : i32, i32, i32
  }
  func.func @transform_9(%arg0: i32) -> (i32, i32, i32) {
    %c0_i32 = arith.constant 0 : i32
    %c0_i32_0 = arith.constant 0 : i32
    %c0_i32_1 = arith.constant 0 : i32
    %c0_i32_2 = arith.constant 0 : i32
    return %c0_i32, %c0_i32_0, %c0_i32_1 : i32, i32, i32
  }
  func.func @transform_10(%arg0: i32) -> (i32, i32) {
    %c0_i32 = arith.constant 0 : i32
    %c0_i32_0 = arith.constant 0 : i32
    %c0_i32_1 = arith.constant 0 : i32
    return %c0_i32, %c0_i32_0 : i32, i32
  }
  func.func @transform_11(%arg0: i32) -> (i32, i32) {
    %c0_i32 = arith.constant 0 : i32
    %c0_i32_0 = arith.constant 0 : i32
    %c0_i32_1 = arith.constant 0 : i32
    return %c0_i32, %c0_i32_0 : i32, i32
  }
  func.func @transform_12(%arg0: i32) -> (i32, i32) {
    %c0_i32 = arith.constant 0 : i32
    %c0_i32_0 = arith.constant 0 : i32
    %c0_i32_1 = arith.constant 0 : i32
    return %c0_i32, %c0_i32_0 : i32, i32
  }
  func.func @transform_13(%arg0: i32) -> (i32, i32) {
    %c0_i32 = arith.constant 0 : i32
    %c0_i32_0 = arith.constant 0 : i32
    %c0_i32_1 = arith.constant 0 : i32
    return %c0_i32, %c0_i32_0 : i32, i32
  }
  func.func @transform_14(%arg0: i32) -> (i32, i32) {
    %c0_i32 = arith.constant 0 : i32
    %c0_i32_0 = arith.constant 0 : i32
    %c0_i32_1 = arith.constant 0 : i32
    return %c0_i32, %c0_i32_0 : i32, i32
  }
  func.func @transform_15(%arg0: i32) -> (i32, i32) {
    %c0_i32 = arith.constant 0 : i32
    %c0_i32_0 = arith.constant 0 : i32
    %c0_i32_1 = arith.constant 0 : i32
    return %c0_i32, %c0_i32_0 : i32, i32
  }
  func.func @transform_16(%arg0: i32) -> (i32, i32) {
    %c0_i32 = arith.constant 0 : i32
    %c0_i32_0 = arith.constant 0 : i32
    %c0_i32_1 = arith.constant 0 : i32
    return %c0_i32, %c0_i32_0 : i32, i32
  }
  func.func @transform_17(%arg0: i32) -> (i32, i32, i32) {
    %c0_i32 = arith.constant 0 : i32
    %c0_i32_0 = arith.constant 0 : i32
    %c0_i32_1 = arith.constant 0 : i32
    %c0_i32_2 = arith.constant 0 : i32
    return %c0_i32, %c0_i32_0, %c0_i32_1 : i32, i32, i32
  }
  func.func @transform_18(%arg0: i32) -> (i32, i32, i32) {
    %c0_i32 = arith.constant 0 : i32
    %c0_i32_0 = arith.constant 0 : i32
    %c0_i32_1 = arith.constant 0 : i32
    %c0_i32_2 = arith.constant 0 : i32
    return %c0_i32, %c0_i32_0, %c0_i32_1 : i32, i32, i32
  }
  func.func @transform_19(%arg0: i32) -> (i32, i32, i32) {
    %c0_i32 = arith.constant 0 : i32
    %c0_i32_0 = arith.constant 0 : i32
    %c0_i32_1 = arith.constant 0 : i32
    %c0_i32_2 = arith.constant 0 : i32
    return %c0_i32, %c0_i32_0, %c0_i32_1 : i32, i32, i32
  }
  func.func @transform_20(%arg0: i32) -> (i32, i32, i32) {
    %c0_i32 = arith.constant 0 : i32
    %c0_i32_0 = arith.constant 0 : i32
    %c0_i32_1 = arith.constant 0 : i32
    %c0_i32_2 = arith.constant 0 : i32
    return %c0_i32, %c0_i32_0, %c0_i32_1 : i32, i32, i32
  }
  func.func @transform_21(%arg0: i32) -> (i32, i32) {
    %c0_i32 = arith.constant 0 : i32
    %c0_i32_0 = arith.constant 0 : i32
    %c0_i32_1 = arith.constant 0 : i32
    return %c0_i32, %c0_i32_0 : i32, i32
  }
  func.func @transform_22(%arg0: i32) -> (i32, i32) {
    %c0_i32 = arith.constant 0 : i32
    %c0_i32_0 = arith.constant 0 : i32
    %c0_i32_1 = arith.constant 0 : i32
    return %c0_i32, %c0_i32_0 : i32, i32
  }
  func.func @transform_23(%arg0: i32) -> (i32, i32) {
    %c0_i32 = arith.constant 0 : i32
    %c0_i32_0 = arith.constant 0 : i32
    %c0_i32_1 = arith.constant 0 : i32
    return %c0_i32, %c0_i32_0 : i32, i32
  }
  func.func @transform_24(%arg0: i32) -> (i32, i32, i32) {
    %c0_i32 = arith.constant 0 : i32
    %c0_i32_0 = arith.constant 0 : i32
    %c0_i32_1 = arith.constant 0 : i32
    return %arg0, %c0_i32, %c0_i32_0 : i32, i32, i32
  }
  func.func @transform_25(%arg0: i32) -> (i32, i32, i32) {
    %c0_i32 = arith.constant 0 : i32
    %c0_i32_0 = arith.constant 0 : i32
    %c0_i32_1 = arith.constant 0 : i32
    return %arg0, %c0_i32, %c0_i32_0 : i32, i32, i32
  }
}

module attributes {stable_mosaic.version = 11 : i64} {
  func.func @_sum_conv_kernel(%arg0: i32, %arg1: memref<24x96xf32, #tpu.memory_space<vmem>>, %arg2: memref<24x96xf32, #tpu.memory_space<vmem>>, %arg3: memref<96x768xbf16, #tpu.memory_space<vmem>>, %arg4: memref<1x768xf32, #tpu.memory_space<vmem>>, %arg5: memref<24x768xf32, #tpu.memory_space<vmem>>) attributes {dimension_semantics = [#tpu.dimension_semantics<parallel>], iteration_bounds = array<i64: 2>, scalar_prefetch = 0 : i64, scratch_operands = 0 : i64, tpu.core_type = #tpu.core_type<tc>, window_params = [{transform_indices = @transform_0, window_bounds = array<i64: 24, 96>}, {transform_indices = @transform_1, window_bounds = array<i64: 24, 96>}, {pipeline_mode = #tpu.pipeline_mode<synchronous>, transform_indices = @transform_2, window_bounds = array<i64: 96, 768>}, {pipeline_mode = #tpu.pipeline_mode<synchronous>, transform_indices = @transform_3, window_bounds = array<i64: 1, 768>}, {transform_indices = @transform_4, window_bounds = array<i64: 24, 768>}]} {
    %c0 = arith.constant 0 : index
    %c0_0 = arith.constant 0 : index
    %0 = vector.load %arg1[%c0, %c0_0] : memref<24x96xf32, #tpu.memory_space<vmem>>, vector<24x96xf32>
    %c0_1 = arith.constant 0 : index
    %c0_2 = arith.constant 0 : index
    %1 = vector.load %arg2[%c0_1, %c0_2] : memref<24x96xf32, #tpu.memory_space<vmem>>, vector<24x96xf32>
    %2 = arith.addf %0, %1 : vector<24x96xf32>
    %3 = arith.truncf %2 : vector<24x96xf32> to vector<24x96xbf16>
    %c0_3 = arith.constant 0 : index
    %c0_4 = arith.constant 0 : index
    %4 = vector.load %arg3[%c0_3, %c0_4] : memref<96x768xbf16, #tpu.memory_space<vmem>>, vector<96x768xbf16>
    %cst = arith.constant dense<0.000000e+00> : vector<24x768xf32>
    %5 = tpu.matmul %3, %4, %cst {dimension_numbers = #tpu.dot_dimension_numbers<[1], [0], [0], [1], [0, 0, 1, 1], [], []>} : vector<24x96xbf16>, vector<96x768xbf16>, vector<24x768xf32> -> vector<24x768xf32>
    %c0_5 = arith.constant 0 : index
    %c0_6 = arith.constant 0 : index
    %6 = vector.load %arg4[%c0_5, %c0_6] : memref<1x768xf32, #tpu.memory_space<vmem>>, vector<1x768xf32>
    %7 = vector.broadcast %6 : vector<1x768xf32> to vector<24x768xf32>
    %8 = arith.addf %5, %7 : vector<24x768xf32>
    %c0_7 = arith.constant 0 : index
    %c0_8 = arith.constant 0 : index
    %9 = vector.load %arg5[%c0_7, %c0_8] : memref<24x768xf32, #tpu.memory_space<vmem>>, vector<24x768xf32>
    tpu.vector_store %arg5[%c0_7, %c0_8], %8 {strides = array<i32>} : memref<24x768xf32, #tpu.memory_space<vmem>>, vector<24x768xf32>,
    return
  }
  func.func @transform_0(%arg0: i32) -> (i32, i32) {
    %c0_i32 = arith.constant 0 : i32
    %c0_i32_0 = arith.constant 0 : i32
    return %arg0, %c0_i32 : i32, i32
  }
  func.func @transform_1(%arg0: i32) -> (i32, i32) {
    %c0_i32 = arith.constant 0 : i32
    %c0_i32_0 = arith.constant 0 : i32
    return %arg0, %c0_i32 : i32, i32
  }
  func.func @transform_2(%arg0: i32) -> (i32, i32) {
    %c0_i32 = arith.constant 0 : i32
    %c0_i32_0 = arith.constant 0 : i32
    %c0_i32_1 = arith.constant 0 : i32
    return %c0_i32, %c0_i32_0 : i32, i32
  }
  func.func @transform_3(%arg0: i32) -> (i32, i32) {
    %c0_i32 = arith.constant 0 : i32
    %c0_i32_0 = arith.constant 0 : i32
    %c0_i32_1 = arith.constant 0 : i32
    return %c0_i32, %c0_i32_0 : i32, i32
  }
  func.func @transform_4(%arg0: i32) -> (i32, i32) {
    %c0_i32 = arith.constant 0 : i32
    %c0_i32_0 = arith.constant 0 : i32
    return %arg0, %c0_i32 : i32, i32
  }
}

</mosaic_0001>

<bundles_post_ra>
// kernel: cross_plus_vit_segnet_forward.6
= control target key start
LH: loop header
LB: loop body
LE: loop exit
PB: predicated region body
PF: predicated region fallthrough
CT: control target
= control target key end

     0   :  { %s485_s15 = smov 0   ;;  %s549_s0 = inlined_call_operand.vmem [shape: f32[2,36,64], index: 0, kind: input, shape index: {}]   ;;  %s550_s1 = inlined_call_operand.vmem [shape: bf16[64,64], index: 1, kind: input, shape index: {}]   ;;  %s551_s2 = inlined_call_operand.vmem [shape: f32[1,64], index: 2, kind: input, shape index: {}]   ;;  %s552_s3 = inlined_call_operand.vmem [shape: f32[36,64], index: 3, kind: input, shape index: {}]   ;;  %s553_s4 = inlined_call_operand.vmem [shape: f32[2,36,64], index: 4, kind: output, shape index: {}]  }
   0x1 LB: > { %s383_s16 = sadd.s32 4294967295, %s456_s15   ;;  %p387_p0 = scmp.ge.s32.totalorder %s456_s15, 1  ;;  %s456_s15 = sphi %s485_s15, %s14_s15  }
   0x2   : > { %p162_p1 = scmp.lt.s32.totalorder %s456_s15, 3 }
   0x4   : > { %p163_p2 = pnand %p387_p0, %p162_p1 }
   0x5   : > { %v446_v0 = vld [vmem:[%s550_s1] sm:$0xff] (!%p163_p2)   ;;  %v458_v1 = vmov (!%p163_p2), 0.0   ;;  %v447_v2 = vld [vmem:[%s550_s1 + $0x8] sm:$0xff] (!%p163_p2)   ;;  %p188_p3 = scmp.lt.s32.totalorder (!%p163_p2), %s383_s16, 1  ;;  %vm459_vm0 = vmmov (!%p163_p2), 0   ;;  %v448_v3 = vld [vmem:[%s550_s1 + $0x10] sm:$0xff] (!%p163_p2)  }
   0x6   : > { %166 = sbr.rel (%p163_p2) target bundleno = 247 (0xf7), region = 36  ;;  %427 = vmatprep.subr.bf16.mxu1 (!%p163_p2), %v458_v1  ;;  %407 = vmatprep.subr.bf16.mxu0 (!%p163_p2), %v458_v1  ;;  %v449_v4 = vld [vmem:[%s550_s1 + $0x18] sm:$0xff] (!%p163_p2)   ;;  %vm246_vm1 = vcmask (!%p163_p2), 523264   ;;  %v390_v13 = vld [vmem:[%s551_s2] ss:$0 sm:$0xff] (!%p163_p2)  ;;  %v314_v15 = vld [vmem:[%s552_s3 + $0x10] sm:$0xff] (!%p163_p2) }
   0x7   : > { %431 = vmatpush3.bf16.msra.mxu1 (!%p163_p2), %v446_v0  ;;  %408 = vmatpush3.bf16.msra.mxu0 (!%p163_p2), %v446_v0  ;;  %v312_v17 = vld [vmem:[%s552_s3] sm:$0xff] (!%p163_p2)  ;;  %v315_v23 = vld [vmem:[%s552_s3 + $0x18] sm:$0xff] (!%p163_p2)  ;;  %v313_v25 = vld [vmem:[%s552_s3 + $0x8] sm:$0xff] (!%p163_p2)  ;;  %vm326_vm2 = vcmask (!%p163_p2), 519168  }
   0x8   : > { %428 = vmatprep.subr.bf16.mxu1 (!%p163_p2), %v458_v1  ;;  %409 = vmatprep.subr.bf16.mxu0 (!%p163_p2), %v458_v1  ;;  %v316_v35 = vld [vmem:[%s552_s3 + $0x20] sm:$0xf] (!%p163_p2) }
   0x9   : > { %419 = vmatprep.mubr.msk.bf16.mxu1 (!%p163_p2), %vm459_vm0, %v458_v1  ;;  %415 = vmatprep.mubr.msk.bf16.mxu0 (!%p163_p2), %vm459_vm0, %v458_v1 }
   0xb   : > { %432 = vmatpush3.bf16.msra.mxu1 (!%p163_p2), %v447_v2  ;;  %410 = vmatpush3.bf16.msra.mxu0 (!%p163_p2), %v447_v2 }
   0xc   : > { %429 = vmatprep.subr.bf16.mxu1 (!%p163_p2), %v458_v1  ;;  %411 = vmatprep.subr.bf16.mxu0 (!%p163_p2), %v458_v1 }
   0xd   : > { %s555_s16 = smov (!%p188_p3, %s383_s16), 1 }
   0xe   : > { %s435_s23 = smul.u32 40, %s555_s16 }
   0xf   : > { %433 = vmatpush3.bf16.msra.mxu1 %v448_v3  ;;  %412 = vmatpush3.bf16.msra.mxu0 %v448_v3 }
  0x10   : > { %s192_s26 = scalar_lea.vmem %s549_s0, %s435_s23  ;;  %430 = vmatprep.subr.bf16.mxu1 %v458_v1  ;;  %413 = vmatprep.subr.bf16.mxu0 %v458_v1  ;;  %s197_s11 = scalar_lea.vmem %s553_s4, %s435_s23 }
  0x11   : > { %v201_v5 = vld [vmem:[%s192_s26 + $0x10] sm:$0xff]  ;;  %v202_v6 = vld [vmem:[%s192_s26 + $0x18] sm:$0xff]  ;;  %v199_v7 = vld [vmem:[%s192_s26] sm:$0xff] }
  0x12   : > { %v200_v8 = vld [vmem:[%s192_s26 + $0x8] sm:$0xff]  ;;  %v205_v9 = vpack.c.bf16 %v202_v6, %v201_v5  ;;  %v203_v11 = vld [vmem:[%s192_s26 + $0x20] sm:$0xf] }
  0x13   : > { %v204_v10 = vpack.c.bf16 %v200_v8, %v199_v7  ;;  %434 = vmatpush3.bf16.msra.mxu1 %v449_v4  ;;  %414 = vmatpush3.bf16.msra.mxu0 %v449_v4  ;;  %v206_v12 = vpack.c.bf16 %v203_v11, %v203_v11 }
  0x16   : > { %420 = vmatmul.mubr.msk.bf16.vlgmr.msra.gmra.mrb[0].mxu1 %vm246_vm1, %v205_v9  ;;  %416 = vmatmul.mubr.msk.bf16.vlgmr.msra.gmra.mrb[0].mxu0 %vm246_vm1, %v204_v10 }
  0x17   : > { %423 = vmatprep.mubr.msk.bf16.mxu1 %vm459_vm0, %v458_v1 }
  0x1e   : > { %424 = vmatmul.mubr.msk.bf16.gmra.mrb[4].mxu1 %vm246_vm1, %v206_v12 }
  0xe9   : > { %v298_v14 = vpop.f32.mrb[0].mxu1  ;;  %v290_v16 = vpop.f32.mrb[0].mxu0 }
  0xea   : > { %v299_v18 = vadd.f32 %v390_v13, %v298_v14  ;;  %v421_v19 = vpop.f32.mrb[1].mxu1  ;;  %v291_v20 = vadd.f32 %v390_v13, %v290_v16  ;;  %v417_v21 = vpop.f32.mrb[1].mxu0 }
  0xeb   : > { %v301_v22 = vpop.f32.mrb[2].mxu1  ;;  %v293_v24 = vpop.f32.mrb[2].mxu0 }
  0xec   : > { %v319_v26 = vadd.f32 %v314_v15, %v299_v18  ;;  %v302_v27 = vadd.f32 %v390_v13, %v301_v22  ;;  %v317_v28 = vadd.f32 %v312_v17, %v291_v20  ;;  %v422_v29 = vpop.f32.mrb[3].mxu1  ;;  %v294_v30 = vadd.f32 %v390_v13, %v293_v24  ;;  %v418_v31 = vpop.f32.mrb[3].mxu0 }
  0xee   : > { %324 = vst.msk [vmem:[%s197_s11 + $0x10] sm:$0xff] %vm246_vm1, %v319_v26  ;;  %v320_v32 = vadd.f32 %v315_v23, %v302_v27  ;;  %322 = vst.msk [vmem:[%s197_s11] sm:$0xff] %vm246_vm1, %v317_v28  ;;  %v318_v33 = vadd.f32 %v313_v25, %v294_v30 }
  0xf0   : > { %325 = vst.msk [vmem:[%s197_s11 + $0x18] sm:$0xff] %vm246_vm1, %v320_v32  ;;  %323 = vst.msk [vmem:[%s197_s11 + $0x8] sm:$0xff] %vm246_vm1, %v318_v33 }
  0xf1   : > { %v306_v34 = vpop.f32.mrb[4].mxu1 }
  0xf2   : > { %v307_v36 = vadd.f32 %v390_v13, %v306_v34  ;;  %v425_v37 = vpop.f32.mrb[5].mxu1 }
  0xf3   : > { %v309_v38 = vpop.f32.mrb[6].mxu1 }
  0xf4   : > { %v321_v39 = vadd.f32 %v316_v35, %v307_v36  ;;  %v426_v40 = vpop.f32.mrb[7].mxu1 }
  0xf6   : > { %327 = vst.msk [vmem:[%s197_s11 + $0x20] sm:$0xf] %vm326_vm2, %v321_v39 }
  0xf7 PF: > { %s14_s15 = sadd.s32 1, %s456_s15  }
  0xf8   : > { %p11_p4 = scmp.ge.s32.totalorder %s14_s15, 4  }
  0xfa   :  { %13 = sbr.rel (!%p11_p4) target bundleno = 1 (0x1), region = 66 }

// kernel: cross_plus_vit_segnet_forward.8
= control target key start
LH: loop header
LB: loop body
LE: loop exit
PB: predicated region body
PF: predicated region fallthrough
CT: control target
= control target key end

     0   :  { %s3100_s21 = smov 0   ;;  %s3690_s0 = inlined_call_operand.vmem [shape: f32[2,36,64], index: 0, kind: input, shape index: {}]   ;;  %s3691_s1 = inlined_call_operand.vmem [shape: f32[1,64], index: 1, kind: input, shape index: {}]   ;;  %s3692_s2 = inlined_call_operand.vmem [shape: f32[1,64], index: 2, kind: input, shape index: {}]   ;;  %s3693_s3 = inlined_call_operand.vmem [shape: bf16[2,64,16], index: 3, kind: input, shape index: {}]   ;;  %s3694_s4 = inlined_call_operand.vmem [shape: bf16[2,64,16], index: 4, kind: input, shape index: {}]   ;;  %s3695_s5 = inlined_call_operand.vmem [shape: bf16[2,64,16], index: 5, kind: input, shape index: {}]   ;;  %s3696_s6 = inlined_call_operand.vmem [shape: bf16[2,16,64], index: 6, kind: input, shape index: {}]   ;;  %s3697_s7 = inlined_call_operand.vmem [shape: f32[1,64], index: 7, kind: input, shape index: {}]   ;;  %s3698_s8 = inlined_call_operand.vmem [shape: f32[1,64], index: 8, kind: input, shape index: {}]   ;;  %s3699_s9 = inlined_call_operand.vmem [shape: f32[1,64], index: 9, kind: input, shape index: {}]   ;;  %s3700_s10 = inlined_call_operand.vmem [shape: bf16[64,128], index: 10, kind: input, shape index: {}]   ;;  %s3701_s11 = inlined_call_operand.vmem [shape: f32[1,128], index: 11, kind: input, shape index: {}]   ;;  %s3702_s12 = inlined_call_operand.vmem [shape: bf16[128,64], index: 12, kind: input, shape index: {}]   ;;  %s3703_s13 = inlined_call_operand.vmem [shape: f32[1,64], index: 13, kind: input, shape index: {}]   ;;  %s3704_s14 = inlined_call_operand.vmem [shape: f32[1,64], index: 14, kind: input, shape index: {}]   ;;  %s3705_s15 = inlined_call_operand.vmem [shape: f32[1,64], index: 15, kind: input, shape index: {}]   ;;  %s3706_s16 = inlined_call_operand.vmem [shape: f32[2,36,64], index: 16, kind: output, shape index: {}]  }
   0x1   :  { %3707 = sst [smem:[#allocation2_spill]] %s3690_s0 }
   0x2 LB: > { %s2380_s22 = sadd.s32 4294967295, %s3011_s21   ;;  %p2384_p0 = scmp.ge.s32.totalorder %s3011_s21, 1  ;;  %s3011_s21 = sphi %s3100_s21, %s26_s21  }
   0x3   : > { %p462_p1 = scmp.lt.s32.totalorder %s3011_s21, 3 }
   0x5   : > { %p463_p2 = pnand %p2384_p0, %p462_p1 }
   0x6   : > { %p512_p3 = scmp.lt.s32.totalorder (!%p463_p2), %s2380_s22, 1  ;;  %vm530_vm0 = vcmask (!%p463_p2), 523264   ;;  %vm543_vm1 = vcmask (!%p463_p2), 519168   ;;  %s3708_s26 = sld [smem:[#allocation2_spill]] (!%p463_p2)  ;;  %v2872_v35 = vld [vmem:[%s3693_s3] sm:$0xff] (!%p463_p2)   ;;  %v3013_v37 = vmov (!%p463_p2), 0.0  }
   0x7   : > { %466 = sbr.rel (%p463_p2) target bundleno = 3465 (0xd89), region = 84  ;;  %v2873_v36 = vld [vmem:[%s3694_s4] sm:$0xff] (!%p463_p2)   ;;  %2593 = vmatprep.subr.bf16.mxu0 (!%p463_p2), %v3013_v37  ;;  %2613 = vmatprep.subr.bf16.mxu1 (!%p463_p2), %v3013_v37  ;;  %v2874_v38 = vld [vmem:[%s3693_s3 + $0x8] sm:$0xff] (!%p463_p2)   ;;  %v2876_v40 = vld [vmem:[%s3693_s3 + $0x10] sm:$0xff] (!%p463_p2)   ;;  %vm3014_vm2 = vmmov (!%p463_p2), 0   ;;  %vm907_vm3 = vcmask (!%p463_p2), 130048  }
   0x8   : > { %2594 = vmatpush3.bf16.msra.mxu0 (!%p463_p2), %v2872_v35  ;;  %2614 = vmatpush3.bf16.msra.mxu1 (!%p463_p2), %v2873_v36  ;;  %v2875_v39 = vld [vmem:[%s3694_s4 + $0x8] sm:$0xff] (!%p463_p2)   ;;  %v2877_v41 = vld [vmem:[%s3694_s4 + $0x10] sm:$0xff] (!%p463_p2)   ;;  %v2878_v42 = vld [vmem:[%s3693_s3 + $0x18] sm:$0xff] (!%p463_p2)   ;;  %vm1054_vm4 = vcmask (!%p463_p2), 1041408   ;;  %vm982_vm5 = vcmask (!%p463_p2), 293888   ;;  %vm995_vm6 = vcmask (!%p463_p2), 289792  }
   0x9   : > { %2595 = vmatprep.subr.bf16.mxu0 (!%p463_p2), %v3013_v37  ;;  %2615 = vmatprep.subr.bf16.mxu1 (!%p463_p2), %v3013_v37  ;;  %v2879_v43 = vld [vmem:[%s3694_s4 + $0x18] sm:$0xff] (!%p463_p2)   ;;  %v2387_v61 = vld [vmem:[%s3691_s1] ss:$0 sm:$0xff] (!%p463_p2) }
   0xa   : > { %2601 = vmatprep.mubr.msk.bf16.mxu0 (!%p463_p2), %vm3014_vm2, %v3013_v37  ;;  %2621 = vmatprep.mubr.msk.bf16.mxu1 (!%p463_p2), %vm3014_vm2, %v3013_v37 }
   0xc   : > { %2596 = vmatpush3.bf16.msra.mxu0 (!%p463_p2), %v2874_v38  ;;  %2616 = vmatpush3.bf16.msra.mxu1 (!%p463_p2), %v2875_v39 }
   0xd   : > { %2597 = vmatprep.subr.bf16.mxu0 (!%p463_p2), %v3013_v37  ;;  %2617 = vmatprep.subr.bf16.mxu1 (!%p463_p2), %v3013_v37 }
   0xe   : > { %s3710_s22 = smov (!%p512_p3, %s2380_s22), 1 }
   0xf   : > { %s2861_s23 = smul.u32 40, %s3710_s22 }
  0x10   : > { %2598 = vmatpush3.bf16.msra.mxu0 %v2876_v40  ;;  %2618 = vmatpush3.bf16.msra.mxu1 %v2877_v41 }
  0x11   : > { %s3116_s27 = scalar_lea.vmem %s3708_s26, %s2861_s23  ;;  %2599 = vmatprep.subr.bf16.mxu0 %v3013_v37  ;;  %2619 = vmatprep.subr.bf16.mxu1 %v3013_v37  ;;  %s521_s17 = scalar_lea.vmem %s3706_s16, %s2861_s23 }
  0x12   : > { %v523_v0 = vld [vmem:[%s3116_s27] sm:$0xff]  ;;  %v525_v1 = vld [vmem:[%s3116_s27 + $0x10] sm:$0xff]  ;;  %v524_v2 = vld [vmem:[%s3116_s27 + $0x8] sm:$0xff] }
  0x13   : > { %v531_v3 = vsel %vm530_vm0, %v523_v0, 0.0  ;;  %v537_v4 = vsel %vm530_vm0, %v525_v1, 0.0  ;;  %v534_v5 = vsel %vm530_vm0, %v524_v2, 0.0  ;;  %v526_v6 = vld [vmem:[%s3116_s27 + $0x18] sm:$0xff]  ;;  %v527_v7 = vld [vmem:[%s3116_s27 + $0x20] sm:$0xf] }
  0x14   : > { %532 = vadd.xlane.f32.xlu0 %v531_v3  ;;  %538 = vadd.xlane.f32.xlu1 %v537_v4  ;;  %v540_v8 = vsel %vm530_vm0, %v526_v6, 0.0  ;;  %v544_v9 = vsel %vm543_vm1, %v527_v7, 0.0 }
  0x15   : > { %2600 = vmatpush3.bf16.msra.mxu0 %v2878_v42  ;;  %2620 = vmatpush3.bf16.msra.mxu1 %v2879_v43 }
  0x16   : > { %2633 = vmatprep.subr.bf16.mxu0 %v3013_v37  ;;  %2653 = vmatprep.subr.bf16.mxu1 %v3013_v37 }
  0x18   : > { %535 = vadd.xlane.f32.xlu0 %v534_v5  ;;  %541 = vadd.xlane.f32.xlu1 %v540_v8 }
  0x1c   : > { %545 = vadd.xlane.f32.xlu0 %v544_v9 }
  0xa1   : > { %v533_v10 = vpop.xlane.xlu0 %532  ;;  %v539_v11 = vpop.xlane.xlu1 %538 }
  0xa2   : > { %v548_v12 = vmul.f32 0.015625, %v533_v10  ;;  %v550_v13 = vmul.f32 0.015625, %v539_v11  ;;  %v2880_v11 = vld [vmem:[%s3695_s5] sm:$0xff]  }
  0xa4   : > { %v3128_v14 = vsub.f32 %v523_v0, %v548_v12  ;;  %v3130_v15 = vsub.f32 %v525_v1, %v550_v13 }
  0xa5   : > { %v536_v16 = vpop.xlane.xlu0 %535  ;;  %v542_v17 = vpop.xlane.xlu1 %541 }
  0xa6   : > { %v549_v18 = vmul.f32 0.015625, %v536_v16  ;;  %v551_v19 = vmul.f32 0.015625, %v542_v17  ;;  %v558_v20 = vmul.f32 %v3128_v14, %v3128_v14  ;;  %v560_v21 = vmul.f32 %v3130_v15, %v3130_v15  ;;  %v2881_v16 = vld [vmem:[%s3695_s5 + $0x8] sm:$0xff]  }
  0xa8   : > { %v3136_v22 = vsub.f32 %v524_v2, %v549_v18  ;;  %v3138_v23 = vsub.f32 %v526_v6, %v551_v19  ;;  %v563_v24 = vsel %vm530_vm0, %v558_v20, 0.0  ;;  %v569_v27 = vsel %vm530_vm0, %v560_v21, 0.0  ;;  %v2388_v2 = vld [vmem:[%s3692_s2] ss:$0 sm:$0xff]  ;;  %v2882_v20 = vld [vmem:[%s3695_s5 + $0x10] sm:$0xff]  }
  0xa9   : > { %564 = vadd.xlane.f32.xlu1 %v563_v24  ;;  %v546_v25 = vpop.xlane.xlu0 %545 }
  0xaa   : > { %v552_v26 = vmul.f32 0.015625, %v546_v25  ;;  %v559_v28 = vmul.f32 %v3136_v22, %v3136_v22  ;;  %v561_v29 = vmul.f32 %v3138_v23, %v3138_v23 }
  0xac   : > { %v3146_v30 = vsub.f32 %v527_v7, %v552_v26  ;;  %v566_v31 = vsel %vm530_vm0, %v559_v28, 0.0  ;;  %v572_v32 = vsel %vm530_vm0, %v561_v29, 0.0 }
  0xad   : > { %570 = vadd.xlane.f32.xlu1 %v569_v27  ;;  %567 = vadd.xlane.f32.xlu0 %v566_v31 }
  0xae   : > { %v562_v33 = vmul.f32 %v3146_v30, %v3146_v30 }
  0xb0   : > { %v575_v34 = vsel %vm543_vm1, %v562_v33, 0.0 }
  0xb1   : > { %573 = vadd.xlane.f32.xlu0 %v572_v32  ;;  %576 = vadd.xlane.f32.xlu1 %v575_v34 }
 0x136   : > { %v565_v44 = vpop.xlane.xlu1 %564 }
 0x137   : > { %v578_v45 = vmul.f32 0.015625, %v565_v44 }
 0x139   : > { %v583_v46 = vadd.f32 1e-05, %v578_v45 }
 0x13a   : > { %v571_v47 = vpop.xlane.xlu1 %570  ;;  %v568_v48 = vpop.xlane.xlu0 %567 }
 0x13b   : > { %2910 = vrsqrt.f32 %v583_v46  ;;  %v580_v49 = vmul.f32 0.015625, %v571_v47  ;;  %v579_v50 = vmul.f32 0.015625, %v568_v48 }
 0x13d   : > { %v584_v51 = vadd.f32 1e-05, %v579_v50  ;;  %v585_v52 = vadd.f32 1e-05, %v580_v49 }
 0x13e   : > { %v577_v53 = vpop.xlane.xlu1 %576  ;;  %v574_v54 = vpop.xlane.xlu0 %573 }
 0x13f   : > { %v581_v55 = vmul.f32 0.015625, %v574_v54  ;;  %2912 = vrsqrt.f32 %v584_v51  ;;  %v582_v56 = vmul.f32 0.015625, %v577_v53 }
 0x140   : > { %2914 = vrsqrt.f32 %v585_v52 }
 0x141   : > { %v586_v57 = vadd.f32 1e-05, %v581_v55  ;;  %v587_v58 = vadd.f32 1e-05, %v582_v56 }
 0x143   : > { %2916 = vrsqrt.f32 %v586_v57 }
 0x144   : > { %2918 = vrsqrt.f32 %v587_v58 }
 0x145   : > { %v2911_v59 = vpop.eup %2910 }
 0x146   : > { %v593_v60 = vmul.f32 %v2911_v59, %v3128_v14 }
 0x148   : > { %v604_v63 = vmul.f32 %v2387_v61, %v593_v60 }
 0x149   : > { %v2913_v62 = vpop.eup %2912 }
 0x14a   : > { %v594_v0 = vmul.f32 %v2913_v62, %v3136_v22  ;;  %v2915_v1 = vpop.eup %2914  ;;  %v615_v5 = vadd.f32 %v2388_v2, %v604_v63  ;;  %v2883_v22 = vld [vmem:[%s3695_s5 + $0x18] sm:$0xff]  }
 0x14b   : > { %v595_v6 = vmul.f32 %v2915_v1, %v3130_v15 }
 0x14c   : > { %v605_v3 = vmul.f32 %v2387_v61, %v594_v0 }
 0x14d   : > { %v2917_v4 = vpop.eup %2916  ;;  %v606_v13 = vmul.f32 %v2387_v61, %v595_v6 }
 0x14e   : > { %v616_v7 = vadd.f32 %v2388_v2, %v605_v3  ;;  %v596_v8 = vmul.f32 %v2917_v4, %v3138_v23  ;;  %v2919_v12 = vpop.eup %2918  ;;  %v2885_v3 = vld [vmem:[%s3693_s3 + $0x28] sm:$0xff]  }
 0x14f   : > { %v597_v14 = vmul.f32 %v2919_v12, %v3146_v30  ;;  %v617_v17 = vadd.f32 %v2388_v2, %v606_v13  ;;  %v2887_v12 = vld [vmem:[%s3693_s3 + $0x38] sm:$0xff]  }
 0x150   : > { %v607_v9 = vmul.f32 %v2387_v61, %v596_v8  ;;  %v3201_v10 = vpack.c.bf16 %v616_v7, %v615_v5 }
 0x151   : > { %v608_v18 = vmul.f32 %v2387_v61, %v597_v14 }
 0x152   : > { %2602 = vmatmul.mubr.msk.bf16.vlgmr.msra.gmra.mrb[0].mxu0 %vm530_vm0, %v3201_v10  ;;  %2622 = vmatmul.mubr.msk.bf16.vlgmr.msra.gmra.mrb[0].mxu1 %vm530_vm0, %v3201_v10  ;;  %v618_v15 = vadd.f32 %v2388_v2, %v607_v9  ;;  %v2886_v9 = vld [vmem:[%s3693_s3 + $0x30] sm:$0xff]  }
 0x153   : > { %2605 = vmatprep.mubr.msk.bf16.mxu0 %vm3014_vm2, %v3013_v37  ;;  %2625 = vmatprep.mubr.msk.bf16.mxu1 %vm3014_vm2, %v3013_v37  ;;  %v619_v21 = vadd.f32 %v2388_v2, %v608_v18  ;;  %v2884_v2 = vld [vmem:[%s3693_s3 + $0x20] sm:$0xff]  }
 0x154   : > { %2634 = vmatpush3.bf16.msra.mxu0 %v2880_v11  ;;  %v3219_v19 = vpack.c.bf16 %v618_v15, %v617_v17 }
 0x155   : > { %2635 = vmatprep.subr.bf16.mxu0 %v3013_v37  ;;  %v3237_v23 = vpack.c.bf16 %v619_v21, %v619_v21  ;;  %v2888_v21 = vld [vmem:[%s3695_s5 + $0x20] sm:$0xff]  }
 0x158   : > { %2636 = vmatpush3.bf16.msra.mxu0 %v2881_v16 }
 0x159   : > { %2637 = vmatprep.subr.bf16.mxu0 %v3013_v37 }
 0x15a   : > { %2606 = vmatmul.mubr.msk.bf16.gmra.mrb[4].mxu0 %vm530_vm0, %v3219_v19  ;;  %2626 = vmatmul.mubr.msk.bf16.gmra.mrb[4].mxu1 %vm530_vm0, %v3219_v19 }
 0x15b   : > { %2609 = vmatprep.mubr.msk.bf16.mxu0 %vm3014_vm2, %v3013_v37  ;;  %2629 = vmatprep.mubr.msk.bf16.mxu1 %vm3014_vm2, %v3013_v37 }
 0x15c   : > { %2638 = vmatpush3.bf16.msra.mxu0 %v2882_v20 }
 0x15d   : > { %2639 = vmatprep.subr.bf16.mxu0 %v3013_v37 }
 0x160   : > { %2640 = vmatpush3.bf16.msra.mxu0 %v2883_v22  ;;  %v2889_v22 = vld [vmem:[%s3695_s5 + $0x28] sm:$0xff]  }
 0x161   : > { %2671 = vmatprep.subr.bf16.mxu0 %v3013_v37 }
 0x162   : > { %2610 = vmatmul.mubr.msk.bf16.gmra.mrb[8].mxu0 %vm530_vm0, %v3237_v23  ;;  %2630 = vmatmul.mubr.msk.bf16.gmra.mrb[8].mxu1 %vm530_vm0, %v3237_v23 }
 0x163   : > { %2641 = vmatprep.mubr.msk.bf16.mxu0 %vm3014_vm2, %v3013_v37  ;;  %2659 = vmatprep.mubr.msk.bf16.mxu1 %vm3014_vm2, %v3013_v37 }
 0x16a   : > { %2642 = vmatmul.mubr.msk.bf16.vlgmr.msra.gmra.mrb[12].mxu0 %vm530_vm0, %v3201_v10 }
 0x16b   : > { %2645 = vmatprep.mubr.msk.bf16.mxu0 %vm3014_vm2, %v3013_v37 }
 0x172   : > { %2646 = vmatmul.mubr.msk.bf16.gmra.mrb[16].mxu0 %vm530_vm0, %v3219_v19 }
 0x173   : > { %2649 = vmatprep.mubr.msk.bf16.mxu0 %vm3014_vm2, %v3013_v37 }
 0x17a   : > { %2650 = vmatmul.mubr.msk.bf16.gmra.mrb[20].mxu0 %vm530_vm0, %v3237_v23 }
 0x17b   : > { %2677 = vmatprep.mubr.msk.bf16.mxu0 %vm3014_vm2, %v3013_v37 }
 0x225   : > { %v698_v24 = vpop.f32.mrb[0].mxu0  ;;  %v791_v25 = vpop.f32.mrb[0].mxu1 }
 0x226   : > { %v2603_v26 = vpop.f32.mrb[1].mxu0  ;;  %v2623_v27 = vpop.f32.mrb[1].mxu1  ;;  %v720_v30 = vmul.f32 0.25, %v698_v24  ;;  %v2890_v24 = vld [vmem:[%s3695_s5 + $0x30] sm:$0xff]  }
 0x227   : > { %v701_v28 = vpop.f32.mrb[2].mxu0  ;;  %v794_v29 = vpop.f32.mrb[2].mxu1 }
 0x228   : > { %v721_v31 = vmul.f32 0.25, %v701_v28  ;;  %v904_v32 = vpack.c.bf16 %v794_v29, %v791_v25  ;;  %v2604_v33 = vpop.f32.mrb[3].mxu0  ;;  %v2624_v34 = vpop.f32.mrb[3].mxu1  ;;  %v2891_v25 = vld [vmem:[%s3695_s5 + $0x38] sm:$0xff]  }
 0x22a   : > { %v901_v35 = vpack.c.bf16 %v721_v31, %v720_v30  ;;  %v918_v36 = vsel %vm907_vm3, %v904_v32, 0 }
 0x22b   : > { %2654 = vmatpush3.bf16.xpose.msra.mxu1 %v918_v36 }
 0x22c   : > { %2655 = vmatprep.subr.bf16.mxu1 %v3013_v37 }
 0x22d   : > { %v706_v38 = vpop.f32.mrb[4].mxu0  ;;  %v799_v39 = vpop.f32.mrb[4].mxu1 }
 0x22e   : > { %v2607_v40 = vpop.f32.mrb[5].mxu0  ;;  %v2627_v41 = vpop.f32.mrb[5].mxu1  ;;  %v722_v44 = vmul.f32 0.25, %v706_v38 }
 0x22f   : > { %v709_v42 = vpop.f32.mrb[6].mxu0  ;;  %v802_v43 = vpop.f32.mrb[6].mxu1 }
 0x230   : > { %v723_v45 = vmul.f32 0.25, %v709_v42  ;;  %v905_v46 = vpack.c.bf16 %v802_v43, %v799_v39  ;;  %v2608_v47 = vpop.f32.mrb[7].mxu0  ;;  %v2628_v48 = vpop.f32.mrb[7].mxu1 }
 0x232   : > { %v902_v49 = vpack.c.bf16 %v723_v45, %v722_v44  ;;  %v921_v50 = vsel %vm907_vm3, %v905_v46, 0 }
 0x233   : > { %2656 = vmatpush3.bf16.xpose.msra.mxu1 %v921_v50 }
 0x234   : > { %2657 = vmatprep.subr.bf16.mxu1 %v3013_v37 }
 0x235   : > { %v714_v51 = vpop.f32.mrb[8].mxu0  ;;  %v807_v52 = vpop.f32.mrb[8].mxu1 }
 0x236   : > { %v906_v53 = vpack.c.bf16 %v807_v52, %v807_v52  ;;  %v2611_v54 = vpop.f32.mrb[9].mxu0  ;;  %v2631_v55 = vpop.f32.mrb[9].mxu1  ;;  %v724_v11 = vmul.f32 0.25, %v714_v51 }
 0x237   : > { %v717_v56 = vpop.f32.mrb[10].mxu0  ;;  %v810_v57 = vpop.f32.mrb[10].mxu1 }
 0x238   : > { %v2612_v58 = vpop.f32.mrb[11].mxu0  ;;  %v2632_v59 = vpop.f32.mrb[11].mxu1  ;;  %v924_v60 = vsel %vm907_vm3, %v906_v53, 0  ;;  %v903_v17 = vpack.c.bf16 %v724_v11, %v724_v11 }
 0x23b   : > { %2658 = vmatpush3.bf16.xpose.msra.mxu1 %v924_v60 }
 0x23c   : > { %2689 = vmatprep.subr.bf16.mxu1 %v3013_v37 }
 0x23d   : > { %v879_v61 = vpop.f32.mrb[12].mxu0 }
 0x23e   : > { %v2643_v62 = vpop.f32.mrb[13].mxu0 }
 0x23f   : > { %v882_v63 = vpop.f32.mrb[14].mxu0 }
 0x240   : > { %v1042_v0 = vpack.c.bf16 %v882_v63, %v879_v61  ;;  %v2644_v1 = vpop.f32.mrb[15].mxu0 }
 0x242   : > { %2660 = vmatmul.mubr.msk.bf16.vlgmr.msra.gmra.mrb[12].mxu1 %vm907_vm3, %v901_v35  ;;  %2672 = vmatpush3.bf16.msra.mxu0 %v1042_v0 }
 0x243   : > { %2663 = vmatprep.mubr.msk.bf16.mxu1 %vm3014_vm2, %v3013_v37  ;;  %2673 = vmatprep.subr.bf16.mxu0 %v3013_v37 }
 0x244   : > { %2690 = vmatpush3.bf16.msra.mxu1 %v2884_v2 }
 0x245   : > { %v887_v4 = vpop.f32.mrb[16].mxu0  ;;  %2691 = vmatprep.subr.bf16.mxu1 %v3013_v37 }
 0x246   : > { %v2647_v5 = vpop.f32.mrb[17].mxu0 }
 0x247   : > { %v890_v6 = vpop.f32.mrb[18].mxu0 }
 0x248   : > { %v1043_v7 = vpack.c.bf16 %v890_v6, %v887_v4  ;;  %v2648_v8 = vpop.f32.mrb[19].mxu0  ;;  %2692 = vmatpush3.bf16.msra.mxu1 %v2885_v3 }
 0x249   : > { %2693 = vmatprep.subr.bf16.mxu1 %v3013_v37 }
 0x24a   : > { %2664 = vmatmul.mubr.msk.bf16.gmra.mrb[16].mxu1 %vm907_vm3, %v902_v49  ;;  %2674 = vmatpush3.bf16.msra.mxu0 %v1043_v7 }
 0x24b   : > { %2675 = vmatprep.subr.bf16.mxu0 %v3013_v37  ;;  %2667 = vmatprep.mubr.msk.bf16.mxu1 %vm3014_vm2, %v3013_v37 }
 0x24c   : > { %2694 = vmatpush3.bf16.msra.mxu1 %v2886_v9 }
 0x24d   : > { %v895_v13 = vpop.f32.mrb[20].mxu0  ;;  %2695 = vmatprep.subr.bf16.mxu1 %v3013_v37 }
 0x24e   : > { %v1044_v14 = vpack.c.bf16 %v895_v13, %v895_v13  ;;  %v2651_v15 = vpop.f32.mrb[21].mxu0 }
 0x24f   : > { %v898_v16 = vpop.f32.mrb[22].mxu0 }
 0x250   : > { %v1056_v18 = vsel %vm1054_vm4, %v1044_v14, 0  ;;  %v2652_v20 = vpop.f32.mrb[23].mxu0  ;;  %2696 = vmatpush3.bf16.msra.mxu1 %v2887_v12 }
 0x251   : > { %2676 = vmatpush3.bf16.msra.mxu0 %v1056_v18  ;;  %2729 = vmatprep.subr.bf16.mxu1 %v3013_v37 }
 0x252   : > { %2668 = vmatmul.mubr.msk.bf16.gmra.mrb[20].mxu1 %vm907_vm3, %v903_v17  ;;  %2709 = vmatprep.subr.bf16.mxu0 %v3013_v37 }
 0x253   : > { %2697 = vmatprep.mubr.msk.bf16.mxu1 %vm3014_vm2, %v3013_v37 }
 0x25a   : > { %2698 = vmatmul.mubr.msk.bf16.vlgmr.msra.gmra.mrb[24].mxu1 %vm530_vm0, %v3201_v10 }
 0x25b   : > { %2701 = vmatprep.mubr.msk.bf16.mxu1 %vm3014_vm2, %v3013_v37  ;;  %2730 = vmatpush3.bf16.msra.mxu1 %v2888_v21 }
 0x25c   : > { %2731 = vmatprep.subr.bf16.mxu1 %v3013_v37 }
 0x25f   : > { %2732 = vmatpush3.bf16.msra.mxu1 %v2889_v22 }
 0x260   : > { %2733 = vmatprep.subr.bf16.mxu1 %v3013_v37 }
 0x262   : > { %2702 = vmatmul.mubr.msk.bf16.gmra.mrb[28].mxu1 %vm530_vm0, %v3219_v19 }
 0x263   : > { %2705 = vmatprep.mubr.msk.bf16.mxu1 %vm3014_vm2, %v3013_v37  ;;  %2734 = vmatpush3.bf16.msra.mxu1 %v2890_v24 }
 0x264   : > { %2735 = vmatprep.subr.bf16.mxu1 %v3013_v37 }
 0x267   : > { %2736 = vmatpush3.bf16.msra.mxu1 %v2891_v25 }
 0x268   : > { %2767 = vmatprep.subr.bf16.mxu1 %v3013_v37 }
 0x26a   : > { %2706 = vmatmul.mubr.msk.bf16.gmra.mrb[32].mxu1 %vm530_vm0, %v3237_v23 }
 0x26b   : > { %2737 = vmatprep.mubr.msk.bf16.mxu1 %vm3014_vm2, %v3013_v37 }
 0x272   : > { %2738 = vmatmul.mubr.msk.bf16.vlgmr.msra.gmra.mrb[36].mxu1 %vm530_vm0, %v3201_v10 }
 0x273   : > { %2741 = vmatprep.mubr.msk.bf16.mxu1 %vm3014_vm2, %v3013_v37 }
 0x27a   : > { %2742 = vmatmul.mubr.msk.bf16.gmra.mrb[40].mxu1 %vm530_vm0, %v3219_v19 }
 0x27b   : > { %2745 = vmatprep.mubr.msk.bf16.mxu1 %vm3014_vm2, %v3013_v37 }
 0x282   : > { %2746 = vmatmul.mubr.msk.bf16.gmra.mrb[44].mxu1 %vm530_vm0, %v3237_v23 }
 0x283   : > { %2773 = vmatprep.mubr.msk.bf16.mxu1 %vm3014_vm2, %v3013_v37 }
 0x315   : > { %v3335_v26 = vpop.f32.mrb[12].mxu1 }
 0x316   : > { %v2661_v27 = vpop.f32.mrb[13].mxu1  ;;  %v983_v28 = vsel %vm982_vm5, %v3335_v26, -inf }
 0x317   : > { %984 = vmax.xlane.f32.xlu0 %v983_v28  ;;  %v3339_v29 = vpop.f32.mrb[14].mxu1 }
 0x318   : > { %v2662_v30 = vpop.f32.mrb[15].mxu1  ;;  %v986_v31 = vsel %vm982_vm5, %v3339_v29, -inf }
 0x319   : > { %987 = vmax.xlane.f32.xlu1 %v986_v31 }
 0x31d   : > { %v3343_v32 = vpop.f32.mrb[16].mxu1 }
 0x31e   : > { %v2665_v33 = vpop.f32.mrb[17].mxu1  ;;  %v989_v34 = vsel %vm982_vm5, %v3343_v32, -inf }
 0x31f   : > { %990 = vmax.xlane.f32.xlu0 %v989_v34  ;;  %v3347_v35 = vpop.f32.mrb[18].mxu1 }
 0x320   : > { %v2666_v36 = vpop.f32.mrb[19].mxu1  ;;  %v992_v38 = vsel %vm982_vm5, %v3347_v35, -inf }
 0x321   : > { %993 = vmax.xlane.f32.xlu1 %v992_v38 }
 0x325   : > { %v3351_v39 = vpop.f32.mrb[20].mxu1 }
 0x326   : > { %v2669_v40 = vpop.f32.mrb[21].mxu1  ;;  %v996_v41 = vsel %vm995_vm6, %v3351_v39, -inf }
 0x327   : > { %997 = vmax.xlane.f32.xlu0 %v996_v41  ;;  %v979_v42 = vpop.f32.mrb[22].mxu1 }
 0x328   : > { %v2670_v43 = vpop.f32.mrb[23].mxu1 }
 0x32d   : > { %v1186_v44 = vpop.f32.mrb[24].mxu1 }
 0x32e   : > { %v2699_v45 = vpop.f32.mrb[25].mxu1  ;;  %v3355_v47 = vmul.f32 0.25, %v1186_v44 }
 0x32f   : > { %v1189_v46 = vpop.f32.mrb[26].mxu1 }
 0x330   : > { %v3357_v48 = vmul.f32 0.25, %v1189_v46  ;;  %v2700_v49 = vpop.f32.mrb[27].mxu1 }
 0x332   : > { %v1391_v50 = vpack.c.bf16 %v3357_v48, %v3355_v47 }
 0x335   : > { %v1194_v51 = vpop.f32.mrb[28].mxu1 }
 0x336   : > { %v2703_v52 = vpop.f32.mrb[29].mxu1  ;;  %v3361_v54 = vmul.f32 0.25, %v1194_v51 }
 0x337   : > { %v1197_v53 = vpop.f32.mrb[30].mxu1 }
 0x338   : > { %v3363_v55 = vmul.f32 0.25, %v1197_v53  ;;  %v2704_v56 = vpop.f32.mrb[31].mxu1 }
 0x339   : > { %v2892_v56 = vld [vmem:[%s3694_s4 + $0x20] sm:$0xff]  }
 0x33a   : > { %v1392_v57 = vpack.c.bf16 %v3363_v55, %v3361_v54 }
 0x33d   : > { %v3367_v58 = vpop.f32.mrb[32].mxu1 }
 0x33e   : > { %v2707_v59 = vpop.f32.mrb[33].mxu1 }
 0x33f   : > { %v1205_v60 = vpop.f32.mrb[34].mxu1 }
 0x340   : > { %v2708_v61 = vpop.f32.mrb[35].mxu1 }
 0x345   : > { %v1369_v62 = vpop.f32.mrb[36].mxu1 }
 0x346   : > { %v2739_v63 = vpop.f32.mrb[37].mxu1 }
 0x347   : > { %v1372_v0 = vpop.f32.mrb[38].mxu1 }
 0x348   : > { %v1529_v1 = vpack.c.bf16 %v1372_v0, %v1369_v62  ;;  %v2740_v2 = vpop.f32.mrb[39].mxu1  ;;  %v2893_v62 = vld [vmem:[%s3694_s4 + $0x28] sm:$0xff]  }
 0x349   : > { %v2894_v2 = vld [vmem:[%s3694_s4 + $0x30] sm:$0xff]  }
 0x34a   : > { %2768 = vmatpush3.bf16.msra.mxu1 %v1529_v1 }
 0x34b   : > { %2769 = vmatprep.subr.bf16.mxu1 %v3013_v37 }
 0x34d   : > { %v1377_v3 = vpop.f32.mrb[40].mxu1 }
 0x34e   : > { %v2743_v4 = vpop.f32.mrb[41].mxu1 }
 0x34f   : > { %v1380_v5 = vpop.f32.mrb[42].mxu1 }
 0x350   : > { %v1530_v6 = vpack.c.bf16 %v1380_v5, %v1377_v3  ;;  %v2744_v7 = vpop.f32.mrb[43].mxu1  ;;  %v2895_v5 = vld [vmem:[%s3694_s4 + $0x38] sm:$0xff]  }
 0x352   : > { %2770 = vmatpush3.bf16.msra.mxu1 %v1530_v6 }
 0x353   : > { %2771 = vmatprep.subr.bf16.mxu1 %v3013_v37 }
 0x355   : > { %v1385_v8 = vpop.f32.mrb[44].mxu1 }
 0x356   : > { %v1531_v9 = vpack.c.bf16 %v1385_v8, %v1385_v8  ;;  %v2747_v11 = vpop.f32.mrb[45].mxu1 }
 0x357   : > { %v1388_v12 = vpop.f32.mrb[46].mxu1 }
 0x358   : > { %v1542_v13 = vsel %vm1054_vm4, %v1531_v9, 0  ;;  %v2748_v14 = vpop.f32.mrb[47].mxu1 }
 0x359   : > { %2772 = vmatpush3.bf16.msra.mxu1 %v1542_v13 }
 0x35a   : > { %2799 = vmatprep.subr.bf16.mxu1 %v3013_v37 }
 0x3a4   : > { %v985_v15 = vpop.xlane.xlu0 %984 }
 0x3a5   : > { %v999_v16 = vsub.f32 %v3335_v26, %v985_v15 }
 0x3a6   : > { %v988_v17 = vpop.xlane.xlu1 %987 }
 0x3a7   : > { %v1004_v18 = vmul.f32 1.442695, %v999_v16  ;;  %v1000_v20 = vsub.f32 %v3339_v29, %v988_v17 }
 0x3a9   : > { %2920 = vpow2.f32 %v1004_v18  ;;  %v1006_v21 = vmul.f32 1.442695, %v1000_v20 }
 0x3ab   : > { %2922 = vpow2.f32 %v1006_v21 }
 0x3ac   : > { %v991_v22 = vpop.xlane.xlu0 %990 }
 0x3ad   : > { %v1001_v24 = vsub.f32 %v3343_v32, %v991_v22 }
 0x3ae   : > { %v994_v25 = vpop.xlane.xlu1 %993 }
 0x3af   : > { %v1008_v27 = vmul.f32 1.442695, %v1001_v24  ;;  %v1002_v28 = vsub.f32 %v3347_v35, %v994_v25 }
 0x3b1   : > { %2924 = vpow2.f32 %v1008_v27  ;;  %v1010_v30 = vmul.f32 1.442695, %v1002_v28 }
 0x3b3   : > { %v2921_v31 = vpop.eup %2920  ;;  %2926 = vpow2.f32 %v1010_v30 }
 0x3b4   : > { %v998_v33 = vpop.xlane.xlu0 %997  ;;  %v1014_v26 = vsel %vm982_vm5, %v2921_v31, 0.0 }
 0x3b5   : > { %v2923_v34 = vpop.eup %2922  ;;  %v1003_v29 = vsub.f32 %v3351_v39, %v998_v33  ;;  %1015 = vadd.xlane.f32.xlu1 %v1014_v26 }
 0x3b6   : > { %v1017_v36 = vsel %vm982_vm5, %v2923_v34, 0.0 }
 0x3b7   : > { %v1012_v38 = vmul.f32 1.442695, %v1003_v29  ;;  %1018 = vadd.xlane.f32.xlu0 %v1017_v36 }
 0x3b9   : > { %2928 = vpow2.f32 %v1012_v38 }
 0x3bb   : > { %v2925_v32 = vpop.eup %2924 }
 0x3bc   : > { %v1020_v40 = vsel %vm982_vm5, %v2925_v32, 0.0 }
 0x3bd   : > { %v2927_v35 = vpop.eup %2926  ;;  %1021 = vadd.xlane.f32.xlu1 %v1020_v40 }
 0x3be   : > { %v1023_v41 = vsel %vm982_vm5, %v2927_v35, 0.0 }
 0x3bf   : > { %1024 = vadd.xlane.f32.xlu0 %v1023_v41 }
 0x3c3   : > { %v2929_v42 = vpop.eup %2928 }
 0x3c4   : > { %v1026_v43 = vsel %vm995_vm6, %v2929_v42, 0.0 }
 0x3c5   : > { %1027 = vadd.xlane.f32.xlu1 %v1026_v43 }
 0x442   : > { %v1016_v44 = vpop.xlane.xlu1 %1015 }
 0x443   : > { %2930 = vrcp.f32 %v1016_v44 }
 0x444   : > { %v1019_v39 = vpop.xlane.xlu0 %1018 }
 0x445   : > { %2932 = vrcp.f32 %v1019_v39 }
 0x44a   : > { %v1022_v45 = vpop.xlane.xlu1 %1021 }
 0x44b   : > { %2934 = vrcp.f32 %v1022_v45 }
 0x44c   : > { %v1025_v46 = vpop.xlane.xlu0 %1024 }
 0x44d   : > { %v2931_v49 = vpop.eup %2930  ;;  %2936 = vrcp.f32 %v1025_v46 }
 0x44e   : > { %v1034_v52 = vmul.f32 %v2931_v49, %v2921_v31 }
 0x44f   : > { %v2933_v51 = vpop.eup %2932 }
 0x450   : > { %v1035_v53 = vmul.f32 %v2933_v51, %v2923_v34 }
 0x452   : > { %v1039_v59 = vpack.c.bf16 %v1035_v53, %v1034_v52  ;;  %v1028_v60 = vpop.xlane.xlu1 %1027 }
 0x453   : > { %2938 = vrcp.f32 %v1028_v60 }
 0x454   : > { %2678 = vmatmul.mubr.msk.bf16.vlgmr.msra.gmra.mrb[24].mxu0 %vm982_vm5, %v1039_v59 }
 0x455   : > { %v2935_v61 = vpop.eup %2934  ;;  %2710 = vmatpush3.bf16.msra.mxu0 %v2892_v56  ;;  %2681 = vmatprep.mubr.msk.bf16.mxu0 %vm3014_vm2, %v3013_v37 }
 0x456   : > { %2711 = vmatprep.subr.bf16.mxu0 %v3013_v37  ;;  %v1036_v0 = vmul.f32 %v2935_v61, %v2925_v32 }
 0x457   : > { %v2937_v63 = vpop.eup %2936 }
 0x458   : > { %v1037_v1 = vmul.f32 %v2937_v63, %v2927_v35 }
 0x459   : > { %2712 = vmatpush3.bf16.msra.mxu0 %v2893_v62 }
 0x45a   : > { %v1040_v3 = vpack.c.bf16 %v1037_v1, %v1036_v0  ;;  %2713 = vmatprep.subr.bf16.mxu0 %v3013_v37 }
 0x45c   : > { %2682 = vmatmul.mubr.msk.bf16.gmra.mrb[28].mxu0 %vm982_vm5, %v1040_v3 }
 0x45d   : > { %v2939_v4 = vpop.eup %2938  ;;  %2714 = vmatpush3.bf16.msra.mxu0 %v2894_v2  ;;  %2685 = vmatprep.mubr.msk.bf16.mxu0 %vm3014_vm2, %v3013_v37 }
 0x45e   : > { %v1038_v6 = vmul.f32 %v2939_v4, %v2929_v42  ;;  %2715 = vmatprep.subr.bf16.mxu0 %v3013_v37  ;;  %v1212_v42 = vmul.f32 0.25, %v3367_v58 }
 0x460   : > { %v1041_v7 = vpack.c.bf16 %v1038_v6, %v1038_v6  ;;  %v1393_v43 = vpack.c.bf16 %v1212_v42, %v1212_v42 }
 0x461   : > { %2716 = vmatpush3.bf16.msra.mxu0 %v2895_v5 }
 0x462   : > { %2749 = vmatprep.subr.bf16.mxu0 %v3013_v37 }
 0x464   : > { %2686 = vmatmul.mubr.msk.bf16.gmra.mrb[32].mxu0 %vm982_vm5, %v1041_v7 }
 0x465   : > { %2717 = vmatprep.mubr.msk.bf16.mxu0 %vm3014_vm2, %v3013_v37 }
 0x46c   : > { %2718 = vmatmul.mubr.msk.bf16.vlgmr.msra.gmra.mrb[36].mxu0 %vm530_vm0, %v3201_v10 }
 0x46d   : > { %2721 = vmatprep.mubr.msk.bf16.mxu0 %vm3014_vm2, %v3013_v37 }
 0x474   : > { %2722 = vmatmul.mubr.msk.bf16.gmra.mrb[40].mxu0 %vm530_vm0, %v3219_v19 }
 0x475   : > { %2725 = vmatprep.mubr.msk.bf16.mxu0 %vm3014_vm2, %v3013_v37 }
 0x47c   : > { %2726 = vmatmul.mubr.msk.bf16.gmra.mrb[44].mxu0 %vm530_vm0, %v3237_v23 }
 0x47d   : > { %2755 = vmatprep.mubr.msk.bf16.mxu0 %vm3014_vm2, %v3013_v37 }
 0x527   : > { %v3420_v8 = vpop.f32.mrb[24].mxu0 }
 0x528   : > { %v2679_v9 = vpop.f32.mrb[25].mxu0 }
 0x529   : > { %v3422_v11 = vpop.f32.mrb[26].mxu0 }
 0x52a   : > { %v1114_v10 = vpack.c.bf16 %v3422_v11, %v3420_v8  ;;  %v2680_v12 = vpop.f32.mrb[27].mxu0 }
 0x52f   : > { %v3426_v13 = vpop.f32.mrb[28].mxu0 }
 0x530   : > { %v2683_v19 = vpop.f32.mrb[29].mxu0 }
 0x531   : > { %v3428_v14 = vpop.f32.mrb[30].mxu0 }
 0x532   : > { %v1115_v23 = vpack.c.bf16 %v3428_v14, %v3426_v13  ;;  %v2684_v15 = vpop.f32.mrb[31].mxu0 }
 0x537   : > { %v3432_v16 = vpop.f32.mrb[32].mxu0 }
 0x538   : > { %v2687_v17 = vpop.f32.mrb[33].mxu0 }
 0x539   : > { %v1111_v18 = vpop.f32.mrb[34].mxu0 }
 0x53a   : > { %v2688_v20 = vpop.f32.mrb[35].mxu0 }
 0x53f   : > { %v1280_v21 = vpop.f32.mrb[36].mxu0 }
 0x540   : > { %v2719_v22 = vpop.f32.mrb[37].mxu0 }
 0x541   : > { %v1283_v24 = vpop.f32.mrb[38].mxu0 }
 0x542   : > { %v1394_v25 = vpack.c.bf16 %v1283_v24, %v1280_v21  ;;  %v2720_v27 = vpop.f32.mrb[39].mxu0 }
 0x544   : > { %v1407_v28 = vsel %vm907_vm3, %v1394_v25, 0 }
 0x545   : > { %2750 = vmatpush3.bf16.xpose.msra.mxu0 %v1407_v28 }
 0x546   : > { %2751 = vmatprep.subr.bf16.mxu0 %v3013_v37 }
 0x547   : > { %v1288_v30 = vpop.f32.mrb[40].mxu0 }
 0x548   : > { %v2723_v31 = vpop.f32.mrb[41].mxu0 }
 0x549   : > { %v1291_v33 = vpop.f32.mrb[42].mxu0 }
 0x54a   : > { %v1395_v26 = vpack.c.bf16 %v1291_v33, %v1288_v30  ;;  %v2724_v34 = vpop.f32.mrb[43].mxu0  ;;  %v2897_v30 = vld [vmem:[%s3696_s6 + $0x8] sm:$0xff]  }
 0x54c   : > { %v1410_v29 = vsel %vm907_vm3, %v1395_v26, 0 }
 0x54d   : > { %2752 = vmatpush3.bf16.xpose.msra.mxu0 %v1410_v29 }
 0x54e   : > { %2753 = vmatprep.subr.bf16.mxu0 %v3013_v37 }
 0x54f   : > { %v1296_v36 = vpop.f32.mrb[44].mxu0 }
 0x550   : > { %v1396_v38 = vpack.c.bf16 %v1296_v36, %v1296_v36  ;;  %v2727_v32 = vpop.f32.mrb[45].mxu0 }
 0x551   : > { %v1299_v40 = vpop.f32.mrb[46].mxu0 }
 0x552   : > { %v2728_v35 = vpop.f32.mrb[47].mxu0  ;;  %v1413_v41 = vsel %vm907_vm3, %v1396_v38, 0  ;;  %v2896_v40 = vld [vmem:[%s3696_s6] sm:$0xff]  }
 0x555   : > { %2754 = vmatpush3.bf16.xpose.msra.mxu0 %v1413_v41 }
 0x556   : > { %2785 = vmatprep.subr.bf16.mxu0 %v3013_v37 }
 0x55c   : > { %2756 = vmatmul.mubr.msk.bf16.vlgmr.msra.gmra.mrb[48].mxu0 %vm907_vm3, %v1391_v50 }
 0x55d   : > { %2759 = vmatprep.mubr.msk.bf16.mxu0 %vm3014_vm2, %v3013_v37  ;;  %2786 = vmatpush3.bf16.msra.mxu0 %v2897_v30 }
 0x55e   : > { %2813 = vmatprep.subr.bf16.mxu0 %v3013_v37 }
 0x564   : > { %2760 = vmatmul.mubr.msk.bf16.gmra.mrb[52].mxu0 %vm907_vm3, %v1392_v57 }
 0x565   : > { %2763 = vmatprep.mubr.msk.bf16.mxu0 %vm3014_vm2, %v3013_v37 }
 0x56c   : > { %2764 = vmatmul.mubr.msk.bf16.gmra.mrb[56].mxu0 %vm907_vm3, %v1393_v43 }
 0x56d   : > { %2787 = vmatprep.mubr.msk.bf16.mxu0 %vm3014_vm2, %v3013_v37 }
 0x62f   : > { %v1449_v47 = vpop.f32.mrb[48].mxu0 }
 0x630   : > { %v2757_v48 = vpop.f32.mrb[49].mxu0  ;;  %v1471_v50 = vsel %vm982_vm5, %v1449_v47, -inf }
 0x631   : > { %1472 = vmax.xlane.f32.xlu0 %v1471_v50  ;;  %v1452_v44 = vpop.f32.mrb[50].mxu0 }
 0x632   : > { %v2758_v54 = vpop.f32.mrb[51].mxu0  ;;  %v1474_v55 = vsel %vm982_vm5, %v1452_v44, -inf }
 0x633   : > { %1475 = vmax.xlane.f32.xlu1 %v1474_v55 }
 0x637   : > { %v1457_v57 = vpop.f32.mrb[52].mxu0 }
 0x638   : > { %v2761_v39 = vpop.f32.mrb[53].mxu0  ;;  %v1477_v58 = vsel %vm982_vm5, %v1457_v57, -inf }
 0x639   : > { %1478 = vmax.xlane.f32.xlu0 %v1477_v58  ;;  %v1460_v45 = vpop.f32.mrb[54].mxu0 }
 0x63a   : > { %v2762_v46 = vpop.f32.mrb[55].mxu0  ;;  %v1480_v49 = vsel %vm982_vm5, %v1460_v45, -inf }
 0x63b   : > { %1481 = vmax.xlane.f32.xlu1 %v1480_v49 }
 0x63f   : > { %v1465_v51 = vpop.f32.mrb[56].mxu0 }
 0x640   : > { %v2765_v52 = vpop.f32.mrb[57].mxu0  ;;  %v1483_v53 = vsel %vm995_vm6, %v1465_v51, -inf }
 0x641   : > { %1484 = vmax.xlane.f32.xlu0 %v1483_v53  ;;  %v1468_v56 = vpop.f32.mrb[58].mxu0 }
 0x642   : > { %v2766_v59 = vpop.f32.mrb[59].mxu0 }
 0x6be   : > { %v1473_v60 = vpop.xlane.xlu0 %1472 }
 0x6bf   : > { %v1486_v61 = vsub.f32 %v1449_v47, %v1473_v60 }
 0x6c0   : > { %v1476_v62 = vpop.xlane.xlu1 %1475 }
 0x6c1   : > { %v1491_v63 = vmul.f32 1.442695, %v1486_v61  ;;  %v1487_v0 = vsub.f32 %v1452_v44, %v1476_v62 }
 0x6c3   : > { %2940 = vpow2.f32 %v1491_v63  ;;  %v1493_v1 = vmul.f32 1.442695, %v1487_v0 }
 0x6c5   : > { %2942 = vpow2.f32 %v1493_v1 }
 0x6c6   : > { %v1479_v2 = vpop.xlane.xlu0 %1478 }
 0x6c7   : > { %v1488_v3 = vsub.f32 %v1457_v57, %v1479_v2  ;;  %v1116_v57 = vpack.c.bf16 %v3432_v16, %v3432_v16 }
 0x6c8   : > { %v1482_v4 = vpop.xlane.xlu1 %1481 }
 0x6c9   : > { %v1495_v5 = vmul.f32 1.442695, %v1488_v3  ;;  %v1489_v6 = vsub.f32 %v1460_v45, %v1482_v4 }
 0x6cb   : > { %2944 = vpow2.f32 %v1495_v5  ;;  %v1497_v7 = vmul.f32 1.442695, %v1489_v6 }
 0x6cd   : > { %v2941_v9 = vpop.eup %2940  ;;  %2946 = vpow2.f32 %v1497_v7 }
 0x6ce   : > { %v1485_v12 = vpop.xlane.xlu0 %1484  ;;  %v1501_v19 = vsel %vm982_vm5, %v2941_v9, 0.0 }
 0x6cf   : > { %v2943_v15 = vpop.eup %2942  ;;  %v1490_v17 = vsub.f32 %v1465_v51, %v1485_v12  ;;  %1502 = vadd.xlane.f32.xlu1 %v1501_v19  ;;  %v2477_v12 = vld [vmem:[%s3697_s7] ss:$0 sm:$0xff] }
 0x6d0   : > { %v1504_v18 = vsel %vm982_vm5, %v2943_v15, 0.0 }
 0x6d1   : > { %v1499_v20 = vmul.f32 1.442695, %v1490_v17  ;;  %1505 = vadd.xlane.f32.xlu0 %v1504_v18 }
 0x6d3   : > { %2948 = vpow2.f32 %v1499_v20 }
 0x6d5   : > { %v2945_v21 = vpop.eup %2944 }
 0x6d6   : > { %v1507_v22 = vsel %vm982_vm5, %v2945_v21, 0.0 }
 0x6d7   : > { %v2947_v24 = vpop.eup %2946  ;;  %1508 = vadd.xlane.f32.xlu1 %v1507_v22  ;;  %v3001_v22 = vld [vmem:[%s3116_s27 + $0x8] sm:$0xff] }
 0x6d8   : > { %v1510_v25 = vsel %vm982_vm5, %v2947_v24, 0.0 }
 0x6d9   : > { %1511 = vadd.xlane.f32.xlu0 %v1510_v25 }
 0x6dd   : > { %v2949_v27 = vpop.eup %2948 }
 0x6de   : > { %v1513_v28 = vsel %vm995_vm6, %v2949_v27, 0.0 }
 0x6df   : > { %1514 = vadd.xlane.f32.xlu1 %v1513_v28 }
 0x75c   : > { %v1503_v31 = vpop.xlane.xlu1 %1502 }
 0x75d   : > { %2950 = vrcp.f32 %v1503_v31 }
 0x75e   : > { %v1506_v33 = vpop.xlane.xlu0 %1505 }
 0x75f   : > { %2952 = vrcp.f32 %v1506_v33 }
 0x764   : > { %v1509_v26 = vpop.xlane.xlu1 %1508 }
 0x765   : > { %2954 = vrcp.f32 %v1509_v26 }
 0x766   : > { %v1512_v34 = vpop.xlane.xlu0 %1511 }
 0x767   : > { %v2951_v29 = vpop.eup %2950  ;;  %2956 = vrcp.f32 %v1512_v34  ;;  %v3002_v34 = vld [vmem:[%s3116_s27 + $0x10] sm:$0xff] }
 0x768   : > { %v1521_v38 = vmul.f32 %v2951_v29, %v2941_v9 }
 0x769   : > { %v2953_v36 = vpop.eup %2952 }
 0x76a   : > { %v1522_v32 = vmul.f32 %v2953_v36, %v2943_v15  ;;  %v3000_v15 = vld [vmem:[%s3116_s27] sm:$0xff] }
 0x76c   : > { %v1526_v35 = vpack.c.bf16 %v1522_v32, %v1521_v38  ;;  %v1515_v41 = vpop.xlane.xlu1 %1514 }
 0x76d   : > { %2958 = vrcp.f32 %v1515_v41 }
 0x76e   : > { %2774 = vmatmul.mubr.msk.bf16.vlgmr.msra.gmra.mrb[48].mxu1 %vm982_vm5, %v1526_v35 }
 0x76f   : > { %v2955_v42 = vpop.eup %2954  ;;  %2777 = vmatprep.mubr.msk.bf16.mxu1 %vm3014_vm2, %v3013_v37  ;;  %2800 = vmatpush3.bf16.msra.mxu1 %v2896_v40  ;;  %v3003_v40 = vld [vmem:[%s3116_s27 + $0x18] sm:$0xff] }
 0x770   : > { %2833 = vmatprep.subr.bf16.mxu1 %v3013_v37  ;;  %v1523_v47 = vmul.f32 %v2955_v42, %v2945_v21 }
 0x771   : > { %v2957_v43 = vpop.eup %2956 }
 0x772   : > { %v1524_v48 = vmul.f32 %v2957_v43, %v2947_v24 }
 0x774   : > { %v1527_v50 = vpack.c.bf16 %v1524_v48, %v1523_v47 }
 0x776   : > { %2778 = vmatmul.mubr.msk.bf16.gmra.mrb[52].mxu1 %vm982_vm5, %v1527_v50 }
 0x777   : > { %v2959_v44 = vpop.eup %2958  ;;  %2781 = vmatprep.mubr.msk.bf16.mxu1 %vm3014_vm2, %v3013_v37 }
 0x778   : > { %v1525_v54 = vmul.f32 %v2959_v44, %v2949_v27 }
 0x77a   : > { %v1528_v55 = vpack.c.bf16 %v1525_v54, %v1525_v54  ;;  %v3004_v54 = vld [vmem:[%s3116_s27 + $0x20] sm:$0xf] }
 0x77e   : > { %2782 = vmatmul.mubr.msk.bf16.gmra.mrb[56].mxu1 %vm982_vm5, %v1528_v55 }
 0x77f   : > { %2801 = vmatprep.mubr.msk.bf16.mxu1 %vm3014_vm2, %v3013_v37 }
 0x786   : > { %2802 = vmatmul.mubr.msk.bf16.vlgmr.msra.gmra.mrb[60].mxu1 %vm907_vm3, %v1114_v10 }
 0x787   : > { %2805 = vmatprep.mubr.msk.bf16.mxu1 %vm3014_vm2, %v3013_v37 }
 0x78e   : > { %2806 = vmatmul.mubr.msk.bf16.gmra.mrb[64].mxu1 %vm907_vm3, %v1115_v23 }
 0x78f   : > { %2809 = vmatprep.mubr.msk.bf16.mxu1 %vm3014_vm2, %v3013_v37 }
 0x796   : > { %2810 = vmatmul.mubr.msk.bf16.gmra.mrb[68].mxu1 %vm907_vm3, %v1116_v57 }
 0x797   : > { %2849 = vmatprep.mubr.msk.bf16.mxu1 %vm3014_vm2, %v3013_v37 }
 0x841   : > { %v1578_v8 = vpop.f32.mrb[48].mxu1 }
 0x842   : > { %v2775_v11 = vpop.f32.mrb[49].mxu1 }
 0x843   : > { %v1581_v10 = vpop.f32.mrb[50].mxu1 }
 0x844   : > { %v1600_v39 = vpack.c.bf16 %v1581_v10, %v1578_v8  ;;  %v2776_v58 = vpop.f32.mrb[51].mxu1 }
 0x846   : > { %2788 = vmatmul.mubr.msk.bf16.vlgmr.msra.gmra.mrb[60].mxu0 %vm907_vm3, %v1600_v39 }
 0x847   : > { %2791 = vmatprep.mubr.msk.bf16.mxu0 %vm3014_vm2, %v3013_v37 }
 0x849   : > { %v1586_v13 = vpop.f32.mrb[52].mxu1 }
 0x84a   : > { %v2779_v14 = vpop.f32.mrb[53].mxu1 }
 0x84b   : > { %v1589_v23 = vpop.f32.mrb[54].mxu1 }
 0x84c   : > { %v1601_v45 = vpack.c.bf16 %v1589_v23, %v1586_v13  ;;  %v2780_v16 = vpop.f32.mrb[55].mxu1 }
 0x84e   : > { %2792 = vmatmul.mubr.msk.bf16.gmra.mrb[64].mxu0 %vm907_vm3, %v1601_v45 }
 0x84f   : > { %2795 = vmatprep.mubr.msk.bf16.mxu0 %vm3014_vm2, %v3013_v37 }
 0x851   : > { %v1594_v46 = vpop.f32.mrb[56].mxu1 }
 0x852   : > { %v2783_v49 = vpop.f32.mrb[57].mxu1  ;;  %v1602_v52 = vpack.c.bf16 %v1594_v46, %v1594_v46 }
 0x853   : > { %v1597_v51 = vpop.f32.mrb[58].mxu1 }
 0x854   : > { %v2784_v53 = vpop.f32.mrb[59].mxu1 }
 0x856   : > { %2796 = vmatmul.mubr.msk.bf16.gmra.mrb[68].mxu0 %vm907_vm3, %v1602_v52 }
 0x857   : > { %2821 = vmatprep.mubr.msk.bf16.mxu0 %vm3014_vm2, %v3013_v37 }
 0x859   : > { %v1726_v56 = vpop.f32.mrb[60].mxu1 }
 0x85a   : > { %v2803_v59 = vpop.f32.mrb[61].mxu1 }
 0x85b   : > { %v1729_v60 = vpop.f32.mrb[62].mxu1 }
 0x85c   : > { %v2804_v61 = vpop.f32.mrb[63].mxu1 }
 0x861   : > { %v1734_v62 = vpop.f32.mrb[64].mxu1 }
 0x862   : > { %v2807_v63 = vpop.f32.mrb[65].mxu1 }
 0x863   : > { %v1737_v0 = vpop.f32.mrb[66].mxu1 }
 0x864   : > { %v2808_v1 = vpop.f32.mrb[67].mxu1 }
 0x869   : > { %v1742_v2 = vpop.f32.mrb[68].mxu1 }
 0x86a   : > { %v2811_v3 = vpop.f32.mrb[69].mxu1 }
 0x86b   : > { %v1745_v4 = vpop.f32.mrb[70].mxu1 }
 0x86c   : > { %v2812_v5 = vpop.f32.mrb[71].mxu1 }
 0x919   : > { %v1655_v6 = vpop.f32.mrb[60].mxu0 }
 0x91a   : > { %v1727_v7 = vadd.f32 %v1726_v56, %v1655_v6  ;;  %v2789_v9 = vpop.f32.mrb[61].mxu0  ;;  %v2898_v6 = vld [vmem:[%s3700_s10] sm:$0xff]  }
 0x91b   : > { %v1658_v19 = vpop.f32.mrb[62].mxu0  ;;  %2814 = vmatpush3.bf16.msra.mxu0 %v2898_v6  ;;  %v2900_v9 = vld [vmem:[%s3700_s10 + $0x10] sm:$0xff]  }
 0x91c   : > { %v1748_v17 = vadd.f32 %v3000_v15, %v1727_v7  ;;  %v1730_v18 = vadd.f32 %v1729_v60, %v1658_v19  ;;  %v2790_v20 = vpop.f32.mrb[63].mxu0  ;;  %2815 = vmatprep.subr.bf16.mxu0 %v3013_v37  ;;  %v2899_v7 = vld [vmem:[%s3700_s10 + $0x8] sm:$0xff]  }
 0x91e   : > { %v3513_v21 = vadd.f32 %v2477_v12, %v1748_v17  ;;  %v1749_v24 = vadd.f32 %v3001_v22, %v1730_v18 }
 0x91f   : > { %2816 = vmatpush3.bf16.msra.mxu0 %v2899_v7 }
 0x920   : > { %v3516_v25 = vadd.f32 %v2477_v12, %v1749_v24  ;;  %v1767_v27 = vsel %vm530_vm0, %v3513_v21, 0.0  ;;  %2817 = vmatprep.subr.bf16.mxu0 %v3013_v37 }
 0x921   : > { %1768 = vadd.xlane.f32.xlu0 %v1767_v27  ;;  %v1663_v28 = vpop.f32.mrb[64].mxu0 }
 0x922   : > { %v1735_v30 = vadd.f32 %v1734_v62, %v1663_v28  ;;  %v2793_v31 = vpop.f32.mrb[65].mxu0  ;;  %v1770_v33 = vsel %vm530_vm0, %v3516_v25, 0.0 }
 0x923   : > { %1771 = vadd.xlane.f32.xlu1 %v1770_v33  ;;  %v1666_v26 = vpop.f32.mrb[66].mxu0  ;;  %2818 = vmatpush3.bf16.msra.mxu0 %v2900_v9 }
 0x924   : > { %v1750_v29 = vadd.f32 %v3002_v34, %v1735_v30  ;;  %v1738_v36 = vadd.f32 %v1737_v0, %v1666_v26  ;;  %v2794_v38 = vpop.f32.mrb[67].mxu0  ;;  %2819 = vmatprep.subr.bf16.mxu0 %v3013_v37  ;;  %v2478_v34 = vld [vmem:[%s3698_s8] ss:$0 sm:$0xff] }
 0x926   : > { %v3523_v32 = vadd.f32 %v2477_v12, %v1750_v29  ;;  %v1751_v35 = vadd.f32 %v3003_v40, %v1738_v36 }
 0x928   : > { %v3526_v41 = vadd.f32 %v2477_v12, %v1751_v35  ;;  %v1773_v42 = vsel %vm530_vm0, %v3523_v32, 0.0 }
 0x929   : > { %1774 = vadd.xlane.f32.xlu0 %v1773_v42  ;;  %v1671_v43 = vpop.f32.mrb[68].mxu0 }
 0x92a   : > { %v1743_v47 = vadd.f32 %v1742_v2, %v1671_v43  ;;  %v2797_v48 = vpop.f32.mrb[69].mxu0  ;;  %v1776_v50 = vsel %vm530_vm0, %v3526_v41, 0.0  ;;  %v2479_v43 = vld [vmem:[%s3699_s9] ss:$0 sm:$0xff] }
 0x92b   : > { %1777 = vadd.xlane.f32.xlu1 %v1776_v50  ;;  %v1674_v44 = vpop.f32.mrb[70].mxu0 }
 0x92c   : > { %v1752_v55 = vadd.f32 %v3004_v54, %v1743_v47  ;;  %v2798_v57 = vpop.f32.mrb[71].mxu0 }
 0x92e   : > { %v3533_v8 = vadd.f32 %v2477_v12, %v1752_v55  ;;  %v2901_v12 = vld [vmem:[%s3700_s10 + $0x18] sm:$0xff]  }
 0x92f   : > { %2820 = vmatpush3.bf16.msra.mxu0 %v2901_v12 }
 0x930   : > { %v1779_v11 = vsel %vm543_vm1, %v3533_v8, 0.0 }
 0x931   : > { %1780 = vadd.xlane.f32.xlu0 %v1779_v11 }
 0x9ae   : > { %v1769_v10 = vpop.xlane.xlu0 %1768 }
 0x9af   : > { %v1782_v39 = vmul.f32 0.015625, %v1769_v10 }
 0x9b0   : > { %v1772_v58 = vpop.xlane.xlu1 %1771 }
 0x9b1   : > { %v1787_v13 = vsub.f32 %v3513_v21, %v1782_v39  ;;  %v1783_v14 = vmul.f32 0.015625, %v1772_v58 }
 0x9b3   : > { %v1788_v23 = vsub.f32 %v3516_v25, %v1783_v14  ;;  %v1792_v45 = vmul.f32 %v1787_v13, %v1787_v13 }
 0x9b5   : > { %v1797_v16 = vsel %vm530_vm0, %v1792_v45, 0.0  ;;  %v1793_v46 = vmul.f32 %v1788_v23, %v1788_v23 }
 0x9b6   : > { %v1775_v49 = vpop.xlane.xlu0 %1774  ;;  %1798 = vadd.xlane.f32.xlu1 %v1797_v16 }
 0x9b7   : > { %v1784_v51 = vmul.f32 0.015625, %v1775_v49  ;;  %v1800_v52 = vsel %vm530_vm0, %v1793_v46, 0.0 }
 0x9b8   : > { %v1778_v53 = vpop.xlane.xlu1 %1777  ;;  %1801 = vadd.xlane.f32.xlu0 %v1800_v52  ;;  %v2902_v52 = vld [vmem:[%s3702_s12] sm:$0xff]  }
 0x9b9   : > { %v1789_v56 = vsub.f32 %v3523_v32, %v1784_v51  ;;  %v1785_v59 = vmul.f32 0.015625, %v1778_v53  ;;  %2834 = vmatpush3.bf16.msra.mxu1 %v2902_v52  ;;  %v2903_v53 = vld [vmem:[%s3702_s12 + $0x8] sm:$0xff]  }
 0x9ba   : > { %2835 = vmatprep.subr.bf16.mxu1 %v3013_v37 }
 0x9bb   : > { %v1790_v60 = vsub.f32 %v3526_v41, %v1785_v59  ;;  %v1794_v61 = vmul.f32 %v1789_v56, %v1789_v56  ;;  %v2905_v59 = vld [vmem:[%s3702_s12 + $0x18] sm:$0xff]  }
 0x9bd   : > { %v1803_v62 = vsel %vm530_vm0, %v1794_v61, 0.0  ;;  %v1795_v63 = vmul.f32 %v1790_v60, %v1790_v60  ;;  %2836 = vmatpush3.bf16.msra.mxu1 %v2903_v53  ;;  %v2907_v61 = vld [vmem:[%s3702_s12 + $0x28] sm:$0xff]  }
 0x9be   : > { %1804 = vadd.xlane.f32.xlu1 %v1803_v62  ;;  %v1781_v0 = vpop.xlane.xlu0 %1780  ;;  %2837 = vmatprep.subr.bf16.mxu1 %v3013_v37  ;;  %v2908_v62 = vld [vmem:[%s3702_s12 + $0x30] sm:$0xff]  }
 0x9bf   : > { %v1786_v1 = vmul.f32 0.015625, %v1781_v0  ;;  %v1806_v2 = vsel %vm530_vm0, %v1795_v63, 0.0  ;;  %v2909_v63 = vld [vmem:[%s3702_s12 + $0x38] sm:$0xff]   ;;  %v2480_v0 = vld [vmem:[%s3701_s11] ss:$0 sm:$0xff] }
 0x9c0   : > { %1807 = vadd.xlane.f32.xlu0 %v1806_v2 }
 0x9c1   : > { %v1791_v3 = vsub.f32 %v3533_v8, %v1786_v1 }
 0x9c3   : > { %v1796_v4 = vmul.f32 %v1791_v3, %v1791_v3 }
 0x9c5   : > { %v1809_v5 = vsel %vm543_vm1, %v1796_v4, 0.0 }
 0x9c6   : > { %1810 = vadd.xlane.f32.xlu1 %v1809_v5 }
 0xa43   : > { %v1799_v19 = vpop.xlane.xlu1 %1798 }
 0xa44   : > { %v1812_v15 = vmul.f32 0.015625, %v1799_v19 }
 0xa45   : > { %v1802_v17 = vpop.xlane.xlu0 %1801 }
 0xa46   : > { %v1817_v18 = vadd.f32 1e-05, %v1812_v15  ;;  %v1813_v20 = vmul.f32 0.015625, %v1802_v17 }
 0xa48   : > { %2960 = vrsqrt.f32 %v1817_v18  ;;  %v1818_v22 = vadd.f32 1e-05, %v1813_v20 }
 0xa4a   : > { %2962 = vrsqrt.f32 %v1818_v22 }
 0xa4b   : > { %v1805_v24 = vpop.xlane.xlu1 %1804 }
 0xa4c   : > { %v1814_v27 = vmul.f32 0.015625, %v1805_v24 }
 0xa4d   : > { %v1808_v28 = vpop.xlane.xlu0 %1807 }
 0xa4e   : > { %v1819_v30 = vadd.f32 1e-05, %v1814_v27  ;;  %v1815_v31 = vmul.f32 0.015625, %v1808_v28 }
 0xa50   : > { %2964 = vrsqrt.f32 %v1819_v30  ;;  %v1820_v33 = vadd.f32 1e-05, %v1815_v31 }
 0xa52   : > { %v2961_v26 = vpop.eup %2960  ;;  %2966 = vrsqrt.f32 %v1820_v33 }
 0xa53   : > { %v1827_v29 = vmul.f32 %v2961_v26, %v1787_v13  ;;  %v1811_v36 = vpop.xlane.xlu1 %1810 }
 0xa54   : > { %v2963_v38 = vpop.eup %2962  ;;  %v1816_v40 = vmul.f32 0.015625, %v1811_v36 }
 0xa55   : > { %v1838_v35 = vmul.f32 %v2478_v34, %v1827_v29  ;;  %v1828_v42 = vmul.f32 %v2963_v38, %v1788_v23 }
 0xa56   : > { %v1821_v47 = vadd.f32 1e-05, %v1816_v40 }
 0xa57   : > { %v1839_v48 = vmul.f32 %v2478_v34, %v1828_v42  ;;  %v1849_v50 = vadd.f32 %v2479_v43, %v1838_v35 }
 0xa58   : > { %2968 = vrsqrt.f32 %v1821_v47 }
 0xa59   : > { %v1850_v44 = vadd.f32 %v2479_v43, %v1839_v48 }
 0xa5a   : > { %v2965_v54 = vpop.eup %2964 }
 0xa5b   : > { %v1829_v55 = vmul.f32 %v2965_v54, %v1789_v56  ;;  %v1854_v57 = vpack.c.bf16 %v1850_v44, %v1849_v50  ;;  %v2904_v56 = vld [vmem:[%s3702_s12 + $0x10] sm:$0xff]  }
 0xa5c   : > { %v2967_v11 = vpop.eup %2966  ;;  %2838 = vmatpush3.bf16.msra.mxu1 %v2904_v56 }
 0xa5d   : > { %v1830_v10 = vmul.f32 %v2967_v11, %v1790_v60  ;;  %2822 = vmatmul.mubr.msk.bf16.vlgmr.msra.gmra.mrb[72].mxu0 %vm530_vm0, %v1854_v57  ;;  %v1840_v39 = vmul.f32 %v2478_v34, %v1829_v55  ;;  %2839 = vmatprep.subr.bf16.mxu1 %v3013_v37  ;;  %v2906_v60 = vld [vmem:[%s3702_s12 + $0x20] sm:$0xff]  }
 0xa5e   : > { %2825 = vmatprep.mubr.msk.bf16.mxu0 %vm3014_vm2, %v3013_v37 }
 0xa5f   : > { %v1841_v58 = vmul.f32 %v2478_v34, %v1830_v10  ;;  %v1851_v13 = vadd.f32 %v2479_v43, %v1840_v39 }
 0xa60   : > { %2840 = vmatpush3.bf16.msra.mxu1 %v2905_v59 }
 0xa61   : > { %v1852_v14 = vadd.f32 %v2479_v43, %v1841_v58  ;;  %2841 = vmatprep.subr.bf16.mxu1 %v3013_v37 }
 0xa62   : > { %v2969_v23 = vpop.eup %2968 }
 0xa63   : > { %v1855_v45 = vpack.c.bf16 %v1852_v14, %v1851_v13  ;;  %v1831_v16 = vmul.f32 %v2969_v23, %v1791_v3 }
 0xa64   : > { %2842 = vmatpush3.bf16.msra.mxu1 %v2906_v60 }
 0xa65   : > { %2826 = vmatmul.mubr.msk.bf16.gmra.mrb[76].mxu0 %vm530_vm0, %v1855_v45  ;;  %v1842_v46 = vmul.f32 %v2478_v34, %v1831_v16  ;;  %2843 = vmatprep.subr.bf16.mxu1 %v3013_v37 }
 0xa66   : > { %2829 = vmatprep.mubr.msk.bf16.mxu0 %vm3014_vm2, %v3013_v37 }
 0xa67   : > { %v1853_v49 = vadd.f32 %v2479_v43, %v1842_v46 }
 0xa68   : > { %2844 = vmatpush3.bf16.msra.mxu1 %v2907_v61 }
 0xa69   : > { %v1856_v51 = vpack.c.bf16 %v1853_v49, %v1853_v49  ;;  %2845 = vmatprep.subr.bf16.mxu1 %v3013_v37 }
 0xa6c   : > { %2846 = vmatpush3.bf16.msra.mxu1 %v2908_v62 }
 0xa6d   : > { %2830 = vmatmul.mubr.msk.bf16.gmra.mrb[80].mxu0 %vm530_vm0, %v1856_v51  ;;  %2847 = vmatprep.subr.bf16.mxu1 %v3013_v37 }
 0xa70   : > { %2848 = vmatpush3.bf16.msra.mxu1 %v2909_v63 }
 0xb30   : > { %v1939_v1 = vpop.f32.mrb[72].mxu0 }
 0xb31   : > { %v3609_v2 = vadd.f32 %v2480_v0, %v1939_v1  ;;  %v2823_v3 = vpop.f32.mrb[73].mxu0 }
 0xb32   : > { %v1942_v4 = vpop.f32.mrb[74].mxu0 }
 0xb33   : > { %v3612_v5 = vmul.f32 0.70710677, %v3609_v2  ;;  %v3614_v6 = vadd.f32 %v2480_v0, %v1942_v4  ;;  %v2824_v7 = vpop.f32.mrb[75].mxu0 }
 0xb35   : > { %v1966_v9 = vand.u32 2147483647, %v3612_v5  ;;  %v3618_v12 = vmul.f32 0.70710677, %v3614_v6  ;;  %vm2066_vm7 = vcmp.ge.f32.partialorder %v3612_v5, 0.0  ;;  %v2082_v5 = vmul.f32 0.5, %v3614_v6 }
 0xb37   : > { %v1971_v19 = vmul.f32 0.3275911, %v1966_v9  ;;  %v1967_v15 = vand.u32 2147483647, %v3618_v12  ;;  %v2036_v29 = vsub.f32 0.0, %v1966_v9  ;;  %vm2067_vm8 = vcmp.ge.f32.partialorder %v3618_v12, 0.0 }
 0xb38   : > { %v1947_v17 = vpop.f32.mrb[76].mxu0 }
 0xb39   : > { %v1976_v18 = vadd.f32 1.0, %v1971_v19  ;;  %v1972_v20 = vmul.f32 0.3275911, %v1967_v15  ;;  %v2827_v22 = vpop.f32.mrb[77].mxu0  ;;  %v3621_v24 = vadd.f32 %v2480_v0, %v1947_v17  ;;  %v2041_v50 = vmul.f32 %v2036_v29, %v1966_v9 }
 0xb3a   : > { %v1950_v27 = vpop.f32.mrb[78].mxu0  ;;  %v2037_v44 = vsub.f32 0.0, %v1967_v15 }
 0xb3b   : > { %2970 = vrcp.f32 %v1976_v18  ;;  %v1977_v28 = vadd.f32 1.0, %v1972_v20  ;;  %v2828_v30 = vpop.f32.mrb[79].mxu0  ;;  %v3624_v31 = vmul.f32 0.70710677, %v3621_v24  ;;  %v3626_v33 = vadd.f32 %v2480_v0, %v1950_v27 }
 0xb3c   : > { %v2046_v14 = vmul.f32 1.442695, %v2041_v50  ;;  %v2042_v23 = vmul.f32 %v2037_v44, %v1967_v15 }
 0xb3d   : > { %2972 = vrcp.f32 %v1977_v28  ;;  %v1968_v26 = vand.u32 2147483647, %v3624_v31  ;;  %v3630_v34 = vmul.f32 0.70710677, %v3626_v33  ;;  %vm2068_vm9 = vcmp.ge.f32.partialorder %v3624_v31, 0.0 }
 0xb3e   : > { %v2048_v56 = vmul.f32 1.442695, %v2042_v23 }
 0xb3f   : > { %v1973_v36 = vmul.f32 0.3275911, %v1968_v26  ;;  %v1969_v38 = vand.u32 2147483647, %v3630_v34  ;;  %v2038_v49 = vsub.f32 0.0, %v1968_v26  ;;  %vm2069_vm10 = vcmp.ge.f32.partialorder %v3630_v34, 0.0 }
 0xb40   : > { %v1955_v40 = vpop.f32.mrb[80].mxu0 }
 0xb41   : > { %v1978_v35 = vadd.f32 1.0, %v1973_v36  ;;  %v1974_v42 = vmul.f32 0.3275911, %v1969_v38  ;;  %v2831_v43 = vpop.f32.mrb[81].mxu0  ;;  %v3633_v47 = vadd.f32 %v2480_v0, %v1955_v40  ;;  %v2039_v60 = vsub.f32 0.0, %v1969_v38 }
 0xb42   : > { %v1958_v48 = vpop.f32.mrb[82].mxu0  ;;  %v2043_v63 = vmul.f32 %v2038_v49, %v1968_v26 }
 0xb43   : > { %2974 = vrcp.f32 %v1978_v35  ;;  %v1979_v54 = vadd.f32 1.0, %v1974_v42  ;;  %v2832_v55 = vpop.f32.mrb[83].mxu0  ;;  %v3636_v11 = vmul.f32 0.70710677, %v3633_v47  ;;  %v2044_v19 = vmul.f32 %v2039_v60, %v1969_v38 }
 0xb44   : > { %v2050_v17 = vmul.f32 1.442695, %v2043_v63  ;;  %v2085_v34 = vmul.f32 0.5, %v3633_v47 }
 0xb45   : > { %v2971_v57 = vpop.eup %2970  ;;  %2976 = vrcp.f32 %v1979_v54  ;;  %v1970_v39 = vand.u32 2147483647, %v3636_v11  ;;  %v2052_v40 = vmul.f32 1.442695, %v2044_v19  ;;  %vm2070_vm11 = vcmp.ge.f32.partialorder %v3636_v11, 0.0 }
 0xb46   : > { %v1991_v10 = vmul.f32 1.0614054, %v2971_v57  ;;  %2978 = vpow2.f32 %v2046_v14 }
 0xb47   : > { %v2973_v58 = vpop.eup %2972  ;;  %v1975_v16 = vmul.f32 0.3275911, %v1970_v39  ;;  %v2040_v27 = vsub.f32 0.0, %v1970_v39 }
 0xb48   : > { %v1996_v13 = vadd.f32 -1.4531521, %v1991_v10  ;;  %v1992_v45 = vmul.f32 1.0614054, %v2973_v58 }
 0xb49   : > { %v1980_v52 = vadd.f32 1.0, %v1975_v16  ;;  %v2045_v44 = vmul.f32 %v2040_v27, %v1970_v39 }
 0xb4a   : > { %v2001_v46 = vmul.f32 %v2971_v57, %v1996_v13  ;;  %v1997_v51 = vadd.f32 -1.4531521, %v1992_v45 }
 0xb4b   : > { %2980 = vrcp.f32 %v1980_v52 }
 0xb4c   : > { %v2006_v53 = vadd.f32 1.4214138, %v2001_v46  ;;  %v2002_v59 = vmul.f32 %v2973_v58, %v1997_v51  ;;  %2982 = vpow2.f32 %v2048_v56  ;;  %v2054_v51 = vmul.f32 1.442695, %v2045_v44 }
 0xb4d   : > { %v2975_v61 = vpop.eup %2974  ;;  %2984 = vpow2.f32 %v2050_v17  ;;  %v2083_v44 = vmul.f32 0.5, %v3621_v24 }
 0xb4e   : > { %v2011_v62 = vmul.f32 %v2971_v57, %v2006_v53  ;;  %v2007_v0 = vadd.f32 1.4214138, %v2002_v59  ;;  %v1993_v1 = vmul.f32 1.0614054, %v2975_v61  ;;  %2986 = vpow2.f32 %v2052_v40 }
 0xb4f   : > { %v2977_v4 = vpop.eup %2976  ;;  %2988 = vpow2.f32 %v2054_v51 }
 0xb50   : > { %v2016_v3 = vadd.f32 -0.28449672, %v2011_v62  ;;  %v2012_v7 = vmul.f32 %v2973_v58, %v2007_v0  ;;  %v1998_v9 = vadd.f32 -1.4531521, %v1993_v1  ;;  %v1994_v18 = vmul.f32 1.0614054, %v2977_v4  ;;  %v2979_v26 = vpop.eup %2978 }
 0xb52   : > { %v2021_v15 = vmul.f32 %v2971_v57, %v2016_v3  ;;  %v2017_v20 = vadd.f32 -0.28449672, %v2012_v7  ;;  %v2003_v22 = vmul.f32 %v2975_v61, %v1998_v9  ;;  %v1999_v30 = vadd.f32 -1.4531521, %v1994_v18 }
 0xb53   : > { %v2081_v9 = vmul.f32 0.5, %v3609_v2 }
 0xb54   : > { %v2026_v28 = vadd.f32 0.2548296, %v2021_v15  ;;  %v2022_v29 = vmul.f32 %v2973_v58, %v2017_v20  ;;  %v2008_v36 = vadd.f32 1.4214138, %v2003_v22  ;;  %v2004_v42 = vmul.f32 %v2977_v4, %v1999_v30 }
 0xb55   : > { %v2981_v43 = vpop.eup %2980 }
 0xb56   : > { %v2031_v35 = vmul.f32 %v2971_v57, %v2026_v28  ;;  %v2027_v48 = vadd.f32 0.2548296, %v2022_v29  ;;  %v2013_v50 = vmul.f32 %v2975_v61, %v2008_v36  ;;  %v2009_v54 = vadd.f32 1.4214138, %v2004_v42  ;;  %v2983_v14 = vpop.eup %2982 }
 0xb57   : > { %v1995_v55 = vmul.f32 1.0614054, %v2981_v43  ;;  %v2985_v0 = vpop.eup %2984 }
 0xb58   : > { %v2056_v38 = vmul.f32 %v2979_v26, %v2031_v35  ;;  %v2032_v10 = vmul.f32 %v2973_v58, %v2027_v48  ;;  %v2018_v13 = vadd.f32 -0.28449672, %v2013_v50  ;;  %v2014_v45 = vmul.f32 %v2977_v4, %v2009_v54  ;;  %v2987_v22 = vpop.eup %2986 }
 0xb59   : > { %v2000_v16 = vadd.f32 -1.4531521, %v1995_v55  ;;  %v2989_v6 = vpop.eup %2988 }
 0xb5a   : > { %v2061_v23 = vsub.f32 1.0, %v2056_v38  ;;  %v2057_v46 = vmul.f32 %v2983_v14, %v2032_v10  ;;  %v2023_v49 = vmul.f32 %v2975_v61, %v2018_v13  ;;  %v2019_v52 = vadd.f32 -0.28449672, %v2014_v45 }
 0xb5b   : > { %v2005_v53 = vmul.f32 %v2981_v43, %v2000_v16  ;;  %v2084_v38 = vmul.f32 0.5, %v3626_v33  ;;  %v2488_v33 = vld [vmem:[%s3703_s13] ss:$0 sm:$0xff] }
 0xb5c   : > { %v2071_v57 = vsub.f32 0.0, %v2061_v23  ;;  %v2062_v56 = vsub.f32 1.0, %v2057_v46  ;;  %v2028_v39 = vadd.f32 0.2548296, %v2023_v49  ;;  %v2024_v60 = vmul.f32 %v2977_v4, %v2019_v52 }
 0xb5d   : > { %v2010_v62 = vadd.f32 1.4214138, %v2005_v53 }
 0xb5e   : > { %v2076_v59 = vsel %vm2066_vm7, %v2061_v23, %v2071_v57  ;;  %v2072_v58 = vsub.f32 0.0, %v2062_v56  ;;  %v2033_v63 = vmul.f32 %v2975_v61, %v2028_v39  ;;  %v2029_v3 = vadd.f32 0.2548296, %v2024_v60 }
 0xb5f   : > { %v2086_v1 = vadd.f32 1.0, %v2076_v59  ;;  %v2015_v7 = vmul.f32 %v2981_v43, %v2010_v62 }
 0xb60   : > { %v2077_v19 = vsel %vm2067_vm8, %v2062_v56, %v2072_v58  ;;  %v2058_v15 = vmul.f32 %v2985_v0, %v2033_v63  ;;  %v2034_v18 = vmul.f32 %v2977_v4, %v2029_v3 }
 0xb61   : > { %v2087_v17 = vadd.f32 1.0, %v2077_v19  ;;  %v2020_v20 = vadd.f32 -0.28449672, %v2015_v7  ;;  %v2091_v28 = vmul.f32 %v2086_v1, %v2081_v9 }
 0xb62   : > { %v2063_v27 = vsub.f32 1.0, %v2058_v15  ;;  %v2059_v30 = vmul.f32 %v2987_v22, %v2034_v18 }
 0xb63   : > { %v2092_v61 = vmul.f32 %v2087_v17, %v2082_v5  ;;  %v2025_v29 = vmul.f32 %v2981_v43, %v2020_v20 }
 0xb64   : > { %v2073_v36 = vsub.f32 0.0, %v2063_v27  ;;  %v2064_v12 = vsub.f32 1.0, %v2059_v30 }
 0xb65   : > { %v2096_v40 = vpack.c.bf16 %v2092_v61, %v2091_v28  ;;  %v2030_v26 = vadd.f32 0.2548296, %v2025_v29 }
 0xb66   : > { %v2078_v2 = vsel %vm2068_vm9, %v2063_v27, %v2073_v36  ;;  %v2074_v35 = vsub.f32 0.0, %v2064_v12 }
 0xb67   : > { %2850 = vmatmul.mubr.bf16.vlgmr.msra.gmra.mrb[72].mxu1 %v2096_v40  ;;  %v2035_v42 = vmul.f32 %v2981_v43, %v2030_v26  ;;  %v2088_v48 = vadd.f32 1.0, %v2078_v2 }
 0xb68   : > { %2853 = vmatprep.mubr.msk.bf16.mxu1 %vm3014_vm2, %v3013_v37  ;;  %v2079_v4 = vsel %vm2069_vm10, %v2064_v12, %v2074_v35 }
 0xb69   : > { %v2060_v50 = vmul.f32 %v2989_v6, %v2035_v42  ;;  %v2089_v31 = vadd.f32 1.0, %v2079_v4  ;;  %v2093_v55 = vmul.f32 %v2088_v48, %v2083_v44 }
 0xb6b   : > { %v2065_v54 = vsub.f32 1.0, %v2060_v50  ;;  %v2094_v10 = vmul.f32 %v2089_v31, %v2084_v38 }
 0xb6d   : > { %v2075_v13 = vsub.f32 0.0, %v2065_v54  ;;  %v2097_v43 = vpack.c.bf16 %v2094_v10, %v2093_v55 }
 0xb6f   : > { %v2080_v14 = vsel %vm2070_vm11, %v2065_v54, %v2075_v13  ;;  %2854 = vmatmul.mubr.bf16.gmra.mrb[76].mxu1 %v2097_v43 }
 0xb70   : > { %v2090_v23 = vadd.f32 1.0, %v2080_v14  ;;  %2857 = vmatprep.mubr.msk.bf16.mxu1 %vm3014_vm2, %v3013_v37 }
 0xb72   : > { %v2095_v45 = vmul.f32 %v2090_v23, %v2085_v34 }
 0xb74   : > { %v2098_v24 = vpack.c.bf16 %v2095_v45, %v2095_v45 }
 0xb77   : > { %2858 = vmatmul.mubr.bf16.gmra.mrb[80].mxu1 %v2098_v24 }
 0xc3a   : > { %v2204_v16 = vpop.f32.mrb[72].mxu1 }
 0xc3b   : > { %v2205_v46 = vadd.f32 %v2488_v33, %v2204_v16  ;;  %v2851_v49 = vpop.f32.mrb[73].mxu1 }
 0xc3c   : > { %v2207_v11 = vpop.f32.mrb[74].mxu1 }
 0xc3d   : > { %v2208_v51 = vadd.f32 %v2488_v33, %v2207_v11  ;;  %v2852_v57 = vpop.f32.mrb[75].mxu1  ;;  %v2226_v47 = vadd.f32 %v2205_v46, %v3513_v21  ;;  %v2497_v46 = vld [vmem:[%s3704_s14] ss:$0 sm:$0xff] }
 0xc3f   : > { %v2233_v52 = vsel %vm530_vm0, %v2226_v47, 0.0  ;;  %v2227_v53 = vadd.f32 %v2208_v51, %v3516_v25  ;;  %v2498_v51 = vld [vmem:[%s3705_s15] ss:$0 sm:$0xff] }
 0xc40   : > { %2234 = vadd.xlane.f32.xlu0 %v2233_v52 }
 0xc41   : > { %v2236_v37 = vsel %vm530_vm0, %v2227_v53, 0.0 }
 0xc42   : > { %2237 = vadd.xlane.f32.xlu1 %v2236_v37  ;;  %v2212_v56 = vpop.f32.mrb[76].mxu1 }
 0xc43   : > { %v2213_v39 = vadd.f32 %v2488_v33, %v2212_v56  ;;  %v2855_v59 = vpop.f32.mrb[77].mxu1 }
 0xc44   : > { %v2215_v60 = vpop.f32.mrb[78].mxu1 }
 0xc45   : > { %v2216_v62 = vadd.f32 %v2488_v33, %v2215_v60  ;;  %v2856_v58 = vpop.f32.mrb[79].mxu1  ;;  %v2228_v63 = vadd.f32 %v2213_v39, %v3523_v32 }
 0xc47   : > { %v2239_v0 = vsel %vm530_vm0, %v2228_v63, 0.0  ;;  %v2229_v21 = vadd.f32 %v2216_v62, %v3526_v41 }
 0xc48   : > { %2240 = vadd.xlane.f32.xlu0 %v2239_v0 }
 0xc49   : > { %v2242_v1 = vsel %vm530_vm0, %v2229_v21, 0.0 }
 0xc4a   : > { %2243 = vadd.xlane.f32.xlu1 %v2242_v1  ;;  %v2220_v25 = vpop.f32.mrb[80].mxu1 }
 0xc4b   : > { %v2221_v3 = vadd.f32 %v2488_v33, %v2220_v25  ;;  %v2859_v7 = vpop.f32.mrb[81].mxu1 }
 0xc4c   : > { %v2223_v9 = vpop.f32.mrb[82].mxu1 }
 0xc4d   : > { %v2860_v19 = vpop.f32.mrb[83].mxu1  ;;  %v2230_v15 = vadd.f32 %v2221_v3, %v3533_v8 }
 0xc4f   : > { %v2245_v5 = vsel %vm543_vm1, %v2230_v15, 0.0 }
 0xc50   : > { %2246 = vadd.xlane.f32.xlu0 %v2245_v5 }
 0xccd   : > { %v2235_v17 = vpop.xlane.xlu0 %2234 }
 0xcce   : > { %v2248_v32 = vmul.f32 0.015625, %v2235_v17 }
 0xccf   : > { %v2238_v18 = vpop.xlane.xlu1 %2237 }
 0xcd0   : > { %v2253_v20 = vsub.f32 %v2226_v47, %v2248_v32  ;;  %v2249_v22 = vmul.f32 0.015625, %v2238_v18 }
 0xcd2   : > { %v2254_v41 = vsub.f32 %v2227_v53, %v2249_v22  ;;  %v2258_v27 = vmul.f32 %v2253_v20, %v2253_v20 }
 0xcd4   : > { %v2263_v28 = vsel %vm530_vm0, %v2258_v27, 0.0  ;;  %v2259_v61 = vmul.f32 %v2254_v41, %v2254_v41 }
 0xcd5   : > { %2264 = vadd.xlane.f32.xlu1 %v2263_v28  ;;  %v2241_v30 = vpop.xlane.xlu0 %2240 }
 0xcd6   : > { %v2266_v29 = vsel %vm530_vm0, %v2259_v61, 0.0  ;;  %v2250_v36 = vmul.f32 0.015625, %v2241_v30 }
 0xcd7   : > { %2267 = vadd.xlane.f32.xlu0 %v2266_v29  ;;  %v2244_v8 = vpop.xlane.xlu1 %2243 }
 0xcd8   : > { %v2255_v40 = vsub.f32 %v2228_v63, %v2250_v36  ;;  %v2251_v12 = vmul.f32 0.015625, %v2244_v8 }
 0xcda   : > { %v2256_v26 = vsub.f32 %v2229_v21, %v2251_v12  ;;  %v2260_v2 = vmul.f32 %v2255_v40, %v2255_v40 }
 0xcdc   : > { %v2269_v35 = vsel %vm530_vm0, %v2260_v2, 0.0  ;;  %v2261_v42 = vmul.f32 %v2256_v26, %v2256_v26 }
 0xcdd   : > { %2270 = vadd.xlane.f32.xlu1 %v2269_v35  ;;  %v2247_v6 = vpop.xlane.xlu0 %2246 }
 0xcde   : > { %v2252_v48 = vmul.f32 0.015625, %v2247_v6  ;;  %v2272_v4 = vsel %vm530_vm0, %v2261_v42, 0.0 }
 0xcdf   : > { %2273 = vadd.xlane.f32.xlu0 %v2272_v4 }
 0xce0   : > { %v2257_v50 = vsub.f32 %v2230_v15, %v2252_v48 }
 0xce2   : > { %v2262_v44 = vmul.f32 %v2257_v50, %v2257_v50 }
 0xce4   : > { %v2275_v38 = vsel %vm543_vm1, %v2262_v44, 0.0 }
 0xce5   : > { %2276 = vadd.xlane.f32.xlu1 %v2275_v38 }
 0xd62   : > { %v2265_v31 = vpop.xlane.xlu1 %2264 }
 0xd63   : > { %v2278_v54 = vmul.f32 0.015625, %v2265_v31 }
 0xd64   : > { %v2268_v55 = vpop.xlane.xlu0 %2267 }
 0xd65   : > { %v2283_v10 = vadd.f32 1e-05, %v2278_v54  ;;  %v2279_v13 = vmul.f32 0.015625, %v2268_v55 }
 0xd67   : > { %2990 = vrsqrt.f32 %v2283_v10  ;;  %v2284_v43 = vadd.f32 1e-05, %v2279_v13 }
 0xd69   : > { %2992 = vrsqrt.f32 %v2284_v43 }
 0xd6a   : > { %v2271_v14 = vpop.xlane.xlu1 %2270 }
 0xd6b   : > { %v2280_v34 = vmul.f32 0.015625, %v2271_v14 }
 0xd6c   : > { %v2274_v23 = vpop.xlane.xlu0 %2273 }
 0xd6d   : > { %v2285_v45 = vadd.f32 1e-05, %v2280_v34  ;;  %v2281_v24 = vmul.f32 0.015625, %v2274_v23 }
 0xd6f   : > { %2994 = vrsqrt.f32 %v2285_v45  ;;  %v2286_v33 = vadd.f32 1e-05, %v2281_v24 }
 0xd71   : > { %v2991_v16 = vpop.eup %2990  ;;  %2996 = vrsqrt.f32 %v2286_v33 }
 0xd72   : > { %v2293_v49 = vmul.f32 %v2991_v16, %v2253_v20  ;;  %v2277_v57 = vpop.xlane.xlu1 %2276 }
 0xd73   : > { %v2993_v11 = vpop.eup %2992  ;;  %v2282_v53 = vmul.f32 0.015625, %v2277_v57 }
 0xd74   : > { %v2304_v47 = vmul.f32 %v2497_v46, %v2293_v49  ;;  %v2294_v52 = vmul.f32 %v2993_v11, %v2254_v41 }
 0xd75   : > { %v2287_v39 = vadd.f32 1e-05, %v2282_v53 }
 0xd76   : > { %v2315_v37 = vadd.f32 %v2498_v51, %v2304_v47  ;;  %v2305_v56 = vmul.f32 %v2497_v46, %v2294_v52 }
 0xd77   : > { %2998 = vrsqrt.f32 %v2287_v39 }
 0xd78   : > { %2320 = vst.msk [vmem:[%s521_s17] sm:$0xff] %vm530_vm0, %v2315_v37  ;;  %v2316_v59 = vadd.f32 %v2498_v51, %v2305_v56 }
 0xd79   : > { %v2995_v60 = vpop.eup %2994 }
 0xd7a   : > { %2321 = vst.msk [vmem:[%s521_s17 + $0x8] sm:$0xff] %vm530_vm0, %v2316_v59  ;;  %v2295_v62 = vmul.f32 %v2995_v60, %v2255_v40 }
 0xd7b   : > { %v2997_v58 = vpop.eup %2996 }
 0xd7c   : > { %v2306_v63 = vmul.f32 %v2497_v46, %v2295_v62  ;;  %v2296_v0 = vmul.f32 %v2997_v58, %v2256_v26 }
 0xd7e   : > { %v2317_v21 = vadd.f32 %v2498_v51, %v2306_v63  ;;  %v2307_v1 = vmul.f32 %v2497_v46, %v2296_v0 }
 0xd80   : > { %2322 = vst.msk [vmem:[%s521_s17 + $0x10] sm:$0xff] %vm530_vm0, %v2317_v21  ;;  %v2318_v25 = vadd.f32 %v2498_v51, %v2307_v1 }
 0xd81   : > { %v2999_v3 = vpop.eup %2998 }
 0xd82   : > { %2323 = vst.msk [vmem:[%s521_s17 + $0x18] sm:$0xff] %vm530_vm0, %v2318_v25  ;;  %v2297_v7 = vmul.f32 %v2999_v3, %v2257_v50 }
 0xd84   : > { %v2308_v9 = vmul.f32 %v2497_v46, %v2297_v7 }
 0xd86   : > { %v2319_v19 = vadd.f32 %v2498_v51, %v2308_v9 }
 0xd88   : > { %2324 = vst.msk [vmem:[%s521_s17 + $0x20] sm:$0xf] %vm543_vm1, %v2319_v19 }
 0xd89 PF: > { %s26_s21 = sadd.s32 1, %s3011_s21  }
 0xd8a   : > { %p23_p4 = scmp.ge.s32.totalorder %s26_s21, 4  }
 0xd8c   :  { %25 = sbr.rel (!%p23_p4) target bundleno = 2 (0x2), region = 118 }

// kernel: cross_plus_vit_segnet_forward.7
= control target key start
LH: loop header
LB: loop body
LE: loop exit
PB: predicated region body
PF: predicated region fallthrough
CT: control target
= control target key end

     0   :  { %s539_s15 = smov 0   ;;  %s635_s0 = inlined_call_operand.vmem [shape: f32[2,16,144], index: 0, kind: input, shape index: {}]   ;;  %s636_s1 = inlined_call_operand.vmem [shape: bf16[144,144], index: 1, kind: input, shape index: {}]   ;;  %s637_s2 = inlined_call_operand.vmem [shape: f32[1,144], index: 2, kind: input, shape index: {}]   ;;  %s638_s3 = inlined_call_operand.vmem [shape: f32[16,144], index: 3, kind: input, shape index: {}]   ;;  %s639_s4 = inlined_call_operand.vmem [shape: f32[2,16,144], index: 4, kind: output, shape index: {}]  }
   0x1 LB: > { %s439_s16 = sadd.s32 4294967295, %s512_s15   ;;  %p443_p0 = scmp.ge.s32.totalorder %s512_s15, 1  ;;  %s512_s15 = sphi %s539_s15, %s14_s15  }
   0x2   : > { %p162_p1 = scmp.lt.s32.totalorder %s512_s15, 3 }
   0x4   : > { %p163_p2 = pnand %p443_p0, %p162_p1 }
   0x5   : > { %v479_v0 = vld [vmem:[%s636_s1 + $0x4] ss:$8 sps:$4 sm:$0xff] (!%p163_p2)   ;;  %p188_p3 = scmp.lt.s32.totalorder (!%p163_p2), %s439_s16, 1  ;;  %v481_v1 = vld [vmem:[%s636_s1] ss:$8 sps:$4 sm:$0xff] (!%p163_p2)   ;;  %vm325_vm0 = vcmask (!%p163_p2), 130048   ;;  %v225_v24 = vlaneseq (!%p163_p2) }
   0x6   : > { %166 = sbr.rel (%p163_p2) target bundleno = 262 (0x106), region = 36  ;;  %329 = vmatprep.subr.bf16.mxu0 (!%p163_p2), %v479_v0  ;;  %v482_v2 = vld [vmem:[%s636_s1 + $0x14] ss:$8 sps:$4 sm:$0xff] (!%p163_p2)   ;;  %v484_v3 = vld [vmem:[%s636_s1 + $0x10] ss:$8 sps:$4 sm:$0xff] (!%p163_p2)   ;;  %v372_v32 = vld [vmem:[%s638_s3] sm:$0xff] (!%p163_p2) }
   0x7   : > { %330 = vmatpush1.bf16.msra.mxu0 (!%p163_p2), %v481_v1  ;;  %v485_v4 = vld [vmem:[%s636_s1 + $0x24] ss:$8 sps:$4 sm:$0xff] (!%p163_p2)   ;;  %v487_v5 = vld [vmem:[%s636_s1 + $0x20] ss:$8 sps:$4 sm:$0xff] (!%p163_p2)   ;;  %v488_v6 = vld [vmem:[%s636_s1 + $0x34] ss:$8 sps:$4 sm:$0xff] (!%p163_p2)  }
   0x8   : > { %331 = vmatprep.subr.bf16.mxu0 (!%p163_p2), %v482_v2  ;;  %v490_v7 = vld [vmem:[%s636_s1 + $0x30] ss:$8 sps:$4 sm:$0xff] (!%p163_p2)   ;;  %v491_v8 = vld [vmem:[%s636_s1 + $0x44] ss:$8 sps:$4 sm:$0xff] (!%p163_p2)   ;;  %v493_v12 = vld [vmem:[%s636_s1 + $0x40] ss:$8 sps:$4 sm:$0xff] (!%p163_p2)  }
   0x9   : > { %v494_v13 = vld [vmem:[%s636_s1 + $0x54] ss:$8 sps:$4 sm:$0xff] (!%p163_p2)   ;;  %v496_v14 = vld [vmem:[%s636_s1 + $0x50] ss:$8 sps:$4 sm:$0xff] (!%p163_p2)   ;;  %v497_v15 = vld [vmem:[%s636_s1 + $0x64] ss:$8 sps:$4 sm:$0xff] (!%p163_p2)  }
   0xa   : > { %v499_v16 = vld [vmem:[%s636_s1 + $0x60] ss:$8 sps:$4 sm:$0xff] (!%p163_p2)   ;;  %v500_v17 = vld [vmem:[%s636_s1 + $0x74] ss:$8 sps:$4 sm:$0xff] (!%p163_p2)   ;;  %v502_v18 = vld [vmem:[%s636_s1 + $0x70] ss:$8 sps:$4 sm:$0xff] (!%p163_p2)  }
   0xb   : > { %332 = vmatpush1.bf16.msra.mxu0 (!%p163_p2), %v484_v3  ;;  %v503_v19 = vld [vmem:[%s636_s1 + $0x84] ss:$8 sps:$4 sm:$0xff] (!%p163_p2)   ;;  %v505_v20 = vld [vmem:[%s636_s1 + $0x80] ss:$8 sps:$4 sm:$0xff] (!%p163_p2)   ;;  %v226_v25 = vshrl.u32 (!%p163_p2), %v225_v24, 7  ;;  %v374_v38 = vld [vmem:[%s638_s3 + $0x10] sm:$0xff] (!%p163_p2) }
   0xc   : > { %333 = vmatprep.subr.bf16.mxu0 (!%p163_p2), %v485_v4  ;;  %v223_v27 = vld [vmem:[%s637_s2] sm:$0x3] (!%p163_p2)  ;;  %v373_v35 = vld [vmem:[%s638_s3 + $0x8] sm:$0xff] (!%p163_p2)  ;;  %v375_v42 = vld [vmem:[%s638_s3 + $0x18] sm:$0xff] (!%p163_p2) }
   0xd   : > { %s641_s16 = smov (!%p188_p3, %s439_s16), 1  ;;  %v227_v26 = vsub.s32 0, %v226_v25  ;;  %v231_v28 = vsub.s32 1, %v226_v25 }
   0xe   : > { %s469_s27 = sshll.u32 %s641_s16, 5 }
   0xf   : > { %s192_s8 = scalar_lea.vmem %s635_s0, %s469_s27  ;;  %334 = vmatpush1.bf16.msra.mxu0 %v487_v5  ;;  %v228_v29 = vrot.slane %v223_v27, %v227_v26  ;;  %v232_v30 = vrot.slane %v223_v27, %v231_v28  ;;  %s197_s18 = scalar_lea.vmem %s639_s4, %s469_s27 }
  0x10   : > { %335 = vmatprep.subr.bf16.mxu0 %v488_v6  ;;  %v200_v9 = vld [vmem:[%s192_s8 + $0x8] sm:$0xff]  ;;  %v202_v10 = vld [vmem:[%s192_s8 + $0x18] sm:$0xff]  ;;  %v199_v21 = vld [vmem:[%s192_s8] sm:$0xff] }
  0x11   : > { %v204_v11 = vpack.c.bf16 %v202_v10, %v200_v9  ;;  %v201_v22 = vld [vmem:[%s192_s8 + $0x10] sm:$0xff] }
  0x12   : > { %v203_v23 = vpack.c.bf16 %v201_v22, %v199_v21 }
  0x13   : > { %336 = vmatpush1.bf16.msra.mxu0 %v490_v7  ;;  %466 = vmatprep.mubr.msk.bf16.mxu0 %vm325_vm0, %v204_v11 }
  0x14   : > { %337 = vmatprep.subr.bf16.mxu0 %v491_v8 }
  0x17   : > { %338 = vmatpush1.bf16.msra.mxu0 %v493_v12 }
  0x18   : > { %339 = vmatprep.subr.bf16.mxu0 %v494_v13 }
  0x1b   : > { %340 = vmatpush1.bf16.msra.mxu0 %v496_v14 }
  0x1c   : > { %341 = vmatprep.subr.bf16.mxu0 %v497_v15 }
  0x1f   : > { %342 = vmatpush1.bf16.msra.mxu0 %v499_v16 }
  0x20   : > { %343 = vmatprep.subr.bf16.mxu0 %v500_v17 }
  0x23   : > { %344 = vmatpush1.bf16.msra.mxu0 %v502_v18 }
  0x24   : > { %345 = vmatprep.subr.bf16.mxu0 %v503_v19 }
  0x27   : > { %346 = vmatpush1.bf16.msra.mxu0 %v505_v20 }
  0x2a   : > { %362 = vmatmul.mubr.bf16.vlgmr.msra.gmra.mrb[0].mxu0 %v203_v23 }
  0xfd   : > { %v363_v31 = vpop.f32.mrb[0].mxu0 }
  0xfe   : > { %v364_v33 = vadd.f32 %v363_v31, %v228_v29  ;;  %v365_v34 = vpop.f32.mrb[1].mxu0 }
  0xff   : > { %v366_v36 = vadd.f32 %v365_v34, %v232_v30  ;;  %v367_v37 = vpop.f32.mrb[2].mxu0 }
 0x100   : > { %v376_v39 = vadd.f32 %v372_v32, %v364_v33  ;;  %v368_v40 = vadd.f32 %v367_v37, %v228_v29  ;;  %v369_v41 = vpop.f32.mrb[3].mxu0 }
 0x101   : > { %v377_v43 = vadd.f32 %v373_v35, %v366_v36  ;;  %v370_v44 = vadd.f32 %v369_v41, %v232_v30 }
 0x102   : > { %380 = vst [vmem:[%s197_s18] sm:$0xff] %v376_v39  ;;  %v378_v45 = vadd.f32 %v374_v38, %v368_v40 }
 0x103   : > { %381 = vst.msk [vmem:[%s197_s18 + $0x8] sm:$0xff] %vm325_vm0, %v377_v43  ;;  %v379_v46 = vadd.f32 %v375_v42, %v370_v44 }
 0x104   : > { %382 = vst [vmem:[%s197_s18 + $0x10] sm:$0xff] %v378_v45 }
 0x105   : > { %383 = vst.msk [vmem:[%s197_s18 + $0x18] sm:$0xff] %vm325_vm0, %v379_v46 }
 0x106 PF: > { %s14_s15 = sadd.s32 1, %s512_s15  }
 0x107   : > { %p11_p4 = scmp.ge.s32.totalorder %s14_s15, 4  }
 0x109   :  { %13 = sbr.rel (!%p11_p4) target bundleno = 1 (0x1), region = 66 }

// kernel: cross_plus_vit_segnet_forward.9
= control target key start
LH: loop header
LB: loop body
LE: loop exit
PB: predicated region body
PF: predicated region fallthrough
CT: control target
= control target key end

     0   :  { %s2630_s21 = smov 0   ;;  %s3157_s0 = inlined_call_operand.vmem [shape: f32[2,16,144], index: 0, kind: input, shape index: {}]   ;;  %s3158_s1 = inlined_call_operand.vmem [shape: f32[1,144], index: 1, kind: input, shape index: {}]   ;;  %s3159_s2 = inlined_call_operand.vmem [shape: f32[1,144], index: 2, kind: input, shape index: {}]   ;;  %s3160_s3 = inlined_call_operand.vmem [shape: bf16[2,144,16], index: 3, kind: input, shape index: {}]   ;;  %s3161_s4 = inlined_call_operand.vmem [shape: bf16[2,144,16], index: 4, kind: input, shape index: {}]   ;;  %s3162_s5 = inlined_call_operand.vmem [shape: bf16[2,144,16], index: 5, kind: input, shape index: {}]   ;;  %s3163_s6 = inlined_call_operand.vmem [shape: bf16[2,16,144], index: 6, kind: input, shape index: {}]   ;;  %s3164_s7 = inlined_call_operand.vmem [shape: f32[1,144], index: 7, kind: input, shape index: {}]   ;;  %s3165_s8 = inlined_call_operand.vmem [shape: f32[1,144], index: 8, kind: input, shape index: {}]   ;;  %s3166_s9 = inlined_call_operand.vmem [shape: f32[1,144], index: 9, kind: input, shape index: {}]   ;;  %s3167_s10 = inlined_call_operand.vmem [shape: bf16[144,128], index: 10, kind: input, shape index: {}]   ;;  %s3168_s11 = inlined_call_operand.vmem [shape: f32[1,128], index: 11, kind: input, shape index: {}]   ;;  %s3169_s12 = inlined_call_operand.vmem [shape: bf16[128,144], index: 12, kind: input, shape index: {}]   ;;  %s3170_s13 = inlined_call_operand.vmem [shape: f32[1,144], index: 13, kind: input, shape index: {}]   ;;  %s3171_s14 = inlined_call_operand.vmem [shape: f32[1,144], index: 14, kind: input, shape index: {}]   ;;  %s3172_s15 = inlined_call_operand.vmem [shape: f32[1,144], index: 15, kind: input, shape index: {}]   ;;  %s3173_s16 = inlined_call_operand.vmem [shape: f32[2,16,144], index: 16, kind: output, shape index: {}]  }
   0x1   :  { %3174 = sst [smem:[#allocation2_spill]] %s3157_s0 }
   0x2 LB: > { %s2190_s22 = sadd.s32 4294967295, %s2540_s21   ;;  %p2194_p0 = scmp.ge.s32.totalorder %s2540_s21, 1  ;;  %s2540_s21 = sphi %s2630_s21, %s26_s21  }
   0x3   : > { %p462_p1 = scmp.lt.s32.totalorder %s2540_s21, 3 }
   0x5   : > { %p463_p2 = pnand %p2194_p0, %p462_p1 }
   0x6   : > { %p512_p3 = scmp.lt.s32.totalorder (!%p463_p2), %s2190_s22, 1  ;;  %vm529_vm0 = vcmask (!%p463_p2), 130048   ;;  %s3175_s26 = sld [smem:[#allocation2_spill]] (!%p463_p2)  ;;  %v2403_v8 = vld [vmem:[%s3160_s3] sm:$0xff] (!%p463_p2)   ;;  %v2542_v10 = vmov (!%p463_p2), 0   ;;  %v2405_v11 = vld [vmem:[%s3160_s3 + $0x8] sm:$0xff] (!%p463_p2)   ;;  %v568_v46 = vlaneseq (!%p463_p2) }
   0x7   : > { %466 = sbr.rel (%p463_p2) target bundleno = 3450 (0xd7a), region = 84  ;;  %v2404_v9 = vld [vmem:[%s3161_s4] sm:$0xff] (!%p463_p2)   ;;  %674 = vmatprep.subr.bf16.mxu0 (!%p463_p2), %v2542_v10  ;;  %789 = vmatprep.subr.bf16.mxu1 (!%p463_p2), %v2542_v10  ;;  %v2406_v12 = vld [vmem:[%s3161_s4 + $0x8] sm:$0xff] (!%p463_p2)   ;;  %v2407_v29 = vld [vmem:[%s3160_s3 + $0x10] sm:$0xff] (!%p463_p2)   ;;  %vm2544_vm1 = vmmov (!%p463_p2), 0  }
   0x8   : > { %675 = vmatpush1.bf16.msra.mxu0 (!%p463_p2), %v2403_v8  ;;  %790 = vmatpush1.bf16.msra.mxu1 (!%p463_p2), %v2404_v9  ;;  %v2408_v30 = vld [vmem:[%s3161_s4 + $0x10] sm:$0xff] (!%p463_p2)   ;;  %v2409_v31 = vld [vmem:[%s3160_s3 + $0x18] sm:$0xff] (!%p463_p2)   ;;  %v2411_v33 = vld [vmem:[%s3160_s3 + $0x20] sm:$0xff] (!%p463_p2)   ;;  %v569_v50 = vshrl.u32 (!%p463_p2), %v568_v46, 7 }
   0x9   : > { %676 = vmatprep.subr.bf16.mxu0 (!%p463_p2), %v2542_v10  ;;  %791 = vmatprep.subr.bf16.mxu1 (!%p463_p2), %v2542_v10  ;;  %v2410_v32 = vld [vmem:[%s3161_s4 + $0x18] sm:$0xff] (!%p463_p2)   ;;  %v2412_v34 = vld [vmem:[%s3161_s4 + $0x20] sm:$0xff] (!%p463_p2)   ;;  %v2413_v35 = vld [vmem:[%s3160_s3 + $0x28] sm:$0xff] (!%p463_p2)  }
   0xa   : > { %v2414_v36 = vld [vmem:[%s3161_s4 + $0x28] sm:$0xff] (!%p463_p2)   ;;  %v2415_v37 = vld [vmem:[%s3160_s3 + $0x30] sm:$0xff] (!%p463_p2)   ;;  %v2417_v39 = vld [vmem:[%s3160_s3 + $0x38] sm:$0xff] (!%p463_p2)   ;;  %v2753_v51 = vsub.s32 (!%p463_p2), 0, %v569_v50  ;;  %v2755_v52 = vsub.s32 (!%p463_p2), 1, %v569_v50 }
   0xb   : > { %v2416_v38 = vld [vmem:[%s3161_s4 + $0x30] sm:$0xff] (!%p463_p2)   ;;  %v2418_v40 = vld [vmem:[%s3161_s4 + $0x38] sm:$0xff] (!%p463_p2)   ;;  %v2419_v41 = vld [vmem:[%s3160_s3 + $0x40] sm:$0xff] (!%p463_p2)  }
   0xc   : > { %677 = vmatpush1.bf16.msra.mxu0 (!%p463_p2), %v2405_v11  ;;  %792 = vmatpush1.bf16.msra.mxu1 (!%p463_p2), %v2406_v12  ;;  %v2420_v42 = vld [vmem:[%s3161_s4 + $0x40] sm:$0xff] (!%p463_p2)  }
   0xd   : > { %678 = vmatprep.subr.bf16.mxu0 (!%p463_p2), %v2542_v10  ;;  %793 = vmatprep.subr.bf16.mxu1 (!%p463_p2), %v2542_v10  ;;  %v527_v53 = vld [vmem:[%s3158_s1] sm:$0x3] (!%p463_p2) }
   0xe   : > { %s3177_s22 = smov (!%p512_p3, %s2190_s22), 1  ;;  %v528_v55 = vld [vmem:[%s3159_s2] sm:$0x3]  ;;  %v571_v56 = vrot.slane %v527_v53, %v2753_v51  ;;  %v575_v57 = vrot.slane %v527_v53, %v2755_v52 }
   0xf   : > { %s2354_s23 = sshll.u32 %s3177_s22, 5  ;;  %v586_v61 = vrot.slane %v528_v55, %v2753_v51  ;;  %v590_v62 = vrot.slane %v528_v55, %v2755_v52 }
  0x10   : > { %s2646_s27 = scalar_lea.vmem %s3175_s26, %s2354_s23  ;;  %679 = vmatpush1.bf16.msra.mxu0 %v2407_v29  ;;  %794 = vmatpush1.bf16.msra.mxu1 %v2408_v30  ;;  %v2436_v29 = vld [vmem:[%s3161_s4 + $0x78] sm:$0xff]   ;;  %v2437_v30 = vld [vmem:[%s3161_s4 + $0x80] sm:$0xff]   ;;  %s521_s17 = scalar_lea.vmem %s3173_s16, %s2354_s23 }
  0x11   : > { %v2649_v0 = vld [vmem:[%s2646_s27] sm:$0xff]  ;;  %v2652_v1 = vld [vmem:[%s2646_s27 + $0x8] sm:$0xff]  ;;  %v525_v2 = vld [vmem:[%s2646_s27 + $0x10] sm:$0xff]  ;;  %680 = vmatprep.subr.bf16.mxu0 %v2542_v10  ;;  %795 = vmatprep.subr.bf16.mxu1 %v2542_v10 }
  0x12   : > { %v530_v3 = vsel %vm529_vm0, %v2652_v1, 0.0  ;;  %v526_v4 = vld [vmem:[%s2646_s27 + $0x18] sm:$0xff] }
  0x13   : > { %v531_v5 = vadd.f32 %v530_v3, %v2649_v0  ;;  %v534_v6 = vsel %vm529_vm0, %v526_v4, 0.0 }
  0x14   : > { %v535_v7 = vadd.f32 %v534_v6, %v525_v2  ;;  %681 = vmatpush1.bf16.msra.mxu0 %v2409_v31  ;;  %796 = vmatpush1.bf16.msra.mxu1 %v2410_v32  ;;  %v2438_v31 = vld [vmem:[%s3161_s4 + $0x88] sm:$0xff]   ;;  %v2543_v32 = vmov 0.0  }
  0x15   : > { %532 = vadd.xlane.f32.xlu0 %v531_v5  ;;  %682 = vmatprep.subr.bf16.mxu0 %v2542_v10 }
  0x16   : > { %797 = vmatprep.subr.bf16.mxu1 %v2542_v10 }
  0x18   : > { %683 = vmatpush1.bf16.msra.mxu0 %v2411_v33  ;;  %798 = vmatpush1.bf16.msra.mxu1 %v2412_v34 }
  0x19   : > { %536 = vadd.xlane.f32.xlu0 %v535_v7  ;;  %684 = vmatprep.subr.bf16.mxu0 %v2542_v10 }
  0x1a   : > { %799 = vmatprep.subr.bf16.mxu1 %v2542_v10 }
  0x1c   : > { %685 = vmatpush1.bf16.msra.mxu0 %v2413_v35  ;;  %800 = vmatpush1.bf16.msra.mxu1 %v2414_v36 }
  0x1d   : > { %686 = vmatprep.subr.bf16.mxu0 %v2542_v10  ;;  %801 = vmatprep.subr.bf16.mxu1 %v2542_v10 }
  0x20   : > { %687 = vmatpush1.bf16.msra.mxu0 %v2415_v37  ;;  %802 = vmatpush1.bf16.msra.mxu1 %v2416_v38 }
  0x21   : > { %688 = vmatprep.subr.bf16.mxu0 %v2542_v10  ;;  %803 = vmatprep.subr.bf16.mxu1 %v2542_v10 }
  0x24   : > { %689 = vmatpush1.bf16.msra.mxu0 %v2417_v39  ;;  %804 = vmatpush1.bf16.msra.mxu1 %v2418_v40 }
  0x25   : > { %690 = vmatprep.subr.bf16.mxu0 %v2542_v10  ;;  %805 = vmatprep.subr.bf16.mxu1 %v2542_v10 }
  0x28   : > { %691 = vmatpush1.bf16.msra.mxu0 %v2419_v41  ;;  %806 = vmatpush1.bf16.msra.mxu1 %v2420_v42 }
  0x29   : > { %902 = vmatprep.subr.bf16.mxu0 %v2542_v10  ;;  %2364 = vmatprep.subr.bf16.mxu1 %v2543_v32 }
  0xa2   : > { %v533_v13 = vpop.xlane.xlu0 %532 }
  0xa3   : > { %v539_v14 = vmul.f32 0.0069444445, %v533_v13 }
  0xa5   : > { %v2679_v15 = vsub.f32 %v2649_v0, %v539_v14  ;;  %v2682_v16 = vsub.f32 %v2652_v1, %v539_v14  ;;  %v2421_v14 = vld [vmem:[%s3162_s5] sm:$0xff]  }
  0xa6   : > { %v537_v17 = vpop.xlane.xlu0 %536 }
  0xa7   : > { %v540_v18 = vmul.f32 0.0069444445, %v537_v17  ;;  %v545_v19 = vmul.f32 %v2679_v15, %v2679_v15  ;;  %v546_v20 = vmul.f32 %v2682_v16, %v2682_v16  ;;  %v2424_v17 = vld [vmem:[%s3162_s5 + $0x18] sm:$0xff]  }
  0xa9   : > { %v2688_v21 = vsub.f32 %v525_v2, %v540_v18  ;;  %v2690_v22 = vsub.f32 %v526_v4, %v540_v18  ;;  %v549_v23 = vsel %vm529_vm0, %v546_v20, 0.0  ;;  %v2425_v18 = vld [vmem:[%s3162_s5 + $0x20] sm:$0xff]   ;;  %v2427_v20 = vld [vmem:[%s3162_s5 + $0x30] sm:$0xff]  }
  0xaa   : > { %v550_v24 = vadd.f32 %v549_v23, %v545_v19  ;;  %v2426_v19 = vld [vmem:[%s3162_s5 + $0x28] sm:$0xff]  }
  0xab   : > { %v547_v25 = vmul.f32 %v2688_v21, %v2688_v21  ;;  %v548_v26 = vmul.f32 %v2690_v22, %v2690_v22  ;;  %v2430_v23 = vld [vmem:[%s3161_s4 + $0x48] sm:$0xff]  }
  0xac   : > { %551 = vadd.xlane.f32.xlu1 %v550_v24  ;;  %v2431_v24 = vld [vmem:[%s3161_s4 + $0x50] sm:$0xff]  }
  0xad   : > { %v553_v27 = vsel %vm529_vm0, %v548_v26, 0.0  ;;  %v2433_v26 = vld [vmem:[%s3161_s4 + $0x60] sm:$0xff]  }
  0xae   : > { %v554_v28 = vadd.f32 %v553_v27, %v547_v25  ;;  %v2432_v25 = vld [vmem:[%s3161_s4 + $0x58] sm:$0xff]   ;;  %v2434_v27 = vld [vmem:[%s3161_s4 + $0x68] sm:$0xff]  }
  0xb0   : > { %555 = vadd.xlane.f32.xlu1 %v554_v28  ;;  %v2435_v28 = vld [vmem:[%s3161_s4 + $0x70] sm:$0xff]  }
 0x139   : > { %v552_v43 = vpop.xlane.xlu1 %551 }
 0x13a   : > { %v557_v44 = vmul.f32 0.0069444445, %v552_v43 }
 0x13c   : > { %v559_v45 = vadd.f32 1e-05, %v557_v44 }
 0x13d   : > { %v556_v47 = vpop.xlane.xlu1 %555 }
 0x13e   : > { %2496 = vrsqrt.f32 %v559_v45  ;;  %v558_v48 = vmul.f32 0.0069444445, %v556_v47 }
 0x140   : > { %v560_v49 = vadd.f32 1e-05, %v558_v48 }
 0x142   : > { %2498 = vrsqrt.f32 %v560_v49 }
 0x148   : > { %v2497_v54 = vpop.eup %2496 }
 0x149   : > { %v563_v58 = vmul.f32 %v2497_v54, %v2679_v15  ;;  %v564_v59 = vmul.f32 %v2497_v54, %v2682_v16  ;;  %v2422_v15 = vld [vmem:[%s3162_s5 + $0x8] sm:$0xff]   ;;  %v2423_v16 = vld [vmem:[%s3162_s5 + $0x10] sm:$0xff]  }
 0x14b   : > { %v578_v63 = vmul.f32 %v571_v56, %v563_v58  ;;  %v579_v2 = vmul.f32 %v575_v57, %v564_v59 }
 0x14c   : > { %v2499_v60 = vpop.eup %2498 }
 0x14d   : > { %v565_v3 = vmul.f32 %v2499_v60, %v2688_v21  ;;  %v566_v4 = vmul.f32 %v2499_v60, %v2690_v22  ;;  %v593_v7 = vadd.f32 %v586_v61, %v578_v63  ;;  %v594_v8 = vadd.f32 %v590_v62, %v579_v2  ;;  %v2428_v21 = vld [vmem:[%s3162_s5 + $0x38] sm:$0xff]   ;;  %v2429_v22 = vld [vmem:[%s3162_s5 + $0x40] sm:$0xff]  }
 0x14f   : > { %v580_v5 = vmul.f32 %v571_v56, %v565_v3  ;;  %v581_v6 = vmul.f32 %v575_v57, %v566_v4 }
 0x151   : > { %v595_v9 = vadd.f32 %v586_v61, %v580_v5  ;;  %v596_v11 = vadd.f32 %v590_v62, %v581_v6 }
 0x153   : > { %v2771_v12 = vpack.c.bf16 %v596_v11, %v594_v8  ;;  %v2773_v13 = vpack.c.bf16 %v595_v9, %v593_v7 }
 0x155   : > { %2208 = vmatprep.mubr.msk.bf16.mxu0 %vm529_vm0, %v2771_v12  ;;  %2218 = vmatprep.mubr.msk.bf16.mxu1 %vm529_vm0, %v2771_v12 }
 0x156   : > { %707 = vmatmul.mubr.bf16.vlgmr.msra.gmra.mrb[0].mxu0 %v2773_v13  ;;  %822 = vmatmul.mubr.bf16.vlgmr.msra.gmra.mrb[0].mxu1 %v2773_v13 }
 0x157   : > { %903 = vmatpush1.bf16.msra.mxu0 %v2421_v14  ;;  %2228 = vmatprep.mubr.msk.bf16.mxu0 %vm529_vm0, %v2771_v12 }
 0x158   : > { %904 = vmatprep.subr.bf16.mxu0 %v2542_v10  ;;  %2366 = vmatprep.mubr.msk.bf16.mxu1 %vm2544_vm1, %v2543_v32 }
 0x15b   : > { %905 = vmatpush1.bf16.msra.mxu0 %v2422_v15 }
 0x15c   : > { %906 = vmatprep.subr.bf16.mxu0 %v2542_v10 }
 0x15f   : > { %907 = vmatpush1.bf16.msra.mxu0 %v2423_v16 }
 0x160   : > { %908 = vmatprep.subr.bf16.mxu0 %v2542_v10 }
 0x163   : > { %909 = vmatpush1.bf16.msra.mxu0 %v2424_v17 }
 0x164   : > { %910 = vmatprep.subr.bf16.mxu0 %v2542_v10 }
 0x167   : > { %911 = vmatpush1.bf16.msra.mxu0 %v2425_v18 }
 0x168   : > { %912 = vmatprep.subr.bf16.mxu0 %v2542_v10 }
 0x16b   : > { %913 = vmatpush1.bf16.msra.mxu0 %v2426_v19 }
 0x16c   : > { %914 = vmatprep.subr.bf16.mxu0 %v2542_v10 }
 0x16f   : > { %915 = vmatpush1.bf16.msra.mxu0 %v2427_v20 }
 0x170   : > { %916 = vmatprep.subr.bf16.mxu0 %v2542_v10 }
 0x173   : > { %917 = vmatpush1.bf16.msra.mxu0 %v2428_v21  ;;  %v2439_v21 = vld [vmem:[%s3160_s3 + $0x48] sm:$0xff]  }
 0x174   : > { %918 = vmatprep.subr.bf16.mxu0 %v2542_v10 }
 0x177   : > { %919 = vmatpush1.bf16.msra.mxu0 %v2429_v22 }
 0x178   : > { %1252 = vmatprep.subr.bf16.mxu0 %v2542_v10 }
 0x17a   : > { %935 = vmatmul.mubr.bf16.vlgmr.msra.gmra.mrb[4].mxu0 %v2773_v13 }
 0x17b   : > { %1253 = vmatpush1.bf16.msra.mxu0 %v2430_v23  ;;  %2286 = vmatprep.mubr.msk.bf16.mxu0 %vm529_vm0, %v2771_v12  ;;  %v2440_v23 = vld [vmem:[%s3160_s3 + $0x50] sm:$0xff]  }
 0x17c   : > { %1254 = vmatprep.subr.bf16.mxu0 %v2542_v10 }
 0x17f   : > { %1255 = vmatpush1.bf16.msra.mxu0 %v2431_v24  ;;  %v2441_v24 = vld [vmem:[%s3160_s3 + $0x58] sm:$0xff]  }
 0x180   : > { %1256 = vmatprep.subr.bf16.mxu0 %v2542_v10 }
 0x183   : > { %1257 = vmatpush1.bf16.msra.mxu0 %v2432_v25  ;;  %v2442_v25 = vld [vmem:[%s3160_s3 + $0x60] sm:$0xff]  }
 0x184   : > { %1258 = vmatprep.subr.bf16.mxu0 %v2542_v10 }
 0x187   : > { %1259 = vmatpush1.bf16.msra.mxu0 %v2433_v26  ;;  %v2443_v26 = vld [vmem:[%s3160_s3 + $0x68] sm:$0xff]  }
 0x188   : > { %1260 = vmatprep.subr.bf16.mxu0 %v2542_v10 }
 0x18b   : > { %1261 = vmatpush1.bf16.msra.mxu0 %v2434_v27  ;;  %v2444_v27 = vld [vmem:[%s3160_s3 + $0x70] sm:$0xff]  }
 0x18c   : > { %1262 = vmatprep.subr.bf16.mxu0 %v2542_v10 }
 0x18f   : > { %1263 = vmatpush1.bf16.msra.mxu0 %v2435_v28  ;;  %v2445_v28 = vld [vmem:[%s3160_s3 + $0x78] sm:$0xff]  }
 0x190   : > { %1264 = vmatprep.subr.bf16.mxu0 %v2542_v10 }
 0x193   : > { %1265 = vmatpush1.bf16.msra.mxu0 %v2436_v29  ;;  %v2446_v29 = vld [vmem:[%s3160_s3 + $0x80] sm:$0xff]  }
 0x194   : > { %1266 = vmatprep.subr.bf16.mxu0 %v2542_v10 }
 0x197   : > { %1267 = vmatpush1.bf16.msra.mxu0 %v2437_v30  ;;  %v2447_v30 = vld [vmem:[%s3160_s3 + $0x88] sm:$0xff]  }
 0x198   : > { %1268 = vmatprep.subr.bf16.mxu0 %v2542_v10 }
 0x19b   : > { %1269 = vmatpush1.bf16.msra.mxu0 %v2438_v31  ;;  %v2448_v31 = vld [vmem:[%s3162_s5 + $0x48] sm:$0xff]  }
 0x19c   : > { %2382 = vmatprep.subr.bf16.mxu0 %v2543_v32 }
 0x19e   : > { %1285 = vmatmul.mubr.bf16.vlgmr.msra.gmra.mrb[8].mxu0 %v2773_v13 }
 0x19f   : > { %2384 = vmatprep.mubr.msk.bf16.mxu0 %vm2544_vm1, %v2543_v32 }
 0x229   : > { %v708_v33 = vpop.f32.mrb[0].mxu0  ;;  %v823_v34 = vpop.f32.mrb[0].mxu1 }
 0x22a   : > { %v710_v35 = vpop.f32.mrb[1].mxu0  ;;  %v825_v36 = vpop.f32.mrb[1].mxu1  ;;  %v715_v39 = vmul.f32 0.25, %v708_v33  ;;  %v2449_v33 = vld [vmem:[%s3162_s5 + $0x50] sm:$0xff]  }
 0x22b   : > { %v711_v37 = vpop.f32.mrb[2].mxu0  ;;  %v826_v38 = vpop.f32.mrb[2].mxu1  ;;  %v2451_v35 = vld [vmem:[%s3162_s5 + $0x60] sm:$0xff]   ;;  %v2453_v36 = vld [vmem:[%s3162_s5 + $0x70] sm:$0xff]  }
 0x22c   : > { %v716_v40 = vmul.f32 0.25, %v711_v37  ;;  %v944_v41 = vpack.c.bf16 %v826_v38, %v823_v34  ;;  %v713_v42 = vpop.f32.mrb[3].mxu0  ;;  %v828_v43 = vpop.f32.mrb[3].mxu1  ;;  %v2450_v34 = vld [vmem:[%s3162_s5 + $0x58] sm:$0xff]   ;;  %v2455_v38 = vld [vmem:[%s3162_s5 + $0x80] sm:$0xff]  }
 0x22d   : > { %v2454_v37 = vld [vmem:[%s3162_s5 + $0x78] sm:$0xff]  }
 0x22e   : > { %v943_v44 = vpack.c.bf16 %v716_v40, %v715_v39  ;;  %v949_v45 = vsel %vm529_vm0, %v944_v41, 0  ;;  %v2456_v39 = vld [vmem:[%s3162_s5 + $0x88] sm:$0xff]  }
 0x22f   : > { %2365 = vmatpush3.bf16.xpose.msra.mxu1 %v949_v45 }
 0x230   : > { %2370 = vmatprep.subr.bf16.mxu1 %v2543_v32 }
 0x236   : > { %2367 = vmatmul.mubr.msk.bf16.vlgmr.msra.gmra.mrb[4].mxu1 %vm529_vm0, %v943_v44 }
 0x237   : > { %2372 = vmatprep.mubr.msk.bf16.mxu1 %vm2544_vm1, %v2543_v32 }
 0x24d   : > { %v936_v46 = vpop.f32.mrb[4].mxu0 }
 0x24e   : > { %v938_v47 = vpop.f32.mrb[5].mxu0 }
 0x24f   : > { %v939_v48 = vpop.f32.mrb[6].mxu0 }
 0x250   : > { %v1015_v49 = vpack.c.bf16 %v939_v48, %v936_v46  ;;  %v941_v50 = vpop.f32.mrb[7].mxu0 }
 0x252   : > { %2371 = vmatpush3.bf16.msra.mxu1 %v1015_v49 }
 0x253   : > { %1136 = vmatprep.subr.bf16.mxu1 %v2542_v10 }
 0x271   : > { %v2870_v53 = vpop.f32.mrb[8].mxu0 }
 0x272   : > { %v1288_v54 = vpop.f32.mrb[9].mxu0 }
 0x273   : > { %v2872_v55 = vpop.f32.mrb[10].mxu0 }
 0x274   : > { %v1408_v56 = vpack.c.bf16 %v2872_v55, %v2870_v53  ;;  %v1291_v57 = vpop.f32.mrb[11].mxu0 }
 0x276   : > { %v1413_v40 = vsel %vm529_vm0, %v1408_v56, 0 }
 0x309   : > { %v985_v58 = vpop.f32.mrb[4].mxu1 }
 0x30a   : > { %v2368_v59 = vpop.f32.mrb[5].mxu1  ;;  %v992_v60 = vsel %vm529_vm0, %v985_v58, -inf }
 0x30b   : > { %993 = vmax.xlane.f32.xlu0 %v992_v60  ;;  %v988_v61 = vpop.f32.mrb[6].mxu1 }
 0x30c   : > { %v2369_v62 = vpop.f32.mrb[7].mxu1  ;;  %v995_v63 = vsel %vm529_vm0, %v988_v61, -inf }
 0x30d   : > { %996 = vmax.xlane.f32.xlu1 %v995_v63 }
 0x398   : > { %v994_v2 = vpop.xlane.xlu0 %993 }
 0x399   : > { %v998_v3 = vsub.f32 %v985_v58, %v994_v2 }
 0x39a   : > { %v997_v4 = vpop.xlane.xlu1 %996 }
 0x39b   : > { %v1000_v5 = vmul.f32 1.442695, %v998_v3  ;;  %v999_v6 = vsub.f32 %v988_v61, %v997_v4 }
 0x39d   : > { %2500 = vpow2.f32 %v1000_v5  ;;  %v1002_v7 = vmul.f32 1.442695, %v999_v6 }
 0x39f   : > { %2502 = vpow2.f32 %v1002_v7 }
 0x3a7   : > { %v2501_v8 = vpop.eup %2500 }
 0x3a8   : > { %v1004_v9 = vsel %vm529_vm0, %v2501_v8, 0.0 }
 0x3a9   : > { %v2503_v11 = vpop.eup %2502  ;;  %1005 = vadd.xlane.f32.xlu0 %v1004_v9 }
 0x3aa   : > { %v1007_v14 = vsel %vm529_vm0, %v2503_v11, 0.0 }
 0x3ab   : > { %1008 = vadd.xlane.f32.xlu1 %v1007_v14 }
 0x436   : > { %v1006_v15 = vpop.xlane.xlu0 %1005 }
 0x437   : > { %2504 = vrcp.f32 %v1006_v15  ;;  %v2459_v15 = vld [vmem:[%s3163_s6 + $0x14] ss:$8 sps:$4 sm:$0xff]  }
 0x438   : > { %v1009_v16 = vpop.xlane.xlu1 %1008 }
 0x439   : > { %2506 = vrcp.f32 %v1009_v16 }
 0x441   : > { %v2505_v17 = vpop.eup %2504 }
 0x442   : > { %v1012_v19 = vmul.f32 %v2505_v17, %v2501_v8 }
 0x443   : > { %v2507_v18 = vpop.eup %2506 }
 0x444   : > { %v1013_v20 = vmul.f32 %v2507_v18, %v2503_v11 }
 0x446   : > { %v1014_v22 = vpack.c.bf16 %v1013_v20, %v1012_v19 }
 0x448   : > { %2373 = vmatmul.mubr.msk.bf16.vlgmr.msra.gmra.mrb[8].mxu1 %vm529_vm0, %v1014_v22  ;;  %v2457_v22 = vld [vmem:[%s3163_s6 + $0x10] ss:$8 sps:$4 sm:$0xff]  }
 0x449   : > { %1137 = vmatpush1.bf16.msra.mxu1 %v2439_v21  ;;  %2258 = vmatprep.mubr.msk.bf16.mxu1 %vm529_vm0, %v2771_v12 }
 0x44a   : > { %1138 = vmatprep.subr.bf16.mxu1 %v2542_v10 }
 0x44d   : > { %1139 = vmatpush1.bf16.msra.mxu1 %v2440_v23 }
 0x44e   : > { %1140 = vmatprep.subr.bf16.mxu1 %v2542_v10 }
 0x451   : > { %1141 = vmatpush1.bf16.msra.mxu1 %v2441_v24  ;;  %v2462_v24 = vld [vmem:[%s3163_s6 + $0x4] ss:$8 sps:$4 sm:$0xff]  }
 0x452   : > { %1142 = vmatprep.subr.bf16.mxu1 %v2542_v10 }
 0x455   : > { %1143 = vmatpush1.bf16.msra.mxu1 %v2442_v25 }
 0x456   : > { %1144 = vmatprep.subr.bf16.mxu1 %v2542_v10 }
 0x459   : > { %1145 = vmatpush1.bf16.msra.mxu1 %v2443_v26 }
 0x45a   : > { %1146 = vmatprep.subr.bf16.mxu1 %v2542_v10 }
 0x45d   : > { %1147 = vmatpush1.bf16.msra.mxu1 %v2444_v27 }
 0x45e   : > { %1148 = vmatprep.subr.bf16.mxu1 %v2542_v10 }
 0x461   : > { %1149 = vmatpush1.bf16.msra.mxu1 %v2445_v28  ;;  %v2460_v28 = vld [vmem:[%s3163_s6] ss:$8 sps:$4 sm:$0xff]  }
 0x462   : > { %1150 = vmatprep.subr.bf16.mxu1 %v2542_v10 }
 0x465   : > { %1151 = vmatpush1.bf16.msra.mxu1 %v2446_v29 }
 0x466   : > { %1152 = vmatprep.subr.bf16.mxu1 %v2542_v10 }
 0x469   : > { %1153 = vmatpush1.bf16.msra.mxu1 %v2447_v30 }
 0x46a   : > { %1366 = vmatprep.subr.bf16.mxu1 %v2542_v10 }
 0x46c   : > { %1169 = vmatmul.mubr.bf16.vlgmr.msra.gmra.mrb[12].mxu1 %v2773_v13 }
 0x46d   : > { %1367 = vmatpush1.bf16.msra.mxu1 %v2448_v31  ;;  %2314 = vmatprep.mubr.msk.bf16.mxu1 %vm529_vm0, %v2771_v12  ;;  %v2452_v12 = vld [vmem:[%s3162_s5 + $0x68] sm:$0xff]   ;;  %v1644_v31 = vld [vmem:[%s3164_s7] sm:$0x3] }
 0x46e   : > { %1368 = vmatprep.subr.bf16.mxu1 %v2542_v10 }
 0x471   : > { %1369 = vmatpush1.bf16.msra.mxu1 %v2449_v33 }
 0x472   : > { %1370 = vmatprep.subr.bf16.mxu1 %v2542_v10 }
 0x475   : > { %1371 = vmatpush1.bf16.msra.mxu1 %v2450_v34  ;;  %v1653_v34 = vrot.slane %v1644_v31, %v2755_v52 }
 0x476   : > { %1372 = vmatprep.subr.bf16.mxu1 %v2542_v10 }
 0x479   : > { %1373 = vmatpush1.bf16.msra.mxu1 %v2451_v35 }
 0x47a   : > { %1374 = vmatprep.subr.bf16.mxu1 %v2542_v10 }
 0x47d   : > { %1375 = vmatpush1.bf16.msra.mxu1 %v2452_v12  ;;  %v1649_v12 = vrot.slane %v1644_v31, %v2753_v51 }
 0x47e   : > { %1376 = vmatprep.subr.bf16.mxu1 %v2542_v10 }
 0x481   : > { %1377 = vmatpush1.bf16.msra.mxu1 %v2453_v36 }
 0x482   : > { %1378 = vmatprep.subr.bf16.mxu1 %v2542_v10 }
 0x485   : > { %1379 = vmatpush1.bf16.msra.mxu1 %v2454_v37 }
 0x486   : > { %1380 = vmatprep.subr.bf16.mxu1 %v2542_v10 }
 0x489   : > { %1381 = vmatpush1.bf16.msra.mxu1 %v2455_v38 }
 0x48a   : > { %1382 = vmatprep.subr.bf16.mxu1 %v2542_v10 }
 0x48d   : > { %1383 = vmatpush1.bf16.msra.mxu1 %v2456_v39  ;;  %v2532_v39 = vld [vmem:[%s2646_s27 + $0x10] sm:$0xff] }
 0x48e   : > { %2376 = vmatprep.subr.bf16.mxu1 %v2543_v32 }
 0x490   : > { %1399 = vmatmul.mubr.bf16.vlgmr.msra.gmra.mrb[16].mxu1 %v2773_v13 }
 0x491   : > { %2378 = vmatprep.mubr.msk.bf16.mxu1 %vm2544_vm1, %v2543_v32 }
 0x496   : > { %2377 = vmatpush3.bf16.xpose.msra.mxu1 %v1413_v40 }
 0x497   : > { %1812 = vmatprep.subr.bf16.mxu1 %v2542_v10 }
 0x51b   : > { %v2966_v41 = vpop.f32.mrb[8].mxu1 }
 0x51c   : > { %v2374_v42 = vpop.f32.mrb[9].mxu1 }
 0x51d   : > { %v2968_v43 = vpop.f32.mrb[10].mxu1 }
 0x51e   : > { %v1060_v44 = vpack.c.bf16 %v2968_v43, %v2966_v41  ;;  %v2375_v13 = vpop.f32.mrb[11].mxu1  ;;  %v2533_v43 = vld [vmem:[%s2646_s27 + $0x18] sm:$0xff] }
 0x53f   : > { %v1170_v45 = vpop.f32.mrb[12].mxu1 }
 0x540   : > { %v1172_v46 = vpop.f32.mrb[13].mxu1  ;;  %v1177_v47 = vmul.f32 0.25, %v1170_v45 }
 0x541   : > { %v1173_v32 = vpop.f32.mrb[14].mxu1 }
 0x542   : > { %v1178_v48 = vmul.f32 0.25, %v1173_v32  ;;  %v1175_v49 = vpop.f32.mrb[15].mxu1 }
 0x543   : > { %v2464_v49 = vld [vmem:[%s3167_s10 + $0x8] sm:$0xff]  }
 0x544   : > { %v1407_v50 = vpack.c.bf16 %v1178_v48, %v1177_v47  ;;  %v2463_v48 = vld [vmem:[%s3167_s10] sm:$0xff]  }
 0x546   : > { %2379 = vmatmul.mubr.msk.bf16.vlgmr.msra.gmra.mrb[20].mxu1 %vm529_vm0, %v1407_v50  ;;  %v2465_v50 = vld [vmem:[%s3167_s10 + $0x10] sm:$0xff]  }
 0x547   : > { %1813 = vmatpush1.bf16.msra.mxu1 %v2463_v48  ;;  %v2478_v48 = vld [vmem:[%s3169_s12 + $0x20] ss:$8 sps:$4 sm:$0xff]  }
 0x548   : > { %1814 = vmatprep.subr.bf16.mxu1 %v2542_v10 }
 0x54b   : > { %1815 = vmatpush1.bf16.msra.mxu1 %v2464_v49  ;;  %v2483_v49 = vld [vmem:[%s3169_s12 + $0x34] ss:$8 sps:$4 sm:$0xff]  }
 0x54c   : > { %1816 = vmatprep.subr.bf16.mxu1 %v2542_v10 }
 0x54f   : > { %1817 = vmatpush1.bf16.msra.mxu1 %v2465_v50  ;;  %v2481_v50 = vld [vmem:[%s3169_s12 + $0x30] ss:$8 sps:$4 sm:$0xff]  }
 0x550   : > { %1818 = vmatprep.subr.bf16.mxu1 %v2542_v10 }
 0x563   : > { %v1400_v53 = vpop.f32.mrb[16].mxu1 }
 0x564   : > { %v1402_v54 = vpop.f32.mrb[17].mxu1 }
 0x565   : > { %v1403_v55 = vpop.f32.mrb[18].mxu1 }
 0x566   : > { %v1479_v56 = vpack.c.bf16 %v1403_v55, %v1400_v53  ;;  %v1405_v57 = vpop.f32.mrb[19].mxu1 }
 0x568   : > { %2383 = vmatpush3.bf16.msra.mxu0 %v1479_v56 }
 0x569   : > { %1541 = vmatprep.subr.bf16.mxu0 %v2459_v15  ;;  %v2471_v15 = vld [vmem:[%s3167_s10 + $0x40] sm:$0xff]  }
 0x619   : > { %v1449_v58 = vpop.f32.mrb[20].mxu1 }
 0x61a   : > { %v2380_v59 = vpop.f32.mrb[21].mxu1  ;;  %v1456_v60 = vsel %vm529_vm0, %v1449_v58, -inf }
 0x61b   : > { %1457 = vmax.xlane.f32.xlu0 %v1456_v60  ;;  %v1452_v61 = vpop.f32.mrb[22].mxu1 }
 0x61c   : > { %v2381_v62 = vpop.f32.mrb[23].mxu1  ;;  %v1459_v63 = vsel %vm529_vm0, %v1452_v61, -inf }
 0x61d   : > { %1460 = vmax.xlane.f32.xlu1 %v1459_v63 }
 0x6a8   : > { %v1458_v2 = vpop.xlane.xlu0 %1457 }
 0x6a9   : > { %v1462_v3 = vsub.f32 %v1449_v58, %v1458_v2 }
 0x6aa   : > { %v1461_v4 = vpop.xlane.xlu1 %1460 }
 0x6ab   : > { %v1464_v5 = vmul.f32 1.442695, %v1462_v3  ;;  %v1463_v6 = vsub.f32 %v1452_v61, %v1461_v4 }
 0x6ad   : > { %2508 = vpow2.f32 %v1464_v5  ;;  %v1466_v7 = vmul.f32 1.442695, %v1463_v6 }
 0x6af   : > { %2510 = vpow2.f32 %v1466_v7  ;;  %v2466_v7 = vld [vmem:[%s3167_s10 + $0x18] sm:$0xff]  }
 0x6b0   : > { %1819 = vmatpush1.bf16.msra.mxu1 %v2466_v7 }
 0x6b1   : > { %1820 = vmatprep.subr.bf16.mxu1 %v2542_v10 }
 0x6b7   : > { %v2509_v8 = vpop.eup %2508 }
 0x6b8   : > { %v1468_v9 = vsel %vm529_vm0, %v2509_v8, 0.0 }
 0x6b9   : > { %v2511_v11 = vpop.eup %2510  ;;  %1469 = vadd.xlane.f32.xlu0 %v1468_v9  ;;  %v2468_v9 = vld [vmem:[%s3167_s10 + $0x28] sm:$0xff]  }
 0x6ba   : > { %v1471_v14 = vsel %vm529_vm0, %v2511_v11, 0.0 }
 0x6bb   : > { %1472 = vadd.xlane.f32.xlu1 %v1471_v14  ;;  %v2470_v14 = vld [vmem:[%s3167_s10 + $0x38] sm:$0xff]  }
 0x746   : > { %v1470_v16 = vpop.xlane.xlu0 %1469 }
 0x747   : > { %2512 = vrcp.f32 %v1470_v16 }
 0x748   : > { %v1473_v17 = vpop.xlane.xlu1 %1472 }
 0x749   : > { %2514 = vrcp.f32 %v1473_v17 }
 0x751   : > { %v2513_v18 = vpop.eup %2512 }
 0x752   : > { %v1476_v20 = vmul.f32 %v2513_v18, %v2509_v8  ;;  %v2467_v8 = vld [vmem:[%s3167_s10 + $0x20] sm:$0xff]  }
 0x753   : > { %v2515_v19 = vpop.eup %2514  ;;  %1821 = vmatpush1.bf16.msra.mxu1 %v2467_v8 }
 0x754   : > { %v1477_v21 = vmul.f32 %v2515_v19, %v2511_v11  ;;  %1822 = vmatprep.subr.bf16.mxu1 %v2542_v10  ;;  %v2469_v11 = vld [vmem:[%s3167_s10 + $0x30] sm:$0xff]  }
 0x756   : > { %v1478_v23 = vpack.c.bf16 %v1477_v21, %v1476_v20 }
 0x757   : > { %1823 = vmatpush1.bf16.msra.mxu1 %v2468_v9 }
 0x758   : > { %2385 = vmatmul.mubr.msk.bf16.vlgmr.msra.gmra.mrb[12].mxu0 %vm529_vm0, %v1478_v23  ;;  %1824 = vmatprep.subr.bf16.mxu1 %v2542_v10  ;;  %v1661_v23 = vld [vmem:[%s3166_s9] sm:$0x3] }
 0x759   : > { %1542 = vmatpush1.bf16.msra.mxu0 %v2457_v22  ;;  %1573 = vmatprep.mubr.bf16.mxu0 %v2542_v10  ;;  %v1660_v22 = vld [vmem:[%s3165_s8] sm:$0x3] }
 0x75a   : > { %1597 = vmatprep.subr.bf16.mxu0 %v2462_v24  ;;  %v1706_v24 = vrot.slane %v1660_v22, %v2755_v52 }
 0x75b   : > { %1825 = vmatpush1.bf16.msra.mxu1 %v2469_v11 }
 0x75c   : > { %1826 = vmatprep.subr.bf16.mxu1 %v2542_v10 }
 0x75f   : > { %1827 = vmatpush1.bf16.msra.mxu1 %v2470_v14 }
 0x760   : > { %1828 = vmatprep.subr.bf16.mxu1 %v2542_v10 }
 0x763   : > { %1829 = vmatpush1.bf16.msra.mxu1 %v2471_v15 }
 0x82b   : > { %v1517_v25 = vpop.f32.mrb[12].mxu0 }
 0x82c   : > { %v2386_v26 = vpop.f32.mrb[13].mxu0 }
 0x82d   : > { %v1520_v27 = vpop.f32.mrb[14].mxu0 }
 0x82e   : > { %v1524_v29 = vpack.c.bf16 %v1520_v27, %v1517_v25  ;;  %v2387_v30 = vpop.f32.mrb[15].mxu0 }
 0x82f   : > { %v1717_v30 = vrot.slane %v1661_v23, %v2753_v51 }
 0x830   : > { %2321 = vmatmul.mubr.msk.bf16.vlgmr.msra.gmra.mrb[16].mxu0 %vm529_vm0, %v1524_v29  ;;  %v1721_v29 = vrot.slane %v1661_v23, %v2755_v52 }
 0x831   : > { %1598 = vmatpush1.bf16.msra.mxu0 %v2460_v28  ;;  %1629 = vmatprep.mubr.bf16.mxu0 %v2542_v10 }
 0x83c   : > { %2324 = vmatmul.mubr.msk.bf16.vlgmr.msra.gmra.mrb[16].mxu0 %vm529_vm0, %v1060_v44 }
 0x83d   : > { %2048 = vmatprep.mubr.bf16.mxu0 %v2542_v10  ;;  %v1702_v10 = vrot.slane %v1660_v22, %v2753_v51 }
 0x90f   : > { %v1631_v33 = vpop.f32.mrb[16].mxu0 }
 0x910   : > { %v1640_v35 = vadd.f32 %v1631_v33, %v2649_v0  ;;  %v1633_v36 = vpop.f32.mrb[17].mxu0 }
 0x911   : > { %v1641_v37 = vadd.f32 %v1633_v36, %v2652_v1  ;;  %v1635_v38 = vpop.f32.mrb[18].mxu0 }
 0x912   : > { %v1642_v40 = vadd.f32 %v2532_v39, %v1635_v38  ;;  %v1637_v41 = vpop.f32.mrb[19].mxu0  ;;  %v3009_v13 = vadd.f32 %v1649_v12, %v1640_v35 }
 0x913   : > { %v3006_v42 = vadd.f32 %v1653_v34, %v1641_v37  ;;  %v1643_v44 = vadd.f32 %v2533_v43, %v1637_v41 }
 0x914   : > { %v3015_v46 = vadd.f32 %v1649_v12, %v1642_v40 }
 0x915   : > { %v3011_v45 = vadd.f32 %v1653_v34, %v1643_v44  ;;  %v1662_v0 = vsel %vm529_vm0, %v3006_v42, 0.0  ;;  %v2474_v44 = vld [vmem:[%s3169_s12 + $0x4] ss:$8 sps:$4 sm:$0xff]  }
 0x916   : > { %v1663_v32 = vadd.f32 %v1662_v0, %v3009_v13  ;;  %v2472_v0 = vld [vmem:[%s3169_s12] ss:$8 sps:$4 sm:$0xff]   ;;  %2016 = vmatprep.subr.bf16.mxu0 %v2474_v44 }
 0x917   : > { %v1666_v1 = vsel %vm529_vm0, %v3011_v45, 0.0  ;;  %2017 = vmatpush1.bf16.msra.mxu0 %v2472_v0 }
 0x918   : > { %1664 = vadd.xlane.f32.xlu0 %v1663_v32  ;;  %v1667_v47 = vadd.f32 %v1666_v1, %v3015_v46  ;;  %v2477_v32 = vld [vmem:[%s3169_s12 + $0x14] ss:$8 sps:$4 sm:$0xff]   ;;  %v2475_v1 = vld [vmem:[%s3169_s12 + $0x10] ss:$8 sps:$4 sm:$0xff]  }
 0x919   : > { %2018 = vmatprep.subr.bf16.mxu0 %v2477_v32 }
 0x91a   : > { %1668 = vadd.xlane.f32.xlu1 %v1667_v47  ;;  %v2480_v47 = vld [vmem:[%s3169_s12 + $0x24] ss:$8 sps:$4 sm:$0xff]  }
 0x91b   : > { %2019 = vmatpush1.bf16.msra.mxu0 %v2475_v1 }
 0x91c   : > { %2020 = vmatprep.subr.bf16.mxu0 %v2480_v47 }
 0x91f   : > { %2021 = vmatpush1.bf16.msra.mxu0 %v2478_v48 }
 0x920   : > { %2022 = vmatprep.subr.bf16.mxu0 %v2483_v49 }
 0x923   : > { %2023 = vmatpush1.bf16.msra.mxu0 %v2481_v50 }
 0x9a5   : > { %v1665_v53 = vpop.xlane.xlu0 %1664 }
 0x9a6   : > { %v1670_v54 = vmul.f32 0.0069444445, %v1665_v53  ;;  %v2486_v53 = vld [vmem:[%s3169_s12 + $0x44] ss:$8 sps:$4 sm:$0xff]  }
 0x9a7   : > { %v1669_v55 = vpop.xlane.xlu1 %1668  ;;  %2024 = vmatprep.subr.bf16.mxu0 %v2486_v53 }
 0x9a8   : > { %v1672_v56 = vsub.f32 %v3009_v13, %v1670_v54  ;;  %v1673_v57 = vsub.f32 %v3006_v42, %v1670_v54  ;;  %v1671_v58 = vmul.f32 0.0069444445, %v1669_v55  ;;  %v2484_v54 = vld [vmem:[%s3169_s12 + $0x40] ss:$8 sps:$4 sm:$0xff]   ;;  %v2489_v55 = vld [vmem:[%s3169_s12 + $0x54] ss:$8 sps:$4 sm:$0xff]  }
 0x9a9   : > { %2025 = vmatpush1.bf16.msra.mxu0 %v2484_v54 }
 0x9aa   : > { %v1674_v59 = vsub.f32 %v3015_v46, %v1671_v58  ;;  %v1675_v60 = vsub.f32 %v3011_v45, %v1671_v58  ;;  %v1676_v61 = vmul.f32 %v1672_v56, %v1672_v56  ;;  %v1677_v62 = vmul.f32 %v1673_v57, %v1673_v57  ;;  %2026 = vmatprep.subr.bf16.mxu0 %v2489_v55  ;;  %v2490_v58 = vld [vmem:[%s3169_s12 + $0x60] ss:$8 sps:$4 sm:$0xff]  }
 0x9ac   : > { %v1680_v63 = vsel %vm529_vm0, %v1677_v62, 0.0  ;;  %v1678_v2 = vmul.f32 %v1674_v59, %v1674_v59  ;;  %v1679_v3 = vmul.f32 %v1675_v60, %v1675_v60 }
 0x9ad   : > { %v1681_v4 = vadd.f32 %v1680_v63, %v1676_v61  ;;  %v2325_v61 = vld [vmem:[%s3168_s11] ss:$0 sm:$0xff] }
 0x9ae   : > { %v1684_v5 = vsel %vm529_vm0, %v1679_v3, 0.0 }
 0x9af   : > { %1682 = vadd.xlane.f32.xlu0 %v1681_v4  ;;  %v1685_v6 = vadd.f32 %v1684_v5, %v1678_v2 }
 0x9b1   : > { %1686 = vadd.xlane.f32.xlu1 %v1685_v6 }
 0xa3c   : > { %v1683_v16 = vpop.xlane.xlu0 %1682 }
 0xa3d   : > { %v1688_v17 = vmul.f32 0.0069444445, %v1683_v16 }
 0xa3e   : > { %v1687_v18 = vpop.xlane.xlu1 %1686 }
 0xa3f   : > { %v1690_v19 = vadd.f32 1e-05, %v1688_v17  ;;  %v1689_v20 = vmul.f32 0.0069444445, %v1687_v18 }
 0xa41   : > { %2516 = vrsqrt.f32 %v1690_v19  ;;  %v1691_v21 = vadd.f32 1e-05, %v1689_v20 }
 0xa43   : > { %2518 = vrsqrt.f32 %v1691_v21 }
 0xa4b   : > { %v2517_v25 = vpop.eup %2516 }
 0xa4c   : > { %v1694_v26 = vmul.f32 %v2517_v25, %v1672_v56  ;;  %v1695_v27 = vmul.f32 %v2517_v25, %v1673_v57  ;;  %v2487_v56 = vld [vmem:[%s3169_s12 + $0x50] ss:$8 sps:$4 sm:$0xff]   ;;  %v2492_v57 = vld [vmem:[%s3169_s12 + $0x64] ss:$8 sps:$4 sm:$0xff]  }
 0xa4d   : > { %v2519_v28 = vpop.eup %2518  ;;  %2027 = vmatpush1.bf16.msra.mxu0 %v2487_v56 }
 0xa4e   : > { %v1696_v31 = vmul.f32 %v2519_v28, %v1674_v59  ;;  %v1697_v33 = vmul.f32 %v2519_v28, %v1675_v60  ;;  %v1710_v34 = vmul.f32 %v1706_v24, %v1695_v27  ;;  %v1709_v35 = vmul.f32 %v1702_v10, %v1694_v26  ;;  %2028 = vmatprep.subr.bf16.mxu0 %v2492_v57  ;;  %v2495_v59 = vld [vmem:[%s3169_s12 + $0x74] ss:$8 sps:$4 sm:$0xff]   ;;  %v2493_v60 = vld [vmem:[%s3169_s12 + $0x70] ss:$8 sps:$4 sm:$0xff]  }
 0xa50   : > { %v1712_v12 = vmul.f32 %v1706_v24, %v1697_v33  ;;  %v1711_v36 = vmul.f32 %v1702_v10, %v1696_v31  ;;  %v1725_v37 = vadd.f32 %v1721_v29, %v1710_v34  ;;  %v1724_v39 = vadd.f32 %v1717_v30, %v1709_v35 }
 0xa51   : > { %2029 = vmatpush1.bf16.msra.mxu0 %v2490_v58 }
 0xa52   : > { %v1727_v38 = vadd.f32 %v1721_v29, %v1712_v12  ;;  %v1726_v40 = vadd.f32 %v1717_v30, %v1711_v36  ;;  %2030 = vmatprep.subr.bf16.mxu0 %v2495_v59 }
 0xa54   : > { %v1729_v41 = vpack.c.bf16 %v1727_v38, %v1725_v37  ;;  %v1728_v43 = vpack.c.bf16 %v1726_v40, %v1724_v39 }
 0xa55   : > { %2031 = vmatpush1.bf16.msra.mxu0 %v2493_v60 }
 0xa56   : > { %2335 = vmatprep.mubr.msk.bf16.mxu1 %vm529_vm0, %v1729_v41 }
 0xa57   : > { %1845 = vmatmul.mubr.bf16.vlgmr.msra.gmra.mrb[24].mxu1 %v1728_v43 }
 0xb2a   : > { %v1846_v62 = vpop.f32.mrb[24].mxu1 }
 0xb2b   : > { %v1847_v63 = vadd.f32 %v2325_v61, %v1846_v62  ;;  %v1848_v2 = vpop.f32.mrb[25].mxu1 }
 0xb2c   : > { %v1849_v3 = vpop.f32.mrb[26].mxu1 }
 0xb2d   : > { %v1853_v4 = vmul.f32 0.70710677, %v1847_v63  ;;  %v1850_v5 = vadd.f32 %v2325_v61, %v1849_v3  ;;  %v1851_v6 = vpop.f32.mrb[27].mxu1  ;;  %v1901_v55 = vmul.f32 0.5, %v1847_v63  ;;  %v1924_v61 = vld [vmem:[%s3170_s13] sm:$0x3] }
 0xb2e   : > { %v1929_v62 = vrot.slane %v1924_v61, %v2753_v51  ;;  %v1933_v2 = vrot.slane %v1924_v61, %v2755_v52 }
 0xb2f   : > { %v1855_v7 = vand.u32 2147483647, %v1853_v4  ;;  %v1854_v8 = vmul.f32 0.70710677, %v1850_v5  ;;  %vm1895_vm2 = vcmp.ge.f32.partialorder %v1853_v4, 0.0  ;;  %v1902_v56 = vmul.f32 0.5, %v1850_v5 }
 0xb31   : > { %v1857_v9 = vmul.f32 0.3275911, %v1855_v7  ;;  %v1856_v11 = vand.u32 2147483647, %v1854_v8  ;;  %v1883_v17 = vsub.f32 0.0, %v1855_v7  ;;  %vm1896_vm3 = vcmp.ge.f32.partialorder %v1854_v8, 0.0 }
 0xb33   : > { %v1859_v14 = vadd.f32 1.0, %v1857_v9  ;;  %v1858_v15 = vmul.f32 0.3275911, %v1856_v11  ;;  %v1884_v18 = vsub.f32 0.0, %v1856_v11  ;;  %v1885_v20 = vmul.f32 %v1883_v17, %v1855_v7 }
 0xb35   : > { %2520 = vrcp.f32 %v1859_v14  ;;  %v1860_v16 = vadd.f32 1.0, %v1858_v15  ;;  %v1886_v24 = vmul.f32 %v1884_v18, %v1856_v11  ;;  %v1887_v10 = vmul.f32 1.442695, %v1885_v20 }
 0xb37   : > { %2522 = vrcp.f32 %v1860_v16  ;;  %v1889_v29 = vmul.f32 1.442695, %v1886_v24 }
 0xb38   : > { %2524 = vpow2.f32 %v1887_v10 }
 0xb39   : > { %2526 = vpow2.f32 %v1889_v29 }
 0xb3f   : > { %v2521_v19 = vpop.eup %2520 }
 0xb40   : > { %v1865_v21 = vmul.f32 1.0614054, %v2521_v19 }
 0xb41   : > { %v2523_v22 = vpop.eup %2522 }
 0xb42   : > { %v1867_v23 = vadd.f32 -1.4531521, %v1865_v21  ;;  %v1866_v25 = vmul.f32 1.0614054, %v2523_v22  ;;  %v2525_v40 = vpop.eup %2524 }
 0xb43   : > { %v2527_v0 = vpop.eup %2526 }
 0xb44   : > { %v1869_v26 = vmul.f32 %v2521_v19, %v1867_v23  ;;  %v1868_v27 = vadd.f32 -1.4531521, %v1866_v25 }
 0xb46   : > { %v1871_v28 = vadd.f32 1.4214138, %v1869_v26  ;;  %v1870_v30 = vmul.f32 %v2523_v22, %v1868_v27 }
 0xb48   : > { %v1873_v31 = vmul.f32 %v2521_v19, %v1871_v28  ;;  %v1872_v33 = vadd.f32 1.4214138, %v1870_v30 }
 0xb4a   : > { %v1875_v34 = vadd.f32 -0.28449672, %v1873_v31  ;;  %v1874_v35 = vmul.f32 %v2523_v22, %v1872_v33 }
 0xb4c   : > { %v1877_v12 = vmul.f32 %v2521_v19, %v1875_v34  ;;  %v1876_v36 = vadd.f32 -0.28449672, %v1874_v35 }
 0xb4e   : > { %v1879_v37 = vadd.f32 0.2548296, %v1877_v12  ;;  %v1878_v38 = vmul.f32 %v2523_v22, %v1876_v36 }
 0xb50   : > { %v1881_v39 = vmul.f32 %v2521_v19, %v1879_v37  ;;  %v1880_v41 = vadd.f32 0.2548296, %v1878_v38  ;;  %v2063_v38 = vld [vmem:[%s3171_s14] sm:$0x3] }
 0xb52   : > { %v1891_v43 = vmul.f32 %v2525_v40, %v1881_v39  ;;  %v1882_v44 = vmul.f32 %v2523_v22, %v1880_v41  ;;  %v2064_v39 = vld [vmem:[%s3172_s15] sm:$0x3]  ;;  %v2105_v40 = vrot.slane %v2063_v38, %v2753_v51  ;;  %v2109_v41 = vrot.slane %v2063_v38, %v2755_v52 }
 0xb54   : > { %v1893_v32 = vsub.f32 1.0, %v1891_v43  ;;  %v1892_v1 = vmul.f32 %v2527_v0, %v1882_v44  ;;  %v2120_v44 = vrot.slane %v2064_v39, %v2753_v51  ;;  %v2124_v0 = vrot.slane %v2064_v39, %v2755_v52 }
 0xb56   : > { %v1897_v47 = vsub.f32 0.0, %v1893_v32  ;;  %v1894_v48 = vsub.f32 1.0, %v1892_v1 }
 0xb58   : > { %v1899_v49 = vsel %vm1895_vm2, %v1893_v32, %v1897_v47  ;;  %v1898_v50 = vsub.f32 0.0, %v1894_v48 }
 0xb59   : > { %v1903_v53 = vadd.f32 1.0, %v1899_v49 }
 0xb5a   : > { %v1900_v54 = vsel %vm1896_vm3, %v1894_v48, %v1898_v50 }
 0xb5b   : > { %v1904_v57 = vadd.f32 1.0, %v1900_v54  ;;  %v1905_v58 = vmul.f32 %v1903_v53, %v1901_v55 }
 0xb5d   : > { %v1906_v59 = vmul.f32 %v1904_v57, %v1902_v56 }
 0xb5f   : > { %v1907_v60 = vpack.c.bf16 %v1906_v59, %v1905_v58 }
 0xb61   : > { %2049 = vmatmul.mubr.bf16.vlgmr.msra.gmra.mrb[20].mxu0 %v1907_v60 }
 0xc34   : > { %v2050_v3 = vpop.f32.mrb[20].mxu0 }
 0xc35   : > { %v2051_v4 = vadd.f32 %v2050_v3, %v1929_v62  ;;  %v2052_v6 = vpop.f32.mrb[21].mxu0 }
 0xc36   : > { %v2053_v7 = vadd.f32 %v2052_v6, %v1933_v2  ;;  %v2054_v8 = vpop.f32.mrb[22].mxu0 }
 0xc37   : > { %v2055_v63 = vadd.f32 %v2054_v8, %v1929_v62  ;;  %v2056_v5 = vpop.f32.mrb[23].mxu0  ;;  %v2059_v14 = vadd.f32 %v2051_v4, %v3009_v13 }
 0xc38   : > { %v2060_v9 = vadd.f32 %v2053_v7, %v3006_v42  ;;  %v2057_v11 = vadd.f32 %v2056_v5, %v1933_v2 }
 0xc39   : > { %v2061_v17 = vadd.f32 %v2055_v63, %v3015_v46 }
 0xc3a   : > { %v2062_v15 = vadd.f32 %v2057_v11, %v3011_v45  ;;  %v2065_v16 = vsel %vm529_vm0, %v2060_v9, 0.0 }
 0xc3b   : > { %v2066_v18 = vadd.f32 %v2065_v16, %v2059_v14 }
 0xc3c   : > { %v2069_v19 = vsel %vm529_vm0, %v2062_v15, 0.0 }
 0xc3d   : > { %2067 = vadd.xlane.f32.xlu0 %v2066_v18  ;;  %v2070_v20 = vadd.f32 %v2069_v19, %v2061_v17 }
 0xc3f   : > { %2071 = vadd.xlane.f32.xlu1 %v2070_v20 }
 0xcca   : > { %v2068_v21 = vpop.xlane.xlu0 %2067 }
 0xccb   : > { %v2073_v22 = vmul.f32 0.0069444445, %v2068_v21 }
 0xccc   : > { %v2072_v23 = vpop.xlane.xlu1 %2071 }
 0xccd   : > { %v2075_v24 = vsub.f32 %v2059_v14, %v2073_v22  ;;  %v2076_v42 = vsub.f32 %v2060_v9, %v2073_v22  ;;  %v2074_v10 = vmul.f32 0.0069444445, %v2072_v23 }
 0xccf   : > { %v2077_v25 = vsub.f32 %v2061_v17, %v2074_v10  ;;  %v2078_v13 = vsub.f32 %v2062_v15, %v2074_v10  ;;  %v2079_v26 = vmul.f32 %v2075_v24, %v2075_v24  ;;  %v2080_v45 = vmul.f32 %v2076_v42, %v2076_v42 }
 0xcd1   : > { %v2083_v27 = vsel %vm529_vm0, %v2080_v45, 0.0  ;;  %v2081_v28 = vmul.f32 %v2077_v25, %v2077_v25  ;;  %v2082_v46 = vmul.f32 %v2078_v13, %v2078_v13 }
 0xcd2   : > { %v2084_v29 = vadd.f32 %v2083_v27, %v2079_v26 }
 0xcd3   : > { %v2087_v30 = vsel %vm529_vm0, %v2082_v46, 0.0 }
 0xcd4   : > { %2085 = vadd.xlane.f32.xlu0 %v2084_v29  ;;  %v2088_v31 = vadd.f32 %v2087_v30, %v2081_v28 }
 0xcd6   : > { %2089 = vadd.xlane.f32.xlu1 %v2088_v31 }
 0xd61   : > { %v2086_v33 = vpop.xlane.xlu0 %2085 }
 0xd62   : > { %v2091_v34 = vmul.f32 0.0069444445, %v2086_v33 }
 0xd63   : > { %v2090_v35 = vpop.xlane.xlu1 %2089 }
 0xd64   : > { %v2093_v12 = vadd.f32 1e-05, %v2091_v34  ;;  %v2092_v36 = vmul.f32 0.0069444445, %v2090_v35 }
 0xd66   : > { %2528 = vrsqrt.f32 %v2093_v12  ;;  %v2094_v37 = vadd.f32 1e-05, %v2092_v36 }
 0xd68   : > { %2530 = vrsqrt.f32 %v2094_v37 }
 0xd70   : > { %v2529_v43 = vpop.eup %2528 }
 0xd71   : > { %v2097_v32 = vmul.f32 %v2529_v43, %v2075_v24  ;;  %v2098_v1 = vmul.f32 %v2529_v43, %v2076_v42 }
 0xd72   : > { %v2531_v47 = vpop.eup %2530 }
 0xd73   : > { %v2112_v48 = vmul.f32 %v2105_v40, %v2097_v32  ;;  %v2113_v49 = vmul.f32 %v2109_v41, %v2098_v1  ;;  %v2099_v50 = vmul.f32 %v2531_v47, %v2077_v25  ;;  %v2100_v53 = vmul.f32 %v2531_v47, %v2078_v13 }
 0xd75   : > { %v2127_v54 = vadd.f32 %v2120_v44, %v2112_v48  ;;  %v2128_v55 = vadd.f32 %v2124_v0, %v2113_v49  ;;  %v2114_v56 = vmul.f32 %v2105_v40, %v2099_v50  ;;  %v2115_v57 = vmul.f32 %v2109_v41, %v2100_v53 }
 0xd77   : > { %2131 = vst [vmem:[%s521_s17] sm:$0xff] %v2127_v54  ;;  %2132 = vst.msk [vmem:[%s521_s17 + $0x8] sm:$0xff] %vm529_vm0, %v2128_v55  ;;  %v2129_v51 = vadd.f32 %v2120_v44, %v2114_v56  ;;  %v2130_v52 = vadd.f32 %v2124_v0, %v2115_v57 }
 0xd79   : > { %2133 = vst [vmem:[%s521_s17 + $0x10] sm:$0xff] %v2129_v51  ;;  %2134 = vst.msk [vmem:[%s521_s17 + $0x18] sm:$0xff] %vm529_vm0, %v2130_v52 }
 0xd7a PF: > { %s26_s21 = sadd.s32 1, %s2540_s21  }
 0xd7b   : > { %p23_p4 = scmp.ge.s32.totalorder %s26_s21, 4  }
 0xd7d   :  { %25 = sbr.rel (!%p23_p4) target bundleno = 2 (0x2), region = 118 }

// kernel: cross_plus_vit_segnet_forward.10
= control target key start
LH: loop header
LB: loop body
LE: loop exit
PB: predicated region body
PF: predicated region fallthrough
CT: control target
= control target key end

     0   :  { %s4912_s29 = smov 0   ;;  %s5886_s0 = inlined_call_operand.vmem [shape: f32[2,36,64], index: 0, kind: input, shape index: {}]   ;;  %s5887_s1 = inlined_call_operand.vmem [shape: f32[2,16,144], index: 1, kind: input, shape index: {}]   ;;  %s5888_s2 = inlined_call_operand.vmem [shape: bf16[64,144], index: 2, kind: input, shape index: {}]   ;;  %s5889_s3 = inlined_call_operand.vmem [shape: f32[1,144], index: 3, kind: input, shape index: {}]   ;;  %s5890_s4 = inlined_call_operand.vmem [shape: f32[1,144], index: 4, kind: input, shape index: {}]   ;;  %s5891_s5 = inlined_call_operand.vmem [shape: f32[1,144], index: 5, kind: input, shape index: {}]   ;;  %s5892_s6 = inlined_call_operand.vmem [shape: bf16[2,144,16], index: 6, kind: input, shape index: {}]   ;;  %s5893_s7 = inlined_call_operand.vmem [shape: bf16[2,144,16], index: 7, kind: input, shape index: {}]   ;;  %s5894_s8 = inlined_call_operand.vmem [shape: bf16[2,144,16], index: 8, kind: input, shape index: {}]   ;;  %s5895_s9 = inlined_call_operand.vmem [shape: bf16[2,16,144], index: 9, kind: input, shape index: {}]   ;;  %s5896_s10 = inlined_call_operand.vmem [shape: f32[1,144], index: 10, kind: input, shape index: {}]   ;;  %s5897_s11 = inlined_call_operand.vmem [shape: bf16[144,64], index: 11, kind: input, shape index: {}]   ;;  %s5898_s12 = inlined_call_operand.vmem [shape: f32[1,64], index: 12, kind: input, shape index: {}]   ;;  %s5899_s13 = inlined_call_operand.vmem [shape: bf16[144,64], index: 13, kind: input, shape index: {}]   ;;  %s5900_s14 = inlined_call_operand.vmem [shape: f32[1,64], index: 14, kind: input, shape index: {}]   ;;  %s5901_s15 = inlined_call_operand.vmem [shape: f32[1,64], index: 15, kind: input, shape index: {}]   ;;  %s5902_s16 = inlined_call_operand.vmem [shape: f32[1,64], index: 16, kind: input, shape index: {}]   ;;  %s5903_s17 = inlined_call_operand.vmem [shape: bf16[2,64,16], index: 17, kind: input, shape index: {}]   ;;  %s5904_s18 = inlined_call_operand.vmem [shape: bf16[2,64,16], index: 18, kind: input, shape index: {}]   ;;  %s5905_s19 = inlined_call_operand.vmem [shape: bf16[2,64,16], index: 19, kind: input, shape index: {}]   ;;  %s5906_s20 = inlined_call_operand.vmem [shape: bf16[2,16,64], index: 20, kind: input, shape index: {}]   ;;  %s5907_s21 = inlined_call_operand.vmem [shape: f32[1,64], index: 21, kind: input, shape index: {}]   ;;  %s5908_s22 = inlined_call_operand.vmem [shape: bf16[64,144], index: 22, kind: input, shape index: {}]   ;;  %s5909_s23 = inlined_call_operand.vmem [shape: f32[1,144], index: 23, kind: input, shape index: {}]   ;;  %s5910_s24 = inlined_call_operand.vmem [shape: f32[2,36,64], index: 24, kind: output, shape index: {0}]   ;;  %s5911_s25 = inlined_call_operand.vmem [shape: f32[2,16,144], index: 25, kind: output, shape index: {1}]  }
   0x1   :  { %5921 = sst [smem:[#allocation2_spill]] %s5886_s0 }
   0x2   :  { %5922 = sst [smem:[#allocation3_spill]] %s5887_s1 }
   0x3   :  { %5923 = sst [smem:[#allocation4_spill]] %s5888_s2 }
   0x4   :  { %5924 = sst [smem:[#allocation5_spill]] %s5889_s3 }
   0x5   :  { %5925 = sst [smem:[#allocation6_spill]] %s5890_s4 }
   0x6   :  { %5926 = sst [smem:[#allocation7_spill]] %s5891_s5 }
   0x7   :  { %5927 = sst [smem:[#allocation8_spill]] %s5892_s6 }
   0x8   :  { %5928 = sst [smem:[#allocation9_spill]] %s5893_s7 }
   0x9   :  { %5929 = sst [smem:[#allocation10_spill]] %s5894_s8 }
   0xa   :  { %5930 = sst [smem:[#allocation11_spill]] %s5895_s9 }
   0xb   :  { %5931 = sst [smem:[#allocation12_spill]] %s5911_s25 }
   0xc LB: > { %s3973_s2 = sadd.s32 4294967295, %s4775_s29   ;;  %p3977_p0 = scmp.ge.s32.totalorder %s4775_s29, 1  ;;  %s4775_s29 = sphi %s4912_s29, %s36_s29  }
   0xd   : > { %p700_p1 = scmp.lt.s32.totalorder %s4775_s29, 3 }
   0xf   : > { %p701_p2 = pnand %p3977_p0, %p700_p1 }
  0x10   : > { %s5932_s7 = sld [smem:[#allocation4_spill]] (!%p701_p2)  ;;  %p778_p3 = scmp.lt.s32.totalorder (!%p701_p2), %s3973_s2, 1  ;;  %v4777_v2 = vmov (!%p701_p2), 0   ;;  %vm869_vm0 = vcmask (!%p701_p2), 523264   ;;  %v859_v11 = vlaneseq (!%p701_p2)  ;;  %vm916_vm1 = vcmask (!%p701_p2), 1040384  }
  0x11   : > { %704 = sbr.rel (%p701_p2) target bundleno = 4287 (0x10bf), region = 116  ;;  %905 = vmatprep.mubr.bf16.mxu0 (!%p701_p2), %v4777_v2  ;;  %1045 = vmatprep.subr.bf16.mxu1 (!%p701_p2), %v4777_v2  ;;  %s5933_s26 = sld [smem:[#allocation2_spill]] (!%p701_p2)  ;;  %vm918_vm2 = vcmask (!%p701_p2), 122880   ;;  %vm1041_vm3 = vcmask (!%p701_p2), 130048   ;;  %vm4779_vm4 = vmmov (!%p701_p2), 0   ;;  %vm1490_vm5 = vcmask (!%p701_p2), 1046528  }
  0x12   : > { %v4964_v12 = vshrl.u32 (!%p701_p2), %v859_v11, 7  ;;  %s5934_s6 = sld [smem:[#allocation5_spill]] (!%p701_p2)  ;;  %s5936_s4 = sld [smem:[#allocation9_spill]] (!%p701_p2)  ;;  %vm1491_vm6 = vcmask (!%p701_p2), 1047552   ;;  %vm1465_vm7 = vcmask (!%p701_p2), 114688   ;;  %vm1486_vm8 = vcmask (!%p701_p2), 121856  }
  0x13   : > { %s5938_s25 = sld [smem:[#allocation12_spill]] (!%p701_p2)  ;;  %s5939_s9 = sld [smem:[#allocation6_spill]] (!%p701_p2)  ;;  %vm1537_vm9 = vcmask (!%p701_p2), 7168   ;;  %vm2545_vm10 = vcmask (!%p701_p2), 516096   ;;  %vm2786_vm11 = vsmask.f32 (!%p701_p2), 7424 }
  0x14   : > { %v4967_v13 = vsub.s32 (!%p701_p2), 0, %v4964_v12  ;;  %v4973_v15 = vsub.s32 (!%p701_p2), 1, %v4964_v12  ;;  %s5940_s30 = sld [smem:[#allocation7_spill]] (!%p701_p2)  ;;  %s5941_s27 = sld [smem:[#allocation10_spill]] (!%p701_p2)  ;;  %vm3842_vm12 = vcmask (!%p701_p2), 519168   ;;  %vm2994_vm13 = vcmask (!%p701_p2), 278528  }
  0x15   : > { %s5942_s0 = sld [smem:[#allocation11_spill]] (!%p701_p2)  ;;  %vm3021_vm14 = vcmask (!%p701_p2), 1041408   ;;  %vm3017_vm15 = vcmask (!%p701_p2), 285696  }
  0x16   : > { %v4612_v0 = vld [vmem:[%s5932_s7 + $0x4] ss:$8 sps:$4 sm:$0xff] (!%p701_p2)   ;;  %v4614_v1 = vld [vmem:[%s5932_s7] ss:$8 sps:$4 sm:$0xff] (!%p701_p2)   ;;  %v4615_v3 = vld [vmem:[%s5932_s7 + $0x14] ss:$8 sps:$4 sm:$0xff] (!%p701_p2)  }
  0x17   : > { %873 = vmatprep.subr.bf16.mxu0 (!%p701_p2), %v4612_v0  ;;  %v4617_v4 = vld [vmem:[%s5932_s7 + $0x10] ss:$8 sps:$4 sm:$0xff] (!%p701_p2)   ;;  %v4618_v5 = vld [vmem:[%s5932_s7 + $0x24] ss:$8 sps:$4 sm:$0xff] (!%p701_p2)   ;;  %v4620_v6 = vld [vmem:[%s5932_s7 + $0x20] ss:$8 sps:$4 sm:$0xff] (!%p701_p2)  }
  0x18   : > { %s5945_s2 = smov (!%p778_p3, %s3973_s2), 1  ;;  %874 = vmatpush1.bf16.msra.mxu0 %v4614_v1  ;;  %v4621_v7 = vld [vmem:[%s5932_s7 + $0x34] ss:$8 sps:$4 sm:$0xff]   ;;  %v4623_v8 = vld [vmem:[%s5932_s7 + $0x30] ss:$8 sps:$4 sm:$0xff]   ;;  %v4985_v28 = vld [vmem:[%s5936_s4] sm:$0xff]  }
  0x19   : > { %875 = vmatprep.subr.bf16.mxu0 %v4615_v3  ;;  %s5917_s5 = smul.u32 40, %s5945_s2  ;;  %v817_v14 = vld [vmem:[%s5934_s6] sm:$0x3]  ;;  %v4994_v30 = vld [vmem:[%s5936_s4 + $0x8] sm:$0xff]   ;;  %v5005_v32 = vld [vmem:[%s5936_s4 + $0x10] sm:$0xff]   ;;  %s4234_s28 = sshll.u32 %s5945_s2, 5 }
  0x1a   : > { %v862_v16 = vrot.slane %v817_v14, %v4967_v13  ;;  %v866_v17 = vrot.slane %v817_v14, %v4973_v15  ;;  %v5028_v43 = vld [vmem:[%s5936_s4 + $0x18] sm:$0xff]   ;;  %v5039_v45 = vld [vmem:[%s5936_s4 + $0x20] sm:$0xff]   ;;  %v5050_v47 = vld [vmem:[%s5936_s4 + $0x28] sm:$0xff]   ;;  %s5937_s6 = sld [smem:[#allocation3_spill]]  ;;  %s5097_s8 = scalar_lea.vmem %s5938_s25, %s4234_s28 }
  0x1b   : > { %s4948_s1 = scalar_lea.vmem %s5933_s26, %s5917_s5  ;;  %s5935_s26 = sld [smem:[#allocation8_spill]]  ;;  %v5061_v49 = vld [vmem:[%s5936_s4 + $0x30] sm:$0xff]   ;;  %v5072_v51 = vld [vmem:[%s5936_s4 + $0x38] sm:$0xff]   ;;  %v5083_v53 = vld [vmem:[%s5936_s4 + $0x40] sm:$0xff]  }
  0x1c   : > { %876 = vmatpush1.bf16.msra.mxu0 %v4617_v4  ;;  %v4957_v9 = vld [vmem:[%s4948_s1] sm:$0xff] }
  0x1d   : > { %877 = vmatprep.subr.bf16.mxu0 %v4618_v5  ;;  %v808_v10 = vpack.c.bf16 %v4957_v9, %v4957_v9  ;;  %v914_v61 = vld [vmem:[%s5939_s9] sm:$0x3] }
  0x1e   : > { %v915_v62 = vld [vmem:[%s5940_s30] sm:$0x3]  ;;  %v943_v0 = vrot.slane %v914_v61, %v4967_v13  ;;  %v947_v1 = vrot.slane %v914_v61, %v4973_v15 }
  0x1f   : > { %v956_v4 = vrot.slane %v915_v62, %v4967_v13  ;;  %v960_v5 = vrot.slane %v915_v62, %v4973_v15 }
  0x20   : > { %878 = vmatpush1.bf16.msra.mxu0 %v4620_v6  ;;  %s787_s5 = scalar_lea.vmem %s5937_s6, %s4234_s28 }
  0x21   : > { %879 = vmatprep.subr.bf16.mxu0 %v4621_v7  ;;  %v4624_v27 = vld [vmem:[%s5935_s26] sm:$0xff]   ;;  %v4626_v29 = vld [vmem:[%s5935_s26 + $0x8] sm:$0xff]   ;;  %v4628_v31 = vld [vmem:[%s5935_s26 + $0x10] sm:$0xff]  }
  0x22   : > { %1046 = vmatpush1.bf16.msra.mxu1 %v4624_v27  ;;  %v4630_v42 = vld [vmem:[%s5935_s26 + $0x18] sm:$0xff]   ;;  %v4632_v44 = vld [vmem:[%s5935_s26 + $0x20] sm:$0xff]   ;;  %v4634_v46 = vld [vmem:[%s5935_s26 + $0x28] sm:$0xff]  }
  0x23   : > { %1047 = vmatprep.subr.bf16.mxu1 %v4777_v2  ;;  %v4636_v48 = vld [vmem:[%s5935_s26 + $0x30] sm:$0xff]   ;;  %v4638_v50 = vld [vmem:[%s5935_s26 + $0x38] sm:$0xff]   ;;  %v4640_v52 = vld [vmem:[%s5935_s26 + $0x40] sm:$0xff]  }
  0x24   : > { %880 = vmatpush1.bf16.msra.mxu0 %v4623_v8  ;;  %v5092_v54 = vld [vmem:[%s787_s5 + $0x8] sm:$0xff]  ;;  %v807_v55 = vld [vmem:[%s787_s5 + $0x18] sm:$0xff]  ;;  %v5099_v56 = vld [vmem:[%s787_s5] sm:$0xff] }
  0x25   : > { %1158 = vmatprep.subr.bf16.mxu0 %v4777_v2  ;;  %v806_v57 = vld [vmem:[%s787_s5 + $0x10] sm:$0xff]  ;;  %3845 = vst.msk [vmem:[%s5097_s8 + $0x8] sm:$0xff] %vm1041_vm3, %v5092_v54  ;;  %3847 = vst.msk [vmem:[%s5097_s8 + $0x18] sm:$0xff] %vm1041_vm3, %v807_v55  ;;  %v968_v63 = vpack.c.bf16 %v807_v55, %v5092_v54  ;;  %v4646_v27 = vld [vmem:[%s5941_s27 + $0x20] sm:$0xff]   ;;  %s5943_s5 = smul.u32 40, %s5945_s2 }
  0x26   : > { %1048 = vmatpush1.bf16.msra.mxu1 %v4626_v29  ;;  %3844 = vst [vmem:[%s5097_s8] sm:$0xff] %v5099_v56  ;;  %3846 = vst [vmem:[%s5097_s8 + $0x10] sm:$0xff] %v806_v57  ;;  %v967_v29 = vpack.c.bf16 %v806_v57, %v5099_v56  ;;  %v4667_v55 = vld [vmem:[%s5941_s27 + $0x80] sm:$0xff]   ;;  %v4668_v57 = vld [vmem:[%s5941_s27 + $0x88] sm:$0xff]  }
  0x27   : > { %3992 = vmatmul.mubr.msk.bf16.vlgmr.msra.gmra.mrb[0].mxu0 %vm869_vm0, %v808_v10  ;;  %1049 = vmatprep.subr.bf16.mxu1 %v4777_v2  ;;  %v1320_v8 = vshll.u32 %v968_v63, 16  ;;  %s5525_s9 = scalar_lea.vmem %s5910_s24, %s5943_s5 }
  0x28   : > { %1159 = vmatpush1.bf16.msra.mxu0 %v4985_v28  ;;  %3838 = vst.msk [vmem:[%s5525_s9] sm:$0xff] %vm869_vm0, %v4957_v9 }
  0x29   : > { %1160 = vmatprep.subr.bf16.mxu0 %v4777_v2 }
  0x2a   : > { %1050 = vmatpush1.bf16.msra.mxu1 %v4628_v31  ;;  %v1313_v31 = vshll.u32 %v967_v29, 16 }
  0x2b   : > { %1051 = vmatprep.subr.bf16.mxu1 %v4777_v2 }
  0x2c   : > { %1161 = vmatpush1.bf16.msra.mxu0 %v4994_v30 }
  0x2d   : > { %1162 = vmatprep.subr.bf16.mxu0 %v4777_v2 }
  0x2e   : > { %1052 = vmatpush1.bf16.msra.mxu1 %v4630_v42  ;;  %v4656_v42 = vld [vmem:[%s5935_s26 + $0x70] sm:$0xff]  }
  0x2f   : > { %1053 = vmatprep.subr.bf16.mxu1 %v4777_v2 }
  0x30   : > { %1163 = vmatpush1.bf16.msra.mxu0 %v5005_v32 }
  0x31   : > { %1164 = vmatprep.subr.bf16.mxu0 %v4777_v2 }
  0x32   : > { %1054 = vmatpush1.bf16.msra.mxu1 %v4632_v44  ;;  %v4658_v44 = vld [vmem:[%s5935_s26 + $0x80] sm:$0xff]  }
  0x33   : > { %1055 = vmatprep.subr.bf16.mxu1 %v4777_v2 }
  0x34   : > { %1165 = vmatpush1.bf16.msra.mxu0 %v5028_v43 }
  0x35   : > { %1166 = vmatprep.subr.bf16.mxu0 %v4777_v2 }
  0x36   : > { %1056 = vmatpush1.bf16.msra.mxu1 %v4634_v46  ;;  %v4660_v46 = vld [vmem:[%s5941_s27 + $0x48] sm:$0xff]  }
  0x37   : > { %1057 = vmatprep.subr.bf16.mxu1 %v4777_v2 }
  0x38   : > { %1167 = vmatpush1.bf16.msra.mxu0 %v5039_v45 }
  0x39   : > { %1168 = vmatprep.subr.bf16.mxu0 %v4777_v2 }
  0x3a   : > { %1058 = vmatpush1.bf16.msra.mxu1 %v4636_v48  ;;  %v4662_v48 = vld [vmem:[%s5941_s27 + $0x58] sm:$0xff]  }
  0x3b   : > { %1059 = vmatprep.subr.bf16.mxu1 %v4777_v2 }
  0x3c   : > { %1169 = vmatpush1.bf16.msra.mxu0 %v5050_v47 }
  0x3d   : > { %1170 = vmatprep.subr.bf16.mxu0 %v4777_v2 }
  0x3e   : > { %1060 = vmatpush1.bf16.msra.mxu1 %v4638_v50  ;;  %v4664_v50 = vld [vmem:[%s5941_s27 + $0x68] sm:$0xff]  }
  0x3f   : > { %1061 = vmatprep.subr.bf16.mxu1 %v4777_v2 }
  0x40   : > { %1171 = vmatpush1.bf16.msra.mxu0 %v5061_v49 }
  0x41   : > { %1172 = vmatprep.subr.bf16.mxu0 %v4777_v2 }
  0x42   : > { %1062 = vmatpush1.bf16.msra.mxu1 %v4640_v52  ;;  %v4665_v52 = vld [vmem:[%s5941_s27 + $0x70] sm:$0xff]  }
  0x43   : > { %1270 = vmatprep.subr.bf16.mxu1 %v4777_v2 }
  0x44   : > { %1173 = vmatpush1.bf16.msra.mxu0 %v5072_v51 }
  0x45   : > { %1174 = vmatprep.subr.bf16.mxu0 %v4777_v2 }
  0x48   : > { %1175 = vmatpush1.bf16.msra.mxu0 %v5083_v53 }
  0x49   : > { %1328 = vmatprep.subr.bf16.mxu0 %v4777_v2 }
  0xfa   : > { %v907_v18 = vpop.f32.mrb[0].mxu0 }
  0xfb   : > { %v908_v19 = vadd.f32 %v907_v18, %v862_v16  ;;  %v909_v20 = vpop.f32.mrb[1].mxu0  ;;  %v1318_v18 = vshrl.u32 %v968_v63, 16 }
  0xfc   : > { %v910_v21 = vadd.f32 %v909_v20, %v866_v17  ;;  %v911_v22 = vpop.f32.mrb[2].mxu0 }
  0xfd   : > { %v912_v23 = vpop.f32.mrb[3].mxu0  ;;  %v917_v24 = vsel %vm916_vm1, %v908_v19, 0.0  ;;  %v4642_v22 = vld [vmem:[%s5941_s27] sm:$0xff]  }
  0xfe   : > { %v919_v25 = vsel %vm918_vm2, %v910_v21, 0.0 }
  0xff   : > { %v920_v26 = vadd.f32 %v919_v25, %v917_v24  ;;  %v4643_v24 = vld [vmem:[%s5941_s27 + $0x8] sm:$0xff]   ;;  %v4644_v25 = vld [vmem:[%s5941_s27 + $0x10] sm:$0xff]  }
 0x101   : > { %921 = vadd.xlane.f32.xlu0 %v920_v26  ;;  %v4645_v26 = vld [vmem:[%s5941_s27 + $0x18] sm:$0xff]  }
 0x18e   : > { %v922_v33 = vpop.xlane.xlu0 %921 }
 0x18f   : > { %v924_v34 = vmul.f32 0.0069444445, %v922_v33  ;;  %v1311_v33 = vshrl.u32 %v967_v29, 16 }
 0x191   : > { %v5012_v35 = vsub.f32 %v908_v19, %v924_v34  ;;  %v5014_v36 = vsub.f32 %v910_v21, %v924_v34  ;;  %v1322_v19 = vrot.slane %v1320_v8, 1  ;;  %v1315_v34 = vrot.slane %v1313_v31, 1 }
 0x193   : > { %v927_v37 = vmul.f32 %v5012_v35, %v5012_v35  ;;  %v928_v38 = vmul.f32 %v5014_v36, %v5014_v36  ;;  %v5133_v23 = vor.u32 %v1322_v19, %v1318_v18 }
 0x195   : > { %v929_v39 = vsel %vm916_vm1, %v927_v37, 0.0  ;;  %v930_v40 = vsel %vm918_vm2, %v928_v38, 0.0  ;;  %v4651_v37 = vld [vmem:[%s5935_s26 + $0x48] sm:$0xff]   ;;  %v4652_v38 = vld [vmem:[%s5935_s26 + $0x50] sm:$0xff]  }
 0x196   : > { %v931_v41 = vadd.f32 %v930_v40, %v929_v39  ;;  %v4653_v39 = vld [vmem:[%s5935_s26 + $0x58] sm:$0xff]   ;;  %v4654_v40 = vld [vmem:[%s5935_s26 + $0x60] sm:$0xff]  }
 0x198   : > { %932 = vadd.xlane.f32.xlu0 %v931_v41  ;;  %v4655_v41 = vld [vmem:[%s5935_s26 + $0x68] sm:$0xff]  }
 0x225   : > { %v933_v58 = vpop.xlane.xlu0 %932 }
 0x226   : > { %v934_v59 = vmul.f32 0.0069444445, %v933_v58 }
 0x228   : > { %v935_v60 = vadd.f32 1e-05, %v934_v59 }
 0x22a   : > { %4740 = vrsqrt.f32 %v935_v60 }
 0x234   : > { %v4741_v3 = vpop.eup %4740 }
 0x235   : > { %v937_v6 = vmul.f32 %v4741_v3, %v5012_v35  ;;  %v938_v7 = vmul.f32 %v4741_v3, %v5014_v36  ;;  %v4650_v35 = vld [vmem:[%s5941_s27 + $0x40] sm:$0xff]   ;;  %v5190_v36 = vor.u32 %v1315_v34, %v1311_v33 }
 0x237   : > { %v950_v10 = vmul.f32 %v943_v0, %v937_v6  ;;  %v951_v14 = vmul.f32 %v947_v1, %v938_v7 }
 0x239   : > { %v963_v16 = vadd.f32 %v956_v4, %v950_v10  ;;  %v964_v17 = vadd.f32 %v960_v5, %v951_v14 }
 0x23b   : > { %v5122_v20 = vpack.c.bf16 %v963_v16, %v963_v16  ;;  %v5124_v21 = vpack.c.bf16 %v964_v17, %v964_v17 }
 0x23d   : > { %4002 = vmatprep.mubr.msk.bf16.mxu1 %vm1041_vm3, %v5124_v21  ;;  %4012 = vmatprep.mubr.msk.bf16.mxu0 %vm1041_vm3, %v5124_v21 }
 0x23e   : > { %1078 = vmatmul.mubr.bf16.vlgmr.msra.gmra.mrb[0].mxu1 %v5122_v20  ;;  %1191 = vmatmul.mubr.bf16.vlgmr.msra.gmra.mrb[4].mxu0 %v5122_v20 }
 0x23f   : > { %1271 = vmatpush1.bf16.msra.mxu1 %v4642_v22  ;;  %1329 = vmatpush1.bf16.msra.mxu0 %v4985_v28  ;;  %v4647_v28 = vld [vmem:[%s5941_s27 + $0x28] sm:$0xff]  }
 0x240   : > { %4022 = vmatprep.mubr.msk.bf16.mxu1 %vm1041_vm3, %v5124_v21  ;;  %1272 = vmatprep.subr.bf16.mxu1 %v4777_v2 }
 0x241   : > { %1330 = vmatprep.subr.bf16.mxu0 %v4777_v2  ;;  %4023 = vmatprep.mubr.msk.bf16.mxu0 %vm1041_vm3, %v5133_v23 }
 0x243   : > { %1273 = vmatpush1.bf16.msra.mxu1 %v4643_v24  ;;  %1331 = vmatpush1.bf16.msra.mxu0 %v4994_v30  ;;  %v4648_v30 = vld [vmem:[%s5941_s27 + $0x30] sm:$0xff]  }
 0x244   : > { %1274 = vmatprep.subr.bf16.mxu1 %v4777_v2  ;;  %1332 = vmatprep.subr.bf16.mxu0 %v4777_v2 }
 0x247   : > { %1275 = vmatpush1.bf16.msra.mxu1 %v4644_v25  ;;  %1333 = vmatpush1.bf16.msra.mxu0 %v5005_v32  ;;  %v4649_v32 = vld [vmem:[%s5941_s27 + $0x38] sm:$0xff]  }
 0x248   : > { %1276 = vmatprep.subr.bf16.mxu1 %v4777_v2  ;;  %1334 = vmatprep.subr.bf16.mxu0 %v4777_v2 }
 0x24b   : > { %1277 = vmatpush1.bf16.msra.mxu1 %v4645_v26  ;;  %1335 = vmatpush1.bf16.msra.mxu0 %v5028_v43  ;;  %v4657_v43 = vld [vmem:[%s5935_s26 + $0x78] sm:$0xff]  }
 0x24c   : > { %1278 = vmatprep.subr.bf16.mxu1 %v4777_v2  ;;  %1336 = vmatprep.subr.bf16.mxu0 %v4777_v2 }
 0x24f   : > { %1279 = vmatpush1.bf16.msra.mxu1 %v4646_v27  ;;  %1337 = vmatpush1.bf16.msra.mxu0 %v5039_v45  ;;  %v4659_v45 = vld [vmem:[%s5935_s26 + $0x88] sm:$0xff]  }
 0x250   : > { %1280 = vmatprep.subr.bf16.mxu1 %v4777_v2  ;;  %1338 = vmatprep.subr.bf16.mxu0 %v4777_v2 }
 0x253   : > { %1281 = vmatpush1.bf16.msra.mxu1 %v4647_v28  ;;  %1339 = vmatpush1.bf16.msra.mxu0 %v5050_v47  ;;  %v4661_v47 = vld [vmem:[%s5941_s27 + $0x50] sm:$0xff]  }
 0x254   : > { %1282 = vmatprep.subr.bf16.mxu1 %v4777_v2  ;;  %1340 = vmatprep.subr.bf16.mxu0 %v4777_v2 }
 0x257   : > { %1283 = vmatpush1.bf16.msra.mxu1 %v4648_v30  ;;  %1341 = vmatpush1.bf16.msra.mxu0 %v5061_v49  ;;  %v4663_v49 = vld [vmem:[%s5941_s27 + $0x60] sm:$0xff]  }
 0x258   : > { %1284 = vmatprep.subr.bf16.mxu1 %v4777_v2  ;;  %1342 = vmatprep.subr.bf16.mxu0 %v4777_v2 }
 0x25b   : > { %1285 = vmatpush1.bf16.msra.mxu1 %v4649_v32  ;;  %1343 = vmatpush1.bf16.msra.mxu0 %v5072_v51  ;;  %v4778_v51 = vmov 0.0  }
 0x25c   : > { %1286 = vmatprep.subr.bf16.mxu1 %v4777_v2  ;;  %1344 = vmatprep.subr.bf16.mxu0 %v4777_v2 }
 0x25f   : > { %1287 = vmatpush1.bf16.msra.mxu1 %v4650_v35  ;;  %1345 = vmatpush1.bf16.msra.mxu0 %v5083_v53  ;;  %v4666_v53 = vld [vmem:[%s5941_s27 + $0x78] sm:$0xff]  }
 0x260   : > { %1369 = vmatprep.subr.bf16.mxu1 %v4777_v2  ;;  %4330 = vmatprep.subr.bf16.mxu0 %v4778_v51 }
 0x262   : > { %1303 = vmatmul.mubr.bf16.vlgmr.msra.gmra.mrb[4].mxu1 %v5122_v20  ;;  %1361 = vmatmul.mubr.bf16.vlgmr.msra.gmra.mrb[8].mxu0 %v5190_v36 }
 0x263   : > { %1370 = vmatpush1.bf16.msra.mxu1 %v4642_v22  ;;  %4024 = vmatprep.mubr.msk.bf16.mxu1 %vm1041_vm3, %v5133_v23 }
 0x264   : > { %1371 = vmatprep.subr.bf16.mxu1 %v4777_v2  ;;  %4332 = vmatprep.mubr.msk.bf16.mxu0 %vm4779_vm4, %v4778_v51 }
 0x267   : > { %1372 = vmatpush1.bf16.msra.mxu1 %v4643_v24 }
 0x268   : > { %1373 = vmatprep.subr.bf16.mxu1 %v4777_v2 }
 0x26b   : > { %1374 = vmatpush1.bf16.msra.mxu1 %v4644_v25 }
 0x26c   : > { %1375 = vmatprep.subr.bf16.mxu1 %v4777_v2 }
 0x26f   : > { %1376 = vmatpush1.bf16.msra.mxu1 %v4645_v26 }
 0x270   : > { %1377 = vmatprep.subr.bf16.mxu1 %v4777_v2 }
 0x273   : > { %1378 = vmatpush1.bf16.msra.mxu1 %v4646_v27 }
 0x274   : > { %1379 = vmatprep.subr.bf16.mxu1 %v4777_v2 }
 0x277   : > { %1380 = vmatpush1.bf16.msra.mxu1 %v4647_v28  ;;  %v4780_v28 = vmov 65535  }
 0x278   : > { %1381 = vmatprep.subr.bf16.mxu1 %v4777_v2  ;;  %v1492_v29 = vsel %vm1490_vm5, 4294967295, %v4780_v28 }
 0x279   : > { %v5308_v33 = vsel %vm1491_vm6, %v1492_v29, 0 }
 0x27b   : > { %1382 = vmatpush1.bf16.msra.mxu1 %v4648_v30 }
 0x27c   : > { %1383 = vmatprep.subr.bf16.mxu1 %v4777_v2 }
 0x27f   : > { %1384 = vmatpush1.bf16.msra.mxu1 %v4649_v32 }
 0x280   : > { %1385 = vmatprep.subr.bf16.mxu1 %v4777_v2 }
 0x283   : > { %1386 = vmatpush1.bf16.msra.mxu1 %v4650_v35 }
 0x284   : > { %1663 = vmatprep.subr.bf16.mxu1 %v4777_v2 }
 0x286   : > { %1402 = vmatmul.mubr.bf16.vlgmr.msra.gmra.mrb[8].mxu1 %v5190_v36 }
 0x287   : > { %1664 = vmatpush1.bf16.msra.mxu1 %v4651_v37  ;;  %4055 = vmatprep.mubr.msk.bf16.mxu1 %vm1041_vm3, %v5124_v21 }
 0x288   : > { %1665 = vmatprep.subr.bf16.mxu1 %v4777_v2 }
 0x28b   : > { %1666 = vmatpush1.bf16.msra.mxu1 %v4652_v38 }
 0x28c   : > { %1667 = vmatprep.subr.bf16.mxu1 %v4777_v2 }
 0x28f   : > { %1668 = vmatpush1.bf16.msra.mxu1 %v4653_v39 }
 0x290   : > { %1669 = vmatprep.subr.bf16.mxu1 %v4777_v2 }
 0x293   : > { %1670 = vmatpush1.bf16.msra.mxu1 %v4654_v40 }
 0x294   : > { %1671 = vmatprep.subr.bf16.mxu1 %v4777_v2 }
 0x297   : > { %1672 = vmatpush1.bf16.msra.mxu1 %v4655_v41 }
 0x298   : > { %1673 = vmatprep.subr.bf16.mxu1 %v4777_v2 }
 0x29b   : > { %1674 = vmatpush1.bf16.msra.mxu1 %v4656_v42 }
 0x29c   : > { %1675 = vmatprep.subr.bf16.mxu1 %v4777_v2 }
 0x29f   : > { %1676 = vmatpush1.bf16.msra.mxu1 %v4657_v43 }
 0x2a0   : > { %1677 = vmatprep.subr.bf16.mxu1 %v4777_v2 }
 0x2a3   : > { %1678 = vmatpush1.bf16.msra.mxu1 %v4658_v44 }
 0x2a4   : > { %1679 = vmatprep.subr.bf16.mxu1 %v4777_v2 }
 0x2a7   : > { %1680 = vmatpush1.bf16.msra.mxu1 %v4659_v45 }
 0x2a8   : > { %1890 = vmatprep.subr.bf16.mxu1 %v4777_v2 }
 0x2aa   : > { %1696 = vmatmul.mubr.bf16.vlgmr.msra.gmra.mrb[12].mxu1 %v5122_v20 }
 0x2ab   : > { %1891 = vmatpush1.bf16.msra.mxu1 %v4660_v46  ;;  %4111 = vmatprep.mubr.msk.bf16.mxu1 %vm1041_vm3, %v5124_v21 }
 0x2ac   : > { %1892 = vmatprep.subr.bf16.mxu1 %v4777_v2 }
 0x2af   : > { %1893 = vmatpush1.bf16.msra.mxu1 %v4661_v47 }
 0x2b0   : > { %1894 = vmatprep.subr.bf16.mxu1 %v4777_v2 }
 0x2b3   : > { %1895 = vmatpush1.bf16.msra.mxu1 %v4662_v48 }
 0x2b4   : > { %1896 = vmatprep.subr.bf16.mxu1 %v4777_v2 }
 0x2b7   : > { %1897 = vmatpush1.bf16.msra.mxu1 %v4663_v49 }
 0x2b8   : > { %1898 = vmatprep.subr.bf16.mxu1 %v4777_v2 }
 0x2bb   : > { %1899 = vmatpush1.bf16.msra.mxu1 %v4664_v50 }
 0x2bc   : > { %1900 = vmatprep.subr.bf16.mxu1 %v4777_v2 }
 0x2bf   : > { %1901 = vmatpush1.bf16.msra.mxu1 %v4665_v52 }
 0x2c0   : > { %1902 = vmatprep.subr.bf16.mxu1 %v4777_v2 }
 0x2c3   : > { %1903 = vmatpush1.bf16.msra.mxu1 %v4666_v53 }
 0x2c4   : > { %1904 = vmatprep.subr.bf16.mxu1 %v4777_v2 }
 0x2c7   : > { %1905 = vmatpush1.bf16.msra.mxu1 %v4667_v55 }
 0x2c8   : > { %1906 = vmatprep.subr.bf16.mxu1 %v4777_v2 }
 0x2cb   : > { %1907 = vmatpush1.bf16.msra.mxu1 %v4668_v57 }
 0x2cc   : > { %1971 = vmatprep.subr.bf16.mxu1 %v4777_v2 }
 0x2ce   : > { %1923 = vmatmul.mubr.bf16.vlgmr.msra.gmra.mrb[16].mxu1 %v5122_v20 }
 0x2cf   : > { %1972 = vmatpush1.bf16.msra.mxu1 %v4660_v46  ;;  %4113 = vmatprep.mubr.msk.bf16.mxu1 %vm1041_vm3, %v5133_v23 }
 0x2d0   : > { %1973 = vmatprep.subr.bf16.mxu1 %v4777_v2 }
 0x2d3   : > { %1974 = vmatpush1.bf16.msra.mxu1 %v4661_v47 }
 0x2d4   : > { %1975 = vmatprep.subr.bf16.mxu1 %v4777_v2 }
 0x2d7   : > { %1976 = vmatpush1.bf16.msra.mxu1 %v4662_v48 }
 0x2d8   : > { %1977 = vmatprep.subr.bf16.mxu1 %v4777_v2 }
 0x2db   : > { %1978 = vmatpush1.bf16.msra.mxu1 %v4663_v49 }
 0x2dc   : > { %1979 = vmatprep.subr.bf16.mxu1 %v4777_v2 }
 0x2df   : > { %1980 = vmatpush1.bf16.msra.mxu1 %v4664_v50 }
 0x2e0   : > { %1981 = vmatprep.subr.bf16.mxu1 %v4777_v2 }
 0x2e3   : > { %1982 = vmatpush1.bf16.msra.mxu1 %v4665_v52 }
 0x2e4   : > { %1983 = vmatprep.subr.bf16.mxu1 %v4777_v2 }
 0x2e7   : > { %1984 = vmatpush1.bf16.msra.mxu1 %v4666_v53 }
 0x2e8   : > { %1985 = vmatprep.subr.bf16.mxu1 %v4777_v2 }
 0x2eb   : > { %1986 = vmatpush1.bf16.msra.mxu1 %v4667_v55 }
 0x2ec   : > { %1987 = vmatprep.subr.bf16.mxu1 %v4777_v2 }
 0x2ef   : > { %1988 = vmatpush1.bf16.msra.mxu1 %v4668_v57 }
 0x2f0   : > { %2384 = vmatprep.subr.bf16.mxu1 %v4777_v2 }
 0x2f2   : > { %2004 = vmatmul.mubr.bf16.vlgmr.msra.gmra.mrb[20].mxu1 %v5190_v36 }
 0x311   : > { %v1079_v58 = vpop.f32.mrb[0].mxu1  ;;  %v1192_v59 = vpop.f32.mrb[4].mxu0 }
 0x312   : > { %v1085_v60 = vmul.f32 0.25, %v1079_v58  ;;  %v1411_v61 = vpack.c.bf16 %v1192_v59, %v1192_v59  ;;  %v1081_v62 = vpop.f32.mrb[1].mxu1  ;;  %v1194_v63 = vpop.f32.mrb[5].mxu0 }
 0x313   : > { %v1082_v0 = vpop.f32.mrb[2].mxu1  ;;  %v1195_v1 = vpop.f32.mrb[6].mxu0  ;;  %v5319_v62 = vsel %vm916_vm1, 65535, %v4777_v2 }
 0x314   : > { %v1410_v3 = vpack.c.bf16 %v1085_v60, %v1085_v60  ;;  %v1083_v4 = vpop.f32.mrb[3].mxu1  ;;  %v1196_v5 = vpop.f32.mrb[7].mxu0  ;;  %v1413_v7 = vunpack.c.l.bf16 %v1411_v61 }
 0x315   : > { %v4669_v4 = vld [vmem:[%s5936_s4 + $0x48] sm:$0xff]  }
 0x316   : > { %v1412_v6 = vunpack.c.l.bf16 %v1410_v3 }
 0x318   : > { %v1414_v8 = vmul.f32 %v1413_v7, %v1412_v6  ;;  %v4670_v6 = vld [vmem:[%s5936_s4 + $0x50] sm:$0xff]   ;;  %v4671_v7 = vld [vmem:[%s5936_s4 + $0x58] sm:$0xff]  }
 0x31a   : > { %v1415_v10 = vsel %vm918_vm2, %v1414_v8, 0.0  ;;  %v4672_v8 = vld [vmem:[%s5936_s4 + $0x60] sm:$0xff]  }
 0x31b   : > { %1416 = vadd.xlane.f32.xlu1 %v1415_v10  ;;  %v4674_v10 = vld [vmem:[%s5936_s4 + $0x70] sm:$0xff]  }
 0x335   : > { %v1304_v14 = vpop.f32.mrb[4].mxu1  ;;  %v1362_v16 = vpop.f32.mrb[8].mxu0 }
 0x336   : > { %v1306_v17 = vpop.f32.mrb[5].mxu1  ;;  %v1364_v18 = vpop.f32.mrb[9].mxu0  ;;  %v1483_v61 = vpack.c.bf16 %v1304_v14, %v1304_v14  ;;  %v4675_v14 = vld [vmem:[%s5936_s4 + $0x78] sm:$0xff]  }
 0x337   : > { %v1307_v19 = vpop.f32.mrb[6].mxu1  ;;  %v1365_v22 = vpop.f32.mrb[10].mxu0  ;;  %v4677_v17 = vld [vmem:[%s5936_s4 + $0x88] sm:$0xff]  }
 0x338   : > { %v1418_v24 = vpack.c.bf16 %v1365_v22, %v1362_v16  ;;  %v1308_v25 = vpop.f32.mrb[7].mxu1  ;;  %v1367_v26 = vpop.f32.mrb[11].mxu0  ;;  %v1544_v1 = vand.u32 %v5319_v62, %v1483_v61  ;;  %v4676_v16 = vld [vmem:[%s5936_s4 + $0x80] sm:$0xff]  }
 0x33a   : > { %v1423_v27 = vsel %vm1041_vm3, %v1418_v24, 0 }
 0x33b   : > { %4331 = vmatpush3.bf16.xpose.msra.mxu0 %v1423_v27 }
 0x33c   : > { %4336 = vmatprep.subr.bf16.mxu0 %v4778_v51 }
 0x342   : > { %4333 = vmatmul.mubr.msk.bf16.vlgmr.msra.gmra.mrb[12].mxu0 %vm1041_vm3, %v1410_v3 }
 0x343   : > { %4338 = vmatprep.mubr.msk.bf16.mxu0 %vm4779_vm4, %v4778_v51 }
 0x359   : > { %v1403_v30 = vpop.f32.mrb[8].mxu1 }
 0x35a   : > { %v1405_v31 = vpop.f32.mrb[9].mxu1 }
 0x35b   : > { %v1406_v32 = vpop.f32.mrb[10].mxu1 }
 0x35c   : > { %v1485_v34 = vpack.c.bf16 %v1406_v32, %v1403_v30  ;;  %v1408_v35 = vpop.f32.mrb[11].mxu1 }
 0x35e   : > { %v1495_v37 = vand.u32 %v5308_v33, %v1485_v34 }
 0x360   : > { %4337 = vmatpush3.bf16.msra.mxu0 %v1495_v37 }
 0x361   : > { %4342 = vmatprep.subr.bf16.mxu0 %v4778_v51 }
 0x37d   : > { %v5312_v38 = vpop.f32.mrb[12].mxu1 }
 0x37e   : > { %v1699_v39 = vpop.f32.mrb[13].mxu1  ;;  %v1703_v22 = vmul.f32 0.25, %v5312_v38 }
 0x37f   : > { %v1700_v40 = vpop.f32.mrb[14].mxu1 }
 0x380   : > { %v1701_v41 = vpop.f32.mrb[15].mxu1  ;;  %v2012_v24 = vpack.c.bf16 %v1703_v22, %v1703_v22 }
 0x382   : > { %v2014_v30 = vunpack.c.l.bf16 %v2012_v24 }
 0x3a1   : > { %v5314_v42 = vpop.f32.mrb[16].mxu1 }
 0x3a2   : > { %v1926_v43 = vpop.f32.mrb[17].mxu1 }
 0x3a3   : > { %v1927_v44 = vpop.f32.mrb[18].mxu1 }
 0x3a4   : > { %v1928_v45 = vpop.f32.mrb[19].mxu1 }
 0x3a8   : > { %v1417_v52 = vpop.xlane.xlu1 %1416 }
 0x415   : > { %v1459_v46 = vpop.f32.mrb[12].mxu0 }
 0x416   : > { %v4334_v47 = vpop.f32.mrb[13].mxu0  ;;  %v1466_v48 = vsel %vm1465_vm7, %v1459_v46, -inf }
 0x417   : > { %v1462_v49 = vpop.f32.mrb[14].mxu0  ;;  %1467 = vmax.xlane.f32.xlu1 %v1466_v48 }
 0x418   : > { %v4335_v50 = vpop.f32.mrb[15].mxu0  ;;  %v2005_v49 = vpop.f32.mrb[20].mxu1 }
 0x419   : > { %v2007_v50 = vpop.f32.mrb[21].mxu1 }
 0x41a   : > { %v4698_v50 = vld [vmem:[%s5897_s11 + $0x28] sm:$0xff]  }
 0x4a4   : > { %v1468_v53 = vpop.xlane.xlu1 %1467 }
 0x4a5   : > { %v1469_v55 = vmax.f32 %v1417_v52, %v1468_v53 }
 0x4a7   : > { %v1473_v57 = vsub.f32 %v1459_v46, %v1469_v55  ;;  %v1470_v59 = vsub.f32 %v1417_v52, %v1469_v55  ;;  %v2008_v52 = vpop.f32.mrb[22].mxu1 }
 0x4a8   : > { %v2010_v53 = vpop.f32.mrb[23].mxu1  ;;  %v2086_v55 = vpack.c.bf16 %v2008_v52, %v2005_v49  ;;  %v2425_v49 = vpack.c.bf16 %v5099_v56, %v5099_v56  ;;  %v4699_v52 = vld [vmem:[%s5897_s11 + $0x30] sm:$0xff]   ;;  %v4700_v56 = vld [vmem:[%s5897_s11 + $0x38] sm:$0xff]  }
 0x4a9   : > { %v1474_v58 = vmul.f32 1.442695, %v1473_v57  ;;  %v1471_v60 = vmul.f32 1.442695, %v1470_v59  ;;  %v4701_v53 = vld [vmem:[%s5897_s11 + $0x40] sm:$0xff]  }
 0x4aa   : > { %v2091_v57 = vand.u32 %v2086_v55, %v5308_v33 }
 0x4ab   : > { %4742 = vpow2.f32 %v1474_v58 }
 0x4ac   : > { %4744 = vpow2.f32 %v1471_v60 }
 0x4b5   : > { %v5321_v63 = vpop.eup %4742 }
 0x4b6   : > { %v1484_v0 = vpack.c.bf16 %v5321_v63, %v5321_v63  ;;  %v5330_v3 = vpop.eup %4744  ;;  %v1477_v48 = vsel %vm1465_vm7, %v5321_v63, 0.0  ;;  %v2084_v63 = vpack.c.bf16 %v5314_v42, %v5314_v42  ;;  %v4678_v42 = vld [vmem:[%s5942_s0 + $0x10] ss:$8 sps:$4 sm:$0xff]  }
 0x4b7   : > { %v1482_v5 = vpack.c.bf16 %v5330_v3, %v5330_v3 }
 0x4b8   : > { %4339 = vmatmul.mubr.msk.bf16.vlgmr.msra.gmra.mrb[16].mxu0 %vm1486_vm8, %v1484_v0  ;;  %v2137_v33 = vand.u32 %v2084_v63, %v5319_v62 }
 0x4b9   : > { %4343 = vmatpush3.bf16.msra.mxu0 %v1544_v1  ;;  %4344 = vmatprep.mubr.msk.bf16.mxu0 %vm4779_vm4, %v4778_v51 }
 0x4ba   : > { %1777 = vmatprep.subr.bf16.mxu0 %v4777_v2 }
 0x4c4   : > { %4345 = vmatmul.mubr.msk.bf16.vlgmr.msra.gmra.mrb[16].mxu0 %vm1537_vm9, %v1482_v5 }
 0x4c5   : > { %1778 = vmatpush1.bf16.msra.mxu0 %v4669_v4  ;;  %4083 = vmatprep.mubr.msk.bf16.mxu0 %vm1041_vm3, %v5124_v21  ;;  %v4673_v21 = vld [vmem:[%s5936_s4 + $0x68] sm:$0xff]  }
 0x4c6   : > { %1779 = vmatprep.subr.bf16.mxu0 %v4777_v2 }
 0x4c9   : > { %1780 = vmatpush1.bf16.msra.mxu0 %v4670_v6 }
 0x4ca   : > { %1781 = vmatprep.subr.bf16.mxu0 %v4777_v2 }
 0x4cd   : > { %1782 = vmatpush1.bf16.msra.mxu0 %v4671_v7 }
 0x4ce   : > { %1783 = vmatprep.subr.bf16.mxu0 %v4777_v2 }
 0x4d1   : > { %1784 = vmatpush1.bf16.msra.mxu0 %v4672_v8 }
 0x4d2   : > { %1785 = vmatprep.subr.bf16.mxu0 %v4777_v2 }
 0x4d5   : > { %1786 = vmatpush1.bf16.msra.mxu0 %v4673_v21 }
 0x4d6   : > { %1787 = vmatprep.subr.bf16.mxu0 %v4777_v2 }
 0x4d9   : > { %1788 = vmatpush1.bf16.msra.mxu0 %v4674_v10 }
 0x4da   : > { %1789 = vmatprep.subr.bf16.mxu0 %v4777_v2 }
 0x4dd   : > { %1790 = vmatpush1.bf16.msra.mxu0 %v4675_v14 }
 0x4de   : > { %1791 = vmatprep.subr.bf16.mxu0 %v4777_v2 }
 0x4e1   : > { %1792 = vmatpush1.bf16.msra.mxu0 %v4676_v16 }
 0x4e2   : > { %1793 = vmatprep.subr.bf16.mxu0 %v4777_v2 }
 0x4e5   : > { %1794 = vmatpush1.bf16.msra.mxu0 %v4677_v17 }
 0x4e6   : > { %1930 = vmatprep.subr.bf16.mxu0 %v4777_v2 }
 0x4e8   : > { %1810 = vmatmul.mubr.bf16.vlgmr.msra.gmra.mrb[20].mxu0 %v5122_v20 }
 0x4e9   : > { %1931 = vmatpush1.bf16.msra.mxu0 %v4669_v4  ;;  %4112 = vmatprep.mubr.msk.bf16.mxu0 %vm1041_vm3, %v5133_v23 }
 0x4ea   : > { %1932 = vmatprep.subr.bf16.mxu0 %v4777_v2 }
 0x4ed   : > { %1933 = vmatpush1.bf16.msra.mxu0 %v4670_v6 }
 0x4ee   : > { %1934 = vmatprep.subr.bf16.mxu0 %v4777_v2 }
 0x4f1   : > { %1935 = vmatpush1.bf16.msra.mxu0 %v4671_v7 }
 0x4f2   : > { %1936 = vmatprep.subr.bf16.mxu0 %v4777_v2 }
 0x4f5   : > { %1937 = vmatpush1.bf16.msra.mxu0 %v4672_v8 }
 0x4f6   : > { %1938 = vmatprep.subr.bf16.mxu0 %v4777_v2 }
 0x4f9   : > { %1939 = vmatpush1.bf16.msra.mxu0 %v4673_v21 }
 0x4fa   : > { %1940 = vmatprep.subr.bf16.mxu0 %v4777_v2 }
 0x4fd   : > { %1941 = vmatpush1.bf16.msra.mxu0 %v4674_v10  ;;  %v4680_v10 = vld [vmem:[%s5942_s0 + $0x14] ss:$8 sps:$4 sm:$0xff]  }
 0x4fe   : > { %1942 = vmatprep.subr.bf16.mxu0 %v4777_v2 }
 0x501   : > { %1943 = vmatpush1.bf16.msra.mxu0 %v4675_v14  ;;  %v4683_v14 = vld [vmem:[%s5942_s0 + $0x4] ss:$8 sps:$4 sm:$0xff]  }
 0x502   : > { %1944 = vmatprep.subr.bf16.mxu0 %v4777_v2 }
 0x505   : > { %1945 = vmatpush1.bf16.msra.mxu0 %v4676_v16  ;;  %v4693_v16 = vld [vmem:[%s5897_s11] sm:$0xff]  }
 0x506   : > { %1946 = vmatprep.subr.bf16.mxu0 %v4777_v2  ;;  %2385 = vmatpush1.bf16.msra.mxu1 %v4693_v16 }
 0x507   : > { %2386 = vmatprep.subr.bf16.mxu1 %v4777_v2 }
 0x509   : > { %1947 = vmatpush1.bf16.msra.mxu0 %v4677_v17  ;;  %v4694_v17 = vld [vmem:[%s5897_s11 + $0x8] sm:$0xff]  }
 0x50a   : > { %4348 = vmatprep.subr.bf16.mxu0 %v4778_v51  ;;  %2387 = vmatpush1.bf16.msra.mxu1 %v4694_v17 }
 0x50b   : > { %2388 = vmatprep.subr.bf16.mxu1 %v4777_v2 }
 0x50c   : > { %1963 = vmatmul.mubr.bf16.vlgmr.msra.gmra.mrb[24].mxu0 %v5190_v36 }
 0x50d   : > { %4350 = vmatprep.mubr.msk.bf16.mxu0 %vm4779_vm4, %v4778_v51 }
 0x597   : > { %v5388_v20 = vpop.f32.mrb[16].mxu0 }
 0x598   : > { %v4346_v23 = vpop.f32.mrb[17].mxu0 }
 0x599   : > { %v1583_v18 = vpop.f32.mrb[18].mxu0  ;;  %v4695_v23 = vld [vmem:[%s5897_s11 + $0x10] sm:$0xff]  }
 0x59a   : > { %v4347_v19 = vpop.f32.mrb[19].mxu0  ;;  %2389 = vmatpush1.bf16.msra.mxu1 %v4695_v23  ;;  %v4696_v18 = vld [vmem:[%s5897_s11 + $0x18] sm:$0xff]  }
 0x59b   : > { %2390 = vmatprep.subr.bf16.mxu1 %v4777_v2  ;;  %v4697_v19 = vld [vmem:[%s5897_s11 + $0x20] sm:$0xff]  }
 0x59e   : > { %2391 = vmatpush1.bf16.msra.mxu1 %v4696_v18 }
 0x59f   : > { %2392 = vmatprep.subr.bf16.mxu1 %v4777_v2 }
 0x5a2   : > { %2393 = vmatpush1.bf16.msra.mxu1 %v4697_v19 }
 0x5a3   : > { %2394 = vmatprep.subr.bf16.mxu1 %v4777_v2 }
 0x5a6   : > { %2395 = vmatpush1.bf16.msra.mxu1 %v4698_v50 }
 0x5a7   : > { %2396 = vmatprep.subr.bf16.mxu1 %v4777_v2 }
 0x5aa   : > { %2397 = vmatpush1.bf16.msra.mxu1 %v4699_v52 }
 0x5ab   : > { %2398 = vmatprep.subr.bf16.mxu1 %v4777_v2 }
 0x5ae   : > { %2399 = vmatpush1.bf16.msra.mxu1 %v4700_v56 }
 0x5af   : > { %2400 = vmatprep.subr.bf16.mxu1 %v4777_v2 }
 0x5b2   : > { %2401 = vmatpush1.bf16.msra.mxu1 %v4701_v53 }
 0x5b3   : > { %4366 = vmatprep.subr.bf16.mxu1 %v4778_v51 }
 0x5bb   : > { %v1811_v25 = vpop.f32.mrb[20].mxu0 }
 0x5bc   : > { %v2013_v26 = vpack.c.bf16 %v1811_v25, %v1811_v25  ;;  %v1813_v27 = vpop.f32.mrb[21].mxu0 }
 0x5bd   : > { %v1814_v29 = vpop.f32.mrb[22].mxu0 }
 0x5be   : > { %v2015_v31 = vunpack.c.l.bf16 %v2013_v26  ;;  %v1815_v32 = vpop.f32.mrb[23].mxu0 }
 0x5c0   : > { %v2016_v34 = vmul.f32 %v2015_v31, %v2014_v30 }
 0x5c2   : > { %v2017_v36 = vsel %vm918_vm2, %v2016_v34, 0.0  ;;  %v4681_v34 = vld [vmem:[%s5942_s0] ss:$8 sps:$4 sm:$0xff]  }
 0x5c3   : > { %2018 = vadd.xlane.f32.xlu0 %v2017_v36 }
 0x5df   : > { %v1964_v35 = vpop.f32.mrb[24].mxu0 }
 0x5e0   : > { %v1966_v37 = vpop.f32.mrb[25].mxu0 }
 0x5e1   : > { %v1967_v39 = vpop.f32.mrb[26].mxu0 }
 0x5e2   : > { %v2020_v40 = vpack.c.bf16 %v1967_v39, %v1964_v35  ;;  %v1969_v41 = vpop.f32.mrb[27].mxu0  ;;  %v4684_v39 = vld [vmem:[%s5899_s13] sm:$0xff]  }
 0x5e4   : > { %v2025_v43 = vsel %vm1041_vm3, %v2020_v40, 0  ;;  %v2426_v40 = vpack.c.bf16 %v5092_v54, %v5092_v54 }
 0x5e5   : > { %4349 = vmatpush3.bf16.xpose.msra.mxu0 %v2025_v43  ;;  %v4685_v43 = vld [vmem:[%s5899_s13 + $0x8] sm:$0xff]  }
 0x5e6   : > { %4354 = vmatprep.subr.bf16.mxu0 %v4778_v51 }
 0x5ec   : > { %4351 = vmatmul.mubr.msk.bf16.vlgmr.msra.gmra.mrb[28].mxu0 %vm1041_vm3, %v2012_v24 }
 0x5ed   : > { %4356 = vmatprep.mubr.msk.bf16.mxu0 %vm4779_vm4, %v4778_v51  ;;  %4355 = vmatpush3.bf16.msra.mxu0 %v2091_v57 }
 0x5ee   : > { %4360 = vmatprep.subr.bf16.mxu0 %v4778_v51 }
 0x650   : > { %v2019_v58 = vpop.xlane.xlu0 %2018 }
 0x6bf   : > { %v2061_v38 = vpop.f32.mrb[28].mxu0 }
 0x6c0   : > { %v4352_v44 = vpop.f32.mrb[29].mxu0  ;;  %v2067_v45 = vsel %vm1465_vm7, %v2061_v38, -inf }
 0x6c1   : > { %2068 = vmax.xlane.f32.xlu1 %v2067_v45  ;;  %v2064_v46 = vpop.f32.mrb[30].mxu0  ;;  %v4688_v44 = vld [vmem:[%s5899_s13 + $0x20] sm:$0xff]   ;;  %v4689_v45 = vld [vmem:[%s5899_s13 + $0x28] sm:$0xff]  }
 0x6c2   : > { %v4353_v47 = vpop.f32.mrb[31].mxu0  ;;  %v4690_v46 = vld [vmem:[%s5899_s13 + $0x30] sm:$0xff]  }
 0x6c3   : > { %v4691_v47 = vld [vmem:[%s5899_s13 + $0x38] sm:$0xff]  }
 0x6c5   : > { %1478 = vadd.xlane.f32.xlu1 %v1477_v48  ;;  %v4692_v48 = vld [vmem:[%s5899_s13 + $0x40] sm:$0xff]  }
 0x74e   : > { %v2069_v59 = vpop.xlane.xlu1 %2068 }
 0x74f   : > { %v2070_v60 = vmax.f32 %v2019_v58, %v2069_v59 }
 0x751   : > { %v2074_v61 = vsub.f32 %v2061_v38, %v2070_v60  ;;  %v2071_v1 = vsub.f32 %v2019_v58, %v2070_v60  ;;  %v4687_v38 = vld [vmem:[%s5899_s13 + $0x18] sm:$0xff]   ;;  %v2292_v60 = vld [vmem:[%s5896_s10] sm:$0x3] }
 0x752   : > { %v1479_v25 = vpop.xlane.xlu1 %1478 }
 0x753   : > { %v2075_v0 = vmul.f32 1.442695, %v2074_v61  ;;  %v2072_v4 = vmul.f32 1.442695, %v2071_v1  ;;  %v1480_v26 = vadd.f32 %v5330_v3, %v1479_v25  ;;  %v2297_v61 = vrot.slane %v2292_v60, %v4967_v13 }
 0x754   : > { %v2301_v1 = vrot.slane %v2292_v60, %v4973_v15 }
 0x755   : > { %4746 = vpow2.f32 %v2075_v0 }
 0x756   : > { %4748 = vpow2.f32 %v2072_v4 }
 0x75f   : > { %v4747_v5 = vpop.eup %4746 }
 0x760   : > { %v2078_v6 = vsel %vm1465_vm7, %v4747_v5, 0.0  ;;  %v2085_v7 = vpack.c.bf16 %v4747_v5, %v4747_v5  ;;  %v4749_v8 = vpop.eup %4748 }
 0x761   : > { %2079 = vadd.xlane.f32.xlu0 %v2078_v6  ;;  %v2083_v21 = vpack.c.bf16 %v4749_v8, %v4749_v8 }
 0x762   : > { %4357 = vmatmul.mubr.msk.bf16.vlgmr.msra.gmra.mrb[32].mxu0 %vm1486_vm8, %v2085_v7 }
 0x763   : > { %4361 = vmatpush3.bf16.msra.mxu0 %v2137_v33  ;;  %4362 = vmatprep.mubr.msk.bf16.mxu0 %vm4779_vm4, %v4778_v51 }
 0x764   : > { %2197 = vmatprep.subr.bf16.mxu0 %v4680_v10  ;;  %v2445_v10 = vld [vmem:[%s5900_s14] sm:$0x1] }
 0x76e   : > { %4363 = vmatmul.mubr.msk.bf16.vlgmr.msra.gmra.mrb[32].mxu0 %vm1537_vm9, %v2083_v21 }
 0x76f   : > { %2229 = vmatprep.mubr.bf16.mxu0 %v4777_v2  ;;  %2198 = vmatpush1.bf16.msra.mxu0 %v4678_v42 }
 0x770   : > { %2251 = vmatprep.subr.bf16.mxu0 %v4683_v14 }
 0x7ee   : > { %v2080_v22 = vpop.xlane.xlu0 %2079 }
 0x7ef   : > { %v2081_v24 = vadd.f32 %v4749_v8, %v2080_v22 }
 0x7f1   : > { %4750 = vrcp.f32 %v2081_v24 }
 0x7f2   : > { %4752 = vrcp.f32 %v1480_v26 }
 0x7fb   : > { %v4751_v27 = vpop.eup %4750 }
 0x7fc   : > { %v4753_v37 = vpop.eup %4752 }
 0x7fd   : > { %v1586_v3 = vmul.f32 %v4753_v37, %v5388_v20  ;;  %v4686_v20 = vld [vmem:[%s5899_s13 + $0x10] sm:$0xff]  }
 0x7ff   : > { %v1587_v41 = vpack.c.bf16 %v1586_v3, %v1586_v3  ;;  %v4708_v3 = vld [vmem:[%s5903_s17 + $0x18] sm:$0xff]  }
 0x841   : > { %v2173_v29 = vpop.f32.mrb[32].mxu0 }
 0x842   : > { %v2179_v30 = vmul.f32 %v4751_v27, %v2173_v29  ;;  %v4364_v31 = vpop.f32.mrb[33].mxu0  ;;  %v4702_v29 = vld [vmem:[%s5903_s17] sm:$0xff]  }
 0x843   : > { %v2176_v32 = vpop.f32.mrb[34].mxu0  ;;  %v4704_v31 = vld [vmem:[%s5903_s17 + $0x8] sm:$0xff]  }
 0x844   : > { %v2180_v36 = vpack.c.bf16 %v2179_v30, %v2179_v30  ;;  %v4365_v35 = vpop.f32.mrb[35].mxu0  ;;  %v5541_v30 = vld [vmem:[%s5904_s18] sm:$0xff]   ;;  %v5552_v32 = vld [vmem:[%s5904_s18 + $0x8] sm:$0xff]  }
 0x845   : > { %v2326_v35 = vld [vmem:[%s5898_s12] sm:$0x1] }
 0x846   : > { %4121 = vmatmul.mubr.msk.bf16.vlgmr.msra.gmra.mrb[36].mxu0 %vm1041_vm3, %v2180_v36  ;;  %v5563_v36 = vld [vmem:[%s5904_s18 + $0x10] sm:$0xff]  }
 0x847   : > { %2252 = vmatpush1.bf16.msra.mxu0 %v4681_v34  ;;  %2283 = vmatprep.mubr.bf16.mxu0 %v4777_v2  ;;  %v4706_v34 = vld [vmem:[%s5903_s17 + $0x10] sm:$0xff]  }
 0x848   : > { %2503 = vmatprep.subr.bf16.mxu0 %v4777_v2 }
 0x84e   : > { %4124 = vmatmul.mubr.msk.bf16.vlgmr.msra.gmra.mrb[40].mxu0 %vm1041_vm3, %v1587_v41 }
 0x84f   : > { %2504 = vmatpush1.bf16.msra.mxu0 %v4684_v39  ;;  %4144 = vmatprep.mubr.msk.bf16.mxu0 %vm1041_vm3, %v2426_v40  ;;  %v5577_v39 = vld [vmem:[%s5904_s18 + $0x18] sm:$0xff]  }
 0x850   : > { %2505 = vmatprep.subr.bf16.mxu0 %v4777_v2 }
 0x853   : > { %2506 = vmatpush1.bf16.msra.mxu0 %v4685_v43 }
 0x854   : > { %2507 = vmatprep.subr.bf16.mxu0 %v4777_v2 }
 0x857   : > { %2508 = vmatpush1.bf16.msra.mxu0 %v4686_v20 }
 0x858   : > { %2509 = vmatprep.subr.bf16.mxu0 %v4777_v2 }
 0x85b   : > { %2510 = vmatpush1.bf16.msra.mxu0 %v4687_v38 }
 0x85c   : > { %2511 = vmatprep.subr.bf16.mxu0 %v4777_v2 }
 0x85f   : > { %2512 = vmatpush1.bf16.msra.mxu0 %v4688_v44  ;;  %v800_v44 = vld [vmem:[%s4948_s1 + $0x8] sm:$0xff] }
 0x860   : > { %2513 = vmatprep.subr.bf16.mxu0 %v4777_v2  ;;  %3839 = vst.msk [vmem:[%s5525_s9 + $0x8] sm:$0xff] %vm869_vm0, %v800_v44 }
 0x863   : > { %2514 = vmatpush1.bf16.msra.mxu0 %v4689_v45  ;;  %v2563_v45 = vpack.c.bf16 %v800_v44, %v4957_v9 }
 0x864   : > { %2515 = vmatprep.subr.bf16.mxu0 %v4777_v2 }
 0x865   : > { %v2788_v50 = vshrl.u32 %v2563_v45, 16 }
 0x867   : > { %2516 = vmatpush1.bf16.msra.mxu0 %v4690_v46  ;;  %v801_v46 = vld [vmem:[%s4948_s1 + $0x10] sm:$0xff] }
 0x868   : > { %2517 = vmatprep.subr.bf16.mxu0 %v4777_v2  ;;  %3840 = vst.msk [vmem:[%s5525_s9 + $0x10] sm:$0xff] %vm869_vm0, %v801_v46 }
 0x86b   : > { %2518 = vmatpush1.bf16.msra.mxu0 %v4691_v47  ;;  %v802_v47 = vld [vmem:[%s4948_s1 + $0x18] sm:$0xff] }
 0x86c   : > { %2519 = vmatprep.subr.bf16.mxu0 %v4777_v2  ;;  %3841 = vst.msk [vmem:[%s5525_s9 + $0x18] sm:$0xff] %vm869_vm0, %v802_v47 }
 0x86f   : > { %2520 = vmatpush1.bf16.msra.mxu0 %v4692_v48  ;;  %v2564_v48 = vpack.c.bf16 %v802_v47, %v801_v46 }
 0x870   : > { %4378 = vmatprep.subr.bf16.mxu0 %v4778_v51 }
 0x871   : > { %v2795_v56 = vshll.u32 %v2564_v48, 16 }
 0x872   : > { %2536 = vmatmul.mubr.bf16.vlgmr.msra.gmra.mrb[44].mxu0 %v2425_v49  ;;  %v2790_v49 = vshll.u32 %v2563_v45, 16 }
 0x873   : > { %4386 = vmatprep.mubr.msk.bf16.mxu0 %vm4779_vm4, %v4778_v51  ;;  %4379 = vmatpush3.bf16.msra.mxu0 %v5541_v30 }
 0x874   : > { %4380 = vmatprep.subr.bf16.mxu0 %v4778_v51  ;;  %v2792_v52 = vrot.slane %v2790_v49, 1 }
 0x876   : > { %v2793_v53 = vor.u32 %v2792_v52, %v2788_v50 }
 0x877   : > { %4381 = vmatpush3.bf16.msra.mxu0 %v5552_v32 }
 0x878   : > { %4382 = vmatprep.subr.bf16.mxu0 %v4778_v51 }
 0x87b   : > { %4383 = vmatpush3.bf16.msra.mxu0 %v5563_v36 }
 0x87c   : > { %4384 = vmatprep.subr.bf16.mxu0 %v4778_v51 }
 0x87f   : > { %4385 = vmatpush3.bf16.msra.mxu0 %v5577_v39 }
 0x880   : > { %4402 = vmatprep.subr.bf16.mxu0 %v4778_v51 }
 0x919   : > { %v2231_v55 = vpop.f32.mrb[36].mxu0 }
 0x91a   : > { %v2233_v57 = vpop.f32.mrb[37].mxu0 }
 0x91b   : > { %v2235_v58 = vpop.f32.mrb[38].mxu0 }
 0x91c   : > { %v2236_v59 = vpop.f32.mrb[39].mxu0 }
 0x91d   : > { %v2799_v59 = vshrl.u32 %v2564_v48, 16 }
 0x921   : > { %v2285_v0 = vpop.f32.mrb[40].mxu0 }
 0x922   : > { %v2286_v4 = vadd.f32 %v2285_v0, %v2231_v55  ;;  %v2287_v63 = vpop.f32.mrb[41].mxu0  ;;  %v2797_v55 = vrot.slane %v2795_v56, 1 }
 0x923   : > { %v2288_v5 = vadd.f32 %v2287_v63, %v2233_v57  ;;  %v2289_v6 = vpop.f32.mrb[42].mxu0 }
 0x924   : > { %v2304_v7 = vadd.f32 %v2297_v61, %v2286_v4  ;;  %v2290_v33 = vpop.f32.mrb[43].mxu0  ;;  %v5595_v57 = vsel %vm2786_vm11, %v2793_v53, %v2797_v55  ;;  %v2801_v60 = vor.u32 %v2799_v59, %v2797_v55 }
 0x925   : > { %v2305_v8 = vadd.f32 %v2301_v1, %v2288_v5 }
 0x926   : > { %v2306_v42 = vpack.c.bf16 %v2304_v7, %v2304_v7  ;;  %v2543_v7 = vld [vmem:[%s5901_s15] sm:$0x1] }
 0x927   : > { %v2307_v21 = vpack.c.bf16 %v2305_v8, %v2305_v8  ;;  %v2544_v8 = vld [vmem:[%s5902_s16] sm:$0x1] }
 0x929   : > { %4134 = vmatprep.mubr.msk.bf16.mxu1 %vm1041_vm3, %v2307_v21 }
 0x92a   : > { %2417 = vmatmul.mubr.bf16.vlgmr.msra.gmra.mrb[24].mxu1 %v2306_v42 }
 0x92b   : > { %4374 = vmatprep.mubr.msk.bf16.mxu1 %vm4779_vm4, %v4778_v51  ;;  %4367 = vmatpush3.bf16.msra.mxu1 %v4702_v29 }
 0x92c   : > { %4368 = vmatprep.subr.bf16.mxu1 %v4778_v51 }
 0x92f   : > { %4369 = vmatpush3.bf16.msra.mxu1 %v4704_v31 }
 0x930   : > { %4370 = vmatprep.subr.bf16.mxu1 %v4778_v51 }
 0x933   : > { %4371 = vmatpush3.bf16.msra.mxu1 %v4706_v34 }
 0x934   : > { %4372 = vmatprep.subr.bf16.mxu1 %v4778_v51 }
 0x937   : > { %4373 = vmatpush3.bf16.msra.mxu1 %v4708_v3 }
 0x938   : > { %4390 = vmatprep.subr.bf16.mxu1 %v4778_v51 }
 0x945   : > { %v2537_v14 = vpop.f32.mrb[44].mxu0 }
 0x946   : > { %v2538_v16 = vadd.f32 %v2537_v14, %v2445_v10  ;;  %v2539_v17 = vpop.f32.mrb[45].mxu0  ;;  %v4710_v10 = vld [vmem:[%s5905_s19] sm:$0xff]  }
 0x947   : > { %v2540_v23 = vpop.f32.mrb[46].mxu0  ;;  %v4712_v17 = vld [vmem:[%s5905_s19 + $0x10] sm:$0xff]  }
 0x948   : > { %v2541_v18 = vpop.f32.mrb[47].mxu0  ;;  %v2546_v19 = vsel %vm2545_vm10, %v2538_v16, 0.0  ;;  %v4713_v23 = vld [vmem:[%s5905_s19 + $0x18] sm:$0xff]  }
 0x949   : > { %2547 = vadd.xlane.f32.xlu0 %v2546_v19 }
 0x9d6   : > { %v2548_v22 = vpop.xlane.xlu0 %2547 }
 0x9d7   : > { %v2550_v24 = vmul.f32 0.015625, %v2548_v22 }
 0x9d9   : > { %v5530_v25 = vsub.f32 %v2538_v16, %v2550_v24  ;;  %v4711_v16 = vld [vmem:[%s5905_s19 + $0x8] sm:$0xff]  }
 0x9db   : > { %v2552_v26 = vmul.f32 %v5530_v25, %v5530_v25 }
 0x9dd   : > { %v2553_v27 = vsel %vm2545_vm10, %v2552_v26, 0.0 }
 0x9de   : > { %2554 = vadd.xlane.f32.xlu1 %v2553_v27 }
 0x9fd   : > { %v2418_v37 = vpop.f32.mrb[24].mxu1 }
 0x9fe   : > { %v2419_v40 = vadd.f32 %v2418_v37, %v2326_v35  ;;  %v2420_v41 = vpop.f32.mrb[25].mxu1 }
 0x9ff   : > { %v2421_v43 = vpop.f32.mrb[26].mxu1 }
 0xa00   : > { %v2424_v20 = vadd.f32 %v2419_v40, %v4957_v9  ;;  %v2422_v38 = vpop.f32.mrb[27].mxu1  ;;  %v803_v9 = vld [vmem:[%s4948_s1 + $0x20] sm:$0xf] }
 0xa01   : > { %v2565_v58 = vpack.c.bf16 %v803_v9, %v803_v9  ;;  %3843 = vst.msk [vmem:[%s5525_s9 + $0x20] sm:$0xf] %vm3842_vm12, %v803_v9 }
 0xa02   : > { %3848 = vst.msk [vmem:[%s5525_s9] sm:$0x1] %vm2545_vm10, %v2424_v20 }
 0xa03   : > { %v2803_v61 = vshll.u32 %v2565_v58, 16  ;;  %v2807_v18 = vshrl.u32 %v2565_v58, 16 }
 0xa05   : > { %v2805_v0 = vrot.slane %v2803_v61, 1 }
 0xa07   : > { %v5598_v1 = vsel %vm2786_vm11, %v2801_v60, %v2805_v0  ;;  %v5657_v19 = vor.u32 %v2807_v18, %v2805_v0 }
 0xa6b   : > { %v2555_v4 = vpop.xlane.xlu1 %2554 }
 0xa6c   : > { %v2556_v63 = vmul.f32 0.015625, %v2555_v4  ;;  %v4714_v4 = vld [vmem:[%s5903_s17 + $0x20] sm:$0xff]  }
 0xa6e   : > { %v2557_v5 = vadd.f32 1e-05, %v2556_v63  ;;  %v4715_v63 = vld [vmem:[%s5903_s17 + $0x28] sm:$0xff]  }
 0xa70   : > { %4754 = vrsqrt.f32 %v2557_v5  ;;  %v4716_v5 = vld [vmem:[%s5903_s17 + $0x30] sm:$0xff]  }
 0xa7a   : > { %v4755_v6 = vpop.eup %4754 }
 0xa7b   : > { %v2559_v33 = vmul.f32 %v4755_v6, %v5530_v25  ;;  %v4717_v6 = vld [vmem:[%s5903_s17 + $0x38] sm:$0xff]  }
 0xa7d   : > { %v2560_v21 = vmul.f32 %v2559_v33, %v2543_v7  ;;  %v4718_v7 = vld [vmem:[%s5904_s18 + $0x20] sm:$0xff]   ;;  %v4719_v33 = vld [vmem:[%s5904_s18 + $0x28] sm:$0xff]  }
 0xa7f   : > { %v2561_v42 = vadd.f32 %v2560_v21, %v2544_v8  ;;  %v4720_v8 = vld [vmem:[%s5904_s18 + $0x30] sm:$0xff]   ;;  %v4721_v21 = vld [vmem:[%s5904_s18 + $0x38] sm:$0xff]  }
 0xa81   : > { %v5611_v14 = vpack.c.bf16 %v2561_v42, %v2561_v42 }
 0xa83   : > { %4375 = vmatmul.mubr.msk.bf16.vlgmr.msra.gmra.mrb[28].mxu1 %vm869_vm0, %v5611_v14  ;;  %4387 = vmatmul.mubr.msk.bf16.vlgmr.msra.gmra.mrb[48].mxu0 %vm869_vm0, %v5611_v14 }
 0xa84   : > { %4391 = vmatpush3.bf16.msra.mxu1 %v4710_v10  ;;  %4403 = vmatpush3.bf16.msra.mxu0 %v5541_v30 }
 0xa85   : > { %4392 = vmatprep.subr.bf16.mxu1 %v4778_v51  ;;  %4404 = vmatprep.subr.bf16.mxu0 %v4778_v51 }
 0xa86   : > { %4398 = vmatprep.mubr.msk.bf16.mxu1 %vm4779_vm4, %v4778_v51  ;;  %4410 = vmatprep.mubr.msk.bf16.mxu0 %vm4779_vm4, %v4778_v51 }
 0xa88   : > { %4393 = vmatpush3.bf16.msra.mxu1 %v4711_v16  ;;  %4405 = vmatpush3.bf16.msra.mxu0 %v5552_v32 }
 0xa89   : > { %4394 = vmatprep.subr.bf16.mxu1 %v4778_v51  ;;  %4406 = vmatprep.subr.bf16.mxu0 %v4778_v51 }
 0xa8c   : > { %4395 = vmatpush3.bf16.msra.mxu1 %v4712_v17  ;;  %4407 = vmatpush3.bf16.msra.mxu0 %v5563_v36 }
 0xa8d   : > { %4396 = vmatprep.subr.bf16.mxu1 %v4778_v51  ;;  %4408 = vmatprep.subr.bf16.mxu0 %v4778_v51 }
 0xa90   : > { %4397 = vmatpush3.bf16.msra.mxu1 %v4713_v23  ;;  %4409 = vmatpush3.bf16.msra.mxu0 %v5577_v39 }
 0xa91   : > { %4442 = vmatprep.subr.bf16.mxu0 %v4778_v51  ;;  %4422 = vmatprep.subr.bf16.mxu1 %v4778_v51 }
 0xa93   : > { %4399 = vmatmul.mubr.msk.bf16.vlgmr.msra.gmra.mrb[32].mxu1 %vm869_vm0, %v5611_v14  ;;  %4411 = vmatmul.mubr.msk.bf16.vlgmr.msra.gmra.mrb[52].mxu0 %vm869_vm0, %v5595_v57 }
 0xa94   : > { %4414 = vmatprep.mubr.msk.bf16.mxu0 %vm4779_vm4, %v4778_v51  ;;  %4423 = vmatpush3.bf16.msra.mxu1 %v4710_v10 }
 0xa95   : > { %4424 = vmatprep.subr.bf16.mxu1 %v4778_v51  ;;  %4430 = vmatprep.mubr.msk.bf16.mxu1 %vm4779_vm4, %v4778_v51 }
 0xa98   : > { %4425 = vmatpush3.bf16.msra.mxu1 %v4711_v16 }
 0xa99   : > { %4426 = vmatprep.subr.bf16.mxu1 %v4778_v51 }
 0xa9b   : > { %4415 = vmatmul.mubr.msk.bf16.gmra.mrb[56].mxu0 %vm869_vm0, %v5598_v1 }
 0xa9c   : > { %4418 = vmatprep.mubr.msk.bf16.mxu0 %vm4779_vm4, %v4778_v51  ;;  %4427 = vmatpush3.bf16.msra.mxu1 %v4712_v17 }
 0xa9d   : > { %4428 = vmatprep.subr.bf16.mxu1 %v4778_v51 }
 0xaa0   : > { %4429 = vmatpush3.bf16.msra.mxu1 %v4713_v23 }
 0xaa1   : > { %4452 = vmatprep.subr.bf16.mxu1 %v4778_v51 }
 0xaa3   : > { %4419 = vmatmul.mubr.msk.bf16.gmra.mrb[60].mxu0 %vm869_vm0, %v5657_v19  ;;  %4431 = vmatmul.mubr.msk.bf16.vlgmr.msra.gmra.mrb[36].mxu1 %vm869_vm0, %v5595_v57 }
 0xaa4   : > { %4448 = vmatprep.mubr.msk.bf16.mxu0 %vm4779_vm4, %v4778_v51  ;;  %4434 = vmatprep.mubr.msk.bf16.mxu1 %vm4779_vm4, %v4778_v51 }
 0xaab   : > { %4435 = vmatmul.mubr.msk.bf16.gmra.mrb[40].mxu1 %vm869_vm0, %v5598_v1 }
 0xaac   : > { %4438 = vmatprep.mubr.msk.bf16.mxu1 %vm4779_vm4, %v4778_v51 }
 0xab3   : > { %4439 = vmatmul.mubr.msk.bf16.gmra.mrb[44].mxu1 %vm869_vm0, %v5657_v19 }
 0xab4   : > { %4458 = vmatprep.mubr.msk.bf16.mxu1 %vm4779_vm4, %v4778_v51 }
 0xb56   : > { %v2635_v22 = vpop.f32.mrb[28].mxu1  ;;  %v2708_v24 = vpop.f32.mrb[48].mxu0 }
 0xb57   : > { %v2641_v25 = vmul.f32 0.25, %v2635_v22  ;;  %v2932_v26 = vpack.c.bf16 %v2708_v24, %v2708_v24  ;;  %v4376_v27 = vpop.f32.mrb[29].mxu1  ;;  %v4388_v29 = vpop.f32.mrb[49].mxu0 }
 0xb58   : > { %v2638_v30 = vpop.f32.mrb[30].mxu1  ;;  %v2711_v31 = vpop.f32.mrb[50].mxu0 }
 0xb59   : > { %v2931_v32 = vpack.c.bf16 %v2641_v25, %v2641_v25  ;;  %v4377_v34 = vpop.f32.mrb[31].mxu1  ;;  %v4389_v36 = vpop.f32.mrb[51].mxu0  ;;  %v2934_v37 = vunpack.c.l.bf16 %v2932_v26 }
 0xb5b   : > { %v2933_v35 = vunpack.c.l.bf16 %v2931_v32 }
 0xb5d   : > { %v2935_v3 = vmul.f32 %v2934_v37, %v2933_v35 }
 0xb5f   : > { %v2936_v39 = vsel %vm918_vm2, %v2935_v3, 0.0 }
 0xb60   : > { %2937 = vadd.xlane.f32.xlu0 %v2936_v39 }
 0xb66   : > { %v5677_v40 = vpop.f32.mrb[32].mxu1  ;;  %v2853_v41 = vpop.f32.mrb[52].mxu0 }
 0xb67   : > { %v4400_v43 = vpop.f32.mrb[33].mxu1  ;;  %v4412_v20 = vpop.f32.mrb[53].mxu0 }
 0xb68   : > { %v2783_v38 = vpop.f32.mrb[34].mxu1  ;;  %v2856_v44 = vpop.f32.mrb[54].mxu0  ;;  %v3022_v43 = vsel %vm916_vm1, 4294967295, %v4780_v28 }
 0xb69   : > { %v2939_v45 = vpack.c.bf16 %v2856_v44, %v2853_v41  ;;  %v4401_v46 = vpop.f32.mrb[35].mxu1  ;;  %v4413_v47 = vpop.f32.mrb[55].mxu0  ;;  %v5751_v38 = vsel %vm3021_vm14, %v3022_v43, 0 }
 0xb6b   : > { %v2946_v48 = vsel %vm1041_vm3, %v2939_v45, 0 }
 0xb6c   : > { %4443 = vmatpush3.bf16.xpose.msra.mxu0 %v2946_v48 }
 0xb6d   : > { %4444 = vmatprep.subr.bf16.mxu0 %v4778_v51 }
 0xb6e   : > { %v2861_v49 = vpop.f32.mrb[56].mxu0 }
 0xb6f   : > { %v4416_v50 = vpop.f32.mrb[57].mxu0 }
 0xb70   : > { %v2864_v52 = vpop.f32.mrb[58].mxu0 }
 0xb71   : > { %v2940_v56 = vpack.c.bf16 %v2864_v52, %v2861_v49  ;;  %v4417_v53 = vpop.f32.mrb[59].mxu0 }
 0xb73   : > { %v2949_v55 = vsel %vm1041_vm3, %v2940_v56, 0 }
 0xb74   : > { %4445 = vmatpush3.bf16.xpose.msra.mxu0 %v2949_v55 }
 0xb75   : > { %4446 = vmatprep.subr.bf16.mxu0 %v4778_v51 }
 0xb76   : > { %v2869_v9 = vpop.f32.mrb[60].mxu0  ;;  %v2909_v42 = vpop.f32.mrb[36].mxu1 }
 0xb77   : > { %v2941_v58 = vpack.c.bf16 %v2869_v9, %v2869_v9  ;;  %v4420_v59 = vpop.f32.mrb[61].mxu0  ;;  %v4432_v10 = vpop.f32.mrb[37].mxu1 }
 0xb78   : > { %v2872_v60 = vpop.f32.mrb[62].mxu0  ;;  %v2912_v29 = vpop.f32.mrb[38].mxu1 }
 0xb79   : > { %v2952_v61 = vsel %vm1041_vm3, %v2941_v58, 0  ;;  %v4421_v0 = vpop.f32.mrb[63].mxu0  ;;  %v3014_v30 = vpack.c.bf16 %v2912_v29, %v2909_v42  ;;  %v4433_v31 = vpop.f32.mrb[39].mxu1 }
 0xb7a   : > { %v3012_v31 = vpack.c.bf16 %v5677_v40, %v5677_v40  ;;  %v4722_v40 = vld [vmem:[%s5905_s19 + $0x20] sm:$0xff]  }
 0xb7b   : > { %4453 = vmatpush3.bf16.msra.mxu1 %v3014_v30 }
 0xb7c   : > { %4447 = vmatpush3.bf16.xpose.msra.mxu0 %v2952_v61  ;;  %4454 = vmatprep.subr.bf16.mxu1 %v4778_v51 }
 0xb7d   : > { %4468 = vmatprep.subr.bf16.mxu0 %v4778_v51 }
 0xb83   : > { %4449 = vmatmul.mubr.msk.bf16.vlgmr.msra.gmra.mrb[64].mxu0 %vm1041_vm3, %v2931_v32  ;;  %v2917_v32 = vpop.f32.mrb[40].mxu1 }
 0xb84   : > { %4469 = vmatpush3.bf16.msra.mxu0 %v4714_v4  ;;  %4476 = vmatprep.mubr.msk.bf16.mxu0 %vm4779_vm4, %v4778_v51  ;;  %v4436_v34 = vpop.f32.mrb[41].mxu1 }
 0xb85   : > { %4470 = vmatprep.subr.bf16.mxu0 %v4778_v51  ;;  %v2920_v36 = vpop.f32.mrb[42].mxu1 }
 0xb86   : > { %v3015_v35 = vpack.c.bf16 %v2920_v36, %v2917_v32  ;;  %v4437_v37 = vpop.f32.mrb[43].mxu1  ;;  %v3071_v36 = vand.u32 %v3012_v31, %v5319_v62 }
 0xb87   : > { %v2925_v39 = vpop.f32.mrb[44].mxu1  ;;  %v4723_v37 = vld [vmem:[%s5905_s19 + $0x28] sm:$0xff]  }
 0xb88   : > { %4471 = vmatpush3.bf16.msra.mxu0 %v4715_v63  ;;  %v3016_v41 = vpack.c.bf16 %v2925_v39, %v2925_v39  ;;  %4455 = vmatpush3.bf16.msra.mxu1 %v3015_v35  ;;  %v4440_v20 = vpop.f32.mrb[45].mxu1  ;;  %v4725_v39 = vld [vmem:[%s5905_s19 + $0x38] sm:$0xff]  }
 0xb89   : > { %4472 = vmatprep.subr.bf16.mxu0 %v4778_v51  ;;  %4456 = vmatprep.subr.bf16.mxu1 %v4778_v51  ;;  %v2928_v44 = vpop.f32.mrb[46].mxu1 }
 0xb8a   : > { %v3025_v45 = vand.u32 %v5751_v38, %v3016_v41  ;;  %v4441_v46 = vpop.f32.mrb[47].mxu1 }
 0xb8c   : > { %4473 = vmatpush3.bf16.msra.mxu0 %v4716_v5  ;;  %4457 = vmatpush3.bf16.msra.mxu1 %v3025_v45 }
 0xb8d   : > { %4474 = vmatprep.subr.bf16.mxu0 %v4778_v51  ;;  %4462 = vmatprep.subr.bf16.mxu1 %v4778_v51 }
 0xb90   : > { %4475 = vmatpush3.bf16.msra.mxu0 %v4717_v6 }
 0xb91   : > { %4480 = vmatprep.subr.bf16.mxu0 %v4778_v51 }
 0xb93   : > { %4477 = vmatmul.mubr.msk.bf16.vlgmr.msra.gmra.mrb[68].mxu0 %vm869_vm0, %v5611_v14 }
 0xb94   : > { %4481 = vmatpush3.bf16.msra.mxu0 %v4718_v7  ;;  %4488 = vmatprep.mubr.msk.bf16.mxu0 %vm4779_vm4, %v4778_v51 }
 0xb95   : > { %4482 = vmatprep.subr.bf16.mxu0 %v4778_v51 }
 0xb98   : > { %4483 = vmatpush3.bf16.msra.mxu0 %v4719_v33 }
 0xb99   : > { %4484 = vmatprep.subr.bf16.mxu0 %v4778_v51 }
 0xb9c   : > { %4485 = vmatpush3.bf16.msra.mxu0 %v4720_v8 }
 0xb9d   : > { %4486 = vmatprep.subr.bf16.mxu0 %v4778_v51 }
 0xba0   : > { %4487 = vmatpush3.bf16.msra.mxu0 %v4721_v21 }
 0xba1   : > { %4504 = vmatprep.subr.bf16.mxu0 %v4778_v51 }
 0xba3   : > { %4489 = vmatmul.mubr.msk.bf16.vlgmr.msra.gmra.mrb[72].mxu0 %vm869_vm0, %v5611_v14 }
 0xba4   : > { %4505 = vmatpush3.bf16.msra.mxu0 %v4718_v7  ;;  %4512 = vmatprep.mubr.msk.bf16.mxu0 %vm4779_vm4, %v4778_v51 }
 0xba5   : > { %4506 = vmatprep.subr.bf16.mxu0 %v4778_v51 }
 0xba8   : > { %4507 = vmatpush3.bf16.msra.mxu0 %v4719_v33 }
 0xba9   : > { %4508 = vmatprep.subr.bf16.mxu0 %v4778_v51 }
 0xbac   : > { %4509 = vmatpush3.bf16.msra.mxu0 %v4720_v8 }
 0xbad   : > { %4510 = vmatprep.subr.bf16.mxu0 %v4778_v51 }
 0xbb0   : > { %4511 = vmatpush3.bf16.msra.mxu0 %v4721_v21 }
 0xbb1   : > { %4544 = vmatprep.subr.bf16.mxu0 %v4778_v51 }
 0xbb3   : > { %4513 = vmatmul.mubr.msk.bf16.vlgmr.msra.gmra.mrb[76].mxu0 %vm869_vm0, %v5595_v57 }
 0xbb4   : > { %4516 = vmatprep.mubr.msk.bf16.mxu0 %vm4779_vm4, %v4778_v51 }
 0xbbb   : > { %4517 = vmatmul.mubr.msk.bf16.gmra.mrb[80].mxu0 %vm869_vm0, %v5598_v1 }
 0xbbc   : > { %4520 = vmatprep.mubr.msk.bf16.mxu0 %vm4779_vm4, %v4778_v51 }
 0xbc3   : > { %4521 = vmatmul.mubr.msk.bf16.gmra.mrb[84].mxu0 %vm869_vm0, %v5657_v19 }
 0xbc4   : > { %4550 = vmatprep.mubr.msk.bf16.mxu0 %vm4779_vm4, %v4778_v51 }
 0xc56   : > { %v5744_v16 = vpop.f32.mrb[64].mxu0 }
 0xc57   : > { %v4450_v17 = vpop.f32.mrb[65].mxu0  ;;  %v2995_v23 = vsel %vm2994_vm13, %v5744_v16, -inf }
 0xc58   : > { %2996 = vmax.xlane.f32.xlu1 %v2995_v23  ;;  %v2991_v18 = vpop.f32.mrb[66].mxu0 }
 0xc59   : > { %v4451_v22 = vpop.f32.mrb[67].mxu0 }
 0xc5a   : > { %v2938_v22 = vpop.xlane.xlu0 %2937 }
 0xc66   : > { %v3184_v24 = vpop.f32.mrb[68].mxu0 }
 0xc67   : > { %v4478_v25 = vpop.f32.mrb[69].mxu0  ;;  %v3190_v3 = vmul.f32 0.25, %v3184_v24 }
 0xc68   : > { %v3187_v26 = vpop.f32.mrb[70].mxu0 }
 0xc69   : > { %v4479_v27 = vpop.f32.mrb[71].mxu0  ;;  %v3449_v47 = vpack.c.bf16 %v3190_v3, %v3190_v3  ;;  %v4724_v3 = vld [vmem:[%s5905_s19 + $0x30] sm:$0xff]  }
 0xc6b   : > { %v3451_v56 = vunpack.c.l.bf16 %v3449_v47 }
 0xc76   : > { %v3258_v48 = vpop.f32.mrb[72].mxu0 }
 0xc77   : > { %v3450_v49 = vpack.c.bf16 %v3258_v48, %v3258_v48  ;;  %v4490_v50 = vpop.f32.mrb[73].mxu0 }
 0xc78   : > { %v3261_v52 = vpop.f32.mrb[74].mxu0 }
 0xc79   : > { %v3452_v28 = vunpack.c.l.bf16 %v3450_v49  ;;  %v4491_v53 = vpop.f32.mrb[75].mxu0 }
 0xc7b   : > { %v3453_v55 = vmul.f32 %v3452_v28, %v3451_v56 }
 0xc7d   : > { %v3454_v9 = vsel %vm918_vm2, %v3453_v55, 0.0 }
 0xc7e   : > { %3455 = vadd.xlane.f32.xlu0 %v3454_v9 }
 0xc86   : > { %v3371_v58 = vpop.f32.mrb[76].mxu0 }
 0xc87   : > { %v4514_v59 = vpop.f32.mrb[77].mxu0 }
 0xc88   : > { %v3374_v60 = vpop.f32.mrb[78].mxu0 }
 0xc89   : > { %v3457_v61 = vpack.c.bf16 %v3374_v60, %v3371_v58  ;;  %v4515_v0 = vpop.f32.mrb[79].mxu0 }
 0xc8b   : > { %v3464_v4 = vsel %vm1041_vm3, %v3457_v61, 0 }
 0xc8c   : > { %4545 = vmatpush3.bf16.xpose.msra.mxu0 %v3464_v4 }
 0xc8d   : > { %4546 = vmatprep.subr.bf16.mxu0 %v4778_v51 }
 0xc8e   : > { %v3379_v63 = vpop.f32.mrb[80].mxu0 }
 0xc8f   : > { %v4518_v5 = vpop.f32.mrb[81].mxu0 }
 0xc90   : > { %v3382_v6 = vpop.f32.mrb[82].mxu0 }
 0xc91   : > { %v3458_v7 = vpack.c.bf16 %v3382_v6, %v3379_v63  ;;  %v4519_v33 = vpop.f32.mrb[83].mxu0 }
 0xc93   : > { %v3467_v8 = vsel %vm1041_vm3, %v3458_v7, 0 }
 0xc94   : > { %4547 = vmatpush3.bf16.xpose.msra.mxu0 %v3467_v8 }
 0xc95   : > { %4548 = vmatprep.subr.bf16.mxu0 %v4778_v51 }
 0xc96   : > { %v3387_v21 = vpop.f32.mrb[84].mxu0 }
 0xc97   : > { %v3459_v42 = vpack.c.bf16 %v3387_v21, %v3387_v21  ;;  %v4522_v10 = vpop.f32.mrb[85].mxu0 }
 0xc98   : > { %v3390_v17 = vpop.f32.mrb[86].mxu0 }
 0xc99   : > { %v3470_v23 = vsel %vm1041_vm3, %v3459_v42, 0  ;;  %v4523_v18 = vpop.f32.mrb[87].mxu0 }
 0xc9c   : > { %4549 = vmatpush3.bf16.xpose.msra.mxu0 %v3470_v23 }
 0xc9d   : > { %4570 = vmatprep.subr.bf16.mxu0 %v4778_v51 }
 0xca3   : > { %4551 = vmatmul.mubr.msk.bf16.vlgmr.msra.gmra.mrb[88].mxu0 %vm1041_vm3, %v3449_v47 }
 0xca4   : > { %4572 = vmatprep.mubr.msk.bf16.mxu0 %vm4779_vm4, %v4778_v51 }
 0xce5   : > { %v2997_v24 = vpop.xlane.xlu1 %2996 }
 0xce6   : > { %v2998_v25 = vmax.f32 %v2938_v22, %v2997_v24 }
 0xce8   : > { %v3002_v26 = vsub.f32 %v5744_v16, %v2998_v25  ;;  %v2999_v29 = vsub.f32 %v2938_v22, %v2998_v25 }
 0xcea   : > { %v3003_v27 = vmul.f32 1.442695, %v3002_v26  ;;  %v3000_v30 = vmul.f32 1.442695, %v2999_v29  ;;  %v4726_v29 = vld [vmem:[%s5906_s20 + $0x8] sm:$0xff]  }
 0xceb   : > { %4571 = vmatpush3.bf16.msra.mxu0 %v4726_v29 }
 0xcec   : > { %4756 = vpow2.f32 %v3003_v27  ;;  %4576 = vmatprep.subr.bf16.mxu0 %v4778_v51 }
 0xced   : > { %4758 = vpow2.f32 %v3000_v30  ;;  %v4730_v30 = vld [vmem:[%s5908_s22 + $0x4] ss:$8 sps:$4 sm:$0xff]  }
 0xcf6   : > { %v4757_v32 = vpop.eup %4756 }
 0xcf7   : > { %v3013_v34 = vpack.c.bf16 %v4757_v32, %v4757_v32  ;;  %v5774_v16 = vpop.eup %4758  ;;  %v3006_v44 = vsel %vm2994_vm13, %v4757_v32, 0.0 }
 0xcf8   : > { %v3011_v35 = vpack.c.bf16 %v5774_v16, %v5774_v16 }
 0xcf9   : > { %4459 = vmatmul.mubr.msk.bf16.vlgmr.msra.gmra.mrb[48].mxu1 %vm3017_vm15, %v3013_v34 }
 0xcfa   : > { %4463 = vmatpush3.bf16.msra.mxu1 %v3071_v36  ;;  %4464 = vmatprep.mubr.msk.bf16.mxu1 %vm4779_vm4, %v4778_v51 }
 0xcfb   : > { %4492 = vmatprep.subr.bf16.mxu1 %v4778_v51 }
 0xd05   : > { %4465 = vmatmul.mubr.msk.bf16.vlgmr.msra.gmra.mrb[48].mxu1 %vm1537_vm9, %v3011_v35 }
 0xd06   : > { %4493 = vmatpush3.bf16.msra.mxu1 %v4722_v40  ;;  %4500 = vmatprep.mubr.msk.bf16.mxu1 %vm4779_vm4, %v4778_v51 }
 0xd07   : > { %4494 = vmatprep.subr.bf16.mxu1 %v4778_v51 }
 0xd0a   : > { %4495 = vmatpush3.bf16.msra.mxu1 %v4723_v37 }
 0xd0b   : > { %4496 = vmatprep.subr.bf16.mxu1 %v4778_v51  ;;  %v3456_v0 = vpop.xlane.xlu0 %3455 }
 0xd0e   : > { %4497 = vmatpush3.bf16.msra.mxu1 %v4724_v3 }
 0xd0f   : > { %4498 = vmatprep.subr.bf16.mxu1 %v4778_v51 }
 0xd12   : > { %4499 = vmatpush3.bf16.msra.mxu1 %v4725_v39 }
 0xd13   : > { %4524 = vmatprep.subr.bf16.mxu1 %v4778_v51 }
 0xd15   : > { %4501 = vmatmul.mubr.msk.bf16.vlgmr.msra.gmra.mrb[52].mxu1 %vm869_vm0, %v5611_v14 }
 0xd16   : > { %4525 = vmatpush3.bf16.msra.mxu1 %v4722_v40  ;;  %4532 = vmatprep.mubr.msk.bf16.mxu1 %vm4779_vm4, %v4778_v51 }
 0xd17   : > { %4526 = vmatprep.subr.bf16.mxu1 %v4778_v51 }
 0xd1a   : > { %4527 = vmatpush3.bf16.msra.mxu1 %v4723_v37 }
 0xd1b   : > { %4528 = vmatprep.subr.bf16.mxu1 %v4778_v51 }
 0xd1e   : > { %4529 = vmatpush3.bf16.msra.mxu1 %v4724_v3 }
 0xd1f   : > { %4530 = vmatprep.subr.bf16.mxu1 %v4778_v51 }
 0xd22   : > { %4531 = vmatpush3.bf16.msra.mxu1 %v4725_v39  ;;  %v4727_v39 = vld [vmem:[%s5906_s20] sm:$0xff]  }
 0xd23   : > { %4554 = vmatprep.subr.bf16.mxu1 %v4778_v51 }
 0xd25   : > { %4533 = vmatmul.mubr.msk.bf16.vlgmr.msra.gmra.mrb[56].mxu1 %vm869_vm0, %v5595_v57 }
 0xd26   : > { %4536 = vmatprep.mubr.msk.bf16.mxu1 %vm4779_vm4, %v4778_v51 }
 0xd2d   : > { %4537 = vmatmul.mubr.msk.bf16.gmra.mrb[60].mxu1 %vm869_vm0, %v5598_v1 }
 0xd2e   : > { %4540 = vmatprep.mubr.msk.bf16.mxu1 %vm4779_vm4, %v4778_v51 }
 0xd35   : > { %4541 = vmatmul.mubr.msk.bf16.gmra.mrb[64].mxu1 %vm869_vm0, %v5657_v19 }
 0xd36   : > { %4560 = vmatprep.mubr.msk.bf16.mxu1 %vm4779_vm4, %v4778_v51 }
 0xd76   : > { %v3506_v14 = vpop.f32.mrb[88].mxu0 }
 0xd77   : > { %v4552_v41 = vpop.f32.mrb[89].mxu0  ;;  %v3512_v43 = vsel %vm2994_vm13, %v3506_v14, -inf }
 0xd78   : > { %3513 = vmax.xlane.f32.xlu1 %v3512_v43  ;;  %v3509_v57 = vpop.f32.mrb[90].mxu0 }
 0xd79   : > { %v4553_v20 = vpop.f32.mrb[91].mxu0 }
 0xd7a   : > { %v4733_v20 = vld [vmem:[%s5908_s22 + $0x14] ss:$8 sps:$4 sm:$0xff]  }
 0xd7c   : > { %3007 = vadd.xlane.f32.xlu1 %v3006_v44  ;;  %v4731_v44 = vld [vmem:[%s5908_s22 + $0x10] ss:$8 sps:$4 sm:$0xff]  }
 0xdd8   : > { %v5819_v1 = vpop.f32.mrb[48].mxu1 }
 0xdd9   : > { %v4466_v45 = vpop.f32.mrb[49].mxu1 }
 0xdda   : > { %v3110_v46 = vpop.f32.mrb[50].mxu1  ;;  %v4736_v45 = vld [vmem:[%s5908_s22 + $0x24] ss:$8 sps:$4 sm:$0xff]  }
 0xddb   : > { %v4467_v47 = vpop.f32.mrb[51].mxu1  ;;  %v4737_v46 = vld [vmem:[%s5908_s22 + $0x30] ss:$8 sps:$4 sm:$0xff]  }
 0xde8   : > { %v3331_v48 = vpop.f32.mrb[52].mxu1 }
 0xde9   : > { %v4502_v19 = vpop.f32.mrb[53].mxu1  ;;  %v3529_v18 = vpack.c.bf16 %v3331_v48, %v3331_v48 }
 0xdea   : > { %v3334_v49 = vpop.f32.mrb[54].mxu1 }
 0xdeb   : > { %v4503_v50 = vpop.f32.mrb[55].mxu1  ;;  %v3584_v26 = vand.u32 %v3529_v18, %v5319_v62  ;;  %v4728_v62 = vld [vmem:[%s5908_s22] ss:$8 sps:$4 sm:$0xff]  }
 0xdf8   : > { %v3427_v52 = vpop.f32.mrb[56].mxu1 }
 0xdf9   : > { %v4534_v56 = vpop.f32.mrb[57].mxu1 }
 0xdfa   : > { %v3430_v28 = vpop.f32.mrb[58].mxu1 }
 0xdfb   : > { %v3531_v53 = vpack.c.bf16 %v3430_v28, %v3427_v52  ;;  %v4535_v55 = vpop.f32.mrb[59].mxu1  ;;  %v3729_v52 = vld [vmem:[%s5907_s21] sm:$0x1] }
 0xdfd   : > { %4555 = vmatpush3.bf16.msra.mxu1 %v3531_v53 }
 0xdfe   : > { %4556 = vmatprep.subr.bf16.mxu1 %v4778_v51 }
 0xe00   : > { %v3435_v9 = vpop.f32.mrb[60].mxu1 }
 0xe01   : > { %v4538_v58 = vpop.f32.mrb[61].mxu1 }
 0xe02   : > { %v3438_v59 = vpop.f32.mrb[62].mxu1 }
 0xe03   : > { %v3532_v60 = vpack.c.bf16 %v3438_v59, %v3435_v9  ;;  %v4539_v61 = vpop.f32.mrb[63].mxu1  ;;  %v3740_v59 = vld [vmem:[%s5909_s23] sm:$0x3] }
 0xe05   : > { %v3514_v4 = vpop.xlane.xlu1 %3513  ;;  %4557 = vmatpush3.bf16.msra.mxu1 %v3532_v60  ;;  %v4781_v60 = vmov 1966171168  }
 0xe06   : > { %v3515_v63 = vmax.f32 %v3456_v0, %v3514_v4  ;;  %4558 = vmatprep.subr.bf16.mxu1 %v4778_v51  ;;  %v3853_v61 = vunpack.c.l.s4 %v4781_v60  ;;  %v3789_v4 = vrot.slane %v3740_v59, %v4973_v15 }
 0xe08   : > { %v3519_v5 = vsub.f32 %v3506_v14, %v3515_v63  ;;  %v3443_v6 = vpop.f32.mrb[64].mxu1  ;;  %v3516_v17 = vsub.f32 %v3456_v0, %v3515_v63  ;;  %v3785_v0 = vrot.slane %v3740_v59, %v4967_v13 }
 0xe09   : > { %v3533_v33 = vpack.c.bf16 %v3443_v6, %v3443_v6  ;;  %v4542_v8 = vpop.f32.mrb[65].mxu1 }
 0xe0a   : > { %v3520_v7 = vmul.f32 1.442695, %v3519_v5  ;;  %v3446_v21 = vpop.f32.mrb[66].mxu1  ;;  %v3517_v23 = vmul.f32 1.442695, %v3516_v17  ;;  %v3854_v5 = vunpack.c.0.s8 %v3853_v61 }
 0xe0b   : > { %v3538_v42 = vand.u32 %v3533_v33, %v5751_v38  ;;  %v4543_v10 = vpop.f32.mrb[67].mxu1  ;;  %v4768_v21 = vld [vmem:[%s5097_s8] sm:$0xff] }
 0xe0c   : > { %4760 = vpow2.f32 %v3520_v7 }
 0xe0d   : > { %4559 = vmatpush3.bf16.msra.mxu1 %v3538_v42  ;;  %4762 = vpow2.f32 %v3517_v23  ;;  %v3857_v23 = vsub.s32 %v3854_v5, %v4964_v12 }
 0xe0e   : > { %4564 = vmatprep.subr.bf16.mxu1 %v4778_v51 }
 0xe16   : > { %v4761_v22 = vpop.eup %4760 }
 0xe17   : > { %v3530_v24 = vpack.c.bf16 %v4761_v22, %v4761_v22  ;;  %v3523_v25 = vsel %vm2994_vm13, %v4761_v22, 0.0  ;;  %v4763_v38 = vpop.eup %4762 }
 0xe18   : > { %3524 = vadd.xlane.f32.xlu0 %v3523_v25  ;;  %v3528_v27 = vpack.c.bf16 %v4763_v38, %v4763_v38 }
 0xe19   : > { %4561 = vmatmul.mubr.msk.bf16.vlgmr.msra.gmra.mrb[68].mxu1 %vm3017_vm15, %v3530_v24 }
 0xe1a   : > { %4565 = vmatpush3.bf16.msra.mxu1 %v3584_v26  ;;  %4566 = vmatprep.mubr.msk.bf16.mxu1 %vm4779_vm4, %v4778_v51 }
 0xe1b   : > { %3795 = vmatprep.subr.bf16.mxu1 %v4730_v30 }
 0xe25   : > { %4567 = vmatmul.mubr.msk.bf16.vlgmr.msra.gmra.mrb[68].mxu1 %vm1537_vm9, %v3528_v27 }
 0xe26   : > { %3827 = vmatprep.mubr.bf16.mxu1 %v4777_v2  ;;  %3796 = vmatpush1.bf16.msra.mxu1 %v4728_v62  ;;  %v3008_v2 = vpop.xlane.xlu1 %3007 }
 0xe27   : > { %v3009_v34 = vadd.f32 %v5774_v16, %v3008_v2  ;;  %3797 = vmatprep.subr.bf16.mxu1 %v4733_v20 }
 0xe2a   : > { %3798 = vmatpush1.bf16.msra.mxu1 %v4731_v44 }
 0xe2b   : > { %3799 = vmatprep.subr.bf16.mxu1 %v4736_v45 }
 0xea5   : > { %v3525_v31 = vpop.xlane.xlu0 %3524 }
 0xea6   : > { %v3526_v32 = vadd.f32 %v4763_v38, %v3525_v31 }
 0xea8   : > { %4764 = vrcp.f32 %v3526_v32 }
 0xea9   : > { %4766 = vrcp.f32 %v3009_v34 }
 0xeb2   : > { %v4765_v36 = vpop.eup %4764 }
 0xeb3   : > { %v4767_v43 = vpop.eup %4766 }
 0xeb4   : > { %v3113_v16 = vmul.f32 %v4767_v43, %v5819_v1  ;;  %v4739_v1 = vld [vmem:[%s5908_s22 + $0x34] ss:$8 sps:$4 sm:$0xff]  }
 0xeb6   : > { %v3114_v57 = vpack.c.bf16 %v3113_v16, %v3113_v16 }
 0xef8   : > { %v3620_v40 = vpop.f32.mrb[68].mxu1 }
 0xef9   : > { %v3626_v35 = vmul.f32 %v4765_v36, %v3620_v40  ;;  %v4568_v37 = vpop.f32.mrb[69].mxu1 }
 0xefa   : > { %v3623_v3 = vpop.f32.mrb[70].mxu1 }
 0xefb   : > { %v3627_v14 = vpack.c.bf16 %v3626_v35, %v3626_v35  ;;  %v4569_v41 = vpop.f32.mrb[71].mxu1 }
 0xefd   : > { %4573 = vmatmul.mubr.msk.bf16.vlgmr.msra.gmra.mrb[92].mxu0 %vm1041_vm3, %v3627_v14 }
 0xefe   : > { %4577 = vmatpush3.bf16.msra.mxu0 %v4727_v39  ;;  %4578 = vmatprep.mubr.msk.bf16.mxu0 %vm4779_vm4, %v4778_v51  ;;  %v4734_v51 = vld [vmem:[%s5908_s22 + $0x20] ss:$8 sps:$4 sm:$0xff]  }
 0xeff   : > { %3800 = vmatpush1.bf16.msra.mxu1 %v4734_v51 }
 0xf00   : > { %3801 = vmatprep.subr.bf16.mxu1 %v4739_v1 }
 0xf03   : > { %3802 = vmatpush1.bf16.msra.mxu1 %v4737_v46 }
 0xf05   : > { %4579 = vmatmul.mubr.msk.bf16.vlgmr.msra.gmra.mrb[96].mxu0 %vm1041_vm3, %v3114_v57 }
 0xfd0   : > { %v3674_v47 = vpop.f32.mrb[92].mxu0 }
 0xfd1   : > { %v4574_v48 = vpop.f32.mrb[93].mxu0 }
 0xfd2   : > { %v3677_v19 = vpop.f32.mrb[94].mxu0 }
 0xfd3   : > { %v4575_v49 = vpop.f32.mrb[95].mxu0 }
 0xfd8   : > { %v3723_v50 = vpop.f32.mrb[96].mxu0 }
 0xfd9   : > { %v3724_v56 = vadd.f32 %v3723_v50, %v3674_v47  ;;  %v4580_v28 = vpop.f32.mrb[97].mxu0 }
 0xfda   : > { %v3726_v53 = vpop.f32.mrb[98].mxu0 }
 0xfdb   : > { %v3730_v55 = vadd.f32 %v3729_v52, %v3724_v56  ;;  %v4581_v9 = vpop.f32.mrb[99].mxu0 }
 0xfdd   : > { %v3731_v58 = vpack.c.bf16 %v3730_v55, %v3730_v55 }
 0xfdf   : > { %4231 = vmatmul.mubr.msk.bf16.vlgmr.msra.gmra.mrb[72].mxu1 %vm869_vm0, %v3731_v58  ;;  %vm3869_vm0 = vcmp.lt.s32.totalorder %v859_v11, 144 }
0x10b2   : > { %v3829_v63 = vpop.f32.mrb[72].mxu1 }
0x10b3   : > { %v3830_v6 = vadd.f32 %v3829_v63, %v3785_v0  ;;  %v3831_v7 = vpop.f32.mrb[73].mxu1 }
0x10b4   : > { %v3832_v33 = vadd.f32 %v3831_v7, %v3789_v4  ;;  %v3833_v8 = vpop.f32.mrb[74].mxu1 }
0x10b5   : > { %v3836_v42 = vadd.f32 %v4768_v21, %v3830_v6  ;;  %v3834_v10 = vpop.f32.mrb[75].mxu1 }
0x10b6   : > { %v3837_v17 = vadd.f32 %v3832_v33, %v5092_v54 }
0x10b8   : > { %v3851_v18 = vcombine.low %v3836_v42, %v3837_v17 }
0x10ba   : > { %v3858_v22 = vrot.slane %v3851_v18, %v3857_v23 }
0x10bc   : > { %v3865_v13 = vrot.slane %v3858_v22, %v3857_v23 }
0x10be   : > { %3871 = vst.msk [vmem:[%s5097_s8] ss:$8 sm:$0x3] %vm3869_vm0, %v3865_v13 }
0x10bf PF: > { %s36_s29 = sadd.s32 1, %s4775_s29  }
0x10c0   : > { %p33_p4 = scmp.ge.s32.totalorder %s36_s29, 4  }
0x10c2   :  { %35 = sbr.rel (!%p33_p4) target bundleno = 12 (0xc), region = 169 }

// kernel: tile.8
= control target key start
LH: loop header
LB: loop body
LE: loop exit
PB: predicated region body
PF: predicated region fallthrough
CT: control target
= control target key end

     0   :  { %s34_s0 = inlined_call_operand.vmem [shape: f32[32], index: 0, kind: input, shape index: {}]   ;;  %s35_s1 = inlined_call_operand.vmem [shape: f32[24,32], index: 1, kind: output, shape index: {}]  }
   0x1   :  { %v4_v0 = vld [vmem:[%s34_s0] ss:$0 sm:$0xff] }
   0x2   :  { %5 = vst [vmem:[%s35_s1] sm:$0xff] %v4_v0  ;;  %10 = vst [vmem:[%s35_s1 + $0x8] sm:$0xff] %v4_v0 }
   0x3   :  { %11 = vst [vmem:[%s35_s1 + $0x10] sm:$0xff] %v4_v0 }

// kernel: tile.9
= control target key start
LH: loop header
LB: loop body
LE: loop exit
PB: predicated region body
PF: predicated region fallthrough
CT: control target
= control target key end

     0   :  { %s77_s8 = smov 96   ;;  %vm3_vm0 = vcmask 261120   ;;  %s79_s15 = smov 64   ;;  %vm10_vm1 = vcmask 1048320   ;;  %vm17_vm2 = vcmask 785920   ;;  %vm24_vm3 = vcmask 523520   ;;  %s120_s0 = inlined_call_operand.vmem [shape: f32[24,32], index: 0, kind: input, shape index: {}]   ;;  %s121_s1 = inlined_call_operand.vmem [shape: f32[1,768], index: 1, kind: output, shape index: {}]  }
   0x1   :  { %v66_v0 = vld [vmem:[%s120_s0 + $0x3] ss:$4 sm:$0x3f]   ;;  %v67_v1 = vld [vmem:[%s120_s0 + $0x2] ss:$4 sm:$0x3f]  }
   0x2   :  { %8 = vrot.lane.b32.xlu0 %v66_v0, %s77_s8  ;;  %v68_v2 = vld [vmem:[%s120_s0 + $0x1] ss:$4 sm:$0x3f]   ;;  %v2_v3 = vld [vmem:[%s120_s0] ss:$4 sm:$0x3f]  }
   0x3   :  { %s78_s0 = smov 32   ;;  %4 = vst.msk [vmem:[#allocation0] ss:$8 sm:$0xf] %vm3_vm0, %v2_v3  }
   0x4   :  { %22 = vrot.lane.b32.xlu1 %v68_v2, %s78_s0  ;;  %5 = vst.msk [vmem:[#allocation0] ss:$8 sm:$0x30] %vm3_vm0, %v2_v3  }
   0x6   :  { %15 = vrot.lane.b32.xlu0 %v67_v1, %s79_s15 }
  0x74   :  { %v9_v4 = vpop.permute.xlu0 %8  }
  0x75   :  { %11 = vst.msk [vmem:[#allocation0] ss:$8 sm:$0xf] %vm10_vm1, %v9_v4   ;;  %12 = vst.msk [vmem:[#allocation0] ss:$8 sm:$0x30] %vm10_vm1, %v9_v4  }
  0x76   :  { %v23_v5 = vpop.permute.xlu1 %22  }
  0x78   :  { %v16_v6 = vpop.permute.xlu0 %15  }
  0x79   :  { %18 = vst.msk [vmem:[#allocation0] ss:$8 sm:$0xf] %vm17_vm2, %v16_v6   ;;  %19 = vst.msk [vmem:[#allocation0] ss:$8 sm:$0x30] %vm17_vm2, %v16_v6  }
  0x7a   :  { %25 = vst.msk [vmem:[#allocation0] ss:$8 sm:$0xf] %vm24_vm3, %v23_v5   ;;  %26 = vst.msk [vmem:[#allocation0] ss:$8 sm:$0x30] %vm24_vm3, %v23_v5  }
  0x81   :  { %v30_v7 = vld [vmem:[#allocation0] sm:$0x1]  ;;  %v34_v8 = vld [vmem:[#allocation0 + $0x8] sm:$0x1]  ;;  %v39_v9 = vld [vmem:[#allocation0 + $0x10] sm:$0x1] }
  0x82   :  { %32 = vst [vmem:[%s121_s1] sm:$0x1] %v30_v7  ;;  %69 = vst [vmem:[%s121_s1 + $0x1] sm:$0x1] %v34_v8  ;;  %v45_v10 = vld [vmem:[#allocation0 + $0x18] sm:$0x1] }
  0x83   :  { %70 = vst [vmem:[%s121_s1 + $0x2] sm:$0x1] %v39_v9  ;;  %v51_v11 = vld [vmem:[#allocation0 + $0x20] sm:$0x1]  ;;  %v57_v12 = vld [vmem:[#allocation0 + $0x28] sm:$0x1] }
  0x84   :  { %71 = vst [vmem:[%s121_s1 + $0x3] sm:$0x1] %v45_v10  ;;  %72 = vst [vmem:[%s121_s1 + $0x4] sm:$0x1] %v51_v11 }
  0x85   :  { %73 = vst [vmem:[%s121_s1 + $0x5] sm:$0x1] %v57_v12 }

// kernel: cross_plus_vit_segnet_forward.11
= control target key start
LH: loop header
LB: loop body
LE: loop exit
PB: predicated region body
PF: predicated region fallthrough
CT: control target
= control target key end

     0   :  { %s895_s15 = smov 0   ;;  %s1062_s0 = inlined_call_operand.vmem [shape: f32[48,96], index: 0, kind: input, shape index: {}]   ;;  %s1063_s1 = inlined_call_operand.vmem [shape: f32[48,96], index: 1, kind: input, shape index: {}]   ;;  %s1064_s2 = inlined_call_operand.vmem [shape: bf16[96,768], index: 2, kind: input, shape index: {}]   ;;  %s1065_s3 = inlined_call_operand.vmem [shape: f32[1,768], index: 3, kind: input, shape index: {}]   ;;  %s1066_s4 = inlined_call_operand.vmem [shape: f32[48,768], index: 4, kind: output, shape index: {}]  }
   0x1 LB: > { %s733_s16 = sadd.s32 4294967295, %s867_s15   ;;  %p737_p0 = scmp.ge.s32.totalorder %s867_s15, 1  ;;  %s867_s15 = sphi %s895_s15, %s14_s15  }
   0x2   : > { %p174_p1 = scmp.lt.s32.totalorder %s867_s15, 3 }
   0x4   : > { %p175_p2 = pnand %p737_p0, %p174_p1 }
   0x5   : > { %v807_v0 = vld [vmem:[%s1064_s2 + $0x4] ss:$24 sps:$4 sm:$0xff] (!%p175_p2)   ;;  %s206_s19 = smul.u32 (!%p175_p2), 3, %s733_s16  ;;  %v869_v2 = vmov (!%p175_p2), 0   ;;  %v811_v3 = vld [vmem:[%s1064_s2] ss:$24 sps:$4 sm:$0xff] (!%p175_p2)   ;;  %v275_v48 = vlaneseq (!%p175_p2) }
   0x6   : > { %178 = sbr.rel (%p175_p2) target bundleno = 273 (0x111), region = 36  ;;  %v809_v1 = vld [vmem:[%s1064_s2 + $0xc] ss:$24 sps:$4 sm:$0xff] (!%p175_p2)   ;;  %524 = vmatprep.mubr.bf16.mxu0 (!%p175_p2), %v869_v2  ;;  %575 = vmatprep.mubr.bf16.mxu1 (!%p175_p2), %v869_v2  ;;  %v812_v4 = vld [vmem:[%s1064_s2 + $0x8] ss:$24 sps:$4 sm:$0xff] (!%p175_p2)   ;;  %vm485_vm0 = vcmask (!%p175_p2), 785408  }
   0x7   : > { %492 = vmatprep.subr.bf16.mxu0 (!%p175_p2), %v807_v0  ;;  %p207_p3 = scmp.lt.s32.totalorder (!%p175_p2), %s206_s19, 5  ;;  %543 = vmatprep.subr.bf16.mxu1 (!%p175_p2), %v809_v1  ;;  %v813_v5 = vld [vmem:[%s1064_s2 + $0x34] ss:$24 sps:$4 sm:$0xff] (!%p175_p2)   ;;  %v817_v7 = vld [vmem:[%s1064_s2 + $0x30] ss:$24 sps:$4 sm:$0xff] (!%p175_p2)   ;;  %v276_v49 = vshrl.u32 (!%p175_p2), %v275_v48, 7 }
   0x8   : > { %493 = vmatpush1.bf16.msra.mxu0 (!%p175_p2), %v811_v3  ;;  %544 = vmatpush1.bf16.msra.mxu1 (!%p175_p2), %v812_v4  ;;  %v815_v6 = vld [vmem:[%s1064_s2 + $0x3c] ss:$24 sps:$4 sm:$0xff] (!%p175_p2)   ;;  %v818_v8 = vld [vmem:[%s1064_s2 + $0x38] ss:$24 sps:$4 sm:$0xff] (!%p175_p2)   ;;  %v821_v10 = vld [vmem:[%s1064_s2 + $0x6c] ss:$24 sps:$4 sm:$0xff] (!%p175_p2)  }
   0x9   : > { %494 = vmatprep.subr.bf16.mxu0 (!%p175_p2), %v813_v5  ;;  %545 = vmatprep.subr.bf16.mxu1 (!%p175_p2), %v815_v6  ;;  %v819_v9 = vld [vmem:[%s1064_s2 + $0x64] ss:$24 sps:$4 sm:$0xff] (!%p175_p2)   ;;  %v823_v11 = vld [vmem:[%s1064_s2 + $0x60] ss:$24 sps:$4 sm:$0xff] (!%p175_p2)   ;;  %v825_v13 = vld [vmem:[%s1064_s2 + $0x94] ss:$24 sps:$4 sm:$0xff] (!%p175_p2)  }
   0xa   : > { %v824_v12 = vld [vmem:[%s1064_s2 + $0x68] ss:$24 sps:$4 sm:$0xff] (!%p175_p2)   ;;  %v827_v14 = vld [vmem:[%s1064_s2 + $0x9c] ss:$24 sps:$4 sm:$0xff] (!%p175_p2)   ;;  %v830_v16 = vld [vmem:[%s1064_s2 + $0x98] ss:$24 sps:$4 sm:$0xff] (!%p175_p2)  }
   0xb   : > { %v829_v15 = vld [vmem:[%s1064_s2 + $0x90] ss:$24 sps:$4 sm:$0xff] (!%p175_p2)   ;;  %v831_v17 = vld [vmem:[%s1064_s2 + $0xc4] ss:$24 sps:$4 sm:$0xff] (!%p175_p2)   ;;  %v835_v19 = vld [vmem:[%s1064_s2 + $0xc0] ss:$24 sps:$4 sm:$0xff] (!%p175_p2)  }
   0xc   : > { %495 = vmatpush1.bf16.msra.mxu0 (!%p175_p2), %v817_v7  ;;  %546 = vmatpush1.bf16.msra.mxu1 (!%p175_p2), %v818_v8  ;;  %v833_v18 = vld [vmem:[%s1064_s2 + $0xcc] ss:$24 sps:$4 sm:$0xff] (!%p175_p2)   ;;  %v836_v20 = vld [vmem:[%s1064_s2 + $0xc8] ss:$24 sps:$4 sm:$0xff] (!%p175_p2)   ;;  %v839_v22 = vld [vmem:[%s1064_s2 + $0xfc] ss:$24 sps:$4 sm:$0xff] (!%p175_p2)  }
   0xd   : > { %s1068_s19 = smov (!%p207_p3, %s206_s19), 5  ;;  %496 = vmatprep.subr.bf16.mxu0 %v819_v9  ;;  %547 = vmatprep.subr.bf16.mxu1 %v821_v10  ;;  %v837_v21 = vld [vmem:[%s1064_s2 + $0xf4] ss:$24 sps:$4 sm:$0xff]   ;;  %v841_v27 = vld [vmem:[%s1064_s2 + $0xf0] ss:$24 sps:$4 sm:$0xff]   ;;  %v277_v50 = vsub.s32 0, %v276_v49 }
   0xe   : > { %s738_s22 = sshll.u32 %s1068_s19, 3  ;;  %v842_v30 = vld [vmem:[%s1064_s2 + $0xf8] ss:$24 sps:$4 sm:$0xff]   ;;  %v845_v31 = vld [vmem:[%s1064_s2 + $0x14] ss:$24 sps:$4 sm:$0xff]   ;;  %v285_v51 = vsub.s32 2, %v276_v49 }
   0xf   : > { %s210_s7 = scalar_lea.vmem %s1062_s0, %s738_s22  ;;  %s216_s10 = scalar_lea.vmem %s1063_s1, %s738_s22  ;;  %v843_v33 = vld [vmem:[%s1064_s2 + $0x10] ss:$24 sps:$4 sm:$0xff]   ;;  %v848_v36 = vld [vmem:[%s1064_s2 + $0x44] ss:$24 sps:$4 sm:$0xff]   ;;  %v846_v38 = vld [vmem:[%s1064_s2 + $0x40] ss:$24 sps:$4 sm:$0xff]  }
  0x10   : > { %497 = vmatpush1.bf16.msra.mxu0 %v823_v11  ;;  %548 = vmatpush1.bf16.msra.mxu1 %v824_v12  ;;  %v226_v23 = vld [vmem:[%s210_s7] sm:$0xff]  ;;  %v227_v24 = vld [vmem:[%s210_s7 + $0x8] sm:$0xff]  ;;  %v228_v34 = vld [vmem:[%s210_s7 + $0x10] sm:$0xff]  ;;  %v281_v53 = vsub.s32 1, %v276_v49  ;;  %v289_v54 = vsub.s32 3, %v276_v49  ;;  %s797_s27 = smul.u32 48, %s1068_s19 }
  0x11   : > { %498 = vmatprep.subr.bf16.mxu0 %v825_v13  ;;  %549 = vmatprep.subr.bf16.mxu1 %v827_v14  ;;  %v229_v25 = vld [vmem:[%s216_s10] sm:$0xff]  ;;  %v230_v26 = vld [vmem:[%s216_s10 + $0x8] sm:$0xff]  ;;  %v231_v35 = vld [vmem:[%s216_s10 + $0x10] sm:$0xff] }
  0x12   : > { %v232_v28 = vadd.f32 %v229_v25, %v226_v23  ;;  %v233_v29 = vadd.f32 %v230_v26, %v227_v24  ;;  %v234_v37 = vadd.f32 %v231_v35, %v228_v34  ;;  %v851_v39 = vld [vmem:[%s1064_s2 + $0x74] ss:$24 sps:$4 sm:$0xff]   ;;  %v849_v41 = vld [vmem:[%s1064_s2 + $0x70] ss:$24 sps:$4 sm:$0xff]   ;;  %v854_v42 = vld [vmem:[%s1064_s2 + $0xa4] ss:$24 sps:$4 sm:$0xff]   ;;  %s1039_s30 = scalar_lea.vmem %s1066_s4, %s797_s27 }
  0x13   : > { %v852_v43 = vld [vmem:[%s1064_s2 + $0xa0] ss:$24 sps:$4 sm:$0xff]   ;;  %v857_v44 = vld [vmem:[%s1064_s2 + $0xd4] ss:$24 sps:$4 sm:$0xff]   ;;  %v855_v45 = vld [vmem:[%s1064_s2 + $0xd0] ss:$24 sps:$4 sm:$0xff]  }
  0x14   : > { %499 = vmatpush1.bf16.msra.mxu0 %v829_v15  ;;  %550 = vmatpush1.bf16.msra.mxu1 %v830_v16  ;;  %v235_v32 = vpack.c.bf16 %v233_v29, %v232_v28  ;;  %v236_v40 = vpack.c.bf16 %v234_v37, %v234_v37  ;;  %v860_v46 = vld [vmem:[%s1064_s2 + $0x104] ss:$24 sps:$4 sm:$0xff]   ;;  %v858_v47 = vld [vmem:[%s1064_s2 + $0x100] ss:$24 sps:$4 sm:$0xff]   ;;  %v293_v23 = vsub.s32 4, %v276_v49  ;;  %v297_v24 = vsub.s32 5, %v276_v49 }
  0x15   : > { %500 = vmatprep.subr.bf16.mxu0 %v831_v17  ;;  %551 = vmatprep.subr.bf16.mxu1 %v833_v18  ;;  %v273_v52 = vld [vmem:[%s1065_s3] sm:$0x3f] }
  0x16   : > { %v278_v55 = vrot.slane %v273_v52, %v277_v50  ;;  %v286_v56 = vrot.slane %v273_v52, %v285_v51  ;;  %v282_v57 = vrot.slane %v273_v52, %v281_v53  ;;  %v290_v58 = vrot.slane %v273_v52, %v289_v54 }
  0x17   : > { %v294_v25 = vrot.slane %v273_v52, %v293_v23  ;;  %v298_v26 = vrot.slane %v273_v52, %v297_v24 }
  0x18   : > { %501 = vmatpush1.bf16.msra.mxu0 %v835_v19  ;;  %552 = vmatpush1.bf16.msra.mxu1 %v836_v20 }
  0x19   : > { %502 = vmatprep.subr.bf16.mxu0 %v837_v21  ;;  %553 = vmatprep.subr.bf16.mxu1 %v839_v22 }
  0x1c   : > { %503 = vmatpush1.bf16.msra.mxu0 %v841_v27  ;;  %554 = vmatpush1.bf16.msra.mxu1 %v842_v30 }
  0x1d   : > { %594 = vmatprep.subr.bf16.mxu0 %v845_v31  ;;  %785 = vmatprep.subr.bf16.mxu1 %v845_v31 }
  0x1f   : > { %777 = vmatmul.mubr.msk.bf16.vlgmr.msra.gmra.mrb[0].mxu0 %vm485_vm0, %v235_v32  ;;  %779 = vmatmul.mubr.msk.bf16.vlgmr.msra.gmra.mrb[0].mxu1 %vm485_vm0, %v235_v32 }
  0x20   : > { %595 = vmatpush1.bf16.msra.mxu0 %v843_v33  ;;  %791 = vmatpush1.bf16.msra.mxu1 %v843_v33 }
  0x21   : > { %596 = vmatprep.subr.bf16.mxu0 %v848_v36  ;;  %786 = vmatprep.subr.bf16.mxu1 %v848_v36 }
  0x22   : > { %534 = vmatprep.mubr.bf16.mxu0 %v869_v2  ;;  %585 = vmatprep.mubr.bf16.mxu1 %v869_v2 }
  0x24   : > { %597 = vmatpush1.bf16.msra.mxu0 %v846_v38  ;;  %792 = vmatpush1.bf16.msra.mxu1 %v846_v38 }
  0x25   : > { %598 = vmatprep.subr.bf16.mxu0 %v851_v39  ;;  %787 = vmatprep.subr.bf16.mxu1 %v851_v39 }
  0x27   : > { %778 = vmatmul.mubr.msk.bf16.gmra.mrb[4].mxu0 %vm485_vm0, %v236_v40  ;;  %780 = vmatmul.mubr.msk.bf16.gmra.mrb[4].mxu1 %vm485_vm0, %v236_v40 }
  0x28   : > { %599 = vmatpush1.bf16.msra.mxu0 %v849_v41  ;;  %793 = vmatpush1.bf16.msra.mxu1 %v849_v41 }
  0x29   : > { %600 = vmatprep.subr.bf16.mxu0 %v854_v42  ;;  %788 = vmatprep.subr.bf16.mxu1 %v854_v42 }
  0x2a   : > { %626 = vmatprep.mubr.bf16.mxu0 %v869_v2  ;;  %636 = vmatprep.mubr.bf16.mxu1 %v869_v2 }
  0x2c   : > { %601 = vmatpush1.bf16.msra.mxu0 %v852_v43  ;;  %794 = vmatpush1.bf16.msra.mxu1 %v852_v43 }
  0x2d   : > { %602 = vmatprep.subr.bf16.mxu0 %v857_v44  ;;  %789 = vmatprep.subr.bf16.mxu1 %v857_v44 }
  0x30   : > { %603 = vmatpush1.bf16.msra.mxu0 %v855_v45  ;;  %795 = vmatpush1.bf16.msra.mxu1 %v855_v45 }
  0x31   : > { %604 = vmatprep.subr.bf16.mxu0 %v860_v46  ;;  %790 = vmatprep.subr.bf16.mxu1 %v860_v46 }
  0x34   : > { %605 = vmatpush1.bf16.msra.mxu0 %v858_v47  ;;  %796 = vmatpush1.bf16.msra.mxu1 %v858_v47 }
  0x37   : > { %781 = vmatmul.mubr.msk.bf16.vlgmr.msra.gmra.mrb[8].mxu0 %vm485_vm0, %v235_v32  ;;  %782 = vmatmul.mubr.msk.bf16.vlgmr.msra.gmra.mrb[8].mxu1 %vm485_vm0, %v236_v40 }
  0xf2   : > { %v526_v59 = vpop.f32.mrb[0].mxu0  ;;  %v577_v60 = vpop.f32.mrb[0].mxu1 }
  0xf3   : > { %v527_v61 = vadd.f32 %v526_v59, %v278_v55  ;;  %v578_v62 = vadd.f32 %v577_v60, %v286_v56  ;;  %v528_v63 = vpop.f32.mrb[1].mxu0  ;;  %v579_v0 = vpop.f32.mrb[1].mxu1 }
  0xf4   : > { %v529_v1 = vadd.f32 %v528_v63, %v282_v57  ;;  %v580_v2 = vadd.f32 %v579_v0, %v290_v58  ;;  %v530_v3 = vpop.f32.mrb[2].mxu0  ;;  %v581_v4 = vpop.f32.mrb[2].mxu1 }
  0xf5   : > { %645 = vst [vmem:[%s1039_s30] sm:$0xff] %v527_v61  ;;  %647 = vst [vmem:[%s1039_s30 + $0x10] sm:$0xff] %v578_v62  ;;  %v531_v5 = vadd.f32 %v530_v3, %v278_v55  ;;  %v582_v6 = vadd.f32 %v581_v4, %v286_v56  ;;  %v532_v7 = vpop.f32.mrb[3].mxu0  ;;  %v583_v8 = vpop.f32.mrb[3].mxu1 }
  0xf6   : > { %646 = vst [vmem:[%s1039_s30 + $0x8] sm:$0xff] %v529_v1  ;;  %648 = vst [vmem:[%s1039_s30 + $0x18] sm:$0xff] %v580_v2  ;;  %v533_v9 = vadd.f32 %v532_v7, %v282_v57  ;;  %v584_v10 = vadd.f32 %v583_v8, %v290_v58 }
  0xf7   : > { %651 = vst [vmem:[%s1039_s30 + $0x30] sm:$0xff] %v531_v5  ;;  %653 = vst [vmem:[%s1039_s30 + $0x40] sm:$0xff] %v582_v6 }
  0xf8   : > { %652 = vst [vmem:[%s1039_s30 + $0x38] sm:$0xff] %v533_v9  ;;  %654 = vst [vmem:[%s1039_s30 + $0x48] sm:$0xff] %v584_v10 }
  0xfa   : > { %v536_v11 = vpop.f32.mrb[4].mxu0  ;;  %v587_v12 = vpop.f32.mrb[4].mxu1 }
  0xfb   : > { %v537_v13 = vadd.f32 %v536_v11, %v278_v55  ;;  %v538_v14 = vpop.f32.mrb[5].mxu0  ;;  %v588_v15 = vadd.f32 %v587_v12, %v286_v56  ;;  %v589_v16 = vpop.f32.mrb[5].mxu1 }
  0xfc   : > { %v539_v17 = vadd.f32 %v538_v14, %v282_v57  ;;  %v540_v18 = vpop.f32.mrb[6].mxu0  ;;  %v590_v19 = vadd.f32 %v589_v16, %v290_v58  ;;  %v591_v20 = vpop.f32.mrb[6].mxu1 }
  0xfd   : > { %657 = vst [vmem:[%s1039_s30 + $0x60] sm:$0xff] %v537_v13  ;;  %659 = vst [vmem:[%s1039_s30 + $0x70] sm:$0xff] %v588_v15  ;;  %v541_v21 = vpop.f32.mrb[7].mxu0  ;;  %v592_v22 = vpop.f32.mrb[7].mxu1 }
  0xfe   : > { %658 = vst [vmem:[%s1039_s30 + $0x68] sm:$0xff] %v539_v17  ;;  %660 = vst [vmem:[%s1039_s30 + $0x78] sm:$0xff] %v590_v19 }
 0x10a   : > { %v628_v27 = vpop.f32.mrb[8].mxu0  ;;  %v638_v28 = vpop.f32.mrb[8].mxu1 }
 0x10b   : > { %v629_v29 = vadd.f32 %v628_v27, %v294_v25  ;;  %v639_v30 = vadd.f32 %v638_v28, %v294_v25  ;;  %v630_v31 = vpop.f32.mrb[9].mxu0  ;;  %v640_v32 = vpop.f32.mrb[9].mxu1 }
 0x10c   : > { %v631_v33 = vadd.f32 %v630_v31, %v298_v26  ;;  %v641_v34 = vadd.f32 %v640_v32, %v298_v26  ;;  %v632_v35 = vpop.f32.mrb[10].mxu0  ;;  %v642_v36 = vpop.f32.mrb[10].mxu1 }
 0x10d   : > { %649 = vst [vmem:[%s1039_s30 + $0x20] sm:$0xff] %v629_v29  ;;  %661 = vst [vmem:[%s1039_s30 + $0x80] sm:$0xff] %v639_v30  ;;  %v633_v37 = vadd.f32 %v632_v35, %v294_v25  ;;  %v634_v38 = vpop.f32.mrb[11].mxu0  ;;  %v643_v39 = vpop.f32.mrb[11].mxu1 }
 0x10e   : > { %650 = vst [vmem:[%s1039_s30 + $0x28] sm:$0xff] %v631_v33  ;;  %662 = vst [vmem:[%s1039_s30 + $0x88] sm:$0xff] %v641_v34  ;;  %v635_v40 = vadd.f32 %v634_v38, %v298_v26 }
 0x10f   : > { %655 = vst [vmem:[%s1039_s30 + $0x50] sm:$0xff] %v633_v37 }
 0x110   : > { %656 = vst [vmem:[%s1039_s30 + $0x58] sm:$0xff] %v635_v40 }
 0x111 PF: > { %s14_s15 = sadd.s32 1, %s867_s15  }
 0x112   : > { %p11_p4 = scmp.ge.s32.totalorder %s14_s15, 4  }
 0x114   :  { %13 = sbr.rel (!%p11_p4) target bundleno = 1 (0x1), region = 69 }

</bundles_post_ra>
